<compile_context>
chip_gen: v6e
topology: v6e:2x2x1
jax: 0.10.0
libtpu: 0.0.40
codegen_flags: <defaults>
</compile_context>

<pallas_src>
import jax
import jax.numpy as jnp
import numpy as np
from jax.experimental import pallas as pl
from jax.experimental.pallas import tpu as pltpu


def _round_up(n, m):
    return ((n + m - 1) // m) * m


def _pad_axis(a, axis, new_size):
    pad = new_size - a.shape[axis]
    if pad == 0:
        return a
    widths = [(0, 0)] * a.ndim
    widths[axis] = (0, pad)
    return jnp.pad(a, widths)


def _make_kernel(num_layers, hidden_p, chunk_t, out_dtype, compute_dtype):
    L, HP, TT = num_layers, hidden_p, chunk_t

    def kernel(*refs):
        # refs = x_ref, (w_cat, bias) * L, wfc_ref, bfc_ref, out_ref,
        #        h_sc, c_sc, acc_sc
        x_ref = refs[0]                      # (BP, TT, IP)
        w_refs = refs[1:1 + 2 * L]
        wfc_ref = refs[1 + 2 * L]            # (TT, HP, OP)
        bfc_ref = refs[2 + 2 * L]            # (1, OP)
        out_ref = refs[3 + 2 * L]            # (BP, OP)
        h_sc, c_sc, acc_sc = refs[4 + 2 * L:]

        tc = pl.program_id(0)

        @pl.when(tc == 0)
        def _():
            h_sc[...] = jnp.zeros_like(h_sc)
            c_sc[...] = jnp.zeros_like(c_sc)
            acc_sc[...] = jnp.zeros_like(acc_sc)

        # Fully-unrolled chunk of time steps (TT is a static Python int).
        for s in range(TT):
            inp = x_ref[:, s, :].astype(compute_dtype)        # (BP, IP)
            for l in range(L):
                h_prev = h_sc[l]                              # (BP, HP) f32
                c_prev = c_sc[l]
                # Fused gate matmul: one MXU pass per layer per step.
                xh = jnp.concatenate(
                    [inp, h_prev.astype(compute_dtype)], axis=1)
                gates = jnp.dot(xh, w_refs[2 * l][...],
                                preferred_element_type=jnp.float32)
                gates = gates + w_refs[2 * l + 1][...]        # (BP, 4*HP) f32
                # 128-lane-aligned gate slices (HP is a multiple of 128).
                i_g = jax.nn.sigmoid(gates[:, 0 * HP:1 * HP])
                f_g = jax.nn.sigmoid(gates[:, 1 * HP:2 * HP])
                g_g = jnp.tanh(gates[:, 2 * HP:3 * HP])
                o_g = jax.nn.sigmoid(gates[:, 3 * HP:4 * HP])
                c_new = f_g * c_prev + i_g * g_g
                h_new = o_g * jnp.tanh(c_new)
                h_sc[l] = h_new
                c_sc[l] = c_new
                inp = h_new.astype(compute_dtype)
            # This step's contribution to the final Linear; no (B, T*H)
            # intermediate is ever materialised.
            acc_sc[...] += jnp.dot(inp, wfc_ref[s],
                                   preferred_element_type=jnp.float32)

        @pl.when(tc == pl.num_programs(0) - 1)
        def _():
            out_ref[...] = (acc_sc[...] + bfc_ref[...]).astype(out_dtype)

    return kernel


def lstm_fc_forward(x, lstm_params, fc_w, fc_b, *, hidden, num_layers,
                    chunk_t=None, compute_dtype=jnp.bfloat16):
    """x: (B, T, I) float32. lstm_params: list of (w_ih, w_hh, b_ih, b_hh) in
    PyTorch shapes ((4H,in),(4H,H),(4H,),(4H,)). fc_w: (O, T*H), fc_b: (O,)."""
    B, T, I = x.shape
    H, L = hidden, num_layers
    O = fc_b.shape[0]

    # Hardware-friendly padded sizes.
    BP = _round_up(B, 8)       # sublane-aligned batch
    IP = _round_up(I, 128)     # lane-aligned input features
    HP = _round_up(H, 128)     # lane-aligned hidden (gate slices, h/c, fc)
    OP = _round_up(O, 128)     # lane-dense output / accumulator stores

    if chunk_t is None:
        chunk_t = T            # small T: everything resident, grid=(1,)
    TT = chunk_t
    assert T % TT == 0 and (TT == T or TT % 8 == 0)

    # Zero-pad x on batch/feature axes (pad rows/cols stay inert: zero weights,
    # zero biases, zero initial state => padded hidden units remain exactly 0).
    x_p = jnp.zeros((BP, T, IP), x.dtype).at[:B, :, :I].set(x)

    flat_inputs = [x_p]
    in_specs = [pl.BlockSpec((BP, TT, IP), lambda t: (0, t, 0))]

    for l in range(L):
        w_ih, w_hh, b_ih, b_hh = lstm_params[l]
        in_dim = w_ih.shape[1]
        in_dim_p = IP if l == 0 else HP
        # (4H, in) -> (in, 4, H): pad each gate's H columns to HP, pad input
        # rows to the padded input width, then fuse input+hidden weights into
        # a single (in_dim_p + HP, 4*HP) bf16 operand.
        wihT = _pad_axis(w_ih.T.reshape(in_dim, 4, H), 2, HP)
        wihT = _pad_axis(wihT.reshape(in_dim, 4 * HP), 0, in_dim_p)
        whhT = _pad_axis(w_hh.T.reshape(H, 4, H), 2, HP)
        whhT = _pad_axis(whhT.reshape(H, 4 * HP), 0, HP)
        w_cat = jnp.concatenate([wihT, whhT], axis=0).astype(compute_dtype)
        bias = _pad_axis((b_ih + b_hh).reshape(4, H), 1, HP)
        bias = bias.reshape(1, 4 * HP).astype(jnp.float32)

        flat_inputs += [w_cat, bias]
        in_specs += [
            pl.BlockSpec((in_dim_p + HP, 4 * HP), lambda t: (0, 0)),
            pl.BlockSpec((1, 4 * HP), lambda t: (0, 0)),
        ]

    # fc weight (O, T*H) -> (T, H, O) so step t multiplies its own (H, O)
    # slice; pad to (T, HP, OP) and stream TT slices per grid step.
    wfc3 = fc_w.T.reshape(T, H, O)
    wfc3 = _pad_axis(_pad_axis(wfc3, 1, HP), 2, OP).astype(compute_dtype)
    bfc = _pad_axis(fc_b, 0, OP).reshape(1, OP).astype(jnp.float32)
    flat_inputs += [wfc3, bfc]
    in_specs += [
        pl.BlockSpec((TT, HP, OP), lambda t: (t, 0, 0)),
        pl.BlockSpec((1, OP), lambda t: (0, 0)),
    ]

    kernel = _make_kernel(L, HP, TT, x.dtype, compute_dtype)

    out_p = pl.pallas_call(
        kernel,
        out_shape=jax.ShapeDtypeStruct((BP, OP), x.dtype),
        grid_spec=pltpu.PrefetchScalarGridSpec(
            num_scalar_prefetch=0,
            grid=(T // TT,),
            in_specs=in_specs,
            out_specs=pl.BlockSpec((BP, OP), lambda t: (0, 0)),
            scratch_shapes=[
                pltpu.VMEM((L, BP, HP), jnp.float32),  # hidden state per layer
                pltpu.VMEM((L, BP, HP), jnp.float32),  # cell state per layer
                pltpu.VMEM((BP, OP), jnp.float32),     # fc accumulator
            ],
        ),
        compiler_params=pltpu.CompilerParams(
            dimension_semantics=("arbitrary",),   # time recurrence: sequential
            vmem_limit_bytes=64 * 1024 * 1024,
        ),
    )(*flat_inputs)

    return out_p[:B, :O]


def lstm_fc_reference(x, lstm_params, fc_w, fc_b, *, hidden, num_layers):
    B, T, I = x.shape
    H, L = hidden, num_layers
    h = [jnp.zeros((B, H), jnp.float32) for _ in range(L)]
    c = [jnp.zeros((B, H), jnp.float32) for _ in range(L)]
    outs = []
    for t in range(T):
        inp = x[:, t, :]
        for l in range(L):
            w_ih, w_hh, b_ih, b_hh = lstm_params[l]
            gates = inp @ w_ih.T + b_ih + h[l] @ w_hh.T + b_hh
            i = jax.nn.sigmoid(gates[:, :H])
            f = jax.nn.sigmoid(gates[:, H:2 * H])
            g = jnp.tanh(gates[:, 2 * H:3 * H])
            o = jax.nn.sigmoid(gates[:, 3 * H:])
            c[l] = f * c[l] + i * g
            h[l] = o * jnp.tanh(c[l])
            inp = h[l]
        outs.append(inp)
    flat = jnp.stack(outs, axis=1).reshape(B, -1)  # (B, T*H)
    return flat @ fc_w.T + fc_b


if __name__ == "__main__":
    # Small shapes consistent with the module's forward.
    B, T = 2, 8            # batch, sequence_length
    I, H = 8, 32           # input_size, hidden_size
    L, O = 2, 4            # num_layers, num_outputs

    key = jax.random.PRNGKey(0)
    k = 1.0 / np.sqrt(H)

    lstm_params = []
    for l in range(L):
        in_dim = I if l == 0 else H
        key, k1, k2, k3, k4 = jax.random.split(key, 5)
        lstm_params.append((
            jax.random.uniform(k1, (4 * H, in_dim), jnp.float32, -k, k),  # w_ih
            jax.random.uniform(k2, (4 * H, H), jnp.float32, -k, k),       # w_hh
            jax.random.uniform(k3, (4 * H,), jnp.float32, -k, k),         # b_ih
            jax.random.uniform(k4, (4 * H,), jnp.float32, -k, k),         # b_hh
        ))
    key, k5, k6, kx = jax.random.split(key, 4)
    kf = 1.0 / np.sqrt(H * T)
    fc_w = jax.random.uniform(k5, (O, H * T), jnp.float32, -kf, kf)
    fc_b = jax.random.uniform(k6, (O,), jnp.float32, -kf, kf)

    x = jax.random.normal(kx, (B, T, I), jnp.float32)

    ref = lstm_fc_reference(x, lstm_params, fc_w, fc_b, hidden=H, num_layers=L)

    # Optimized path: bf16 matmul operands, f32 accumulation / gate math.
    out_bf16 = lstm_fc_forward(x, lstm_params, fc_w, fc_b,
                               hidden=H, num_layers=L,
                               compute_dtype=jnp.bfloat16)
    out_bf16 = jax.block_until_ready(out_bf16)
    np.testing.assert_allclose(np.asarray(out_bf16), np.asarray(ref),
                               rtol=2e-2, atol=2e-2)

    # Full-precision path of the same kernel (tight check of the structure).
    out_f32 = lstm_fc_forward(x, lstm_params, fc_w, fc_b,
                              hidden=H, num_layers=L,
                              compute_dtype=jnp.float32)
    out_f32 = jax.block_until_ready(out_f32)
    np.testing.assert_allclose(np.asarray(out_f32), np.asarray(ref),
                               rtol=1e-4, atol=1e-4)

    print("KERNEL_OK")
</pallas_src>

<mosaic_0001>
module attributes {stable_mosaic.version = 11 : i64} {
  func.func @kernel(%arg0: i32, %arg1: memref<8x8x128xf32, #tpu.memory_space<vmem>>, %arg2: memref<256x512xbf16, #tpu.memory_space<vmem>>, %arg3: memref<1x512xf32, #tpu.memory_space<vmem>>, %arg4: memref<256x512xbf16, #tpu.memory_space<vmem>>, %arg5: memref<1x512xf32, #tpu.memory_space<vmem>>, %arg6: memref<8x128x128xbf16, #tpu.memory_space<vmem>>, %arg7: memref<1x128xf32, #tpu.memory_space<vmem>>, %arg8: memref<8x128xf32, #tpu.memory_space<vmem>>, %arg9: memref<2x8x128xf32, #tpu.memory_space<vmem>>, %arg10: memref<2x8x128xf32, #tpu.memory_space<vmem>>, %arg11: memref<8x128xf32, #tpu.memory_space<vmem>>) attributes {dimension_semantics = [#tpu.dimension_semantics<arbitrary>], iteration_bounds = array<i64: 1>, scalar_prefetch = 0 : i64, scratch_operands = 3 : i64, tpu.core_type = #tpu.core_type<tc>, window_params = [{transform_indices = @transform_0, window_bounds = array<i64: 8, 8, 128>}, {pipeline_mode = #tpu.pipeline_mode<synchronous>, transform_indices = @transform_1, window_bounds = array<i64: 256, 512>}, {pipeline_mode = #tpu.pipeline_mode<synchronous>, transform_indices = @transform_2, window_bounds = array<i64: 1, 512>}, {pipeline_mode = #tpu.pipeline_mode<synchronous>, transform_indices = @transform_3, window_bounds = array<i64: 256, 512>}, {pipeline_mode = #tpu.pipeline_mode<synchronous>, transform_indices = @transform_4, window_bounds = array<i64: 1, 512>}, {transform_indices = @transform_5, window_bounds = array<i64: 8, 128, 128>}, {pipeline_mode = #tpu.pipeline_mode<synchronous>, transform_indices = @transform_6, window_bounds = array<i64: 1, 128>}, {pipeline_mode = #tpu.pipeline_mode<synchronous>, transform_indices = @transform_7, window_bounds = array<i64: 8, 128>}]} {
    %c0_i32 = arith.constant 0 : i32
    %0 = arith.cmpi eq, %arg0, %c0_i32 : i32
    %1 = arith.extui %0 : i1 to i32
    %c0_i32_0 = arith.constant 0 : i32
    %2 = arith.cmpi ne, %1, %c0_i32_0 : i32
    scf.if %2 {
      %cst_402 = arith.constant 0.000000e+00 : f32
      %766 = vector.broadcast %cst_402 : f32 to vector<2x8x128xf32>
      %c0_403 = arith.constant 0 : index
      %c0_404 = arith.constant 0 : index
      %c0_405 = arith.constant 0 : index
      %767 = vector.load %arg9[%c0_403, %c0_404, %c0_405] : memref<2x8x128xf32, #tpu.memory_space<vmem>>, vector<2x8x128xf32>
      tpu.vector_store %arg9[%c0_403, %c0_404, %c0_405], %766 {strides = array<i32>} : memref<2x8x128xf32, #tpu.memory_space<vmem>>, vector<2x8x128xf32>,
      %cst_406 = arith.constant 0.000000e+00 : f32
      %768 = vector.broadcast %cst_406 : f32 to vector<2x8x128xf32>
      %c0_407 = arith.constant 0 : index
      %c0_408 = arith.constant 0 : index
      %c0_409 = arith.constant 0 : index
      %769 = vector.load %arg10[%c0_407, %c0_408, %c0_409] : memref<2x8x128xf32, #tpu.memory_space<vmem>>, vector<2x8x128xf32>
      tpu.vector_store %arg10[%c0_407, %c0_408, %c0_409], %768 {strides = array<i32>} : memref<2x8x128xf32, #tpu.memory_space<vmem>>, vector<2x8x128xf32>,
      %cst_410 = arith.constant 0.000000e+00 : f32
      %770 = vector.broadcast %cst_410 : f32 to vector<8x128xf32>
      %c0_411 = arith.constant 0 : index
      %c0_412 = arith.constant 0 : index
      %771 = vector.load %arg11[%c0_411, %c0_412] : memref<8x128xf32, #tpu.memory_space<vmem>>, vector<8x128xf32>
      tpu.vector_store %arg11[%c0_411, %c0_412], %770 {strides = array<i32>} : memref<8x128xf32, #tpu.memory_space<vmem>>, vector<8x128xf32>,
    } else {
    }
    %c0 = arith.constant 0 : index
    %c0_1 = arith.constant 0 : index
    %c0_2 = arith.constant 0 : index
    %3 = vector.load %arg1[%c0, %c0_1, %c0_2] : memref<8x8x128xf32, #tpu.memory_space<vmem>>, vector<8x1x128xf32>
    %4 = vector.shape_cast %3 : vector<8x1x128xf32> to vector<8x128xf32>
    %5 = arith.truncf %4 : vector<8x128xf32> to vector<8x128xbf16>
    %c0_3 = arith.constant 0 : index
    %c0_4 = arith.constant 0 : index
    %c0_5 = arith.constant 0 : index
    %6 = vector.load %arg9[%c0_3, %c0_4, %c0_5] : memref<2x8x128xf32, #tpu.memory_space<vmem>>, vector<1x8x128xf32>
    %7 = vector.shape_cast %6 : vector<1x8x128xf32> to vector<8x128xf32>
    %c0_6 = arith.constant 0 : index
    %c0_7 = arith.constant 0 : index
    %c0_8 = arith.constant 0 : index
    %8 = vector.load %arg10[%c0_6, %c0_7, %c0_8] : memref<2x8x128xf32, #tpu.memory_space<vmem>>, vector<1x8x128xf32>
    %9 = vector.shape_cast %8 : vector<1x8x128xf32> to vector<8x128xf32>
    %10 = arith.truncf %7 : vector<8x128xf32> to vector<8x128xbf16>
    %11 = tpu.concatenate %5, %10 in 1 : vector<8x128xbf16>, vector<8x128xbf16> -> vector<8x256xbf16>
    %c0_9 = arith.constant 0 : index
    %c0_10 = arith.constant 0 : index
    %12 = vector.load %arg2[%c0_9, %c0_10] : memref<256x512xbf16, #tpu.memory_space<vmem>>, vector<256x512xbf16>
    %cst = arith.constant dense<0.000000e+00> : vector<8x512xf32>
    %13 = tpu.matmul %11, %12, %cst {dimension_numbers = #tpu.dot_dimension_numbers<[1], [0], [0], [1], [0, 0, 1, 1], [], []>} : vector<8x256xbf16>, vector<256x512xbf16>, vector<8x512xf32> -> vector<8x512xf32>
    %c0_11 = arith.constant 0 : index
    %c0_12 = arith.constant 0 : index
    %14 = vector.load %arg3[%c0_11, %c0_12] : memref<1x512xf32, #tpu.memory_space<vmem>>, vector<1x512xf32>
    %15 = vector.broadcast %14 : vector<1x512xf32> to vector<8x512xf32>
    %16 = arith.addf %13, %15 : vector<8x512xf32>
    %17 = vector.extract_strided_slice %16 {offsets = [0, 0], sizes = [8, 128], strides = [1, 1]} : vector<8x512xf32> to vector<8x128xf32>
    %18 = arith.negf %17 : vector<8x128xf32>
    %19 = math.exp %18 : vector<8x128xf32>
    %cst_13 = arith.constant 1.000000e+00 : f32
    %20 = vector.broadcast %cst_13 : f32 to vector<8x128xf32>
    %21 = arith.addf %20, %19 : vector<8x128xf32>
    %22 = arith.divf %20, %21 : vector<8x128xf32>
    %23 = vector.extract_strided_slice %16 {offsets = [0, 128], sizes = [8, 128], strides = [1, 1]} : vector<8x512xf32> to vector<8x128xf32>
    %24 = arith.negf %23 : vector<8x128xf32>
    %25 = math.exp %24 : vector<8x128xf32>
    %cst_14 = arith.constant 1.000000e+00 : f32
    %26 = vector.broadcast %cst_14 : f32 to vector<8x128xf32>
    %27 = arith.addf %26, %25 : vector<8x128xf32>
    %28 = arith.divf %26, %27 : vector<8x128xf32>
    %29 = vector.extract_strided_slice %16 {offsets = [0, 256], sizes = [8, 128], strides = [1, 1]} : vector<8x512xf32> to vector<8x128xf32>
    %30 = math.tanh %29 : vector<8x128xf32>
    %31 = vector.extract_strided_slice %16 {offsets = [0, 384], sizes = [8, 128], strides = [1, 1]} : vector<8x512xf32> to vector<8x128xf32>
    %32 = arith.negf %31 : vector<8x128xf32>
    %33 = math.exp %32 : vector<8x128xf32>
    %cst_15 = arith.constant 1.000000e+00 : f32
    %34 = vector.broadcast %cst_15 : f32 to vector<8x128xf32>
    %35 = arith.addf %34, %33 : vector<8x128xf32>
    %36 = arith.divf %34, %35 : vector<8x128xf32>
    %37 = arith.mulf %28, %9 : vector<8x128xf32>
    %38 = arith.mulf %22, %30 : vector<8x128xf32>
    %39 = arith.addf %37, %38 : vector<8x128xf32>
    %40 = math.tanh %39 : vector<8x128xf32>
    %41 = arith.mulf %36, %40 : vector<8x128xf32>
    %c0_16 = arith.constant 0 : index
    %c0_17 = arith.constant 0 : index
    %c0_18 = arith.constant 0 : index
    %42 = vector.load %arg9[%c0_16, %c0_17, %c0_18] : memref<2x8x128xf32, #tpu.memory_space<vmem>>, vector<1x8x128xf32>
    %43 = vector.shape_cast %42 : vector<1x8x128xf32> to vector<8x128xf32>
    %44 = vector.shape_cast %41 : vector<8x128xf32> to vector<1x8x128xf32>
    tpu.vector_store %arg9[%c0_16, %c0_17, %c0_18], %44 {strides = array<i32>} : memref<2x8x128xf32, #tpu.memory_space<vmem>>, vector<1x8x128xf32>,
    %c0_19 = arith.constant 0 : index
    %c0_20 = arith.constant 0 : index
    %c0_21 = arith.constant 0 : index
    %45 = vector.load %arg10[%c0_19, %c0_20, %c0_21] : memref<2x8x128xf32, #tpu.memory_space<vmem>>, vector<1x8x128xf32>
    %46 = vector.shape_cast %45 : vector<1x8x128xf32> to vector<8x128xf32>
    %47 = vector.shape_cast %39 : vector<8x128xf32> to vector<1x8x128xf32>
    tpu.vector_store %arg10[%c0_19, %c0_20, %c0_21], %47 {strides = array<i32>} : memref<2x8x128xf32, #tpu.memory_space<vmem>>, vector<1x8x128xf32>,
    %48 = arith.truncf %41 : vector<8x128xf32> to vector<8x128xbf16>
    %c1 = arith.constant 1 : index
    %c0_22 = arith.constant 0 : index
    %c0_23 = arith.constant 0 : index
    %49 = vector.load %arg9[%c1, %c0_22, %c0_23] : memref<2x8x128xf32, #tpu.memory_space<vmem>>, vector<1x8x128xf32>
    %50 = vector.shape_cast %49 : vector<1x8x128xf32> to vector<8x128xf32>
    %c1_24 = arith.constant 1 : index
    %c0_25 = arith.constant 0 : index
    %c0_26 = arith.constant 0 : index
    %51 = vector.load %arg10[%c1_24, %c0_25, %c0_26] : memref<2x8x128xf32, #tpu.memory_space<vmem>>, vector<1x8x128xf32>
    %52 = vector.shape_cast %51 : vector<1x8x128xf32> to vector<8x128xf32>
    %53 = arith.truncf %50 : vector<8x128xf32> to vector<8x128xbf16>
    %54 = tpu.concatenate %48, %53 in 1 : vector<8x128xbf16>, vector<8x128xbf16> -> vector<8x256xbf16>
    %c0_27 = arith.constant 0 : index
    %c0_28 = arith.constant 0 : index
    %55 = vector.load %arg4[%c0_27, %c0_28] : memref<256x512xbf16, #tpu.memory_space<vmem>>, vector<256x512xbf16>
    %cst_29 = arith.constant dense<0.000000e+00> : vector<8x512xf32>
    %56 = tpu.matmul %54, %55, %cst_29 {dimension_numbers = #tpu.dot_dimension_numbers<[1], [0], [0], [1], [0, 0, 1, 1], [], []>} : vector<8x256xbf16>, vector<256x512xbf16>, vector<8x512xf32> -> vector<8x512xf32>
    %c0_30 = arith.constant 0 : index
    %c0_31 = arith.constant 0 : index
    %57 = vector.load %arg5[%c0_30, %c0_31] : memref<1x512xf32, #tpu.memory_space<vmem>>, vector<1x512xf32>
    %58 = vector.broadcast %57 : vector<1x512xf32> to vector<8x512xf32>
    %59 = arith.addf %56, %58 : vector<8x512xf32>
    %60 = vector.extract_strided_slice %59 {offsets = [0, 0], sizes = [8, 128], strides = [1, 1]} : vector<8x512xf32> to vector<8x128xf32>
    %61 = arith.negf %60 : vector<8x128xf32>
    %62 = math.exp %61 : vector<8x128xf32>
    %cst_32 = arith.constant 1.000000e+00 : f32
    %63 = vector.broadcast %cst_32 : f32 to vector<8x128xf32>
    %64 = arith.addf %63, %62 : vector<8x128xf32>
    %65 = arith.divf %63, %64 : vector<8x128xf32>
    %66 = vector.extract_strided_slice %59 {offsets = [0, 128], sizes = [8, 128], strides = [1, 1]} : vector<8x512xf32> to vector<8x128xf32>
    %67 = arith.negf %66 : vector<8x128xf32>
    %68 = math.exp %67 : vector<8x128xf32>
    %cst_33 = arith.constant 1.000000e+00 : f32
    %69 = vector.broadcast %cst_33 : f32 to vector<8x128xf32>
    %70 = arith.addf %69, %68 : vector<8x128xf32>
    %71 = arith.divf %69, %70 : vector<8x128xf32>
    %72 = vector.extract_strided_slice %59 {offsets = [0, 256], sizes = [8, 128], strides = [1, 1]} : vector<8x512xf32> to vector<8x128xf32>
    %73 = math.tanh %72 : vector<8x128xf32>
    %74 = vector.extract_strided_slice %59 {offsets = [0, 384], sizes = [8, 128], strides = [1, 1]} : vector<8x512xf32> to vector<8x128xf32>
    %75 = arith.negf %74 : vector<8x128xf32>
    %76 = math.exp %75 : vector<8x128xf32>
    %cst_34 = arith.constant 1.000000e+00 : f32
    %77 = vector.broadcast %cst_34 : f32 to vector<8x128xf32>
    %78 = arith.addf %77, %76 : vector<8x128xf32>
    %79 = arith.divf %77, %78 : vector<8x128xf32>
    %80 = arith.mulf %71, %52 : vector<8x128xf32>
    %81 = arith.mulf %65, %73 : vector<8x128xf32>
    %82 = arith.addf %80, %81 : vector<8x128xf32>
    %83 = math.tanh %82 : vector<8x128xf32>
    %84 = arith.mulf %79, %83 : vector<8x128xf32>
    %c1_35 = arith.constant 1 : index
    %c0_36 = arith.constant 0 : index
    %c0_37 = arith.constant 0 : index
    %85 = vector.load %arg9[%c1_35, %c0_36, %c0_37] : memref<2x8x128xf32, #tpu.memory_space<vmem>>, vector<1x8x128xf32>
    %86 = vector.shape_cast %85 : vector<1x8x128xf32> to vector<8x128xf32>
    %87 = vector.shape_cast %84 : vector<8x128xf32> to vector<1x8x128xf32>
    tpu.vector_store %arg9[%c1_35, %c0_36, %c0_37], %87 {strides = array<i32>} : memref<2x8x128xf32, #tpu.memory_space<vmem>>, vector<1x8x128xf32>,
    %c1_38 = arith.constant 1 : index
    %c0_39 = arith.constant 0 : index
    %c0_40 = arith.constant 0 : index
    %88 = vector.load %arg10[%c1_38, %c0_39, %c0_40] : memref<2x8x128xf32, #tpu.memory_space<vmem>>, vector<1x8x128xf32>
    %89 = vector.shape_cast %88 : vector<1x8x128xf32> to vector<8x128xf32>
    %90 = vector.shape_cast %82 : vector<8x128xf32> to vector<1x8x128xf32>
    tpu.vector_store %arg10[%c1_38, %c0_39, %c0_40], %90 {strides = array<i32>} : memref<2x8x128xf32, #tpu.memory_space<vmem>>, vector<1x8x128xf32>,
    %91 = arith.truncf %84 : vector<8x128xf32> to vector<8x128xbf16>
    %c0_41 = arith.constant 0 : index
    %c0_42 = arith.constant 0 : index
    %92 = vector.load %arg11[%c0_41, %c0_42] : memref<8x128xf32, #tpu.memory_space<vmem>>, vector<8x128xf32>
    %c0_43 = arith.constant 0 : index
    %c0_44 = arith.constant 0 : index
    %c0_45 = arith.constant 0 : index
    %93 = vector.load %arg6[%c0_43, %c0_44, %c0_45] : memref<8x128x128xbf16, #tpu.memory_space<vmem>>, vector<1x128x128xbf16>
    %94 = vector.shape_cast %93 : vector<1x128x128xbf16> to vector<128x128xbf16>
    %cst_46 = arith.constant dense<0.000000e+00> : vector<8x128xf32>
    %95 = tpu.matmul %91, %94, %cst_46 {dimension_numbers = #tpu.dot_dimension_numbers<[1], [0], [0], [1], [0, 0, 1, 1], [], []>} : vector<8x128xbf16>, vector<128x128xbf16>, vector<8x128xf32> -> vector<8x128xf32>
    %96 = arith.addf %92, %95 : vector<8x128xf32>
    %c0_47 = arith.constant 0 : index
    %c0_48 = arith.constant 0 : index
    %97 = vector.load %arg11[%c0_47, %c0_48] : memref<8x128xf32, #tpu.memory_space<vmem>>, vector<8x128xf32>
    tpu.vector_store %arg11[%c0_47, %c0_48], %96 {strides = array<i32>} : memref<8x128xf32, #tpu.memory_space<vmem>>, vector<8x128xf32>,
    %c0_49 = arith.constant 0 : index
    %c1_50 = arith.constant 1 : index
    %c0_51 = arith.constant 0 : index
    %98 = vector.load %arg1[%c0_49, %c1_50, %c0_51] : memref<8x8x128xf32, #tpu.memory_space<vmem>>, vector<8x1x128xf32>
    %99 = vector.shape_cast %98 : vector<8x1x128xf32> to vector<8x128xf32>
    %100 = arith.truncf %99 : vector<8x128xf32> to vector<8x128xbf16>
    %c0_52 = arith.constant 0 : index
    %c0_53 = arith.constant 0 : index
    %c0_54 = arith.constant 0 : index
    %101 = vector.load %arg9[%c0_52, %c0_53, %c0_54] : memref<2x8x128xf32, #tpu.memory_space<vmem>>, vector<1x8x128xf32>
    %102 = vector.shape_cast %101 : vector<1x8x128xf32> to vector<8x128xf32>
    %c0_55 = arith.constant 0 : index
    %c0_56 = arith.constant 0 : index
    %c0_57 = arith.constant 0 : index
    %103 = vector.load %arg10[%c0_55, %c0_56, %c0_57] : memref<2x8x128xf32, #tpu.memory_space<vmem>>, vector<1x8x128xf32>
    %104 = vector.shape_cast %103 : vector<1x8x128xf32> to vector<8x128xf32>
    %105 = arith.truncf %102 : vector<8x128xf32> to vector<8x128xbf16>
    %106 = tpu.concatenate %100, %105 in 1 : vector<8x128xbf16>, vector<8x128xbf16> -> vector<8x256xbf16>
    %c0_58 = arith.constant 0 : index
    %c0_59 = arith.constant 0 : index
    %107 = vector.load %arg2[%c0_58, %c0_59] : memref<256x512xbf16, #tpu.memory_space<vmem>>, vector<256x512xbf16>
    %cst_60 = arith.constant dense<0.000000e+00> : vector<8x512xf32>
    %108 = tpu.matmul %106, %107, %cst_60 {dimension_numbers = #tpu.dot_dimension_numbers<[1], [0], [0], [1], [0, 0, 1, 1], [], []>} : vector<8x256xbf16>, vector<256x512xbf16>, vector<8x512xf32> -> vector<8x512xf32>
    %c0_61 = arith.constant 0 : index
    %c0_62 = arith.constant 0 : index
    %109 = vector.load %arg3[%c0_61, %c0_62] : memref<1x512xf32, #tpu.memory_space<vmem>>, vector<1x512xf32>
    %110 = vector.broadcast %109 : vector<1x512xf32> to vector<8x512xf32>
    %111 = arith.addf %108, %110 : vector<8x512xf32>
    %112 = vector.extract_strided_slice %111 {offsets = [0, 0], sizes = [8, 128], strides = [1, 1]} : vector<8x512xf32> to vector<8x128xf32>
    %113 = arith.negf %112 : vector<8x128xf32>
    %114 = math.exp %113 : vector<8x128xf32>
    %cst_63 = arith.constant 1.000000e+00 : f32
    %115 = vector.broadcast %cst_63 : f32 to vector<8x128xf32>
    %116 = arith.addf %115, %114 : vector<8x128xf32>
    %117 = arith.divf %115, %116 : vector<8x128xf32>
    %118 = vector.extract_strided_slice %111 {offsets = [0, 128], sizes = [8, 128], strides = [1, 1]} : vector<8x512xf32> to vector<8x128xf32>
    %119 = arith.negf %118 : vector<8x128xf32>
    %120 = math.exp %119 : vector<8x128xf32>
    %cst_64 = arith.constant 1.000000e+00 : f32
    %121 = vector.broadcast %cst_64 : f32 to vector<8x128xf32>
    %122 = arith.addf %121, %120 : vector<8x128xf32>
    %123 = arith.divf %121, %122 : vector<8x128xf32>
    %124 = vector.extract_strided_slice %111 {offsets = [0, 256], sizes = [8, 128], strides = [1, 1]} : vector<8x512xf32> to vector<8x128xf32>
    %125 = math.tanh %124 : vector<8x128xf32>
    %126 = vector.extract_strided_slice %111 {offsets = [0, 384], sizes = [8, 128], strides = [1, 1]} : vector<8x512xf32> to vector<8x128xf32>
    %127 = arith.negf %126 : vector<8x128xf32>
    %128 = math.exp %127 : vector<8x128xf32>
    %cst_65 = arith.constant 1.000000e+00 : f32
    %129 = vector.broadcast %cst_65 : f32 to vector<8x128xf32>
    %130 = arith.addf %129, %128 : vector<8x128xf32>
    %131 = arith.divf %129, %130 : vector<8x128xf32>
    %132 = arith.mulf %123, %104 : vector<8x128xf32>
    %133 = arith.mulf %117, %125 : vector<8x128xf32>
    %134 = arith.addf %132, %133 : vector<8x128xf32>
    %135 = math.tanh %134 : vector<8x128xf32>
    %136 = arith.mulf %131, %135 : vector<8x128xf32>
    %c0_66 = arith.constant 0 : index
    %c0_67 = arith.constant 0 : index
    %c0_68 = arith.constant 0 : index
    %137 = vector.load %arg9[%c0_66, %c0_67, %c0_68] : memref<2x8x128xf32, #tpu.memory_space<vmem>>, vector<1x8x128xf32>
    %138 = vector.shape_cast %137 : vector<1x8x128xf32> to vector<8x128xf32>
    %139 = vector.shape_cast %136 : vector<8x128xf32> to vector<1x8x128xf32>
    tpu.vector_store %arg9[%c0_66, %c0_67, %c0_68], %139 {strides = array<i32>} : memref<2x8x128xf32, #tpu.memory_space<vmem>>, vector<1x8x128xf32>,
    %c0_69 = arith.constant 0 : index
    %c0_70 = arith.constant 0 : index
    %c0_71 = arith.constant 0 : index
    %140 = vector.load %arg10[%c0_69, %c0_70, %c0_71] : memref<2x8x128xf32, #tpu.memory_space<vmem>>, vector<1x8x128xf32>
    %141 = vector.shape_cast %140 : vector<1x8x128xf32> to vector<8x128xf32>
    %142 = vector.shape_cast %134 : vector<8x128xf32> to vector<1x8x128xf32>
    tpu.vector_store %arg10[%c0_69, %c0_70, %c0_71], %142 {strides = array<i32>} : memref<2x8x128xf32, #tpu.memory_space<vmem>>, vector<1x8x128xf32>,
    %143 = arith.truncf %136 : vector<8x128xf32> to vector<8x128xbf16>
    %c1_72 = arith.constant 1 : index
    %c0_73 = arith.constant 0 : index
    %c0_74 = arith.constant 0 : index
    %144 = vector.load %arg9[%c1_72, %c0_73, %c0_74] : memref<2x8x128xf32, #tpu.memory_space<vmem>>, vector<1x8x128xf32>
    %145 = vector.shape_cast %144 : vector<1x8x128xf32> to vector<8x128xf32>
    %c1_75 = arith.constant 1 : index
    %c0_76 = arith.constant 0 : index
    %c0_77 = arith.constant 0 : index
    %146 = vector.load %arg10[%c1_75, %c0_76, %c0_77] : memref<2x8x128xf32, #tpu.memory_space<vmem>>, vector<1x8x128xf32>
    %147 = vector.shape_cast %146 : vector<1x8x128xf32> to vector<8x128xf32>
    %148 = arith.truncf %145 : vector<8x128xf32> to vector<8x128xbf16>
    %149 = tpu.concatenate %143, %148 in 1 : vector<8x128xbf16>, vector<8x128xbf16> -> vector<8x256xbf16>
    %c0_78 = arith.constant 0 : index
    %c0_79 = arith.constant 0 : index
    %150 = vector.load %arg4[%c0_78, %c0_79] : memref<256x512xbf16, #tpu.memory_space<vmem>>, vector<256x512xbf16>
    %cst_80 = arith.constant dense<0.000000e+00> : vector<8x512xf32>
    %151 = tpu.matmul %149, %150, %cst_80 {dimension_numbers = #tpu.dot_dimension_numbers<[1], [0], [0], [1], [0, 0, 1, 1], [], []>} : vector<8x256xbf16>, vector<256x512xbf16>, vector<8x512xf32> -> vector<8x512xf32>
    %c0_81 = arith.constant 0 : index
    %c0_82 = arith.constant 0 : index
    %152 = vector.load %arg5[%c0_81, %c0_82] : memref<1x512xf32, #tpu.memory_space<vmem>>, vector<1x512xf32>
    %153 = vector.broadcast %152 : vector<1x512xf32> to vector<8x512xf32>
    %154 = arith.addf %151, %153 : vector<8x512xf32>
    %155 = vector.extract_strided_slice %154 {offsets = [0, 0], sizes = [8, 128], strides = [1, 1]} : vector<8x512xf32> to vector<8x128xf32>
    %156 = arith.negf %155 : vector<8x128xf32>
    %157 = math.exp %156 : vector<8x128xf32>
    %cst_83 = arith.constant 1.000000e+00 : f32
    %158 = vector.broadcast %cst_83 : f32 to vector<8x128xf32>
    %159 = arith.addf %158, %157 : vector<8x128xf32>
    %160 = arith.divf %158, %159 : vector<8x128xf32>
    %161 = vector.extract_strided_slice %154 {offsets = [0, 128], sizes = [8, 128], strides = [1, 1]} : vector<8x512xf32> to vector<8x128xf32>
    %162 = arith.negf %161 : vector<8x128xf32>
    %163 = math.exp %162 : vector<8x128xf32>
    %cst_84 = arith.constant 1.000000e+00 : f32
    %164 = vector.broadcast %cst_84 : f32 to vector<8x128xf32>
    %165 = arith.addf %164, %163 : vector<8x128xf32>
    %166 = arith.divf %164, %165 : vector<8x128xf32>
    %167 = vector.extract_strided_slice %154 {offsets = [0, 256], sizes = [8, 128], strides = [1, 1]} : vector<8x512xf32> to vector<8x128xf32>
    %168 = math.tanh %167 : vector<8x128xf32>
    %169 = vector.extract_strided_slice %154 {offsets = [0, 384], sizes = [8, 128], strides = [1, 1]} : vector<8x512xf32> to vector<8x128xf32>
    %170 = arith.negf %169 : vector<8x128xf32>
    %171 = math.exp %170 : vector<8x128xf32>
    %cst_85 = arith.constant 1.000000e+00 : f32
    %172 = vector.broadcast %cst_85 : f32 to vector<8x128xf32>
    %173 = arith.addf %172, %171 : vector<8x128xf32>
    %174 = arith.divf %172, %173 : vector<8x128xf32>
    %175 = arith.mulf %166, %147 : vector<8x128xf32>
    %176 = arith.mulf %160, %168 : vector<8x128xf32>
    %177 = arith.addf %175, %176 : vector<8x128xf32>
    %178 = math.tanh %177 : vector<8x128xf32>
    %179 = arith.mulf %174, %178 : vector<8x128xf32>
    %c1_86 = arith.constant 1 : index
    %c0_87 = arith.constant 0 : index
    %c0_88 = arith.constant 0 : index
    %180 = vector.load %arg9[%c1_86, %c0_87, %c0_88] : memref<2x8x128xf32, #tpu.memory_space<vmem>>, vector<1x8x128xf32>
    %181 = vector.shape_cast %180 : vector<1x8x128xf32> to vector<8x128xf32>
    %182 = vector.shape_cast %179 : vector<8x128xf32> to vector<1x8x128xf32>
    tpu.vector_store %arg9[%c1_86, %c0_87, %c0_88], %182 {strides = array<i32>} : memref<2x8x128xf32, #tpu.memory_space<vmem>>, vector<1x8x128xf32>,
    %c1_89 = arith.constant 1 : index
    %c0_90 = arith.constant 0 : index
    %c0_91 = arith.constant 0 : index
    %183 = vector.load %arg10[%c1_89, %c0_90, %c0_91] : memref<2x8x128xf32, #tpu.memory_space<vmem>>, vector<1x8x128xf32>
    %184 = vector.shape_cast %183 : vector<1x8x128xf32> to vector<8x128xf32>
    %185 = vector.shape_cast %177 : vector<8x128xf32> to vector<1x8x128xf32>
    tpu.vector_store %arg10[%c1_89, %c0_90, %c0_91], %185 {strides = array<i32>} : memref<2x8x128xf32, #tpu.memory_space<vmem>>, vector<1x8x128xf32>,
    %186 = arith.truncf %179 : vector<8x128xf32> to vector<8x128xbf16>
    %c0_92 = arith.constant 0 : index
    %c0_93 = arith.constant 0 : index
    %187 = vector.load %arg11[%c0_92, %c0_93] : memref<8x128xf32, #tpu.memory_space<vmem>>, vector<8x128xf32>
    %c1_94 = arith.constant 1 : index
    %c0_95 = arith.constant 0 : index
    %c0_96 = arith.constant 0 : index
    %188 = vector.load %arg6[%c1_94, %c0_95, %c0_96] : memref<8x128x128xbf16, #tpu.memory_space<vmem>>, vector<1x128x128xbf16>
    %189 = vector.shape_cast %188 : vector<1x128x128xbf16> to vector<128x128xbf16>
    %cst_97 = arith.constant dense<0.000000e+00> : vector<8x128xf32>
    %190 = tpu.matmul %186, %189, %cst_97 {dimension_numbers = #tpu.dot_dimension_numbers<[1], [0], [0], [1], [0, 0, 1, 1], [], []>} : vector<8x128xbf16>, vector<128x128xbf16>, vector<8x128xf32> -> vector<8x128xf32>
    %191 = arith.addf %187, %190 : vector<8x128xf32>
    %c0_98 = arith.constant 0 : index
    %c0_99 = arith.constant 0 : index
    %192 = vector.load %arg11[%c0_98, %c0_99] : memref<8x128xf32, #tpu.memory_space<vmem>>, vector<8x128xf32>
    tpu.vector_store %arg11[%c0_98, %c0_99], %191 {strides = array<i32>} : memref<8x128xf32, #tpu.memory_space<vmem>>, vector<8x128xf32>,
    %c0_100 = arith.constant 0 : index
    %c2 = arith.constant 2 : index
    %c0_101 = arith.constant 0 : index
    %193 = vector.load %arg1[%c0_100, %c2, %c0_101] : memref<8x8x128xf32, #tpu.memory_space<vmem>>, vector<8x1x128xf32>
    %194 = vector.shape_cast %193 : vector<8x1x128xf32> to vector<8x128xf32>
    %195 = arith.truncf %194 : vector<8x128xf32> to vector<8x128xbf16>
    %c0_102 = arith.constant 0 : index
    %c0_103 = arith.constant 0 : index
    %c0_104 = arith.constant 0 : index
    %196 = vector.load %arg9[%c0_102, %c0_103, %c0_104] : memref<2x8x128xf32, #tpu.memory_space<vmem>>, vector<1x8x128xf32>
    %197 = vector.shape_cast %196 : vector<1x8x128xf32> to vector<8x128xf32>
    %c0_105 = arith.constant 0 : index
    %c0_106 = arith.constant 0 : index
    %c0_107 = arith.constant 0 : index
    %198 = vector.load %arg10[%c0_105, %c0_106, %c0_107] : memref<2x8x128xf32, #tpu.memory_space<vmem>>, vector<1x8x128xf32>
    %199 = vector.shape_cast %198 : vector<1x8x128xf32> to vector<8x128xf32>
    %200 = arith.truncf %197 : vector<8x128xf32> to vector<8x128xbf16>
    %201 = tpu.concatenate %195, %200 in 1 : vector<8x128xbf16>, vector<8x128xbf16> -> vector<8x256xbf16>
    %c0_108 = arith.constant 0 : index
    %c0_109 = arith.constant 0 : index
    %202 = vector.load %arg2[%c0_108, %c0_109] : memref<256x512xbf16, #tpu.memory_space<vmem>>, vector<256x512xbf16>
    %cst_110 = arith.constant dense<0.000000e+00> : vector<8x512xf32>
    %203 = tpu.matmul %201, %202, %cst_110 {dimension_numbers = #tpu.dot_dimension_numbers<[1], [0], [0], [1], [0, 0, 1, 1], [], []>} : vector<8x256xbf16>, vector<256x512xbf16>, vector<8x512xf32> -> vector<8x512xf32>
    %c0_111 = arith.constant 0 : index
    %c0_112 = arith.constant 0 : index
    %204 = vector.load %arg3[%c0_111, %c0_112] : memref<1x512xf32, #tpu.memory_space<vmem>>, vector<1x512xf32>
    %205 = vector.broadcast %204 : vector<1x512xf32> to vector<8x512xf32>
    %206 = arith.addf %203, %205 : vector<8x512xf32>
    %207 = vector.extract_strided_slice %206 {offsets = [0, 0], sizes = [8, 128], strides = [1, 1]} : vector<8x512xf32> to vector<8x128xf32>
    %208 = arith.negf %207 : vector<8x128xf32>
    %209 = math.exp %208 : vector<8x128xf32>
    %cst_113 = arith.constant 1.000000e+00 : f32
    %210 = vector.broadcast %cst_113 : f32 to vector<8x128xf32>
    %211 = arith.addf %210, %209 : vector<8x128xf32>
    %212 = arith.divf %210, %211 : vector<8x128xf32>
    %213 = vector.extract_strided_slice %206 {offsets = [0, 128], sizes = [8, 128], strides = [1, 1]} : vector<8x512xf32> to vector<8x128xf32>
    %214 = arith.negf %213 : vector<8x128xf32>
    %215 = math.exp %214 : vector<8x128xf32>
    %cst_114 = arith.constant 1.000000e+00 : f32
    %216 = vector.broadcast %cst_114 : f32 to vector<8x128xf32>
    %217 = arith.addf %216, %215 : vector<8x128xf32>
    %218 = arith.divf %216, %217 : vector<8x128xf32>
    %219 = vector.extract_strided_slice %206 {offsets = [0, 256], sizes = [8, 128], strides = [1, 1]} : vector<8x512xf32> to vector<8x128xf32>
    %220 = math.tanh %219 : vector<8x128xf32>
    %221 = vector.extract_strided_slice %206 {offsets = [0, 384], sizes = [8, 128], strides = [1, 1]} : vector<8x512xf32> to vector<8x128xf32>
    %222 = arith.negf %221 : vector<8x128xf32>
    %223 = math.exp %222 : vector<8x128xf32>
    %cst_115 = arith.constant 1.000000e+00 : f32
    %224 = vector.broadcast %cst_115 : f32 to vector<8x128xf32>
    %225 = arith.addf %224, %223 : vector<8x128xf32>
    %226 = arith.divf %224, %225 : vector<8x128xf32>
    %227 = arith.mulf %218, %199 : vector<8x128xf32>
    %228 = arith.mulf %212, %220 : vector<8x128xf32>
    %229 = arith.addf %227, %228 : vector<8x128xf32>
    %230 = math.tanh %229 : vector<8x128xf32>
    %231 = arith.mulf %226, %230 : vector<8x128xf32>
    %c0_116 = arith.constant 0 : index
    %c0_117 = arith.constant 0 : index
    %c0_118 = arith.constant 0 : index
    %232 = vector.load %arg9[%c0_116, %c0_117, %c0_118] : memref<2x8x128xf32, #tpu.memory_space<vmem>>, vector<1x8x128xf32>
    %233 = vector.shape_cast %232 : vector<1x8x128xf32> to vector<8x128xf32>
    %234 = vector.shape_cast %231 : vector<8x128xf32> to vector<1x8x128xf32>
    tpu.vector_store %arg9[%c0_116, %c0_117, %c0_118], %234 {strides = array<i32>} : memref<2x8x128xf32, #tpu.memory_space<vmem>>, vector<1x8x128xf32>,
    %c0_119 = arith.constant 0 : index
    %c0_120 = arith.constant 0 : index
    %c0_121 = arith.constant 0 : index
    %235 = vector.load %arg10[%c0_119, %c0_120, %c0_121] : memref<2x8x128xf32, #tpu.memory_space<vmem>>, vector<1x8x128xf32>
    %236 = vector.shape_cast %235 : vector<1x8x128xf32> to vector<8x128xf32>
    %237 = vector.shape_cast %229 : vector<8x128xf32> to vector<1x8x128xf32>
    tpu.vector_store %arg10[%c0_119, %c0_120, %c0_121], %237 {strides = array<i32>} : memref<2x8x128xf32, #tpu.memory_space<vmem>>, vector<1x8x128xf32>,
    %238 = arith.truncf %231 : vector<8x128xf32> to vector<8x128xbf16>
    %c1_122 = arith.constant 1 : index
    %c0_123 = arith.constant 0 : index
    %c0_124 = arith.constant 0 : index
    %239 = vector.load %arg9[%c1_122, %c0_123, %c0_124] : memref<2x8x128xf32, #tpu.memory_space<vmem>>, vector<1x8x128xf32>
    %240 = vector.shape_cast %239 : vector<1x8x128xf32> to vector<8x128xf32>
    %c1_125 = arith.constant 1 : index
    %c0_126 = arith.constant 0 : index
    %c0_127 = arith.constant 0 : index
    %241 = vector.load %arg10[%c1_125, %c0_126, %c0_127] : memref<2x8x128xf32, #tpu.memory_space<vmem>>, vector<1x8x128xf32>
    %242 = vector.shape_cast %241 : vector<1x8x128xf32> to vector<8x128xf32>
    %243 = arith.truncf %240 : vector<8x128xf32> to vector<8x128xbf16>
    %244 = tpu.concatenate %238, %243 in 1 : vector<8x128xbf16>, vector<8x128xbf16> -> vector<8x256xbf16>
    %c0_128 = arith.constant 0 : index
    %c0_129 = arith.constant 0 : index
    %245 = vector.load %arg4[%c0_128, %c0_129] : memref<256x512xbf16, #tpu.memory_space<vmem>>, vector<256x512xbf16>
    %cst_130 = arith.constant dense<0.000000e+00> : vector<8x512xf32>
    %246 = tpu.matmul %244, %245, %cst_130 {dimension_numbers = #tpu.dot_dimension_numbers<[1], [0], [0], [1], [0, 0, 1, 1], [], []>} : vector<8x256xbf16>, vector<256x512xbf16>, vector<8x512xf32> -> vector<8x512xf32>
    %c0_131 = arith.constant 0 : index
    %c0_132 = arith.constant 0 : index
    %247 = vector.load %arg5[%c0_131, %c0_132] : memref<1x512xf32, #tpu.memory_space<vmem>>, vector<1x512xf32>
    %248 = vector.broadcast %247 : vector<1x512xf32> to vector<8x512xf32>
    %249 = arith.addf %246, %248 : vector<8x512xf32>
    %250 = vector.extract_strided_slice %249 {offsets = [0, 0], sizes = [8, 128], strides = [1, 1]} : vector<8x512xf32> to vector<8x128xf32>
    %251 = arith.negf %250 : vector<8x128xf32>
    %252 = math.exp %251 : vector<8x128xf32>
    %cst_133 = arith.constant 1.000000e+00 : f32
    %253 = vector.broadcast %cst_133 : f32 to vector<8x128xf32>
    %254 = arith.addf %253, %252 : vector<8x128xf32>
    %255 = arith.divf %253, %254 : vector<8x128xf32>
    %256 = vector.extract_strided_slice %249 {offsets = [0, 128], sizes = [8, 128], strides = [1, 1]} : vector<8x512xf32> to vector<8x128xf32>
    %257 = arith.negf %256 : vector<8x128xf32>
    %258 = math.exp %257 : vector<8x128xf32>
    %cst_134 = arith.constant 1.000000e+00 : f32
    %259 = vector.broadcast %cst_134 : f32 to vector<8x128xf32>
    %260 = arith.addf %259, %258 : vector<8x128xf32>
    %261 = arith.divf %259, %260 : vector<8x128xf32>
    %262 = vector.extract_strided_slice %249 {offsets = [0, 256], sizes = [8, 128], strides = [1, 1]} : vector<8x512xf32> to vector<8x128xf32>
    %263 = math.tanh %262 : vector<8x128xf32>
    %264 = vector.extract_strided_slice %249 {offsets = [0, 384], sizes = [8, 128], strides = [1, 1]} : vector<8x512xf32> to vector<8x128xf32>
    %265 = arith.negf %264 : vector<8x128xf32>
    %266 = math.exp %265 : vector<8x128xf32>
    %cst_135 = arith.constant 1.000000e+00 : f32
    %267 = vector.broadcast %cst_135 : f32 to vector<8x128xf32>
    %268 = arith.addf %267, %266 : vector<8x128xf32>
    %269 = arith.divf %267, %268 : vector<8x128xf32>
    %270 = arith.mulf %261, %242 : vector<8x128xf32>
    %271 = arith.mulf %255, %263 : vector<8x128xf32>
    %272 = arith.addf %270, %271 : vector<8x128xf32>
    %273 = math.tanh %272 : vector<8x128xf32>
    %274 = arith.mulf %269, %273 : vector<8x128xf32>
    %c1_136 = arith.constant 1 : index
    %c0_137 = arith.constant 0 : index
    %c0_138 = arith.constant 0 : index
    %275 = vector.load %arg9[%c1_136, %c0_137, %c0_138] : memref<2x8x128xf32, #tpu.memory_space<vmem>>, vector<1x8x128xf32>
    %276 = vector.shape_cast %275 : vector<1x8x128xf32> to vector<8x128xf32>
    %277 = vector.shape_cast %274 : vector<8x128xf32> to vector<1x8x128xf32>
    tpu.vector_store %arg9[%c1_136, %c0_137, %c0_138], %277 {strides = array<i32>} : memref<2x8x128xf32, #tpu.memory_space<vmem>>, vector<1x8x128xf32>,
    %c1_139 = arith.constant 1 : index
    %c0_140 = arith.constant 0 : index
    %c0_141 = arith.constant 0 : index
    %278 = vector.load %arg10[%c1_139, %c0_140, %c0_141] : memref<2x8x128xf32, #tpu.memory_space<vmem>>, vector<1x8x128xf32>
    %279 = vector.shape_cast %278 : vector<1x8x128xf32> to vector<8x128xf32>
    %280 = vector.shape_cast %272 : vector<8x128xf32> to vector<1x8x128xf32>
    tpu.vector_store %arg10[%c1_139, %c0_140, %c0_141], %280 {strides = array<i32>} : memref<2x8x128xf32, #tpu.memory_space<vmem>>, vector<1x8x128xf32>,
    %281 = arith.truncf %274 : vector<8x128xf32> to vector<8x128xbf16>
    %c0_142 = arith.constant 0 : index
    %c0_143 = arith.constant 0 : index
    %282 = vector.load %arg11[%c0_142, %c0_143] : memref<8x128xf32, #tpu.memory_space<vmem>>, vector<8x128xf32>
    %c2_144 = arith.constant 2 : index
    %c0_145 = arith.constant 0 : index
    %c0_146 = arith.constant 0 : index
    %283 = vector.load %arg6[%c2_144, %c0_145, %c0_146] : memref<8x128x128xbf16, #tpu.memory_space<vmem>>, vector<1x128x128xbf16>
    %284 = vector.shape_cast %283 : vector<1x128x128xbf16> to vector<128x128xbf16>
    %cst_147 = arith.constant dense<0.000000e+00> : vector<8x128xf32>
    %285 = tpu.matmul %281, %284, %cst_147 {dimension_numbers = #tpu.dot_dimension_numbers<[1], [0], [0], [1], [0, 0, 1, 1], [], []>} : vector<8x128xbf16>, vector<128x128xbf16>, vector<8x128xf32> -> vector<8x128xf32>
    %286 = arith.addf %282, %285 : vector<8x128xf32>
    %c0_148 = arith.constant 0 : index
    %c0_149 = arith.constant 0 : index
    %287 = vector.load %arg11[%c0_148, %c0_149] : memref<8x128xf32, #tpu.memory_space<vmem>>, vector<8x128xf32>
    tpu.vector_store %arg11[%c0_148, %c0_149], %286 {strides = array<i32>} : memref<8x128xf32, #tpu.memory_space<vmem>>, vector<8x128xf32>,
    %c0_150 = arith.constant 0 : index
    %c3 = arith.constant 3 : index
    %c0_151 = arith.constant 0 : index
    %288 = vector.load %arg1[%c0_150, %c3, %c0_151] : memref<8x8x128xf32, #tpu.memory_space<vmem>>, vector<8x1x128xf32>
    %289 = vector.shape_cast %288 : vector<8x1x128xf32> to vector<8x128xf32>
    %290 = arith.truncf %289 : vector<8x128xf32> to vector<8x128xbf16>
    %c0_152 = arith.constant 0 : index
    %c0_153 = arith.constant 0 : index
    %c0_154 = arith.constant 0 : index
    %291 = vector.load %arg9[%c0_152, %c0_153, %c0_154] : memref<2x8x128xf32, #tpu.memory_space<vmem>>, vector<1x8x128xf32>
    %292 = vector.shape_cast %291 : vector<1x8x128xf32> to vector<8x128xf32>
    %c0_155 = arith.constant 0 : index
    %c0_156 = arith.constant 0 : index
    %c0_157 = arith.constant 0 : index
    %293 = vector.load %arg10[%c0_155, %c0_156, %c0_157] : memref<2x8x128xf32, #tpu.memory_space<vmem>>, vector<1x8x128xf32>
    %294 = vector.shape_cast %293 : vector<1x8x128xf32> to vector<8x128xf32>
    %295 = arith.truncf %292 : vector<8x128xf32> to vector<8x128xbf16>
    %296 = tpu.concatenate %290, %295 in 1 : vector<8x128xbf16>, vector<8x128xbf16> -> vector<8x256xbf16>
    %c0_158 = arith.constant 0 : index
    %c0_159 = arith.constant 0 : index
    %297 = vector.load %arg2[%c0_158, %c0_159] : memref<256x512xbf16, #tpu.memory_space<vmem>>, vector<256x512xbf16>
    %cst_160 = arith.constant dense<0.000000e+00> : vector<8x512xf32>
    %298 = tpu.matmul %296, %297, %cst_160 {dimension_numbers = #tpu.dot_dimension_numbers<[1], [0], [0], [1], [0, 0, 1, 1], [], []>} : vector<8x256xbf16>, vector<256x512xbf16>, vector<8x512xf32> -> vector<8x512xf32>
    %c0_161 = arith.constant 0 : index
    %c0_162 = arith.constant 0 : index
    %299 = vector.load %arg3[%c0_161, %c0_162] : memref<1x512xf32, #tpu.memory_space<vmem>>, vector<1x512xf32>
    %300 = vector.broadcast %299 : vector<1x512xf32> to vector<8x512xf32>
    %301 = arith.addf %298, %300 : vector<8x512xf32>
    %302 = vector.extract_strided_slice %301 {offsets = [0, 0], sizes = [8, 128], strides = [1, 1]} : vector<8x512xf32> to vector<8x128xf32>
    %303 = arith.negf %302 : vector<8x128xf32>
    %304 = math.exp %303 : vector<8x128xf32>
    %cst_163 = arith.constant 1.000000e+00 : f32
    %305 = vector.broadcast %cst_163 : f32 to vector<8x128xf32>
    %306 = arith.addf %305, %304 : vector<8x128xf32>
    %307 = arith.divf %305, %306 : vector<8x128xf32>
    %308 = vector.extract_strided_slice %301 {offsets = [0, 128], sizes = [8, 128], strides = [1, 1]} : vector<8x512xf32> to vector<8x128xf32>
    %309 = arith.negf %308 : vector<8x128xf32>
    %310 = math.exp %309 : vector<8x128xf32>
    %cst_164 = arith.constant 1.000000e+00 : f32
    %311 = vector.broadcast %cst_164 : f32 to vector<8x128xf32>
    %312 = arith.addf %311, %310 : vector<8x128xf32>
    %313 = arith.divf %311, %312 : vector<8x128xf32>
    %314 = vector.extract_strided_slice %301 {offsets = [0, 256], sizes = [8, 128], strides = [1, 1]} : vector<8x512xf32> to vector<8x128xf32>
    %315 = math.tanh %314 : vector<8x128xf32>
    %316 = vector.extract_strided_slice %301 {offsets = [0, 384], sizes = [8, 128], strides = [1, 1]} : vector<8x512xf32> to vector<8x128xf32>
    %317 = arith.negf %316 : vector<8x128xf32>
    %318 = math.exp %317 : vector<8x128xf32>
    %cst_165 = arith.constant 1.000000e+00 : f32
    %319 = vector.broadcast %cst_165 : f32 to vector<8x128xf32>
    %320 = arith.addf %319, %318 : vector<8x128xf32>
    %321 = arith.divf %319, %320 : vector<8x128xf32>
    %322 = arith.mulf %313, %294 : vector<8x128xf32>
    %323 = arith.mulf %307, %315 : vector<8x128xf32>
    %324 = arith.addf %322, %323 : vector<8x128xf32>
    %325 = math.tanh %324 : vector<8x128xf32>
    %326 = arith.mulf %321, %325 : vector<8x128xf32>
    %c0_166 = arith.constant 0 : index
    %c0_167 = arith.constant 0 : index
    %c0_168 = arith.constant 0 : index
    %327 = vector.load %arg9[%c0_166, %c0_167, %c0_168] : memref<2x8x128xf32, #tpu.memory_space<vmem>>, vector<1x8x128xf32>
    %328 = vector.shape_cast %327 : vector<1x8x128xf32> to vector<8x128xf32>
    %329 = vector.shape_cast %326 : vector<8x128xf32> to vector<1x8x128xf32>
    tpu.vector_store %arg9[%c0_166, %c0_167, %c0_168], %329 {strides = array<i32>} : memref<2x8x128xf32, #tpu.memory_space<vmem>>, vector<1x8x128xf32>,
    %c0_169 = arith.constant 0 : index
    %c0_170 = arith.constant 0 : index
    %c0_171 = arith.constant 0 : index
    %330 = vector.load %arg10[%c0_169, %c0_170, %c0_171] : memref<2x8x128xf32, #tpu.memory_space<vmem>>, vector<1x8x128xf32>
    %331 = vector.shape_cast %330 : vector<1x8x128xf32> to vector<8x128xf32>
    %332 = vector.shape_cast %324 : vector<8x128xf32> to vector<1x8x128xf32>
    tpu.vector_store %arg10[%c0_169, %c0_170, %c0_171], %332 {strides = array<i32>} : memref<2x8x128xf32, #tpu.memory_space<vmem>>, vector<1x8x128xf32>,
    %333 = arith.truncf %326 : vector<8x128xf32> to vector<8x128xbf16>
    %c1_172 = arith.constant 1 : index
    %c0_173 = arith.constant 0 : index
    %c0_174 = arith.constant 0 : index
    %334 = vector.load %arg9[%c1_172, %c0_173, %c0_174] : memref<2x8x128xf32, #tpu.memory_space<vmem>>, vector<1x8x128xf32>
    %335 = vector.shape_cast %334 : vector<1x8x128xf32> to vector<8x128xf32>
    %c1_175 = arith.constant 1 : index
    %c0_176 = arith.constant 0 : index
    %c0_177 = arith.constant 0 : index
    %336 = vector.load %arg10[%c1_175, %c0_176, %c0_177] : memref<2x8x128xf32, #tpu.memory_space<vmem>>, vector<1x8x128xf32>
    %337 = vector.shape_cast %336 : vector<1x8x128xf32> to vector<8x128xf32>
    %338 = arith.truncf %335 : vector<8x128xf32> to vector<8x128xbf16>
    %339 = tpu.concatenate %333, %338 in 1 : vector<8x128xbf16>, vector<8x128xbf16> -> vector<8x256xbf16>
    %c0_178 = arith.constant 0 : index
    %c0_179 = arith.constant 0 : index
    %340 = vector.load %arg4[%c0_178, %c0_179] : memref<256x512xbf16, #tpu.memory_space<vmem>>, vector<256x512xbf16>
    %cst_180 = arith.constant dense<0.000000e+00> : vector<8x512xf32>
    %341 = tpu.matmul %339, %340, %cst_180 {dimension_numbers = #tpu.dot_dimension_numbers<[1], [0], [0], [1], [0, 0, 1, 1], [], []>} : vector<8x256xbf16>, vector<256x512xbf16>, vector<8x512xf32> -> vector<8x512xf32>
    %c0_181 = arith.constant 0 : index
    %c0_182 = arith.constant 0 : index
    %342 = vector.load %arg5[%c0_181, %c0_182] : memref<1x512xf32, #tpu.memory_space<vmem>>, vector<1x512xf32>
    %343 = vector.broadcast %342 : vector<1x512xf32> to vector<8x512xf32>
    %344 = arith.addf %341, %343 : vector<8x512xf32>
    %345 = vector.extract_strided_slice %344 {offsets = [0, 0], sizes = [8, 128], strides = [1, 1]} : vector<8x512xf32> to vector<8x128xf32>
    %346 = arith.negf %345 : vector<8x128xf32>
    %347 = math.exp %346 : vector<8x128xf32>
    %cst_183 = arith.constant 1.000000e+00 : f32
    %348 = vector.broadcast %cst_183 : f32 to vector<8x128xf32>
    %349 = arith.addf %348, %347 : vector<8x128xf32>
    %350 = arith.divf %348, %349 : vector<8x128xf32>
    %351 = vector.extract_strided_slice %344 {offsets = [0, 128], sizes = [8, 128], strides = [1, 1]} : vector<8x512xf32> to vector<8x128xf32>
    %352 = arith.negf %351 : vector<8x128xf32>
    %353 = math.exp %352 : vector<8x128xf32>
    %cst_184 = arith.constant 1.000000e+00 : f32
    %354 = vector.broadcast %cst_184 : f32 to vector<8x128xf32>
    %355 = arith.addf %354, %353 : vector<8x128xf32>
    %356 = arith.divf %354, %355 : vector<8x128xf32>
    %357 = vector.extract_strided_slice %344 {offsets = [0, 256], sizes = [8, 128], strides = [1, 1]} : vector<8x512xf32> to vector<8x128xf32>
    %358 = math.tanh %357 : vector<8x128xf32>
    %359 = vector.extract_strided_slice %344 {offsets = [0, 384], sizes = [8, 128], strides = [1, 1]} : vector<8x512xf32> to vector<8x128xf32>
    %360 = arith.negf %359 : vector<8x128xf32>
    %361 = math.exp %360 : vector<8x128xf32>
    %cst_185 = arith.constant 1.000000e+00 : f32
    %362 = vector.broadcast %cst_185 : f32 to vector<8x128xf32>
    %363 = arith.addf %362, %361 : vector<8x128xf32>
    %364 = arith.divf %362, %363 : vector<8x128xf32>
    %365 = arith.mulf %356, %337 : vector<8x128xf32>
    %366 = arith.mulf %350, %358 : vector<8x128xf32>
    %367 = arith.addf %365, %366 : vector<8x128xf32>
    %368 = math.tanh %367 : vector<8x128xf32>
    %369 = arith.mulf %364, %368 : vector<8x128xf32>
    %c1_186 = arith.constant 1 : index
    %c0_187 = arith.constant 0 : index
    %c0_188 = arith.constant 0 : index
    %370 = vector.load %arg9[%c1_186, %c0_187, %c0_188] : memref<2x8x128xf32, #tpu.memory_space<vmem>>, vector<1x8x128xf32>
    %371 = vector.shape_cast %370 : vector<1x8x128xf32> to vector<8x128xf32>
    %372 = vector.shape_cast %369 : vector<8x128xf32> to vector<1x8x128xf32>
    tpu.vector_store %arg9[%c1_186, %c0_187, %c0_188], %372 {strides = array<i32>} : memref<2x8x128xf32, #tpu.memory_space<vmem>>, vector<1x8x128xf32>,
    %c1_189 = arith.constant 1 : index
    %c0_190 = arith.constant 0 : index
    %c0_191 = arith.constant 0 : index
    %373 = vector.load %arg10[%c1_189, %c0_190, %c0_191] : memref<2x8x128xf32, #tpu.memory_space<vmem>>, vector<1x8x128xf32>
    %374 = vector.shape_cast %373 : vector<1x8x128xf32> to vector<8x128xf32>
    %375 = vector.shape_cast %367 : vector<8x128xf32> to vector<1x8x128xf32>
    tpu.vector_store %arg10[%c1_189, %c0_190, %c0_191], %375 {strides = array<i32>} : memref<2x8x128xf32, #tpu.memory_space<vmem>>, vector<1x8x128xf32>,
    %376 = arith.truncf %369 : vector<8x128xf32> to vector<8x128xbf16>
    %c0_192 = arith.constant 0 : index
    %c0_193 = arith.constant 0 : index
    %377 = vector.load %arg11[%c0_192, %c0_193] : memref<8x128xf32, #tpu.memory_space<vmem>>, vector<8x128xf32>
    %c3_194 = arith.constant 3 : index
    %c0_195 = arith.constant 0 : index
    %c0_196 = arith.constant 0 : index
    %378 = vector.load %arg6[%c3_194, %c0_195, %c0_196] : memref<8x128x128xbf16, #tpu.memory_space<vmem>>, vector<1x128x128xbf16>
    %379 = vector.shape_cast %378 : vector<1x128x128xbf16> to vector<128x128xbf16>
    %cst_197 = arith.constant dense<0.000000e+00> : vector<8x128xf32>
    %380 = tpu.matmul %376, %379, %cst_197 {dimension_numbers = #tpu.dot_dimension_numbers<[1], [0], [0], [1], [0, 0, 1, 1], [], []>} : vector<8x128xbf16>, vector<128x128xbf16>, vector<8x128xf32> -> vector<8x128xf32>
    %381 = arith.addf %377, %380 : vector<8x128xf32>
    %c0_198 = arith.constant 0 : index
    %c0_199 = arith.constant 0 : index
    %382 = vector.load %arg11[%c0_198, %c0_199] : memref<8x128xf32, #tpu.memory_space<vmem>>, vector<8x128xf32>
    tpu.vector_store %arg11[%c0_198, %c0_199], %381 {strides = array<i32>} : memref<8x128xf32, #tpu.memory_space<vmem>>, vector<8x128xf32>,
    %c0_200 = arith.constant 0 : index
    %c4 = arith.constant 4 : index
    %c0_201 = arith.constant 0 : index
    %383 = vector.load %arg1[%c0_200, %c4, %c0_201] : memref<8x8x128xf32, #tpu.memory_space<vmem>>, vector<8x1x128xf32>
    %384 = vector.shape_cast %383 : vector<8x1x128xf32> to vector<8x128xf32>
    %385 = arith.truncf %384 : vector<8x128xf32> to vector<8x128xbf16>
    %c0_202 = arith.constant 0 : index
    %c0_203 = arith.constant 0 : index
    %c0_204 = arith.constant 0 : index
    %386 = vector.load %arg9[%c0_202, %c0_203, %c0_204] : memref<2x8x128xf32, #tpu.memory_space<vmem>>, vector<1x8x128xf32>
    %387 = vector.shape_cast %386 : vector<1x8x128xf32> to vector<8x128xf32>
    %c0_205 = arith.constant 0 : index
    %c0_206 = arith.constant 0 : index
    %c0_207 = arith.constant 0 : index
    %388 = vector.load %arg10[%c0_205, %c0_206, %c0_207] : memref<2x8x128xf32, #tpu.memory_space<vmem>>, vector<1x8x128xf32>
    %389 = vector.shape_cast %388 : vector<1x8x128xf32> to vector<8x128xf32>
    %390 = arith.truncf %387 : vector<8x128xf32> to vector<8x128xbf16>
    %391 = tpu.concatenate %385, %390 in 1 : vector<8x128xbf16>, vector<8x128xbf16> -> vector<8x256xbf16>
    %c0_208 = arith.constant 0 : index
    %c0_209 = arith.constant 0 : index
    %392 = vector.load %arg2[%c0_208, %c0_209] : memref<256x512xbf16, #tpu.memory_space<vmem>>, vector<256x512xbf16>
    %cst_210 = arith.constant dense<0.000000e+00> : vector<8x512xf32>
    %393 = tpu.matmul %391, %392, %cst_210 {dimension_numbers = #tpu.dot_dimension_numbers<[1], [0], [0], [1], [0, 0, 1, 1], [], []>} : vector<8x256xbf16>, vector<256x512xbf16>, vector<8x512xf32> -> vector<8x512xf32>
    %c0_211 = arith.constant 0 : index
    %c0_212 = arith.constant 0 : index
    %394 = vector.load %arg3[%c0_211, %c0_212] : memref<1x512xf32, #tpu.memory_space<vmem>>, vector<1x512xf32>
    %395 = vector.broadcast %394 : vector<1x512xf32> to vector<8x512xf32>
    %396 = arith.addf %393, %395 : vector<8x512xf32>
    %397 = vector.extract_strided_slice %396 {offsets = [0, 0], sizes = [8, 128], strides = [1, 1]} : vector<8x512xf32> to vector<8x128xf32>
    %398 = arith.negf %397 : vector<8x128xf32>
    %399 = math.exp %398 : vector<8x128xf32>
    %cst_213 = arith.constant 1.000000e+00 : f32
    %400 = vector.broadcast %cst_213 : f32 to vector<8x128xf32>
    %401 = arith.addf %400, %399 : vector<8x128xf32>
    %402 = arith.divf %400, %401 : vector<8x128xf32>
    %403 = vector.extract_strided_slice %396 {offsets = [0, 128], sizes = [8, 128], strides = [1, 1]} : vector<8x512xf32> to vector<8x128xf32>
    %404 = arith.negf %403 : vector<8x128xf32>
    %405 = math.exp %404 : vector<8x128xf32>
    %cst_214 = arith.constant 1.000000e+00 : f32
    %406 = vector.broadcast %cst_214 : f32 to vector<8x128xf32>
    %407 = arith.addf %406, %405 : vector<8x128xf32>
    %408 = arith.divf %406, %407 : vector<8x128xf32>
    %409 = vector.extract_strided_slice %396 {offsets = [0, 256], sizes = [8, 128], strides = [1, 1]} : vector<8x512xf32> to vector<8x128xf32>
    %410 = math.tanh %409 : vector<8x128xf32>
    %411 = vector.extract_strided_slice %396 {offsets = [0, 384], sizes = [8, 128], strides = [1, 1]} : vector<8x512xf32> to vector<8x128xf32>
    %412 = arith.negf %411 : vector<8x128xf32>
    %413 = math.exp %412 : vector<8x128xf32>
    %cst_215 = arith.constant 1.000000e+00 : f32
    %414 = vector.broadcast %cst_215 : f32 to vector<8x128xf32>
    %415 = arith.addf %414, %413 : vector<8x128xf32>
    %416 = arith.divf %414, %415 : vector<8x128xf32>
    %417 = arith.mulf %408, %389 : vector<8x128xf32>
    %418 = arith.mulf %402, %410 : vector<8x128xf32>
    %419 = arith.addf %417, %418 : vector<8x128xf32>
    %420 = math.tanh %419 : vector<8x128xf32>
    %421 = arith.mulf %416, %420 : vector<8x128xf32>
    %c0_216 = arith.constant 0 : index
    %c0_217 = arith.constant 0 : index
    %c0_218 = arith.constant 0 : index
    %422 = vector.load %arg9[%c0_216, %c0_217, %c0_218] : memref<2x8x128xf32, #tpu.memory_space<vmem>>, vector<1x8x128xf32>
    %423 = vector.shape_cast %422 : vector<1x8x128xf32> to vector<8x128xf32>
    %424 = vector.shape_cast %421 : vector<8x128xf32> to vector<1x8x128xf32>
    tpu.vector_store %arg9[%c0_216, %c0_217, %c0_218], %424 {strides = array<i32>} : memref<2x8x128xf32, #tpu.memory_space<vmem>>, vector<1x8x128xf32>,
    %c0_219 = arith.constant 0 : index
    %c0_220 = arith.constant 0 : index
    %c0_221 = arith.constant 0 : index
    %425 = vector.load %arg10[%c0_219, %c0_220, %c0_221] : memref<2x8x128xf32, #tpu.memory_space<vmem>>, vector<1x8x128xf32>
    %426 = vector.shape_cast %425 : vector<1x8x128xf32> to vector<8x128xf32>
    %427 = vector.shape_cast %419 : vector<8x128xf32> to vector<1x8x128xf32>
    tpu.vector_store %arg10[%c0_219, %c0_220, %c0_221], %427 {strides = array<i32>} : memref<2x8x128xf32, #tpu.memory_space<vmem>>, vector<1x8x128xf32>,
    %428 = arith.truncf %421 : vector<8x128xf32> to vector<8x128xbf16>
    %c1_222 = arith.constant 1 : index
    %c0_223 = arith.constant 0 : index
    %c0_224 = arith.constant 0 : index
    %429 = vector.load %arg9[%c1_222, %c0_223, %c0_224] : memref<2x8x128xf32, #tpu.memory_space<vmem>>, vector<1x8x128xf32>
    %430 = vector.shape_cast %429 : vector<1x8x128xf32> to vector<8x128xf32>
    %c1_225 = arith.constant 1 : index
    %c0_226 = arith.constant 0 : index
    %c0_227 = arith.constant 0 : index
    %431 = vector.load %arg10[%c1_225, %c0_226, %c0_227] : memref<2x8x128xf32, #tpu.memory_space<vmem>>, vector<1x8x128xf32>
    %432 = vector.shape_cast %431 : vector<1x8x128xf32> to vector<8x128xf32>
    %433 = arith.truncf %430 : vector<8x128xf32> to vector<8x128xbf16>
    %434 = tpu.concatenate %428, %433 in 1 : vector<8x128xbf16>, vector<8x128xbf16> -> vector<8x256xbf16>
    %c0_228 = arith.constant 0 : index
    %c0_229 = arith.constant 0 : index
    %435 = vector.load %arg4[%c0_228, %c0_229] : memref<256x512xbf16, #tpu.memory_space<vmem>>, vector<256x512xbf16>
    %cst_230 = arith.constant dense<0.000000e+00> : vector<8x512xf32>
    %436 = tpu.matmul %434, %435, %cst_230 {dimension_numbers = #tpu.dot_dimension_numbers<[1], [0], [0], [1], [0, 0, 1, 1], [], []>} : vector<8x256xbf16>, vector<256x512xbf16>, vector<8x512xf32> -> vector<8x512xf32>
    %c0_231 = arith.constant 0 : index
    %c0_232 = arith.constant 0 : index
    %437 = vector.load %arg5[%c0_231, %c0_232] : memref<1x512xf32, #tpu.memory_space<vmem>>, vector<1x512xf32>
    %438 = vector.broadcast %437 : vector<1x512xf32> to vector<8x512xf32>
    %439 = arith.addf %436, %438 : vector<8x512xf32>
    %440 = vector.extract_strided_slice %439 {offsets = [0, 0], sizes = [8, 128], strides = [1, 1]} : vector<8x512xf32> to vector<8x128xf32>
    %441 = arith.negf %440 : vector<8x128xf32>
    %442 = math.exp %441 : vector<8x128xf32>
    %cst_233 = arith.constant 1.000000e+00 : f32
    %443 = vector.broadcast %cst_233 : f32 to vector<8x128xf32>
    %444 = arith.addf %443, %442 : vector<8x128xf32>
    %445 = arith.divf %443, %444 : vector<8x128xf32>
    %446 = vector.extract_strided_slice %439 {offsets = [0, 128], sizes = [8, 128], strides = [1, 1]} : vector<8x512xf32> to vector<8x128xf32>
    %447 = arith.negf %446 : vector<8x128xf32>
    %448 = math.exp %447 : vector<8x128xf32>
    %cst_234 = arith.constant 1.000000e+00 : f32
    %449 = vector.broadcast %cst_234 : f32 to vector<8x128xf32>
    %450 = arith.addf %449, %448 : vector<8x128xf32>
    %451 = arith.divf %449, %450 : vector<8x128xf32>
    %452 = vector.extract_strided_slice %439 {offsets = [0, 256], sizes = [8, 128], strides = [1, 1]} : vector<8x512xf32> to vector<8x128xf32>
    %453 = math.tanh %452 : vector<8x128xf32>
    %454 = vector.extract_strided_slice %439 {offsets = [0, 384], sizes = [8, 128], strides = [1, 1]} : vector<8x512xf32> to vector<8x128xf32>
    %455 = arith.negf %454 : vector<8x128xf32>
    %456 = math.exp %455 : vector<8x128xf32>
    %cst_235 = arith.constant 1.000000e+00 : f32
    %457 = vector.broadcast %cst_235 : f32 to vector<8x128xf32>
    %458 = arith.addf %457, %456 : vector<8x128xf32>
    %459 = arith.divf %457, %458 : vector<8x128xf32>
    %460 = arith.mulf %451, %432 : vector<8x128xf32>
    %461 = arith.mulf %445, %453 : vector<8x128xf32>
    %462 = arith.addf %460, %461 : vector<8x128xf32>
    %463 = math.tanh %462 : vector<8x128xf32>
    %464 = arith.mulf %459, %463 : vector<8x128xf32>
    %c1_236 = arith.constant 1 : index
    %c0_237 = arith.constant 0 : index
    %c0_238 = arith.constant 0 : index
    %465 = vector.load %arg9[%c1_236, %c0_237, %c0_238] : memref<2x8x128xf32, #tpu.memory_space<vmem>>, vector<1x8x128xf32>
    %466 = vector.shape_cast %465 : vector<1x8x128xf32> to vector<8x128xf32>
    %467 = vector.shape_cast %464 : vector<8x128xf32> to vector<1x8x128xf32>
    tpu.vector_store %arg9[%c1_236, %c0_237, %c0_238], %467 {strides = array<i32>} : memref<2x8x128xf32, #tpu.memory_space<vmem>>, vector<1x8x128xf32>,
    %c1_239 = arith.constant 1 : index
    %c0_240 = arith.constant 0 : index
    %c0_241 = arith.constant 0 : index
    %468 = vector.load %arg10[%c1_239, %c0_240, %c0_241] : memref<2x8x128xf32, #tpu.memory_space<vmem>>, vector<1x8x128xf32>
    %469 = vector.shape_cast %468 : vector<1x8x128xf32> to vector<8x128xf32>
    %470 = vector.shape_cast %462 : vector<8x128xf32> to vector<1x8x128xf32>
    tpu.vector_store %arg10[%c1_239, %c0_240, %c0_241], %470 {strides = array<i32>} : memref<2x8x128xf32, #tpu.memory_space<vmem>>, vector<1x8x128xf32>,
    %471 = arith.truncf %464 : vector<8x128xf32> to vector<8x128xbf16>
    %c0_242 = arith.constant 0 : index
    %c0_243 = arith.constant 0 : index
    %472 = vector.load %arg11[%c0_242, %c0_243] : memref<8x128xf32, #tpu.memory_space<vmem>>, vector<8x128xf32>
    %c4_244 = arith.constant 4 : index
    %c0_245 = arith.constant 0 : index
    %c0_246 = arith.constant 0 : index
    %473 = vector.load %arg6[%c4_244, %c0_245, %c0_246] : memref<8x128x128xbf16, #tpu.memory_space<vmem>>, vector<1x128x128xbf16>
    %474 = vector.shape_cast %473 : vector<1x128x128xbf16> to vector<128x128xbf16>
    %cst_247 = arith.constant dense<0.000000e+00> : vector<8x128xf32>
    %475 = tpu.matmul %471, %474, %cst_247 {dimension_numbers = #tpu.dot_dimension_numbers<[1], [0], [0], [1], [0, 0, 1, 1], [], []>} : vector<8x128xbf16>, vector<128x128xbf16>, vector<8x128xf32> -> vector<8x128xf32>
    %476 = arith.addf %472, %475 : vector<8x128xf32>
    %c0_248 = arith.constant 0 : index
    %c0_249 = arith.constant 0 : index
    %477 = vector.load %arg11[%c0_248, %c0_249] : memref<8x128xf32, #tpu.memory_space<vmem>>, vector<8x128xf32>
    tpu.vector_store %arg11[%c0_248, %c0_249], %476 {strides = array<i32>} : memref<8x128xf32, #tpu.memory_space<vmem>>, vector<8x128xf32>,
    %c0_250 = arith.constant 0 : index
    %c5 = arith.constant 5 : index
    %c0_251 = arith.constant 0 : index
    %478 = vector.load %arg1[%c0_250, %c5, %c0_251] : memref<8x8x128xf32, #tpu.memory_space<vmem>>, vector<8x1x128xf32>
    %479 = vector.shape_cast %478 : vector<8x1x128xf32> to vector<8x128xf32>
    %480 = arith.truncf %479 : vector<8x128xf32> to vector<8x128xbf16>
    %c0_252 = arith.constant 0 : index
    %c0_253 = arith.constant 0 : index
    %c0_254 = arith.constant 0 : index
    %481 = vector.load %arg9[%c0_252, %c0_253, %c0_254] : memref<2x8x128xf32, #tpu.memory_space<vmem>>, vector<1x8x128xf32>
    %482 = vector.shape_cast %481 : vector<1x8x128xf32> to vector<8x128xf32>
    %c0_255 = arith.constant 0 : index
    %c0_256 = arith.constant 0 : index
    %c0_257 = arith.constant 0 : index
    %483 = vector.load %arg10[%c0_255, %c0_256, %c0_257] : memref<2x8x128xf32, #tpu.memory_space<vmem>>, vector<1x8x128xf32>
    %484 = vector.shape_cast %483 : vector<1x8x128xf32> to vector<8x128xf32>
    %485 = arith.truncf %482 : vector<8x128xf32> to vector<8x128xbf16>
    %486 = tpu.concatenate %480, %485 in 1 : vector<8x128xbf16>, vector<8x128xbf16> -> vector<8x256xbf16>
    %c0_258 = arith.constant 0 : index
    %c0_259 = arith.constant 0 : index
    %487 = vector.load %arg2[%c0_258, %c0_259] : memref<256x512xbf16, #tpu.memory_space<vmem>>, vector<256x512xbf16>
    %cst_260 = arith.constant dense<0.000000e+00> : vector<8x512xf32>
    %488 = tpu.matmul %486, %487, %cst_260 {dimension_numbers = #tpu.dot_dimension_numbers<[1], [0], [0], [1], [0, 0, 1, 1], [], []>} : vector<8x256xbf16>, vector<256x512xbf16>, vector<8x512xf32> -> vector<8x512xf32>
    %c0_261 = arith.constant 0 : index
    %c0_262 = arith.constant 0 : index
    %489 = vector.load %arg3[%c0_261, %c0_262] : memref<1x512xf32, #tpu.memory_space<vmem>>, vector<1x512xf32>
    %490 = vector.broadcast %489 : vector<1x512xf32> to vector<8x512xf32>
    %491 = arith.addf %488, %490 : vector<8x512xf32>
    %492 = vector.extract_strided_slice %491 {offsets = [0, 0], sizes = [8, 128], strides = [1, 1]} : vector<8x512xf32> to vector<8x128xf32>
    %493 = arith.negf %492 : vector<8x128xf32>
    %494 = math.exp %493 : vector<8x128xf32>
    %cst_263 = arith.constant 1.000000e+00 : f32
    %495 = vector.broadcast %cst_263 : f32 to vector<8x128xf32>
    %496 = arith.addf %495, %494 : vector<8x128xf32>
    %497 = arith.divf %495, %496 : vector<8x128xf32>
    %498 = vector.extract_strided_slice %491 {offsets = [0, 128], sizes = [8, 128], strides = [1, 1]} : vector<8x512xf32> to vector<8x128xf32>
    %499 = arith.negf %498 : vector<8x128xf32>
    %500 = math.exp %499 : vector<8x128xf32>
    %cst_264 = arith.constant 1.000000e+00 : f32
    %501 = vector.broadcast %cst_264 : f32 to vector<8x128xf32>
    %502 = arith.addf %501, %500 : vector<8x128xf32>
    %503 = arith.divf %501, %502 : vector<8x128xf32>
    %504 = vector.extract_strided_slice %491 {offsets = [0, 256], sizes = [8, 128], strides = [1, 1]} : vector<8x512xf32> to vector<8x128xf32>
    %505 = math.tanh %504 : vector<8x128xf32>
    %506 = vector.extract_strided_slice %491 {offsets = [0, 384], sizes = [8, 128], strides = [1, 1]} : vector<8x512xf32> to vector<8x128xf32>
    %507 = arith.negf %506 : vector<8x128xf32>
    %508 = math.exp %507 : vector<8x128xf32>
    %cst_265 = arith.constant 1.000000e+00 : f32
    %509 = vector.broadcast %cst_265 : f32 to vector<8x128xf32>
    %510 = arith.addf %509, %508 : vector<8x128xf32>
    %511 = arith.divf %509, %510 : vector<8x128xf32>
    %512 = arith.mulf %503, %484 : vector<8x128xf32>
    %513 = arith.mulf %497, %505 : vector<8x128xf32>
    %514 = arith.addf %512, %513 : vector<8x128xf32>
    %515 = math.tanh %514 : vector<8x128xf32>
    %516 = arith.mulf %511, %515 : vector<8x128xf32>
    %c0_266 = arith.constant 0 : index
    %c0_267 = arith.constant 0 : index
    %c0_268 = arith.constant 0 : index
    %517 = vector.load %arg9[%c0_266, %c0_267, %c0_268] : memref<2x8x128xf32, #tpu.memory_space<vmem>>, vector<1x8x128xf32>
    %518 = vector.shape_cast %517 : vector<1x8x128xf32> to vector<8x128xf32>
    %519 = vector.shape_cast %516 : vector<8x128xf32> to vector<1x8x128xf32>
    tpu.vector_store %arg9[%c0_266, %c0_267, %c0_268], %519 {strides = array<i32>} : memref<2x8x128xf32, #tpu.memory_space<vmem>>, vector<1x8x128xf32>,
    %c0_269 = arith.constant 0 : index
    %c0_270 = arith.constant 0 : index
    %c0_271 = arith.constant 0 : index
    %520 = vector.load %arg10[%c0_269, %c0_270, %c0_271] : memref<2x8x128xf32, #tpu.memory_space<vmem>>, vector<1x8x128xf32>
    %521 = vector.shape_cast %520 : vector<1x8x128xf32> to vector<8x128xf32>
    %522 = vector.shape_cast %514 : vector<8x128xf32> to vector<1x8x128xf32>
    tpu.vector_store %arg10[%c0_269, %c0_270, %c0_271], %522 {strides = array<i32>} : memref<2x8x128xf32, #tpu.memory_space<vmem>>, vector<1x8x128xf32>,
    %523 = arith.truncf %516 : vector<8x128xf32> to vector<8x128xbf16>
    %c1_272 = arith.constant 1 : index
    %c0_273 = arith.constant 0 : index
    %c0_274 = arith.constant 0 : index
    %524 = vector.load %arg9[%c1_272, %c0_273, %c0_274] : memref<2x8x128xf32, #tpu.memory_space<vmem>>, vector<1x8x128xf32>
    %525 = vector.shape_cast %524 : vector<1x8x128xf32> to vector<8x128xf32>
    %c1_275 = arith.constant 1 : index
    %c0_276 = arith.constant 0 : index
    %c0_277 = arith.constant 0 : index
    %526 = vector.load %arg10[%c1_275, %c0_276, %c0_277] : memref<2x8x128xf32, #tpu.memory_space<vmem>>, vector<1x8x128xf32>
    %527 = vector.shape_cast %526 : vector<1x8x128xf32> to vector<8x128xf32>
    %528 = arith.truncf %525 : vector<8x128xf32> to vector<8x128xbf16>
    %529 = tpu.concatenate %523, %528 in 1 : vector<8x128xbf16>, vector<8x128xbf16> -> vector<8x256xbf16>
    %c0_278 = arith.constant 0 : index
    %c0_279 = arith.constant 0 : index
    %530 = vector.load %arg4[%c0_278, %c0_279] : memref<256x512xbf16, #tpu.memory_space<vmem>>, vector<256x512xbf16>
    %cst_280 = arith.constant dense<0.000000e+00> : vector<8x512xf32>
    %531 = tpu.matmul %529, %530, %cst_280 {dimension_numbers = #tpu.dot_dimension_numbers<[1], [0], [0], [1], [0, 0, 1, 1], [], []>} : vector<8x256xbf16>, vector<256x512xbf16>, vector<8x512xf32> -> vector<8x512xf32>
    %c0_281 = arith.constant 0 : index
    %c0_282 = arith.constant 0 : index
    %532 = vector.load %arg5[%c0_281, %c0_282] : memref<1x512xf32, #tpu.memory_space<vmem>>, vector<1x512xf32>
    %533 = vector.broadcast %532 : vector<1x512xf32> to vector<8x512xf32>
    %534 = arith.addf %531, %533 : vector<8x512xf32>
    %535 = vector.extract_strided_slice %534 {offsets = [0, 0], sizes = [8, 128], strides = [1, 1]} : vector<8x512xf32> to vector<8x128xf32>
    %536 = arith.negf %535 : vector<8x128xf32>
    %537 = math.exp %536 : vector<8x128xf32>
    %cst_283 = arith.constant 1.000000e+00 : f32
    %538 = vector.broadcast %cst_283 : f32 to vector<8x128xf32>
    %539 = arith.addf %538, %537 : vector<8x128xf32>
    %540 = arith.divf %538, %539 : vector<8x128xf32>
    %541 = vector.extract_strided_slice %534 {offsets = [0, 128], sizes = [8, 128], strides = [1, 1]} : vector<8x512xf32> to vector<8x128xf32>
    %542 = arith.negf %541 : vector<8x128xf32>
    %543 = math.exp %542 : vector<8x128xf32>
    %cst_284 = arith.constant 1.000000e+00 : f32
    %544 = vector.broadcast %cst_284 : f32 to vector<8x128xf32>
    %545 = arith.addf %544, %543 : vector<8x128xf32>
    %546 = arith.divf %544, %545 : vector<8x128xf32>
    %547 = vector.extract_strided_slice %534 {offsets = [0, 256], sizes = [8, 128], strides = [1, 1]} : vector<8x512xf32> to vector<8x128xf32>
    %548 = math.tanh %547 : vector<8x128xf32>
    %549 = vector.extract_strided_slice %534 {offsets = [0, 384], sizes = [8, 128], strides = [1, 1]} : vector<8x512xf32> to vector<8x128xf32>
    %550 = arith.negf %549 : vector<8x128xf32>
    %551 = math.exp %550 : vector<8x128xf32>
    %cst_285 = arith.constant 1.000000e+00 : f32
    %552 = vector.broadcast %cst_285 : f32 to vector<8x128xf32>
    %553 = arith.addf %552, %551 : vector<8x128xf32>
    %554 = arith.divf %552, %553 : vector<8x128xf32>
    %555 = arith.mulf %546, %527 : vector<8x128xf32>
    %556 = arith.mulf %540, %548 : vector<8x128xf32>
    %557 = arith.addf %555, %556 : vector<8x128xf32>
    %558 = math.tanh %557 : vector<8x128xf32>
    %559 = arith.mulf %554, %558 : vector<8x128xf32>
    %c1_286 = arith.constant 1 : index
    %c0_287 = arith.constant 0 : index
    %c0_288 = arith.constant 0 : index
    %560 = vector.load %arg9[%c1_286, %c0_287, %c0_288] : memref<2x8x128xf32, #tpu.memory_space<vmem>>, vector<1x8x128xf32>
    %561 = vector.shape_cast %560 : vector<1x8x128xf32> to vector<8x128xf32>
    %562 = vector.shape_cast %559 : vector<8x128xf32> to vector<1x8x128xf32>
    tpu.vector_store %arg9[%c1_286, %c0_287, %c0_288], %562 {strides = array<i32>} : memref<2x8x128xf32, #tpu.memory_space<vmem>>, vector<1x8x128xf32>,
    %c1_289 = arith.constant 1 : index
    %c0_290 = arith.constant 0 : index
    %c0_291 = arith.constant 0 : index
    %563 = vector.load %arg10[%c1_289, %c0_290, %c0_291] : memref<2x8x128xf32, #tpu.memory_space<vmem>>, vector<1x8x128xf32>
    %564 = vector.shape_cast %563 : vector<1x8x128xf32> to vector<8x128xf32>
    %565 = vector.shape_cast %557 : vector<8x128xf32> to vector<1x8x128xf32>
    tpu.vector_store %arg10[%c1_289, %c0_290, %c0_291], %565 {strides = array<i32>} : memref<2x8x128xf32, #tpu.memory_space<vmem>>, vector<1x8x128xf32>,
    %566 = arith.truncf %559 : vector<8x128xf32> to vector<8x128xbf16>
    %c0_292 = arith.constant 0 : index
    %c0_293 = arith.constant 0 : index
    %567 = vector.load %arg11[%c0_292, %c0_293] : memref<8x128xf32, #tpu.memory_space<vmem>>, vector<8x128xf32>
    %c5_294 = arith.constant 5 : index
    %c0_295 = arith.constant 0 : index
    %c0_296 = arith.constant 0 : index
    %568 = vector.load %arg6[%c5_294, %c0_295, %c0_296] : memref<8x128x128xbf16, #tpu.memory_space<vmem>>, vector<1x128x128xbf16>
    %569 = vector.shape_cast %568 : vector<1x128x128xbf16> to vector<128x128xbf16>
    %cst_297 = arith.constant dense<0.000000e+00> : vector<8x128xf32>
    %570 = tpu.matmul %566, %569, %cst_297 {dimension_numbers = #tpu.dot_dimension_numbers<[1], [0], [0], [1], [0, 0, 1, 1], [], []>} : vector<8x128xbf16>, vector<128x128xbf16>, vector<8x128xf32> -> vector<8x128xf32>
    %571 = arith.addf %567, %570 : vector<8x128xf32>
    %c0_298 = arith.constant 0 : index
    %c0_299 = arith.constant 0 : index
    %572 = vector.load %arg11[%c0_298, %c0_299] : memref<8x128xf32, #tpu.memory_space<vmem>>, vector<8x128xf32>
    tpu.vector_store %arg11[%c0_298, %c0_299], %571 {strides = array<i32>} : memref<8x128xf32, #tpu.memory_space<vmem>>, vector<8x128xf32>,
    %c0_300 = arith.constant 0 : index
    %c6 = arith.constant 6 : index
    %c0_301 = arith.constant 0 : index
    %573 = vector.load %arg1[%c0_300, %c6, %c0_301] : memref<8x8x128xf32, #tpu.memory_space<vmem>>, vector<8x1x128xf32>
    %574 = vector.shape_cast %573 : vector<8x1x128xf32> to vector<8x128xf32>
    %575 = arith.truncf %574 : vector<8x128xf32> to vector<8x128xbf16>
    %c0_302 = arith.constant 0 : index
    %c0_303 = arith.constant 0 : index
    %c0_304 = arith.constant 0 : index
    %576 = vector.load %arg9[%c0_302, %c0_303, %c0_304] : memref<2x8x128xf32, #tpu.memory_space<vmem>>, vector<1x8x128xf32>
    %577 = vector.shape_cast %576 : vector<1x8x128xf32> to vector<8x128xf32>
    %c0_305 = arith.constant 0 : index
    %c0_306 = arith.constant 0 : index
    %c0_307 = arith.constant 0 : index
    %578 = vector.load %arg10[%c0_305, %c0_306, %c0_307] : memref<2x8x128xf32, #tpu.memory_space<vmem>>, vector<1x8x128xf32>
    %579 = vector.shape_cast %578 : vector<1x8x128xf32> to vector<8x128xf32>
    %580 = arith.truncf %577 : vector<8x128xf32> to vector<8x128xbf16>
    %581 = tpu.concatenate %575, %580 in 1 : vector<8x128xbf16>, vector<8x128xbf16> -> vector<8x256xbf16>
    %c0_308 = arith.constant 0 : index
    %c0_309 = arith.constant 0 : index
    %582 = vector.load %arg2[%c0_308, %c0_309] : memref<256x512xbf16, #tpu.memory_space<vmem>>, vector<256x512xbf16>
    %cst_310 = arith.constant dense<0.000000e+00> : vector<8x512xf32>
    %583 = tpu.matmul %581, %582, %cst_310 {dimension_numbers = #tpu.dot_dimension_numbers<[1], [0], [0], [1], [0, 0, 1, 1], [], []>} : vector<8x256xbf16>, vector<256x512xbf16>, vector<8x512xf32> -> vector<8x512xf32>
    %c0_311 = arith.constant 0 : index
    %c0_312 = arith.constant 0 : index
    %584 = vector.load %arg3[%c0_311, %c0_312] : memref<1x512xf32, #tpu.memory_space<vmem>>, vector<1x512xf32>
    %585 = vector.broadcast %584 : vector<1x512xf32> to vector<8x512xf32>
    %586 = arith.addf %583, %585 : vector<8x512xf32>
    %587 = vector.extract_strided_slice %586 {offsets = [0, 0], sizes = [8, 128], strides = [1, 1]} : vector<8x512xf32> to vector<8x128xf32>
    %588 = arith.negf %587 : vector<8x128xf32>
    %589 = math.exp %588 : vector<8x128xf32>
    %cst_313 = arith.constant 1.000000e+00 : f32
    %590 = vector.broadcast %cst_313 : f32 to vector<8x128xf32>
    %591 = arith.addf %590, %589 : vector<8x128xf32>
    %592 = arith.divf %590, %591 : vector<8x128xf32>
    %593 = vector.extract_strided_slice %586 {offsets = [0, 128], sizes = [8, 128], strides = [1, 1]} : vector<8x512xf32> to vector<8x128xf32>
    %594 = arith.negf %593 : vector<8x128xf32>
    %595 = math.exp %594 : vector<8x128xf32>
    %cst_314 = arith.constant 1.000000e+00 : f32
    %596 = vector.broadcast %cst_314 : f32 to vector<8x128xf32>
    %597 = arith.addf %596, %595 : vector<8x128xf32>
    %598 = arith.divf %596, %597 : vector<8x128xf32>
    %599 = vector.extract_strided_slice %586 {offsets = [0, 256], sizes = [8, 128], strides = [1, 1]} : vector<8x512xf32> to vector<8x128xf32>
    %600 = math.tanh %599 : vector<8x128xf32>
    %601 = vector.extract_strided_slice %586 {offsets = [0, 384], sizes = [8, 128], strides = [1, 1]} : vector<8x512xf32> to vector<8x128xf32>
    %602 = arith.negf %601 : vector<8x128xf32>
    %603 = math.exp %602 : vector<8x128xf32>
    %cst_315 = arith.constant 1.000000e+00 : f32
    %604 = vector.broadcast %cst_315 : f32 to vector<8x128xf32>
    %605 = arith.addf %604, %603 : vector<8x128xf32>
    %606 = arith.divf %604, %605 : vector<8x128xf32>
    %607 = arith.mulf %598, %579 : vector<8x128xf32>
    %608 = arith.mulf %592, %600 : vector<8x128xf32>
    %609 = arith.addf %607, %608 : vector<8x128xf32>
    %610 = math.tanh %609 : vector<8x128xf32>
    %611 = arith.mulf %606, %610 : vector<8x128xf32>
    %c0_316 = arith.constant 0 : index
    %c0_317 = arith.constant 0 : index
    %c0_318 = arith.constant 0 : index
    %612 = vector.load %arg9[%c0_316, %c0_317, %c0_318] : memref<2x8x128xf32, #tpu.memory_space<vmem>>, vector<1x8x128xf32>
    %613 = vector.shape_cast %612 : vector<1x8x128xf32> to vector<8x128xf32>
    %614 = vector.shape_cast %611 : vector<8x128xf32> to vector<1x8x128xf32>
    tpu.vector_store %arg9[%c0_316, %c0_317, %c0_318], %614 {strides = array<i32>} : memref<2x8x128xf32, #tpu.memory_space<vmem>>, vector<1x8x128xf32>,
    %c0_319 = arith.constant 0 : index
    %c0_320 = arith.constant 0 : index
    %c0_321 = arith.constant 0 : index
    %615 = vector.load %arg10[%c0_319, %c0_320, %c0_321] : memref<2x8x128xf32, #tpu.memory_space<vmem>>, vector<1x8x128xf32>
    %616 = vector.shape_cast %615 : vector<1x8x128xf32> to vector<8x128xf32>
    %617 = vector.shape_cast %609 : vector<8x128xf32> to vector<1x8x128xf32>
    tpu.vector_store %arg10[%c0_319, %c0_320, %c0_321], %617 {strides = array<i32>} : memref<2x8x128xf32, #tpu.memory_space<vmem>>, vector<1x8x128xf32>,
    %618 = arith.truncf %611 : vector<8x128xf32> to vector<8x128xbf16>
    %c1_322 = arith.constant 1 : index
    %c0_323 = arith.constant 0 : index
    %c0_324 = arith.constant 0 : index
    %619 = vector.load %arg9[%c1_322, %c0_323, %c0_324] : memref<2x8x128xf32, #tpu.memory_space<vmem>>, vector<1x8x128xf32>
    %620 = vector.shape_cast %619 : vector<1x8x128xf32> to vector<8x128xf32>
    %c1_325 = arith.constant 1 : index
    %c0_326 = arith.constant 0 : index
    %c0_327 = arith.constant 0 : index
    %621 = vector.load %arg10[%c1_325, %c0_326, %c0_327] : memref<2x8x128xf32, #tpu.memory_space<vmem>>, vector<1x8x128xf32>
    %622 = vector.shape_cast %621 : vector<1x8x128xf32> to vector<8x128xf32>
    %623 = arith.truncf %620 : vector<8x128xf32> to vector<8x128xbf16>
    %624 = tpu.concatenate %618, %623 in 1 : vector<8x128xbf16>, vector<8x128xbf16> -> vector<8x256xbf16>
    %c0_328 = arith.constant 0 : index
    %c0_329 = arith.constant 0 : index
    %625 = vector.load %arg4[%c0_328, %c0_329] : memref<256x512xbf16, #tpu.memory_space<vmem>>, vector<256x512xbf16>
    %cst_330 = arith.constant dense<0.000000e+00> : vector<8x512xf32>
    %626 = tpu.matmul %624, %625, %cst_330 {dimension_numbers = #tpu.dot_dimension_numbers<[1], [0], [0], [1], [0, 0, 1, 1], [], []>} : vector<8x256xbf16>, vector<256x512xbf16>, vector<8x512xf32> -> vector<8x512xf32>
    %c0_331 = arith.constant 0 : index
    %c0_332 = arith.constant 0 : index
    %627 = vector.load %arg5[%c0_331, %c0_332] : memref<1x512xf32, #tpu.memory_space<vmem>>, vector<1x512xf32>
    %628 = vector.broadcast %627 : vector<1x512xf32> to vector<8x512xf32>
    %629 = arith.addf %626, %628 : vector<8x512xf32>
    %630 = vector.extract_strided_slice %629 {offsets = [0, 0], sizes = [8, 128], strides = [1, 1]} : vector<8x512xf32> to vector<8x128xf32>
    %631 = arith.negf %630 : vector<8x128xf32>
    %632 = math.exp %631 : vector<8x128xf32>
    %cst_333 = arith.constant 1.000000e+00 : f32
    %633 = vector.broadcast %cst_333 : f32 to vector<8x128xf32>
    %634 = arith.addf %633, %632 : vector<8x128xf32>
    %635 = arith.divf %633, %634 : vector<8x128xf32>
    %636 = vector.extract_strided_slice %629 {offsets = [0, 128], sizes = [8, 128], strides = [1, 1]} : vector<8x512xf32> to vector<8x128xf32>
    %637 = arith.negf %636 : vector<8x128xf32>
    %638 = math.exp %637 : vector<8x128xf32>
    %cst_334 = arith.constant 1.000000e+00 : f32
    %639 = vector.broadcast %cst_334 : f32 to vector<8x128xf32>
    %640 = arith.addf %639, %638 : vector<8x128xf32>
    %641 = arith.divf %639, %640 : vector<8x128xf32>
    %642 = vector.extract_strided_slice %629 {offsets = [0, 256], sizes = [8, 128], strides = [1, 1]} : vector<8x512xf32> to vector<8x128xf32>
    %643 = math.tanh %642 : vector<8x128xf32>
    %644 = vector.extract_strided_slice %629 {offsets = [0, 384], sizes = [8, 128], strides = [1, 1]} : vector<8x512xf32> to vector<8x128xf32>
    %645 = arith.negf %644 : vector<8x128xf32>
    %646 = math.exp %645 : vector<8x128xf32>
    %cst_335 = arith.constant 1.000000e+00 : f32
    %647 = vector.broadcast %cst_335 : f32 to vector<8x128xf32>
    %648 = arith.addf %647, %646 : vector<8x128xf32>
    %649 = arith.divf %647, %648 : vector<8x128xf32>
    %650 = arith.mulf %641, %622 : vector<8x128xf32>
    %651 = arith.mulf %635, %643 : vector<8x128xf32>
    %652 = arith.addf %650, %651 : vector<8x128xf32>
    %653 = math.tanh %652 : vector<8x128xf32>
    %654 = arith.mulf %649, %653 : vector<8x128xf32>
    %c1_336 = arith.constant 1 : index
    %c0_337 = arith.constant 0 : index
    %c0_338 = arith.constant 0 : index
    %655 = vector.load %arg9[%c1_336, %c0_337, %c0_338] : memref<2x8x128xf32, #tpu.memory_space<vmem>>, vector<1x8x128xf32>
    %656 = vector.shape_cast %655 : vector<1x8x128xf32> to vector<8x128xf32>
    %657 = vector.shape_cast %654 : vector<8x128xf32> to vector<1x8x128xf32>
    tpu.vector_store %arg9[%c1_336, %c0_337, %c0_338], %657 {strides = array<i32>} : memref<2x8x128xf32, #tpu.memory_space<vmem>>, vector<1x8x128xf32>,
    %c1_339 = arith.constant 1 : index
    %c0_340 = arith.constant 0 : index
    %c0_341 = arith.constant 0 : index
    %658 = vector.load %arg10[%c1_339, %c0_340, %c0_341] : memref<2x8x128xf32, #tpu.memory_space<vmem>>, vector<1x8x128xf32>
    %659 = vector.shape_cast %658 : vector<1x8x128xf32> to vector<8x128xf32>
    %660 = vector.shape_cast %652 : vector<8x128xf32> to vector<1x8x128xf32>
    tpu.vector_store %arg10[%c1_339, %c0_340, %c0_341], %660 {strides = array<i32>} : memref<2x8x128xf32, #tpu.memory_space<vmem>>, vector<1x8x128xf32>,
    %661 = arith.truncf %654 : vector<8x128xf32> to vector<8x128xbf16>
    %c0_342 = arith.constant 0 : index
    %c0_343 = arith.constant 0 : index
    %662 = vector.load %arg11[%c0_342, %c0_343] : memref<8x128xf32, #tpu.memory_space<vmem>>, vector<8x128xf32>
    %c6_344 = arith.constant 6 : index
    %c0_345 = arith.constant 0 : index
    %c0_346 = arith.constant 0 : index
    %663 = vector.load %arg6[%c6_344, %c0_345, %c0_346] : memref<8x128x128xbf16, #tpu.memory_space<vmem>>, vector<1x128x128xbf16>
    %664 = vector.shape_cast %663 : vector<1x128x128xbf16> to vector<128x128xbf16>
    %cst_347 = arith.constant dense<0.000000e+00> : vector<8x128xf32>
    %665 = tpu.matmul %661, %664, %cst_347 {dimension_numbers = #tpu.dot_dimension_numbers<[1], [0], [0], [1], [0, 0, 1, 1], [], []>} : vector<8x128xbf16>, vector<128x128xbf16>, vector<8x128xf32> -> vector<8x128xf32>
    %666 = arith.addf %662, %665 : vector<8x128xf32>
    %c0_348 = arith.constant 0 : index
    %c0_349 = arith.constant 0 : index
    %667 = vector.load %arg11[%c0_348, %c0_349] : memref<8x128xf32, #tpu.memory_space<vmem>>, vector<8x128xf32>
    tpu.vector_store %arg11[%c0_348, %c0_349], %666 {strides = array<i32>} : memref<8x128xf32, #tpu.memory_space<vmem>>, vector<8x128xf32>,
    %c0_350 = arith.constant 0 : index
    %c7 = arith.constant 7 : index
    %c0_351 = arith.constant 0 : index
    %668 = vector.load %arg1[%c0_350, %c7, %c0_351] : memref<8x8x128xf32, #tpu.memory_space<vmem>>, vector<8x1x128xf32>
    %669 = vector.shape_cast %668 : vector<8x1x128xf32> to vector<8x128xf32>
    %670 = arith.truncf %669 : vector<8x128xf32> to vector<8x128xbf16>
    %c0_352 = arith.constant 0 : index
    %c0_353 = arith.constant 0 : index
    %c0_354 = arith.constant 0 : index
    %671 = vector.load %arg9[%c0_352, %c0_353, %c0_354] : memref<2x8x128xf32, #tpu.memory_space<vmem>>, vector<1x8x128xf32>
    %672 = vector.shape_cast %671 : vector<1x8x128xf32> to vector<8x128xf32>
    %c0_355 = arith.constant 0 : index
    %c0_356 = arith.constant 0 : index
    %c0_357 = arith.constant 0 : index
    %673 = vector.load %arg10[%c0_355, %c0_356, %c0_357] : memref<2x8x128xf32, #tpu.memory_space<vmem>>, vector<1x8x128xf32>
    %674 = vector.shape_cast %673 : vector<1x8x128xf32> to vector<8x128xf32>
    %675 = arith.truncf %672 : vector<8x128xf32> to vector<8x128xbf16>
    %676 = tpu.concatenate %670, %675 in 1 : vector<8x128xbf16>, vector<8x128xbf16> -> vector<8x256xbf16>
    %c0_358 = arith.constant 0 : index
    %c0_359 = arith.constant 0 : index
    %677 = vector.load %arg2[%c0_358, %c0_359] : memref<256x512xbf16, #tpu.memory_space<vmem>>, vector<256x512xbf16>
    %cst_360 = arith.constant dense<0.000000e+00> : vector<8x512xf32>
    %678 = tpu.matmul %676, %677, %cst_360 {dimension_numbers = #tpu.dot_dimension_numbers<[1], [0], [0], [1], [0, 0, 1, 1], [], []>} : vector<8x256xbf16>, vector<256x512xbf16>, vector<8x512xf32> -> vector<8x512xf32>
    %c0_361 = arith.constant 0 : index
    %c0_362 = arith.constant 0 : index
    %679 = vector.load %arg3[%c0_361, %c0_362] : memref<1x512xf32, #tpu.memory_space<vmem>>, vector<1x512xf32>
    %680 = vector.broadcast %679 : vector<1x512xf32> to vector<8x512xf32>
    %681 = arith.addf %678, %680 : vector<8x512xf32>
    %682 = vector.extract_strided_slice %681 {offsets = [0, 0], sizes = [8, 128], strides = [1, 1]} : vector<8x512xf32> to vector<8x128xf32>
    %683 = arith.negf %682 : vector<8x128xf32>
    %684 = math.exp %683 : vector<8x128xf32>
    %cst_363 = arith.constant 1.000000e+00 : f32
    %685 = vector.broadcast %cst_363 : f32 to vector<8x128xf32>
    %686 = arith.addf %685, %684 : vector<8x128xf32>
    %687 = arith.divf %685, %686 : vector<8x128xf32>
    %688 = vector.extract_strided_slice %681 {offsets = [0, 128], sizes = [8, 128], strides = [1, 1]} : vector<8x512xf32> to vector<8x128xf32>
    %689 = arith.negf %688 : vector<8x128xf32>
    %690 = math.exp %689 : vector<8x128xf32>
    %cst_364 = arith.constant 1.000000e+00 : f32
    %691 = vector.broadcast %cst_364 : f32 to vector<8x128xf32>
    %692 = arith.addf %691, %690 : vector<8x128xf32>
    %693 = arith.divf %691, %692 : vector<8x128xf32>
    %694 = vector.extract_strided_slice %681 {offsets = [0, 256], sizes = [8, 128], strides = [1, 1]} : vector<8x512xf32> to vector<8x128xf32>
    %695 = math.tanh %694 : vector<8x128xf32>
    %696 = vector.extract_strided_slice %681 {offsets = [0, 384], sizes = [8, 128], strides = [1, 1]} : vector<8x512xf32> to vector<8x128xf32>
    %697 = arith.negf %696 : vector<8x128xf32>
    %698 = math.exp %697 : vector<8x128xf32>
    %cst_365 = arith.constant 1.000000e+00 : f32
    %699 = vector.broadcast %cst_365 : f32 to vector<8x128xf32>
    %700 = arith.addf %699, %698 : vector<8x128xf32>
    %701 = arith.divf %699, %700 : vector<8x128xf32>
    %702 = arith.mulf %693, %674 : vector<8x128xf32>
    %703 = arith.mulf %687, %695 : vector<8x128xf32>
    %704 = arith.addf %702, %703 : vector<8x128xf32>
    %705 = math.tanh %704 : vector<8x128xf32>
    %706 = arith.mulf %701, %705 : vector<8x128xf32>
    %c0_366 = arith.constant 0 : index
    %c0_367 = arith.constant 0 : index
    %c0_368 = arith.constant 0 : index
    %707 = vector.load %arg9[%c0_366, %c0_367, %c0_368] : memref<2x8x128xf32, #tpu.memory_space<vmem>>, vector<1x8x128xf32>
    %708 = vector.shape_cast %707 : vector<1x8x128xf32> to vector<8x128xf32>
    %709 = vector.shape_cast %706 : vector<8x128xf32> to vector<1x8x128xf32>
    tpu.vector_store %arg9[%c0_366, %c0_367, %c0_368], %709 {strides = array<i32>} : memref<2x8x128xf32, #tpu.memory_space<vmem>>, vector<1x8x128xf32>,
    %c0_369 = arith.constant 0 : index
    %c0_370 = arith.constant 0 : index
    %c0_371 = arith.constant 0 : index
    %710 = vector.load %arg10[%c0_369, %c0_370, %c0_371] : memref<2x8x128xf32, #tpu.memory_space<vmem>>, vector<1x8x128xf32>
    %711 = vector.shape_cast %710 : vector<1x8x128xf32> to vector<8x128xf32>
    %712 = vector.shape_cast %704 : vector<8x128xf32> to vector<1x8x128xf32>
    tpu.vector_store %arg10[%c0_369, %c0_370, %c0_371], %712 {strides = array<i32>} : memref<2x8x128xf32, #tpu.memory_space<vmem>>, vector<1x8x128xf32>,
    %713 = arith.truncf %706 : vector<8x128xf32> to vector<8x128xbf16>
    %c1_372 = arith.constant 1 : index
    %c0_373 = arith.constant 0 : index
    %c0_374 = arith.constant 0 : index
    %714 = vector.load %arg9[%c1_372, %c0_373, %c0_374] : memref<2x8x128xf32, #tpu.memory_space<vmem>>, vector<1x8x128xf32>
    %715 = vector.shape_cast %714 : vector<1x8x128xf32> to vector<8x128xf32>
    %c1_375 = arith.constant 1 : index
    %c0_376 = arith.constant 0 : index
    %c0_377 = arith.constant 0 : index
    %716 = vector.load %arg10[%c1_375, %c0_376, %c0_377] : memref<2x8x128xf32, #tpu.memory_space<vmem>>, vector<1x8x128xf32>
    %717 = vector.shape_cast %716 : vector<1x8x128xf32> to vector<8x128xf32>
    %718 = arith.truncf %715 : vector<8x128xf32> to vector<8x128xbf16>
    %719 = tpu.concatenate %713, %718 in 1 : vector<8x128xbf16>, vector<8x128xbf16> -> vector<8x256xbf16>
    %c0_378 = arith.constant 0 : index
    %c0_379 = arith.constant 0 : index
    %720 = vector.load %arg4[%c0_378, %c0_379] : memref<256x512xbf16, #tpu.memory_space<vmem>>, vector<256x512xbf16>
    %cst_380 = arith.constant dense<0.000000e+00> : vector<8x512xf32>
    %721 = tpu.matmul %719, %720, %cst_380 {dimension_numbers = #tpu.dot_dimension_numbers<[1], [0], [0], [1], [0, 0, 1, 1], [], []>} : vector<8x256xbf16>, vector<256x512xbf16>, vector<8x512xf32> -> vector<8x512xf32>
    %c0_381 = arith.constant 0 : index
    %c0_382 = arith.constant 0 : index
    %722 = vector.load %arg5[%c0_381, %c0_382] : memref<1x512xf32, #tpu.memory_space<vmem>>, vector<1x512xf32>
    %723 = vector.broadcast %722 : vector<1x512xf32> to vector<8x512xf32>
    %724 = arith.addf %721, %723 : vector<8x512xf32>
    %725 = vector.extract_strided_slice %724 {offsets = [0, 0], sizes = [8, 128], strides = [1, 1]} : vector<8x512xf32> to vector<8x128xf32>
    %726 = arith.negf %725 : vector<8x128xf32>
    %727 = math.exp %726 : vector<8x128xf32>
    %cst_383 = arith.constant 1.000000e+00 : f32
    %728 = vector.broadcast %cst_383 : f32 to vector<8x128xf32>
    %729 = arith.addf %728, %727 : vector<8x128xf32>
    %730 = arith.divf %728, %729 : vector<8x128xf32>
    %731 = vector.extract_strided_slice %724 {offsets = [0, 128], sizes = [8, 128], strides = [1, 1]} : vector<8x512xf32> to vector<8x128xf32>
    %732 = arith.negf %731 : vector<8x128xf32>
    %733 = math.exp %732 : vector<8x128xf32>
    %cst_384 = arith.constant 1.000000e+00 : f32
    %734 = vector.broadcast %cst_384 : f32 to vector<8x128xf32>
    %735 = arith.addf %734, %733 : vector<8x128xf32>
    %736 = arith.divf %734, %735 : vector<8x128xf32>
    %737 = vector.extract_strided_slice %724 {offsets = [0, 256], sizes = [8, 128], strides = [1, 1]} : vector<8x512xf32> to vector<8x128xf32>
    %738 = math.tanh %737 : vector<8x128xf32>
    %739 = vector.extract_strided_slice %724 {offsets = [0, 384], sizes = [8, 128], strides = [1, 1]} : vector<8x512xf32> to vector<8x128xf32>
    %740 = arith.negf %739 : vector<8x128xf32>
    %741 = math.exp %740 : vector<8x128xf32>
    %cst_385 = arith.constant 1.000000e+00 : f32
    %742 = vector.broadcast %cst_385 : f32 to vector<8x128xf32>
    %743 = arith.addf %742, %741 : vector<8x128xf32>
    %744 = arith.divf %742, %743 : vector<8x128xf32>
    %745 = arith.mulf %736, %717 : vector<8x128xf32>
    %746 = arith.mulf %730, %738 : vector<8x128xf32>
    %747 = arith.addf %745, %746 : vector<8x128xf32>
    %748 = math.tanh %747 : vector<8x128xf32>
    %749 = arith.mulf %744, %748 : vector<8x128xf32>
    %c1_386 = arith.constant 1 : index
    %c0_387 = arith.constant 0 : index
    %c0_388 = arith.constant 0 : index
    %750 = vector.load %arg9[%c1_386, %c0_387, %c0_388] : memref<2x8x128xf32, #tpu.memory_space<vmem>>, vector<1x8x128xf32>
    %751 = vector.shape_cast %750 : vector<1x8x128xf32> to vector<8x128xf32>
    %752 = vector.shape_cast %749 : vector<8x128xf32> to vector<1x8x128xf32>
    tpu.vector_store %arg9[%c1_386, %c0_387, %c0_388], %752 {strides = array<i32>} : memref<2x8x128xf32, #tpu.memory_space<vmem>>, vector<1x8x128xf32>,
    %c1_389 = arith.constant 1 : index
    %c0_390 = arith.constant 0 : index
    %c0_391 = arith.constant 0 : index
    %753 = vector.load %arg10[%c1_389, %c0_390, %c0_391] : memref<2x8x128xf32, #tpu.memory_space<vmem>>, vector<1x8x128xf32>
    %754 = vector.shape_cast %753 : vector<1x8x128xf32> to vector<8x128xf32>
    %755 = vector.shape_cast %747 : vector<8x128xf32> to vector<1x8x128xf32>
    tpu.vector_store %arg10[%c1_389, %c0_390, %c0_391], %755 {strides = array<i32>} : memref<2x8x128xf32, #tpu.memory_space<vmem>>, vector<1x8x128xf32>,
    %756 = arith.truncf %749 : vector<8x128xf32> to vector<8x128xbf16>
    %c0_392 = arith.constant 0 : index
    %c0_393 = arith.constant 0 : index
    %757 = vector.load %arg11[%c0_392, %c0_393] : memref<8x128xf32, #tpu.memory_space<vmem>>, vector<8x128xf32>
    %c7_394 = arith.constant 7 : index
    %c0_395 = arith.constant 0 : index
    %c0_396 = arith.constant 0 : index
    %758 = vector.load %arg6[%c7_394, %c0_395, %c0_396] : memref<8x128x128xbf16, #tpu.memory_space<vmem>>, vector<1x128x128xbf16>
    %759 = vector.shape_cast %758 : vector<1x128x128xbf16> to vector<128x128xbf16>
    %cst_397 = arith.constant dense<0.000000e+00> : vector<8x128xf32>
    %760 = tpu.matmul %756, %759, %cst_397 {dimension_numbers = #tpu.dot_dimension_numbers<[1], [0], [0], [1], [0, 0, 1, 1], [], []>} : vector<8x128xbf16>, vector<128x128xbf16>, vector<8x128xf32> -> vector<8x128xf32>
    %761 = arith.addf %757, %760 : vector<8x128xf32>
    %c0_398 = arith.constant 0 : index
    %c0_399 = arith.constant 0 : index
    %762 = vector.load %arg11[%c0_398, %c0_399] : memref<8x128xf32, #tpu.memory_space<vmem>>, vector<8x128xf32>
    tpu.vector_store %arg11[%c0_398, %c0_399], %761 {strides = array<i32>} : memref<8x128xf32, #tpu.memory_space<vmem>>, vector<8x128xf32>,
    %c0_i32_400 = arith.constant 0 : i32
    %763 = arith.cmpi eq, %arg0, %c0_i32_400 : i32
    %764 = arith.extui %763 : i1 to i32
    %c0_i32_401 = arith.constant 0 : i32
    %765 = arith.cmpi ne, %764, %c0_i32_401 : i32
    scf.if %765 {
      %c0_402 = arith.constant 0 : index
      %c0_403 = arith.constant 0 : index
      %766 = vector.load %arg11[%c0_402, %c0_403] : memref<8x128xf32, #tpu.memory_space<vmem>>, vector<8x128xf32>
      %c0_404 = arith.constant 0 : index
      %c0_405 = arith.constant 0 : index
      %767 = vector.load %arg7[%c0_404, %c0_405] : memref<1x128xf32, #tpu.memory_space<vmem>>, vector<1x128xf32>
      %768 = vector.broadcast %767 : vector<1x128xf32> to vector<8x128xf32>
      %769 = arith.addf %766, %768 : vector<8x128xf32>
      %c0_406 = arith.constant 0 : index
      %c0_407 = arith.constant 0 : index
      %770 = vector.load %arg8[%c0_406, %c0_407] : memref<8x128xf32, #tpu.memory_space<vmem>>, vector<8x128xf32>
      tpu.vector_store %arg8[%c0_406, %c0_407], %769 {strides = array<i32>} : memref<8x128xf32, #tpu.memory_space<vmem>>, vector<8x128xf32>,
    } else {
    }
    return
  }
  func.func @transform_0(%arg0: i32) -> (i32, i32, i32) {
    %c0_i32 = arith.constant 0 : i32
    %c0_i32_0 = arith.constant 0 : i32
    %c0_i32_1 = arith.constant 0 : i32
    return %c0_i32, %arg0, %c0_i32_0 : i32, i32, i32
  }
  func.func @transform_1(%arg0: i32) -> (i32, i32) {
    %c0_i32 = arith.constant 0 : i32
    %c0_i32_0 = arith.constant 0 : i32
    %c0_i32_1 = arith.constant 0 : i32
    return %c0_i32, %c0_i32_0 : i32, i32
  }
  func.func @transform_2(%arg0: i32) -> (i32, i32) {
    %c0_i32 = arith.constant 0 : i32
    %c0_i32_0 = arith.constant 0 : i32
    %c0_i32_1 = arith.constant 0 : i32
    return %c0_i32, %c0_i32_0 : i32, i32
  }
  func.func @transform_3(%arg0: i32) -> (i32, i32) {
    %c0_i32 = arith.constant 0 : i32
    %c0_i32_0 = arith.constant 0 : i32
    %c0_i32_1 = arith.constant 0 : i32
    return %c0_i32, %c0_i32_0 : i32, i32
  }
  func.func @transform_4(%arg0: i32) -> (i32, i32) {
    %c0_i32 = arith.constant 0 : i32
    %c0_i32_0 = arith.constant 0 : i32
    %c0_i32_1 = arith.constant 0 : i32
    return %c0_i32, %c0_i32_0 : i32, i32
  }
  func.func @transform_5(%arg0: i32) -> (i32, i32, i32) {
    %c0_i32 = arith.constant 0 : i32
    %c0_i32_0 = arith.constant 0 : i32
    %c0_i32_1 = arith.constant 0 : i32
    return %arg0, %c0_i32, %c0_i32_0 : i32, i32, i32
  }
  func.func @transform_6(%arg0: i32) -> (i32, i32) {
    %c0_i32 = arith.constant 0 : i32
    %c0_i32_0 = arith.constant 0 : i32
    %c0_i32_1 = arith.constant 0 : i32
    return %c0_i32, %c0_i32_0 : i32, i32
  }
  func.func @transform_7(%arg0: i32) -> (i32, i32) {
    %c0_i32 = arith.constant 0 : i32
    %c0_i32_0 = arith.constant 0 : i32
    %c0_i32_1 = arith.constant 0 : i32
    return %c0_i32, %c0_i32_0 : i32, i32
  }
}

</mosaic_0001>

<bundles_post_ra>
// kernel: tpu_custom_call.1
= control target key start
LH: loop header
LB: loop body
LE: loop exit
PB: predicated region body
PF: predicated region fallthrough
CT: control target
= control target key end

     0   :  { %12 = vsyncpa [#allocation6], 0  ;;  %s13565_s0 = inlined_call_operand.hbm [shape: f32[8,8,128], index: 0, kind: input, shape index: {}]   ;;  %s13566_s1 = inlined_call_operand.hbm [shape: bf16[256,512], index: 1, kind: input, shape index: {}]   ;;  %s13567_s2 = inlined_call_operand.hbm [shape: f32[1,512], index: 2, kind: input, shape index: {}]   ;;  %s13568_s3 = inlined_call_operand.hbm [shape: bf16[256,512], index: 3, kind: input, shape index: {}]   ;;  %s13569_s4 = inlined_call_operand.vmem [shape: f32[1,512], index: 4, kind: input, shape index: {}]   ;;  %s13570_s5 = inlined_call_operand.hbm [shape: bf16[8,128,128], index: 5, kind: input, shape index: {}]   ;;  %s13571_s6 = inlined_call_operand.vmem [shape: f32[1,128], index: 6, kind: input, shape index: {}]   ;;  %s13572_s7 = inlined_call_operand.hbm [shape: f32[8,128], index: 7, kind: output, shape index: {}]  }
   0x1   :  { %13 = vsyncpa [#allocation9], 0 }
   0x2   :  { %14 = vsyncpa [#allocation12], 0 }
   0x3   :  { %15 = vsyncpa [#allocation7], 0  ;;  %s13029_s24 = smov [#allocation8]  }
   0x4   :  { %s33_s25 = sshll.u32 %s13029_s24, 4  ;;  %s34_s25 = int_to_ptr.vmem [resolvable:$true] %s33_s25 }
   0x5   :  { %s12909_s26 = scalar_lea.vmem %s34_s25, 8192  ;;  %p12914_p1 = scmp.lt.s32.totalorder %s34_s25, %s34_s25 }
   0x6   :  { %p12910_p0 = scmp.ne.s32.totalorder %s34_s25, %s12909_s26  ;;  %p12915_p2 = scmp.lt.s32.totalorder %s12909_s26, %s12909_s26 }
   0x8   :  { %p12916_p3 = por %p12915_p2, %p12914_p1 }
   0xa   :  { %p12917_p4 = pnand %p12916_p3, %p12910_p0 }
   0xc   :  { %12920 = shalt.err (!%p12917_p4)
}
   0xd   :  { %s13030_s27 = smov 256   ;;  %s13031_s28 = smov 16  }
   0xe   :  { %39 = dma.hbm_to_vmem [thread:$0]  %s13566_s1, 8192, %s34_s25, [#allocation9], %s13030_s27, %s13030_s27, %s13031_s28  }
   0xf   :  { %s13032_s8 = smov [#allocation11]   ;;  %s13033_s10 = smov [#allocation5]  }
  0x10   :  { %s55_s9 = sshll.u32 %s13032_s8, 4  ;;  %s21_s11 = sshll.u32 %s13033_s10, 4  ;;  %s56_s9 = int_to_ptr.vmem [resolvable:$true] %s55_s9  ;;  %s22_s11 = int_to_ptr.vmem [resolvable:$true] %s21_s11 }
  0x11   :  { %s12929_s12 = scalar_lea.vmem %s56_s9, 8192  ;;  %p12934_p6 = scmp.lt.s32.totalorder %s56_s9, %s56_s9 }
  0x12   :  { %p12930_p5 = scmp.ne.s32.totalorder %s56_s9, %s12929_s12  ;;  %p12935_p7 = scmp.lt.s32.totalorder %s12929_s12, %s12929_s12 }
  0x14   :  { %p12936_p8 = por %p12935_p7, %p12934_p6 }
  0x16   :  { %p12937_p9 = pnand %p12936_p8, %p12930_p5 }
  0x18   :  { %12940 = shalt.err (!%p12937_p9)
}
  0x19   :  { %61 = dma.hbm_to_vmem [thread:$0]  %s13568_s3, 8192, %s56_s9, [#allocation12], %s13030_s27, %s13030_s27, %s13031_s28  }
  0x1a   :  { %s12949_s15 = scalar_lea.vmem %s22_s11, 1024  ;;  %p12954_p11 = scmp.lt.s32.totalorder %s22_s11, %s22_s11 }
  0x1b   :  { %p12950_p10 = scmp.ne.s32.totalorder %s22_s11, %s12949_s15  ;;  %p12955_p12 = scmp.lt.s32.totalorder %s12949_s15, %s12949_s15 }
  0x1d   :  { %p12956_p13 = por %p12955_p12, %p12954_p11 }
  0x1f   :  { %p12957_p0 = pnand %p12956_p13, %p12950_p10 }
  0x21   :  { %12960 = shalt.err (!%p12957_p0)
}
  0x22   :  { %s13034_s1 = smov 128   ;;  %s13035_s16 = smov 8  }
  0x23   :  { %27 = dma.hbm_to_vmem [thread:$0]  %s13565_s0, 1024, %s22_s11, [#allocation6], %s13034_s1, %s13034_s1, %s13035_s16  }
  0x24   :  { %s13036_s19 = smov [#allocation10]   ;;  %s13037_s21 = smov [#allocation13]  }
  0x25   :  { %s46_s20 = sshll.u32 %s13036_s19, 4  ;;  %s69_s22 = sshll.u32 %s13037_s21, 4  ;;  %s47_s20 = int_to_ptr.vmem [resolvable:$true] %s46_s20  ;;  %s70_s22 = int_to_ptr.vmem [resolvable:$true] %s69_s22 }
  0x26   :  { %s12969_s3 = scalar_lea.vmem %s47_s20, 64  ;;  %p12974_p2 = scmp.lt.s32.totalorder %s47_s20, %s47_s20 }
  0x27   :  { %p12970_p1 = scmp.ne.s32.totalorder %s47_s20, %s12969_s3  ;;  %p12975_p3 = scmp.lt.s32.totalorder %s12969_s3, %s12969_s3 }
  0x29   :  { %p12976_p4 = por %p12975_p3, %p12974_p2 }
  0x2b   :  { %p12977_p5 = pnand %p12976_p4, %p12970_p1 }
  0x2d   :  { %12980 = shalt.err (!%p12977_p5)
}
  0x2e   :  { %49 = dma.hbm_to_vmem [thread:$0]  %s13567_s2, 64, %s47_s20, [#allocation9]  }
  0x2f   :  { %s12989_s25 = scalar_lea.vmem %s70_s22, 8192  ;;  %p12994_p7 = scmp.lt.s32.totalorder %s70_s22, %s70_s22 }
  0x30   :  { %p12990_p6 = scmp.ne.s32.totalorder %s70_s22, %s12989_s25  ;;  %p12995_p8 = scmp.lt.s32.totalorder %s12989_s25, %s12989_s25 }
  0x32   :  { %p12996_p9 = por %p12995_p8, %p12994_p7 }
  0x34   :  { %p12997_p10 = pnand %p12996_p9, %p12990_p6 }
  0x36   :  { %13000 = shalt.err (!%p12997_p10)
}
  0x37   :  { %s13038_s0 = smov 64   ;;  %s13039_s26 = smov 4  }
  0x38   :  { %75 = dma.hbm_to_vmem [thread:$0]  %s13570_s5, 8192, %s70_s22, [#allocation12], %s13038_s0, %s13038_s0, %s13039_s26  }
  0x39   :  { %13021 = dma.done.wait [#allocation6], 1024  }
  0x3a   :  { %13022 = vsyncadd [#allocation6], 4294966272 }
  0x3b   :  { %13023 = dma.done.wait [#allocation9], 8256  }
  0x3c   :  { %13024 = vsyncadd [#allocation9], 4294959040 }
  0x3d   :  { %13025 = dma.done.wait [#allocation12], 16384  }
  0x3e   :  { %13026 = vsyncadd [#allocation12], 4294950912  ;;  %v13040_v0 = vmov 0.0|0.0   ;;  %v11061_v1 = vld [vmem:[#allocation8 + $0xe4] ss:$16 sps:$4 sm:$0xff]   ;;  %vm139_vm0 = vcmask 1041409  }
  0x3f   :  { %599 = vmatprep.mubr.bf16.mxu0 %v13040_v0  ;;  %640 = vmatprep.mubr.bf16.mxu1 %v13040_v0  ;;  %v11063_v2 = vld [vmem:[#allocation8 + $0xe0] ss:$16 sps:$4 sm:$0xff]   ;;  %v11064_v3 = vld [vmem:[#allocation8 + $0xc4] ss:$16 sps:$4 sm:$0xff]   ;;  %v11072_v6 = vld [vmem:[#allocation8 + $0xec] ss:$16 sps:$4 sm:$0xff]  }
  0x40   :  { %567 = vmatprep.subr.bf16.mxu0 %v11061_v1  ;;  %v11066_v4 = vld [vmem:[#allocation8 + $0xc0] ss:$16 sps:$4 sm:$0xff]   ;;  %v11067_v5 = vld [vmem:[#allocation8 + $0xa4] ss:$16 sps:$4 sm:$0xff]   ;;  %v11075_v7 = vld [vmem:[#allocation8 + $0xe8] ss:$16 sps:$4 sm:$0xff]   ;;  %608 = vmatprep.subr.bf16.mxu1 %v11072_v6 }
  0x41   :  { %568 = vmatpush1.bf16.msra.mxu0 %v11063_v2  ;;  %v11069_v8 = vld [vmem:[#allocation8 + $0xa0] ss:$16 sps:$4 sm:$0xff]   ;;  %v11070_v9 = vld [vmem:[#allocation8 + $0x84] ss:$16 sps:$4 sm:$0xff]   ;;  %609 = vmatpush1.bf16.msra.mxu1 %v11075_v7  ;;  %v11078_v10 = vld [vmem:[#allocation8 + $0xcc] ss:$16 sps:$4 sm:$0xff]  }
  0x42   :  { %569 = vmatprep.subr.bf16.mxu0 %v11064_v3  ;;  %v11081_v11 = vld [vmem:[#allocation8 + $0xc8] ss:$16 sps:$4 sm:$0xff]   ;;  %610 = vmatprep.subr.bf16.mxu1 %v11078_v10  ;;  %v11074_v12 = vld [vmem:[#allocation8 + $0x80] ss:$16 sps:$4 sm:$0xff]   ;;  %v11076_v13 = vld [vmem:[#allocation8 + $0x64] ss:$16 sps:$4 sm:$0xff]  }
  0x43   :  { %v11084_v14 = vld [vmem:[#allocation8 + $0xac] ss:$16 sps:$4 sm:$0xff]   ;;  %v11087_v15 = vld [vmem:[#allocation8 + $0xa8] ss:$16 sps:$4 sm:$0xff]   ;;  %v11080_v17 = vld [vmem:[#allocation8 + $0x60] ss:$16 sps:$4 sm:$0xff]  }
  0x44   :  { %v11090_v16 = vld [vmem:[#allocation8 + $0x8c] ss:$16 sps:$4 sm:$0xff]   ;;  %v11082_v18 = vld [vmem:[#allocation8 + $0x44] ss:$16 sps:$4 sm:$0xff]   ;;  %v11093_v19 = vld [vmem:[#allocation8 + $0x88] ss:$16 sps:$4 sm:$0xff]  }
  0x45   :  { %570 = vmatpush1.bf16.msra.mxu0 %v11066_v4  ;;  %611 = vmatpush1.bf16.msra.mxu1 %v11081_v11  ;;  %v11096_v20 = vld [vmem:[#allocation8 + $0x6c] ss:$16 sps:$4 sm:$0xff]   ;;  %v11086_v21 = vld [vmem:[#allocation8 + $0x40] ss:$16 sps:$4 sm:$0xff]   ;;  %v11088_v22 = vld [vmem:[#allocation8 + $0x24] ss:$16 sps:$4 sm:$0xff]  }
  0x46   :  { %571 = vmatprep.subr.bf16.mxu0 %v11067_v5  ;;  %612 = vmatprep.subr.bf16.mxu1 %v11084_v14  ;;  %v11099_v23 = vld [vmem:[#allocation8 + $0x68] ss:$16 sps:$4 sm:$0xff]   ;;  %v11102_v24 = vld [vmem:[#allocation8 + $0x4c] ss:$16 sps:$4 sm:$0xff]   ;;  %v11092_v25 = vld [vmem:[#allocation8 + $0x20] ss:$16 sps:$4 sm:$0xff]  }
  0x47   :  { %v11094_v26 = vld [vmem:[#allocation8 + $0x4] ss:$16 sps:$4 sm:$0xff]   ;;  %v11105_v27 = vld [vmem:[#allocation8 + $0x48] ss:$16 sps:$4 sm:$0xff]   ;;  %v11108_v28 = vld [vmem:[#allocation8 + $0x2c] ss:$16 sps:$4 sm:$0xff]  }
  0x48   :  { %v11098_v29 = vld [vmem:[#allocation8] ss:$16 sps:$4 sm:$0xff]   ;;  %v11100_v30 = vld [vmem:[#allocation8 + $0x1e4] ss:$16 sps:$4 sm:$0xff]   ;;  %v11111_v31 = vld [vmem:[#allocation8 + $0x28] ss:$16 sps:$4 sm:$0xff]  }
  0x49   :  { %572 = vmatpush1.bf16.msra.mxu0 %v11069_v8  ;;  %613 = vmatpush1.bf16.msra.mxu1 %v11087_v15  ;;  %v11114_v32 = vld [vmem:[#allocation8 + $0xc] ss:$16 sps:$4 sm:$0xff]   ;;  %v11104_v33 = vld [vmem:[#allocation8 + $0x1e0] ss:$16 sps:$4 sm:$0xff]   ;;  %v11106_v34 = vld [vmem:[#allocation8 + $0x1c4] ss:$16 sps:$4 sm:$0xff]  }
  0x4a   :  { %573 = vmatprep.subr.bf16.mxu0 %v11070_v9  ;;  %614 = vmatprep.subr.bf16.mxu1 %v11090_v16  ;;  %v11117_v35 = vld [vmem:[#allocation8 + $0x8] ss:$16 sps:$4 sm:$0xff]   ;;  %v11120_v36 = vld [vmem:[#allocation8 + $0x1ec] ss:$16 sps:$4 sm:$0xff]   ;;  %v11110_v37 = vld [vmem:[#allocation8 + $0x1c0] ss:$16 sps:$4 sm:$0xff]  }
  0x4b   :  { %v11112_v38 = vld [vmem:[#allocation8 + $0x1a4] ss:$16 sps:$4 sm:$0xff]   ;;  %v11123_v39 = vld [vmem:[#allocation8 + $0x1e8] ss:$16 sps:$4 sm:$0xff]   ;;  %v11116_v40 = vld [vmem:[#allocation8 + $0x1a0] ss:$16 sps:$4 sm:$0xff]  }
  0x4c   :  { %v11126_v41 = vld [vmem:[#allocation8 + $0x1cc] ss:$16 sps:$4 sm:$0xff]   ;;  %v11118_v42 = vld [vmem:[#allocation8 + $0x184] ss:$16 sps:$4 sm:$0xff]   ;;  %v11129_v43 = vld [vmem:[#allocation8 + $0x1c8] ss:$16 sps:$4 sm:$0xff]  }
  0x4d   :  { %574 = vmatpush1.bf16.msra.mxu0 %v11074_v12  ;;  %615 = vmatpush1.bf16.msra.mxu1 %v11093_v19  ;;  %v103_v44 = vld [vmem:[#allocation5] sm:$0x1]  ;;  %v104_v45 = vld [vmem:[#allocation5 + $0x8] sm:$0x1]  ;;  %v105_v46 = vld [vmem:[#allocation5 + $0x10] sm:$0x1] }
  0x4e   :  { %575 = vmatprep.subr.bf16.mxu0 %v11076_v13  ;;  %616 = vmatprep.subr.bf16.mxu1 %v11096_v20  ;;  %v106_v47 = vld [vmem:[#allocation5 + $0x18] sm:$0x1]  ;;  %v111_v48 = vpack.c.bf16 %v103_v44, %v103_v44  ;;  %v11132_v49 = vld [vmem:[#allocation8 + $0x1ac] ss:$16 sps:$4 sm:$0xff]   ;;  %v107_v50 = vld [vmem:[#allocation5 + $0x20] sm:$0x1]  ;;  %v112_v52 = vpack.c.bf16 %v104_v45, %v104_v45  ;;  %v113_v53 = vpack.c.bf16 %v105_v46, %v105_v46 }
  0x4f   :  { %v108_v51 = vld [vmem:[#allocation5 + $0x28] sm:$0x1]  ;;  %v114_v54 = vpack.c.bf16 %v106_v47, %v106_v47  ;;  %v109_v55 = vld [vmem:[#allocation5 + $0x30] sm:$0x1]  ;;  %v115_v56 = vpack.c.bf16 %v107_v50, %v107_v50  ;;  %v11124_v59 = vld [vmem:[#allocation8 + $0x164] ss:$16 sps:$4 sm:$0xff]  }
  0x50   :  { %v116_v57 = vpack.c.bf16 %v108_v51, %v108_v51  ;;  %v11122_v58 = vld [vmem:[#allocation8 + $0x180] ss:$16 sps:$4 sm:$0xff]   ;;  %v130_v60 = vunpack.c.l.b16 %v111_v48  ;;  %v131_v61 = vunpack.c.l.b16 %v112_v52  ;;  %v132_v62 = vunpack.c.l.b16 %v113_v53  ;;  %v11135_v1 = vld [vmem:[#allocation8 + $0x1a8] ss:$16 sps:$4 sm:$0xff]   ;;  %v11138_v8 = vld [vmem:[#allocation8 + $0x18c] ss:$16 sps:$4 sm:$0xff]  }
  0x51   :  { %576 = vmatpush1.bf16.msra.mxu0 %v11080_v17  ;;  %617 = vmatpush1.bf16.msra.mxu1 %v11099_v23  ;;  %v133_v63 = vunpack.c.l.b16 %v114_v54  ;;  %v110_v2 = vld [vmem:[#allocation5 + $0x38] sm:$0x1]  ;;  %v134_v3 = vunpack.c.l.b16 %v115_v56  ;;  %vm142_vm1 = vcmask 1042434   ;;  %v117_v4 = vpack.c.bf16 %v109_v55, %v109_v55  ;;  %v11128_v12 = vld [vmem:[#allocation8 + $0x160] ss:$16 sps:$4 sm:$0xff]   ;;  %s13043_s20 = smov [#allocation14]  }
  0x52   :  { %577 = vmatprep.subr.bf16.mxu0 %v11082_v18  ;;  %618 = vmatprep.subr.bf16.mxu1 %v11102_v24  ;;  %v138_v5 = vrot.slane %v131_v61, 7  ;;  %v141_v6 = vrot.slane %v132_v62, 6  ;;  %v135_v9 = vunpack.c.l.b16 %v116_v57  ;;  %vm145_vm2 = vcmask 1043459   ;;  %v11130_v13 = vld [vmem:[#allocation8 + $0x144] ss:$16 sps:$4 sm:$0xff]   ;;  %s9666_s21 = sshll.u32 %s13043_s20, 4  ;;  %s9667_s21 = int_to_ptr.vmem [resolvable:$true] %s9666_s21 }
  0x53   :  { %v144_v7 = vrot.slane %v133_v63, 5  ;;  %v147_v11 = vrot.slane %v134_v3, 4  ;;  %v118_v14 = vpack.c.bf16 %v110_v2, %v110_v2  ;;  %vm148_vm3 = vcmask 1044484   ;;  %v11141_v16 = vld [vmem:[#allocation8 + $0x188] ss:$16 sps:$4 sm:$0xff]   ;;  %s13001_s22 = scalar_lea.vmem %s9667_s21, 128  ;;  %p13006_p12 = scmp.lt.s32.totalorder %s9667_s21, %s9667_s21 }
  0x54   :  { %v140_v10 = vsel %vm139_vm0, %v138_v5, %v130_v60  ;;  %v136_v17 = vunpack.c.l.b16 %v117_v4  ;;  %v11134_v19 = vld [vmem:[#allocation8 + $0x140] ss:$16 sps:$4 sm:$0xff]   ;;  %v11144_v20 = vld [vmem:[#allocation8 + $0x16c] ss:$16 sps:$4 sm:$0xff]   ;;  %v11147_v23 = vld [vmem:[#allocation8 + $0x168] ss:$16 sps:$4 sm:$0xff]   ;;  %p13002_p11 = scmp.ne.s32.totalorder %s9667_s21, %s13001_s22  ;;  %p13007_p13 = scmp.lt.s32.totalorder %s13001_s22, %s13001_s22 }
  0x55   :  { %578 = vmatpush1.bf16.msra.mxu0 %v11086_v21  ;;  %619 = vmatpush1.bf16.msra.mxu1 %v11105_v27  ;;  %v143_v15 = vsel %vm142_vm1, %v141_v6, %v140_v10  ;;  %v150_v21 = vrot.slane %v135_v9, 3  ;;  %vm151_vm4 = vcmask 1045509   ;;  %vm154_vm5 = vcmask 1046534   ;;  %v11159_v44 = vld [vmem:[#allocation11 + $0xec] ss:$16 sps:$4 sm:$0xff]  }
  0x56   :  { %579 = vmatprep.subr.bf16.mxu0 %v11088_v22  ;;  %620 = vmatprep.subr.bf16.mxu1 %v11108_v28  ;;  %v146_v18 = vsel %vm145_vm2, %v144_v7, %v143_v15  ;;  %v11136_v22 = vld [vmem:[#allocation8 + $0x124] ss:$16 sps:$4 sm:$0xff]   ;;  %v153_v27 = vrot.slane %v136_v17, 2  ;;  %v11140_v28 = vld [vmem:[#allocation8 + $0x120] ss:$16 sps:$4 sm:$0xff]   ;;  %vm157_vm6 = vcmask 1047559   ;;  %p13008_p0 = por %p13007_p13, %p13006_p12 }
  0x57   :  { %v149_v24 = vsel %vm148_vm3, %v147_v11, %v146_v18  ;;  %v11166_v45 = vld [vmem:[#allocation11 + $0xc0] ss:$16 sps:$4 sm:$0xff]   ;;  %v11157_v46 = vld [vmem:[#allocation11 + $0xe8] ss:$16 sps:$4 sm:$0xff]   ;;  %v11165_v47 = vld [vmem:[#allocation11 + $0xcc] ss:$16 sps:$4 sm:$0xff]  }
  0x58   :  { %v11163_v48 = vld [vmem:[#allocation11 + $0xc8] ss:$16 sps:$4 sm:$0xff]   ;;  %v11174_v51 = vld [vmem:[#allocation11 + $0xa4] ss:$16 sps:$4 sm:$0xff]   ;;  %v11172_v52 = vld [vmem:[#allocation11 + $0xa0] ss:$16 sps:$4 sm:$0xff]   ;;  %p13009_p1 = pnand %p13008_p0, %p13002_p11 }
  0x59   :  { %580 = vmatpush1.bf16.msra.mxu0 %v11092_v25  ;;  %621 = vmatpush1.bf16.msra.mxu1 %v11111_v31  ;;  %v137_v25 = vunpack.c.l.b16 %v118_v14  ;;  %v11150_v31 = vld [vmem:[#allocation8 + $0x148] ss:$16 sps:$4 sm:$0xff]   ;;  %v11169_v50 = vld [vmem:[#allocation11 + $0xa8] ss:$16 sps:$4 sm:$0xff]   ;;  %v11177_v53 = vld [vmem:[#allocation11 + $0x8c] ss:$16 sps:$4 sm:$0xff]  }
  0x5a   :  { %581 = vmatprep.subr.bf16.mxu0 %v11094_v26  ;;  %622 = vmatprep.subr.bf16.mxu1 %v11114_v32  ;;  %v11148_v26 = vld [vmem:[#allocation8 + $0x14c] ss:$16 sps:$4 sm:$0xff]   ;;  %v11180_v55 = vld [vmem:[#allocation11 + $0x84] ss:$16 sps:$4 sm:$0xff]   ;;  %v11178_v56 = vld [vmem:[#allocation11 + $0x80] ss:$16 sps:$4 sm:$0xff]  }
  0x5b   :  { %v156_v32 = vrot.slane %v137_v25, 1  ;;  %v11175_v54 = vld [vmem:[#allocation11 + $0x88] ss:$16 sps:$4 sm:$0xff]   ;;  %v11183_v57 = vld [vmem:[#allocation11 + $0x6c] ss:$16 sps:$4 sm:$0xff]   ;;  %vm13042_vm7 = vmmov 0  }
  0x5c   :  { %v11189_v60 = vld [vmem:[#allocation11 + $0x4c] ss:$16 sps:$4 sm:$0xff]   ;;  %v11187_v61 = vld [vmem:[#allocation11 + $0x48] ss:$16 sps:$4 sm:$0xff]   ;;  %v11192_v62 = vld [vmem:[#allocation11 + $0x44] ss:$16 sps:$4 sm:$0xff]  }
  0x5d   :  { %582 = vmatpush1.bf16.msra.mxu0 %v11098_v29  ;;  %623 = vmatpush1.bf16.msra.mxu1 %v11117_v35  ;;  %v152_v29 = vsel %vm151_vm4, %v150_v21, %v149_v24  ;;  %v11146_v35 = vld [vmem:[#allocation8 + $0x100] ss:$16 sps:$4 sm:$0xff]   ;;  %v11190_v63 = vld [vmem:[#allocation11 + $0x40] ss:$16 sps:$4 sm:$0xff]   ;;  %v11193_v2 = vld [vmem:[#allocation11 + $0x28] ss:$16 sps:$4 sm:$0xff]  }
  0x5e   :  { %583 = vmatprep.subr.bf16.mxu0 %v11100_v30  ;;  %624 = vmatprep.subr.bf16.mxu1 %v11120_v36  ;;  %v11142_v30 = vld [vmem:[#allocation8 + $0x104] ss:$16 sps:$4 sm:$0xff]   ;;  %v11153_v36 = vld [vmem:[#allocation8 + $0x128] ss:$16 sps:$4 sm:$0xff]   ;;  %v11201_v5 = vld [vmem:[#allocation11 + $0xc] ss:$16 sps:$4 sm:$0xff]  }
  0x5f   :  { %v11198_v3 = vld [vmem:[#allocation11 + $0x24] ss:$16 sps:$4 sm:$0xff]   ;;  %v11196_v4 = vld [vmem:[#allocation11 + $0x20] ss:$16 sps:$4 sm:$0xff]   ;;  %v11199_v6 = vld [vmem:[#allocation11 + $0x8] ss:$16 sps:$4 sm:$0xff]  }
  0x60   :  { %v11204_v7 = vld [vmem:[#allocation11 + $0x4] ss:$16 sps:$4 sm:$0xff]   ;;  %v11207_v9 = vld [vmem:[#allocation11 + $0x1ec] ss:$16 sps:$4 sm:$0xff]   ;;  %v11205_v10 = vld [vmem:[#allocation11 + $0x1e8] ss:$16 sps:$4 sm:$0xff]  }
  0x61   :  { %584 = vmatpush2.bf16.msra.mxu0 %v11104_v33  ;;  %625 = vmatpush2.bf16.msra.mxu1 %v11123_v39  ;;  %v11151_v33 = vld [vmem:[#allocation8 + $0x12c] ss:$16 sps:$4 sm:$0xff]   ;;  %v11210_v11 = vld [vmem:[#allocation11 + $0x1e4] ss:$16 sps:$4 sm:$0xff]   ;;  %v11219_v17 = vld [vmem:[#allocation11 + $0x1ac] ss:$16 sps:$4 sm:$0xff]  }
  0x62   :  { %585 = vmatprep.subr.bf16.mxu0 %v11106_v34  ;;  %626 = vmatprep.subr.bf16.mxu1 %v11126_v41  ;;  %v155_v34 = vsel %vm154_vm5, %v153_v27, %v152_v29  ;;  %v11154_v39 = vld [vmem:[#allocation8 + $0x10c] ss:$16 sps:$4 sm:$0xff]   ;;  %v11216_v15 = vld [vmem:[#allocation11 + $0x1c4] ss:$16 sps:$4 sm:$0xff]   ;;  %v11225_v21 = vld [vmem:[#allocation11 + $0x18c] ss:$16 sps:$4 sm:$0xff]  }
  0x63   :  { %v11211_v14 = vld [vmem:[#allocation11 + $0x1c8] ss:$16 sps:$4 sm:$0xff]   ;;  %v11226_v24 = vld [vmem:[#allocation11 + $0x180] ss:$16 sps:$4 sm:$0xff]   ;;  %v11231_v25 = vld [vmem:[#allocation11 + $0x16c] ss:$16 sps:$4 sm:$0xff]  }
  0x64   :  { %v11217_v18 = vld [vmem:[#allocation11 + $0x1a8] ss:$16 sps:$4 sm:$0xff]   ;;  %v11232_v27 = vld [vmem:[#allocation11 + $0x160] ss:$16 sps:$4 sm:$0xff]   ;;  %v11237_v29 = vld [vmem:[#allocation11 + $0x14c] ss:$16 sps:$4 sm:$0xff]  }
  0x65   :  { %586 = vmatpush2.bf16.msra.mxu0 %v11110_v37  ;;  %627 = vmatpush2.bf16.msra.mxu1 %v11129_v43  ;;  %v11162_v37 = vld [vmem:[#allocation11 + $0xe4] ss:$16 sps:$4 sm:$0xff]  }
  0x66   :  { %587 = vmatprep.subr.bf16.mxu0 %v11112_v38  ;;  %628 = vmatprep.subr.bf16.mxu1 %v11132_v49  ;;  %v158_v38 = vsel %vm157_vm6, %v156_v32, %v155_v34  ;;  %v11168_v43 = vld [vmem:[#allocation11 + $0xc4] ss:$16 sps:$4 sm:$0xff]   ;;  %v11171_v49 = vld [vmem:[#allocation11 + $0xac] ss:$16 sps:$4 sm:$0xff]   ;;  %v11238_v32 = vld [vmem:[#allocation11 + $0x140] ss:$16 sps:$4 sm:$0xff]  }
  0x67   :  { %v159_v41 = vpack.c.b16 %v158_v38, %v158_v38  ;;  %v11241_v34 = vld [vmem:[#allocation11 + $0x128] ss:$16 sps:$4 sm:$0xff]   ;;  %v11252_v38 = vld [vmem:[#allocation11 + $0x104] ss:$16 sps:$4 sm:$0xff]  }
  0x69   :  { %588 = vmatpush2.bf16.msra.mxu0 %v11116_v40  ;;  %629 = vmatpush2.bf16.msra.mxu1 %v11135_v1  ;;  %v11160_v40 = vld [vmem:[#allocation11 + $0xe0] ss:$16 sps:$4 sm:$0xff]   ;;  %v11195_v1 = vld [vmem:[#allocation11 + $0x2c] ss:$16 sps:$4 sm:$0xff]  }
  0x6a   :  { %589 = vmatprep.subr.bf16.mxu0 %v11118_v42  ;;  %630 = vmatprep.subr.bf16.mxu1 %v11138_v8  ;;  %v11156_v42 = vld [vmem:[#allocation8 + $0x108] ss:$16 sps:$4 sm:$0xff]   ;;  %v11202_v8 = vld [vmem:[#allocation11] ss:$16 sps:$4 sm:$0xff]  }
  0x6d   :  { %590 = vmatpush2.bf16.msra.mxu0 %v11122_v58  ;;  %631 = vmatpush2.bf16.msra.mxu1 %v11141_v16  ;;  %v11186_v58 = vld [vmem:[#allocation11 + $0x64] ss:$16 sps:$4 sm:$0xff]   ;;  %v11214_v16 = vld [vmem:[#allocation11 + $0x1c0] ss:$16 sps:$4 sm:$0xff]  }
  0x6e   :  { %591 = vmatprep.subr.bf16.mxu0 %v11124_v59  ;;  %632 = vmatprep.subr.bf16.mxu1 %v11144_v20  ;;  %v11184_v59 = vld [vmem:[#allocation11 + $0x60] ss:$16 sps:$4 sm:$0xff]  }
  0x6f   :  { %v11220_v20 = vld [vmem:[#allocation11 + $0x1a0] ss:$16 sps:$4 sm:$0xff]  }
  0x71   :  { %592 = vmatpush2.bf16.msra.mxu0 %v11128_v12  ;;  %633 = vmatpush2.bf16.msra.mxu1 %v11147_v23  ;;  %v11208_v12 = vld [vmem:[#allocation11 + $0x1e0] ss:$16 sps:$4 sm:$0xff]   ;;  %v11228_v23 = vld [vmem:[#allocation11 + $0x184] ss:$16 sps:$4 sm:$0xff]  }
  0x72   :  { %593 = vmatprep.subr.bf16.mxu0 %v11130_v13  ;;  %634 = vmatprep.subr.bf16.mxu1 %v11148_v26  ;;  %v11213_v13 = vld [vmem:[#allocation11 + $0x1cc] ss:$16 sps:$4 sm:$0xff]   ;;  %v11229_v26 = vld [vmem:[#allocation11 + $0x168] ss:$16 sps:$4 sm:$0xff]  }
  0x75   :  { %594 = vmatpush2.bf16.msra.mxu0 %v11134_v19  ;;  %635 = vmatpush2.bf16.msra.mxu1 %v11150_v31  ;;  %v11222_v19 = vld [vmem:[#allocation11 + $0x1a4] ss:$16 sps:$4 sm:$0xff]  }
  0x76   :  { %595 = vmatprep.subr.bf16.mxu0 %v11136_v22  ;;  %636 = vmatprep.subr.bf16.mxu1 %v11151_v33  ;;  %v11223_v22 = vld [vmem:[#allocation11 + $0x188] ss:$16 sps:$4 sm:$0xff]   ;;  %v11240_v31 = vld [vmem:[#allocation11 + $0x144] ss:$16 sps:$4 sm:$0xff]   ;;  %v11243_v33 = vld [vmem:[#allocation11 + $0x12c] ss:$16 sps:$4 sm:$0xff]  }
  0x79   :  { %596 = vmatpush2.bf16.msra.mxu0 %v11140_v28  ;;  %637 = vmatpush2.bf16.msra.mxu1 %v11153_v36  ;;  %v11234_v28 = vld [vmem:[#allocation11 + $0x164] ss:$16 sps:$4 sm:$0xff]   ;;  %v11244_v36 = vld [vmem:[#allocation11 + $0x120] ss:$16 sps:$4 sm:$0xff]  }
  0x7a   :  { %597 = vmatprep.subr.bf16.mxu0 %v11142_v30  ;;  %638 = vmatprep.subr.bf16.mxu1 %v11154_v39  ;;  %v11235_v30 = vld [vmem:[#allocation11 + $0x148] ss:$16 sps:$4 sm:$0xff]  }
  0x7b   :  { %v11247_v39 = vld [vmem:[#allocation11 + $0x108] ss:$16 sps:$4 sm:$0xff]  }
  0x7d   :  { %598 = vmatpush2.bf16.msra.mxu0 %v11146_v35  ;;  %639 = vmatpush2.bf16.msra.mxu1 %v11156_v42  ;;  %v11246_v35 = vld [vmem:[#allocation11 + $0x124] ss:$16 sps:$4 sm:$0xff]   ;;  %v227_v42 = vlaneseq }
  0x7e   :  { %1087 = vmatprep.subr.bf16.mxu0 %v11162_v37  ;;  %1128 = vmatprep.subr.bf16.mxu1 %v11159_v44  ;;  %v11249_v37 = vld [vmem:[#allocation11 + $0x10c] ss:$16 sps:$4 sm:$0xff]  }
  0x7f   :  { %v225_v44 = vld [vmem:[#allocation10] sm:$0xf] }
  0x80   :  { %600 = vmatmul.mubr.bf16.vlgmr.msra.gmra.mxu0 %v159_v41  ;;  %641 = vmatmul.mubr.bf16.vlgmr.msra.gmra.mxu1 %v159_v41  ;;  %v12869_v41 = vld [vmem:[#allocation8 + $0xe4] ss:$16 sps:$4 sm:$0xff]  }
  0x81   :  { %1088 = vmatpush1.bf16.msra.mxu0 %v11160_v40  ;;  %1119 = vmatprep.mubr.bf16.mxu0 %v13040_v0  ;;  %v11250_v40 = vld [vmem:[#allocation11 + $0x100] ss:$16 sps:$4 sm:$0xff]  }
  0x82   :  { %1089 = vmatprep.subr.bf16.mxu0 %v11168_v43  ;;  %1129 = vmatpush1.bf16.msra.mxu1 %v11157_v46  ;;  %v228_v43 = vshrl.u32 %v227_v42, 7  ;;  %v1307_v42 = vld [vmem:[#allocation5 + $0x21] sm:$0x1] }
  0x83   :  { %1160 = vmatprep.mubr.bf16.mxu1 %v13040_v0  ;;  %1130 = vmatprep.subr.bf16.mxu1 %v11165_v47  ;;  %v11181_v0 = vld [vmem:[#allocation11 + $0x68] ss:$16 sps:$4 sm:$0xff]  }
  0x84   :  { %v13112_v46 = vsub.s32 1, %v228_v43 }
  0x85   :  { %1090 = vmatpush1.bf16.msra.mxu0 %v11166_v45  ;;  %v13110_v45 = vsub.s32 0, %v228_v43 }
  0x86   :  { %1131 = vmatpush1.bf16.msra.mxu1 %v11163_v48  ;;  %1091 = vmatprep.subr.bf16.mxu0 %v11174_v51  ;;  %v234_v48 = vrot.slane %v225_v44, %v13112_v46 }
  0x87   :  { %1132 = vmatprep.subr.bf16.mxu1 %v11171_v49  ;;  %v230_v47 = vrot.slane %v225_v44, %v13110_v45 }
  0x89   :  { %1092 = vmatpush1.bf16.msra.mxu0 %v11172_v52 }
  0x8a   :  { %1133 = vmatpush1.bf16.msra.mxu1 %v11169_v50  ;;  %1093 = vmatprep.subr.bf16.mxu0 %v11180_v55  ;;  %v13116_v55 = vsub.s32 3, %v228_v43 }
  0x8b   :  { %1134 = vmatprep.subr.bf16.mxu1 %v11177_v53 }
  0x8d   :  { %1094 = vmatpush1.bf16.msra.mxu0 %v11178_v56 }
  0x8e   :  { %1135 = vmatpush1.bf16.msra.mxu1 %v11175_v54  ;;  %1095 = vmatprep.subr.bf16.mxu0 %v11186_v58  ;;  %v13118_v58 = vsub.s32 2, %v228_v43 }
  0x8f   :  { %1136 = vmatprep.subr.bf16.mxu1 %v11183_v57 }
  0x91   :  { %1096 = vmatpush1.bf16.msra.mxu0 %v11184_v59 }
  0x92   :  { %1137 = vmatpush1.bf16.msra.mxu1 %v11181_v0  ;;  %1097 = vmatprep.subr.bf16.mxu0 %v11192_v62  ;;  %v238_v62 = vrot.slane %v225_v44, %v13118_v58 }
  0x93   :  { %1138 = vmatprep.subr.bf16.mxu1 %v11189_v60  ;;  %v242_v60 = vrot.slane %v225_v44, %v13116_v55 }
  0x95   :  { %1098 = vmatpush1.bf16.msra.mxu0 %v11190_v63 }
  0x96   :  { %1139 = vmatpush1.bf16.msra.mxu1 %v11187_v61  ;;  %1099 = vmatprep.subr.bf16.mxu0 %v11198_v3 }
  0x97   :  { %1140 = vmatprep.subr.bf16.mxu1 %v11195_v1 }
  0x99   :  { %1100 = vmatpush1.bf16.msra.mxu0 %v11196_v4 }
  0x9a   :  { %1141 = vmatpush1.bf16.msra.mxu1 %v11193_v2  ;;  %1101 = vmatprep.subr.bf16.mxu0 %v11204_v7 }
  0x9b   :  { %1142 = vmatprep.subr.bf16.mxu1 %v11201_v5 }
  0x9d   :  { %1102 = vmatpush1.bf16.msra.mxu0 %v11202_v8 }
  0x9e   :  { %1143 = vmatpush1.bf16.msra.mxu1 %v11199_v6  ;;  %1103 = vmatprep.subr.bf16.mxu0 %v11210_v11 }
  0x9f   :  { %1144 = vmatprep.subr.bf16.mxu1 %v11207_v9 }
  0xa1   :  { %1104 = vmatpush2.bf16.msra.mxu0 %v11208_v12 }
  0xa2   :  { %1145 = vmatpush2.bf16.msra.mxu1 %v11205_v10  ;;  %1105 = vmatprep.subr.bf16.mxu0 %v11216_v15 }
  0xa3   :  { %1146 = vmatprep.subr.bf16.mxu1 %v11213_v13 }
  0xa5   :  { %1106 = vmatpush2.bf16.msra.mxu0 %v11214_v16 }
  0xa6   :  { %1147 = vmatpush2.bf16.msra.mxu1 %v11211_v14  ;;  %1107 = vmatprep.subr.bf16.mxu0 %v11222_v19 }
  0xa7   :  { %1148 = vmatprep.subr.bf16.mxu1 %v11219_v17 }
  0xa9   :  { %1108 = vmatpush2.bf16.msra.mxu0 %v11220_v20  ;;  %v12870_v20 = vld [vmem:[#allocation8 + $0xe0] ss:$16 sps:$4 sm:$0xff]  }
  0xaa   :  { %1149 = vmatpush2.bf16.msra.mxu1 %v11217_v18  ;;  %1109 = vmatprep.subr.bf16.mxu0 %v11228_v23  ;;  %v12873_v23 = vld [vmem:[#allocation8 + $0xa4] ss:$16 sps:$4 sm:$0xff]  }
  0xab   :  { %1150 = vmatprep.subr.bf16.mxu1 %v11225_v21  ;;  %v12871_v21 = vld [vmem:[#allocation8 + $0xc4] ss:$16 sps:$4 sm:$0xff]  }
  0xad   :  { %1110 = vmatpush2.bf16.msra.mxu0 %v11226_v24  ;;  %v12874_v24 = vld [vmem:[#allocation8 + $0xa0] ss:$16 sps:$4 sm:$0xff]  }
  0xae   :  { %1151 = vmatpush2.bf16.msra.mxu1 %v11223_v22  ;;  %1111 = vmatprep.subr.bf16.mxu0 %v11234_v28  ;;  %v12872_v22 = vld [vmem:[#allocation8 + $0xc0] ss:$16 sps:$4 sm:$0xff]  }
  0xaf   :  { %1152 = vmatprep.subr.bf16.mxu1 %v11231_v25  ;;  %v12875_v25 = vld [vmem:[#allocation8 + $0x84] ss:$16 sps:$4 sm:$0xff]   ;;  %v12878_v28 = vld [vmem:[#allocation8 + $0x60] ss:$16 sps:$4 sm:$0xff]  }
  0xb1   :  { %1112 = vmatpush2.bf16.msra.mxu0 %v11232_v27  ;;  %v12877_v27 = vld [vmem:[#allocation8 + $0x64] ss:$16 sps:$4 sm:$0xff]  }
  0xb2   :  { %1153 = vmatpush2.bf16.msra.mxu1 %v11229_v26  ;;  %1113 = vmatprep.subr.bf16.mxu0 %v11240_v31  ;;  %v12876_v26 = vld [vmem:[#allocation8 + $0x80] ss:$16 sps:$4 sm:$0xff]   ;;  %v12881_v31 = vld [vmem:[#allocation8 + $0x24] ss:$16 sps:$4 sm:$0xff]  }
  0xb3   :  { %1154 = vmatprep.subr.bf16.mxu1 %v11237_v29  ;;  %v12879_v29 = vld [vmem:[#allocation8 + $0x44] ss:$16 sps:$4 sm:$0xff]  }
  0xb5   :  { %1114 = vmatpush2.bf16.msra.mxu0 %v11238_v32  ;;  %v1304_v32 = vld [vmem:[#allocation5 + $0x9] sm:$0x1] }
  0xb6   :  { %1155 = vmatpush2.bf16.msra.mxu1 %v11235_v30  ;;  %1115 = vmatprep.subr.bf16.mxu0 %v11246_v35  ;;  %v12880_v30 = vld [vmem:[#allocation8 + $0x40] ss:$16 sps:$4 sm:$0xff]   ;;  %v12883_v35 = vld [vmem:[#allocation8 + $0x4] ss:$16 sps:$4 sm:$0xff]  }
  0xb7   :  { %1156 = vmatprep.subr.bf16.mxu1 %v11243_v33  ;;  %v12882_v33 = vld [vmem:[#allocation8 + $0x20] ss:$16 sps:$4 sm:$0xff]  }
  0xb9   :  { %1116 = vmatpush2.bf16.msra.mxu0 %v11244_v36  ;;  %v1303_v36 = vld [vmem:[#allocation5 + $0x1] sm:$0x1] }
  0xba   :  { %1157 = vmatpush2.bf16.msra.mxu1 %v11241_v34  ;;  %1117 = vmatprep.subr.bf16.mxu0 %v11252_v38  ;;  %v1305_v34 = vld [vmem:[#allocation5 + $0x11] sm:$0x1]  ;;  %v1306_v38 = vld [vmem:[#allocation5 + $0x19] sm:$0x1]  ;;  %v1311_v43 = vpack.c.bf16 %v1303_v36, %v1303_v36  ;;  %v11256_v36 = vld [vmem:[#allocation13 + $0x20] sm:$0xff]  }
  0xbb   :  { %1158 = vmatprep.subr.bf16.mxu1 %v11249_v37  ;;  %v1312_v37 = vpack.c.bf16 %v1304_v32, %v1304_v32  ;;  %v11253_v32 = vld [vmem:[#allocation13 + $0x38] sm:$0xff]  }
  0xbd   :  { %1118 = vmatpush2.bf16.msra.mxu0 %v11250_v40  ;;  %v12885_v40 = vld [vmem:[#allocation8 + $0x1e4] ss:$16 sps:$4 sm:$0xff]   ;;  %v1331_v44 = vunpack.c.l.b16 %v1312_v37  ;;  %v11257_v37 = vld [vmem:[#allocation13 + $0x18] sm:$0xff]  }
  0xbe   :  { %1159 = vmatpush2.bf16.msra.mxu1 %v11247_v39  ;;  %v12884_v39 = vld [vmem:[#allocation8] ss:$16 sps:$4 sm:$0xff]  }
  0xbf   :  { %1760 = vmatprep.subr.bf16.mxu1 %v12869_v41  ;;  %v1313_v41 = vpack.c.bf16 %v1305_v34, %v1305_v34  ;;  %v11254_v34 = vld [vmem:[#allocation13 + $0x30] sm:$0xff]  }
 0x140   :  { %v601_v49 = vpop.f32.mrf.mxu0  ;;  %v642_v57 = vpop.f32.mrf.mxu1 }
 0x141   :  { %v602_v50 = vadd.f32 %v601_v49, %v230_v47  ;;  %v643_v2 = vadd.f32 %v642_v57, %v238_v62  ;;  %v12886_v47 = vld [vmem:[#allocation8 + $0x1e0] ss:$16 sps:$4 sm:$0xff]   ;;  %v12887_v49 = vld [vmem:[#allocation8 + $0x1c4] ss:$16 sps:$4 sm:$0xff]  }
 0x142   :  { %v603_v51 = vpop.f32.mrf.mxu0  ;;  %v644_v59 = vpop.f32.mrf.mxu1  ;;  %v1309_v57 = vld [vmem:[#allocation5 + $0x31] sm:$0x1] }
 0x143   :  { %v9741_v52 = vmul.f32 -1.442695, %v602_v50  ;;  %v604_v53 = vadd.f32 %v603_v51, %v234_v48  ;;  %v645_v1 = vadd.f32 %v644_v59, %v242_v60  ;;  %v1314_v48 = vpack.c.bf16 %v1306_v38, %v1306_v38  ;;  %v1308_v50 = vld [vmem:[#allocation5 + $0x29] sm:$0x1]  ;;  %v12889_v59 = vld [vmem:[#allocation8 + $0x1a4] ss:$16 sps:$4 sm:$0xff]  }
 0x144   :  { %v605_v54 = vpop.f32.mrf.mxu0  ;;  %v646_v61 = vpop.f32.mrf.mxu1  ;;  %v1332_v51 = vunpack.c.l.b16 %v1313_v41  ;;  %v11258_v38 = vld [vmem:[#allocation13 + $0x10] sm:$0xff]   ;;  %v11263_v41 = vld [vmem:[#allocation8 + $0xec] ss:$16 sps:$4 sm:$0xff]  }
 0x145   :  { %12613 = vpow2.f32 %v9741_v52  ;;  %v9742_v56 = vmul.f32 -1.442695, %v604_v53  ;;  %v9743_v3 = vmul.f32 -1.442695, %v645_v1  ;;  %v1330_v52 = vunpack.c.l.b16 %v1311_v43 }
 0x146   :  { %v606_v0 = vpop.f32.mrf.mxu0  ;;  %v647_v63 = vpop.f32.mrf.mxu1  ;;  %v1338_v53 = vrot.slane %v1331_v44, 7  ;;  %v1315_v54 = vpack.c.bf16 %v1307_v42, %v1307_v42  ;;  %v1340_v60 = vrot.slane %v1332_v51, 6  ;;  %v1316_v61 = vpack.c.bf16 %v1308_v50, %v1308_v50  ;;  %v745_v42 = vld [vmem:[%s13569_s4] sm:$0xf] }
 0x147   :  { %12615 = vpow2.f32 %v9742_v56  ;;  %v12888_v56 = vld [vmem:[#allocation8 + $0x1c0] ss:$16 sps:$4 sm:$0xff]   ;;  %v1333_v0 = vunpack.c.l.b16 %v1314_v48  ;;  %v1310_v63 = vld [vmem:[#allocation5 + $0x39] sm:$0x1]  ;;  %v750_v43 = vrot.slane %v745_v42, %v13110_v45  ;;  %v754_v44 = vrot.slane %v745_v42, %v13112_v46 }
 0x148   :  { %12617 = vtanh.f32 %v643_v2  ;;  %v1339_v62 = vsel %vm139_vm0, %v1338_v53, %v1330_v52  ;;  %v1334_v1 = vunpack.c.l.b16 %v1315_v54  ;;  %v12890_v2 = vld [vmem:[#allocation8 + $0x1a0] ss:$16 sps:$4 sm:$0xff]  }
 0x149   :  { %12619 = vpow2.f32 %v9743_v3  ;;  %v1342_v3 = vrot.slane %v1333_v0, 5 }
 0x152   :  { %v12614_v4 = vpop.eup %12613 }
 0x153   :  { %v652_v5 = vadd.f32 1.0, %v12614_v4  ;;  %v12891_v4 = vld [vmem:[#allocation8 + $0x184] ss:$16 sps:$4 sm:$0xff]  }
 0x154   :  { %v12616_v6 = vpop.eup %12615 }
 0x155   :  { %12621 = vrcp.f32 %v652_v5  ;;  %v658_v7 = vadd.f32 1.0, %v12616_v6  ;;  %v12618_v8 = vpop.eup %12617  ;;  %v1317_v5 = vpack.c.bf16 %v1309_v57, %v1309_v57  ;;  %v1341_v6 = vsel %vm142_vm1, %v1340_v60, %v1339_v62 }
 0x156   :  { %v12620_v9 = vpop.eup %12619  ;;  %v762_v60 = vrot.slane %v745_v42, %v13116_v55  ;;  %v758_v62 = vrot.slane %v745_v42, %v13118_v58  ;;  %v11290_v42 = vld [vmem:[#allocation8 + $0x1cc] ss:$16 sps:$4 sm:$0xff]  }
 0x157   :  { %12623 = vrcp.f32 %v658_v7  ;;  %v665_v12 = vadd.f32 1.0, %v12620_v9  ;;  %v1335_v7 = vunpack.c.l.b16 %v1316_v61  ;;  %v12892_v9 = vld [vmem:[#allocation8 + $0x180] ss:$16 sps:$4 sm:$0xff]  }
 0x159   :  { %12625 = vrcp.f32 %v665_v12  ;;  %v12893_v12 = vld [vmem:[#allocation8 + $0x164] ss:$16 sps:$4 sm:$0xff]  }
 0x162   :  { %v12622_v10 = vpop.eup %12621 }
 0x163   :  { %v669_v14 = vmul.f32 %v12622_v10, %v12618_v8  ;;  %v1344_v8 = vrot.slane %v1334_v1, 4  ;;  %v1318_v10 = vpack.c.bf16 %v1310_v63, %v1310_v63 }
 0x164   :  { %v12624_v11 = vpop.eup %12623 }
 0x165   :  { %v668_v13 = vmul.f32 0.0, %v12624_v11  ;;  %v1343_v11 = vsel %vm145_vm2, %v1342_v3, %v1341_v6 }
 0x166   :  { %v12626_v16 = vpop.eup %12625 }
 0x167   :  { %v13122_v15 = vadd.f32 %v669_v14, %v668_v13  ;;  %v1336_v13 = vunpack.c.l.b16 %v1317_v5  ;;  %v1346_v14 = vrot.slane %v1335_v7, 3 }
 0x169   :  { %12627 = vtanh.f32 %v13122_v15 }
 0x176   :  { %v12628_v17 = vpop.eup %12627 }
 0x177   :  { %v672_v18 = vmul.f32 %v12628_v17, %v12626_v16  ;;  %v1345_v16 = vsel %vm148_vm3, %v1344_v8, %v1343_v11  ;;  %v12894_v17 = vld [vmem:[#allocation8 + $0x160] ss:$16 sps:$4 sm:$0xff]  }
 0x179   :  { %v13125_v19 = vpack.c.bf16 %v672_v18, %v672_v18  ;;  %v1337_v18 = vunpack.c.l.b16 %v1318_v10 }
 0x17b   :  { %1120 = vmatmul.mubr.bf16.vlgmr.msra.gmra.mxu0 %v13125_v19  ;;  %1161 = vmatmul.mubr.bf16.vlgmr.msra.gmra.mxu1 %v13125_v19 }
 0x17c   :  { %1761 = vmatpush1.bf16.msra.mxu1 %v12870_v20  ;;  %1792 = vmatprep.mubr.bf16.mxu1 %v13125_v19  ;;  %v12895_v20 = vld [vmem:[#allocation8 + $0x144] ss:$16 sps:$4 sm:$0xff]  }
 0x17d   :  { %1762 = vmatprep.subr.bf16.mxu1 %v12871_v21  ;;  %v1348_v21 = vrot.slane %v1336_v13, 2 }
 0x180   :  { %1763 = vmatpush1.bf16.msra.mxu1 %v12872_v22  ;;  %v1347_v22 = vsel %vm151_vm4, %v1346_v14, %v1345_v16 }
 0x181   :  { %1764 = vmatprep.subr.bf16.mxu1 %v12873_v23  ;;  %v12896_v23 = vld [vmem:[#allocation8 + $0x140] ss:$16 sps:$4 sm:$0xff]  }
 0x184   :  { %1765 = vmatpush1.bf16.msra.mxu1 %v12874_v24  ;;  %v1350_v24 = vrot.slane %v1337_v18, 1  ;;  %v11261_v18 = vld [vmem:[#allocation8 + $0xe8] ss:$16 sps:$4 sm:$0xff]  }
 0x185   :  { %1766 = vmatprep.subr.bf16.mxu1 %v12875_v25  ;;  %v12897_v25 = vld [vmem:[#allocation8 + $0x124] ss:$16 sps:$4 sm:$0xff]  }
 0x188   :  { %1767 = vmatpush1.bf16.msra.mxu1 %v12876_v26  ;;  %v1349_v26 = vsel %vm154_vm5, %v1348_v21, %v1347_v22  ;;  %v11266_v21 = vld [vmem:[#allocation8 + $0xcc] ss:$16 sps:$4 sm:$0xff]   ;;  %v11264_v22 = vld [vmem:[#allocation8 + $0xc8] ss:$16 sps:$4 sm:$0xff]  }
 0x189   :  { %1768 = vmatprep.subr.bf16.mxu1 %v12877_v27  ;;  %v12898_v27 = vld [vmem:[#allocation8 + $0x120] ss:$16 sps:$4 sm:$0xff]  }
 0x18c   :  { %1769 = vmatpush1.bf16.msra.mxu1 %v12878_v28  ;;  %v1351_v28 = vsel %vm157_vm6, %v1350_v24, %v1349_v26  ;;  %v11272_v26 = vld [vmem:[#allocation8 + $0x8c] ss:$16 sps:$4 sm:$0xff]  }
 0x18d   :  { %1770 = vmatprep.subr.bf16.mxu1 %v12879_v29  ;;  %v12899_v29 = vld [vmem:[#allocation8 + $0x104] ss:$16 sps:$4 sm:$0xff]  }
 0x190   :  { %1771 = vmatpush1.bf16.msra.mxu1 %v12880_v30  ;;  %v13137_v30 = vpack.c.b16 %v1351_v28, %v1351_v28  ;;  %v11270_v28 = vld [vmem:[#allocation8 + $0x88] ss:$16 sps:$4 sm:$0xff]  }
 0x191   :  { %1772 = vmatprep.subr.bf16.mxu1 %v12881_v31  ;;  %v12900_v31 = vld [vmem:[#allocation8 + $0x100] ss:$16 sps:$4 sm:$0xff]  }
 0x194   :  { %1773 = vmatpush1.bf16.msra.mxu1 %v12882_v33  ;;  %v13041_v33 = vmov 0.0  }
 0x195   :  { %1774 = vmatprep.subr.bf16.mxu1 %v12883_v35  ;;  %10886 = vmatprep.subr.bf16.mxu0 %v13041_v33  ;;  %v11255_v35 = vld [vmem:[#allocation13 + $0x28] sm:$0xff]  }
 0x196   :  { %10887 = vmatpush3.bf16.msra.mxu0 %v11253_v32  ;;  %10902 = vmatprep.mubr.msk.bf16.mxu0 %vm13042_vm7, %v13041_v33 }
 0x197   :  { %10888 = vmatprep.subr.bf16.mxu0 %v13041_v33 }
 0x198   :  { %1775 = vmatpush1.bf16.msra.mxu1 %v12884_v39  ;;  %v11259_v39 = vld [vmem:[#allocation13 + $0x8] sm:$0xff]  }
 0x199   :  { %1776 = vmatprep.subr.bf16.mxu1 %v12885_v40  ;;  %v11260_v40 = vld [vmem:[#allocation13] sm:$0xff]  }
 0x19a   :  { %10889 = vmatpush3.bf16.msra.mxu0 %v11254_v34  ;;  %v11273_v34 = vld [vmem:[#allocation8 + $0x68] ss:$16 sps:$4 sm:$0xff]  }
 0x19b   :  { %10890 = vmatprep.subr.bf16.mxu0 %v13041_v33 }
 0x19c   :  { %1777 = vmatpush2.bf16.msra.mxu1 %v12886_v47 }
 0x19d   :  { %1778 = vmatprep.subr.bf16.mxu1 %v12887_v49 }
 0x19e   :  { %10891 = vmatpush3.bf16.msra.mxu0 %v11255_v35  ;;  %v11276_v35 = vld [vmem:[#allocation8 + $0x48] ss:$16 sps:$4 sm:$0xff]  }
 0x19f   :  { %10892 = vmatprep.subr.bf16.mxu0 %v13041_v33 }
 0x1a0   :  { %1779 = vmatpush2.bf16.msra.mxu1 %v12888_v56 }
 0x1a1   :  { %1780 = vmatprep.subr.bf16.mxu1 %v12889_v59 }
 0x1a2   :  { %10893 = vmatpush3.bf16.msra.mxu0 %v11256_v36  ;;  %v11281_v36 = vld [vmem:[#allocation8 + $0x2c] ss:$16 sps:$4 sm:$0xff]  }
 0x1a3   :  { %10894 = vmatprep.subr.bf16.mxu0 %v13041_v33 }
 0x1a4   :  { %1781 = vmatpush2.bf16.msra.mxu1 %v12890_v2 }
 0x1a5   :  { %1782 = vmatprep.subr.bf16.mxu1 %v12891_v4 }
 0x1a6   :  { %10895 = vmatpush3.bf16.msra.mxu0 %v11257_v37  ;;  %v11279_v37 = vld [vmem:[#allocation8 + $0x28] ss:$16 sps:$4 sm:$0xff]  }
 0x1a7   :  { %10896 = vmatprep.subr.bf16.mxu0 %v13041_v33 }
 0x1a8   :  { %1783 = vmatpush2.bf16.msra.mxu1 %v12892_v9 }
 0x1a9   :  { %1784 = vmatprep.subr.bf16.mxu1 %v12893_v12 }
 0x1aa   :  { %10897 = vmatpush3.bf16.msra.mxu0 %v11258_v38  ;;  %v11284_v38 = vld [vmem:[#allocation8 + $0xc] ss:$16 sps:$4 sm:$0xff]  }
 0x1ab   :  { %10898 = vmatprep.subr.bf16.mxu0 %v13041_v33 }
 0x1ac   :  { %1785 = vmatpush2.bf16.msra.mxu1 %v12894_v17 }
 0x1ad   :  { %1786 = vmatprep.subr.bf16.mxu1 %v12895_v20 }
 0x1ae   :  { %10899 = vmatpush3.bf16.msra.mxu0 %v11259_v39  ;;  %v11282_v39 = vld [vmem:[#allocation8 + $0x8] ss:$16 sps:$4 sm:$0xff]  }
 0x1af   :  { %10900 = vmatprep.subr.bf16.mxu0 %v13041_v33 }
 0x1b0   :  { %1787 = vmatpush2.bf16.msra.mxu1 %v12896_v23  ;;  %v11269_v23 = vld [vmem:[#allocation8 + $0xac] ss:$16 sps:$4 sm:$0xff]  }
 0x1b1   :  { %1788 = vmatprep.subr.bf16.mxu1 %v12897_v25  ;;  %v11267_v25 = vld [vmem:[#allocation8 + $0xa8] ss:$16 sps:$4 sm:$0xff]  }
 0x1b2   :  { %10901 = vmatpush3.bf16.msra.mxu0 %v11260_v40  ;;  %v11287_v40 = vld [vmem:[#allocation8 + $0x1ec] ss:$16 sps:$4 sm:$0xff]  }
 0x1b3   :  { %1801 = vmatprep.subr.bf16.mxu0 %v11263_v41  ;;  %v11285_v41 = vld [vmem:[#allocation8 + $0x1e8] ss:$16 sps:$4 sm:$0xff]  }
 0x1b4   :  { %1789 = vmatpush2.bf16.msra.mxu1 %v12898_v27 }
 0x1b5   :  { %1790 = vmatprep.subr.bf16.mxu1 %v12899_v29 }
 0x1b8   :  { %1791 = vmatpush2.bf16.msra.mxu1 %v12900_v31  ;;  %v11275_v31 = vld [vmem:[#allocation8 + $0x6c] ss:$16 sps:$4 sm:$0xff]  }
 0x1bb   :  { %1793 = vmatmul.mubr.bf16.vlgmr.msra.gmra.mxu1 %v13137_v30 }
 0x23b   :  { %v1121_v47 = vpop.f32.mrf.mxu0  ;;  %v1162_v48 = vpop.f32.mrf.mxu1 }
 0x23c   :  { %v1122_v49 = vadd.f32 %v1121_v47, %v750_v43  ;;  %v1163_v2 = vadd.f32 %v1162_v48, %v758_v62  ;;  %v11288_v43 = vld [vmem:[#allocation8 + $0x1c8] ss:$16 sps:$4 sm:$0xff]   ;;  %v11296_v48 = vld [vmem:[#allocation8 + $0x18c] ss:$16 sps:$4 sm:$0xff]  }
 0x23d   :  { %v1123_v50 = vpop.f32.mrf.mxu0  ;;  %v1164_v51 = vpop.f32.mrf.mxu1  ;;  %v11291_v47 = vld [vmem:[#allocation8 + $0x1a8] ss:$16 sps:$4 sm:$0xff]  }
 0x23e   :  { %v9808_v52 = vmul.f32 -1.442695, %v1122_v49  ;;  %v1124_v53 = vadd.f32 %v1123_v50, %v754_v44  ;;  %v1165_v61 = vadd.f32 %v1164_v51, %v762_v60  ;;  %v11293_v44 = vld [vmem:[#allocation8 + $0x1ac] ss:$16 sps:$4 sm:$0xff]   ;;  %v11294_v49 = vld [vmem:[#allocation8 + $0x188] ss:$16 sps:$4 sm:$0xff]  }
 0x23f   :  { %v1125_v54 = vpop.f32.mrf.mxu0  ;;  %v1166_v56 = vpop.f32.mrf.mxu1  ;;  %v11299_v50 = vld [vmem:[#allocation8 + $0x16c] ss:$16 sps:$4 sm:$0xff]   ;;  %v11297_v51 = vld [vmem:[#allocation8 + $0x168] ss:$16 sps:$4 sm:$0xff]   ;;  %v11311_v60 = vld [vmem:[#allocation11 + $0xec] ss:$16 sps:$4 sm:$0xff]  }
 0x240   :  { %12629 = vpow2.f32 %v9808_v52  ;;  %v9809_v57 = vmul.f32 -1.442695, %v1124_v53  ;;  %v9810_v63 = vmul.f32 -1.442695, %v1165_v61  ;;  %v11302_v52 = vld [vmem:[#allocation8 + $0x14c] ss:$16 sps:$4 sm:$0xff]  }
 0x241   :  { %v1126_v0 = vpop.f32.mrf.mxu0  ;;  %v1167_v59 = vpop.f32.mrf.mxu1  ;;  %v11300_v53 = vld [vmem:[#allocation8 + $0x148] ss:$16 sps:$4 sm:$0xff]   ;;  %v11305_v54 = vld [vmem:[#allocation8 + $0x12c] ss:$16 sps:$4 sm:$0xff]   ;;  %v11312_v61 = vld [vmem:[#allocation11 + $0xe0] ss:$16 sps:$4 sm:$0xff]  }
 0x242   :  { %12631 = vpow2.f32 %v9809_v57  ;;  %v11303_v56 = vld [vmem:[#allocation8 + $0x128] ss:$16 sps:$4 sm:$0xff]   ;;  %v11308_v57 = vld [vmem:[#allocation8 + $0x10c] ss:$16 sps:$4 sm:$0xff]  }
 0x243   :  { %12633 = vpow2.f32 %v9810_v63  ;;  %v11306_v0 = vld [vmem:[#allocation8 + $0x108] ss:$16 sps:$4 sm:$0xff]   ;;  %v11309_v59 = vld [vmem:[#allocation11 + $0xe8] ss:$16 sps:$4 sm:$0xff]   ;;  %v11317_v63 = vld [vmem:[#allocation11 + $0xcc] ss:$16 sps:$4 sm:$0xff]  }
 0x244   :  { %v11314_v62 = vld [vmem:[#allocation11 + $0xe4] ss:$16 sps:$4 sm:$0xff]  }
 0x245   :  { %2278 = vmatprep.subr.bf16.mxu1 %v11314_v62  ;;  %v11393_v62 = vld [vmem:[#allocation11 + $0x128] ss:$16 sps:$4 sm:$0xff]  }
 0x246   :  { %2279 = vmatpush1.bf16.msra.mxu1 %v11312_v61  ;;  %v11398_v61 = vld [vmem:[#allocation11 + $0x124] ss:$16 sps:$4 sm:$0xff]  }
 0x24d   :  { %v12630_v1 = vpop.eup %12629 }
 0x24e   :  { %v1172_v3 = vadd.f32 1.0, %v12630_v1  ;;  %v11320_v1 = vld [vmem:[#allocation11 + $0xc4] ss:$16 sps:$4 sm:$0xff]  }
 0x24f   :  { %v12632_v4 = vpop.eup %12631  ;;  %2280 = vmatprep.subr.bf16.mxu1 %v11320_v1  ;;  %v11401_v1 = vld [vmem:[#allocation11 + $0x10c] ss:$16 sps:$4 sm:$0xff]  }
 0x250   :  { %12635 = vrcp.f32 %v1172_v3  ;;  %v1178_v5 = vadd.f32 1.0, %v12632_v4  ;;  %v12634_v6 = vpop.eup %12633  ;;  %v11318_v3 = vld [vmem:[#allocation11 + $0xc0] ss:$16 sps:$4 sm:$0xff]   ;;  %v11323_v4 = vld [vmem:[#allocation11 + $0xac] ss:$16 sps:$4 sm:$0xff]  }
 0x251   :  { %12637 = vtanh.f32 %v1163_v2  ;;  %v1185_v10 = vadd.f32 1.0, %v12634_v6  ;;  %v11315_v2 = vld [vmem:[#allocation11 + $0xc8] ss:$16 sps:$4 sm:$0xff]   ;;  %2281 = vmatpush1.bf16.msra.mxu1 %v11318_v3  ;;  %v11324_v6 = vld [vmem:[#allocation11 + $0xa0] ss:$16 sps:$4 sm:$0xff]  }
 0x252   :  { %12639 = vrcp.f32 %v1178_v5  ;;  %v11326_v5 = vld [vmem:[#allocation11 + $0xa4] ss:$16 sps:$4 sm:$0xff]   ;;  %v11399_v3 = vld [vmem:[#allocation11 + $0x108] ss:$16 sps:$4 sm:$0xff]  }
 0x253   :  { %12641 = vrcp.f32 %v1185_v10  ;;  %2282 = vmatprep.subr.bf16.mxu1 %v11326_v5  ;;  %v11330_v10 = vld [vmem:[#allocation11 + $0x80] ss:$16 sps:$4 sm:$0xff]  }
 0x254   :  { %v11407_v5 = vld [vmem:[#allocation8 + $0xe4] ss:$16 sps:$4 sm:$0xff]  }
 0x255   :  { %2283 = vmatpush1.bf16.msra.mxu1 %v11324_v6 }
 0x25d   :  { %v12636_v7 = vpop.eup %12635 }
 0x25e   :  { %v12638_v8 = vpop.eup %12637 }
 0x25f   :  { %v12640_v9 = vpop.eup %12639  ;;  %v1189_v12 = vmul.f32 %v12638_v8, %v12636_v7  ;;  %v11329_v7 = vld [vmem:[#allocation11 + $0x8c] ss:$16 sps:$4 sm:$0xff]   ;;  %v11332_v8 = vld [vmem:[#allocation11 + $0x84] ss:$16 sps:$4 sm:$0xff]  }
 0x260   :  { %v1188_v11 = vmul.f32 0.0, %v12640_v9  ;;  %v12642_v14 = vpop.eup %12641  ;;  %v11327_v9 = vld [vmem:[#allocation11 + $0x88] ss:$16 sps:$4 sm:$0xff]   ;;  %2284 = vmatprep.subr.bf16.mxu1 %v11332_v8 }
 0x261   :  { %2285 = vmatpush1.bf16.msra.mxu1 %v11330_v10 }
 0x262   :  { %v13157_v13 = vadd.f32 %v1189_v12, %v1188_v11  ;;  %v11335_v11 = vld [vmem:[#allocation11 + $0x6c] ss:$16 sps:$4 sm:$0xff]   ;;  %v11338_v12 = vld [vmem:[#allocation11 + $0x64] ss:$16 sps:$4 sm:$0xff]  }
 0x263   :  { %2286 = vmatprep.subr.bf16.mxu1 %v11338_v12 }
 0x264   :  { %12643 = vtanh.f32 %v13157_v13 }
 0x271   :  { %v12644_v16 = vpop.eup %12643 }
 0x272   :  { %v1192_v17 = vmul.f32 %v12644_v16, %v12642_v14  ;;  %v11333_v14 = vld [vmem:[#allocation11 + $0x68] ss:$16 sps:$4 sm:$0xff]   ;;  %v11336_v16 = vld [vmem:[#allocation11 + $0x60] ss:$16 sps:$4 sm:$0xff]  }
 0x273   :  { %2287 = vmatpush1.bf16.msra.mxu1 %v11336_v16 }
 0x274   :  { %v13160_v20 = vpack.c.bf16 %v1192_v17, %v1192_v17  ;;  %v11341_v17 = vld [vmem:[#allocation11 + $0x4c] ss:$16 sps:$4 sm:$0xff]  }
 0x276   :  { %10903 = vmatmul.mubr.bf16.vlgmr.msra.gmra.mxu0 %v13160_v20  ;;  %2310 = vmatprep.mubr.bf16.mxu1 %v13160_v20 }
 0x277   :  { %1802 = vmatpush1.bf16.msra.mxu0 %v11261_v18  ;;  %1833 = vmatprep.mubr.bf16.mxu0 %v13125_v19  ;;  %v11278_v19 = vld [vmem:[#allocation8 + $0x4c] ss:$16 sps:$4 sm:$0xff]   ;;  %v11344_v18 = vld [vmem:[#allocation11 + $0x44] ss:$16 sps:$4 sm:$0xff]  }
 0x278   :  { %1803 = vmatprep.subr.bf16.mxu0 %v11266_v21  ;;  %v11342_v21 = vld [vmem:[#allocation11 + $0x40] ss:$16 sps:$4 sm:$0xff]   ;;  %2288 = vmatprep.subr.bf16.mxu1 %v11344_v18 }
 0x279   :  { %2289 = vmatpush1.bf16.msra.mxu1 %v11342_v21 }
 0x27b   :  { %v13165_v24 = vpop.f32.mrf.mxu1  ;;  %1804 = vmatpush1.bf16.msra.mxu0 %v11264_v22  ;;  %v11347_v22 = vld [vmem:[#allocation11 + $0x2c] ss:$16 sps:$4 sm:$0xff]  }
 0x27c   :  { %1805 = vmatprep.subr.bf16.mxu0 %v11269_v23  ;;  %v11345_v23 = vld [vmem:[#allocation11 + $0x28] ss:$16 sps:$4 sm:$0xff]  }
 0x27d   :  { %v13167_v27 = vpop.f32.mrf.mxu1 }
 0x27f   :  { %1806 = vmatpush1.bf16.msra.mxu0 %v11267_v25  ;;  %v1798_v29 = vpop.f32.mrf.mxu1  ;;  %v11350_v25 = vld [vmem:[#allocation11 + $0x24] ss:$16 sps:$4 sm:$0xff]  }
 0x280   :  { %1807 = vmatprep.subr.bf16.mxu0 %v11272_v26  ;;  %v11348_v26 = vld [vmem:[#allocation11 + $0x20] ss:$16 sps:$4 sm:$0xff]   ;;  %2290 = vmatprep.subr.bf16.mxu1 %v11350_v25  ;;  %v11351_v29 = vld [vmem:[#allocation11 + $0x8] ss:$16 sps:$4 sm:$0xff]  }
 0x281   :  { %v1799_v32 = vpop.f32.mrf.mxu1  ;;  %2291 = vmatpush1.bf16.msra.mxu1 %v11348_v26 }
 0x282   :  { %v11354_v32 = vld [vmem:[#allocation11] ss:$16 sps:$4 sm:$0xff]  }
 0x283   :  { %1808 = vmatpush1.bf16.msra.mxu0 %v11270_v28  ;;  %v11353_v28 = vld [vmem:[#allocation11 + $0xc] ss:$16 sps:$4 sm:$0xff]  }
 0x284   :  { %1809 = vmatprep.subr.bf16.mxu0 %v11275_v31  ;;  %v11356_v31 = vld [vmem:[#allocation11 + $0x4] ss:$16 sps:$4 sm:$0xff]  }
 0x285   :  { %2292 = vmatprep.subr.bf16.mxu1 %v11356_v31 }
 0x286   :  { %2293 = vmatpush1.bf16.msra.mxu1 %v11354_v32 }
 0x287   :  { %1810 = vmatpush1.bf16.msra.mxu0 %v11273_v34  ;;  %v11359_v34 = vld [vmem:[#allocation11 + $0x1ec] ss:$16 sps:$4 sm:$0xff]  }
 0x288   :  { %1811 = vmatprep.subr.bf16.mxu0 %v11278_v19  ;;  %v11357_v19 = vld [vmem:[#allocation11 + $0x1e8] ss:$16 sps:$4 sm:$0xff]  }
 0x28b   :  { %1812 = vmatpush1.bf16.msra.mxu0 %v11276_v35  ;;  %v11362_v35 = vld [vmem:[#allocation11 + $0x1e4] ss:$16 sps:$4 sm:$0xff]  }
 0x28c   :  { %1813 = vmatprep.subr.bf16.mxu0 %v11281_v36  ;;  %v11360_v36 = vld [vmem:[#allocation11 + $0x1e0] ss:$16 sps:$4 sm:$0xff]   ;;  %2294 = vmatprep.subr.bf16.mxu1 %v11362_v35 }
 0x28d   :  { %2295 = vmatpush2.bf16.msra.mxu1 %v11360_v36 }
 0x28f   :  { %1814 = vmatpush1.bf16.msra.mxu0 %v11279_v37  ;;  %v11365_v37 = vld [vmem:[#allocation11 + $0x1cc] ss:$16 sps:$4 sm:$0xff]  }
 0x290   :  { %1815 = vmatprep.subr.bf16.mxu0 %v11284_v38  ;;  %v11363_v38 = vld [vmem:[#allocation11 + $0x1c8] ss:$16 sps:$4 sm:$0xff]  }
 0x293   :  { %1816 = vmatpush1.bf16.msra.mxu0 %v11282_v39  ;;  %v11368_v39 = vld [vmem:[#allocation11 + $0x1c4] ss:$16 sps:$4 sm:$0xff]  }
 0x294   :  { %1817 = vmatprep.subr.bf16.mxu0 %v11287_v40  ;;  %v11366_v40 = vld [vmem:[#allocation11 + $0x1c0] ss:$16 sps:$4 sm:$0xff]   ;;  %2296 = vmatprep.subr.bf16.mxu1 %v11368_v39 }
 0x295   :  { %2297 = vmatpush2.bf16.msra.mxu1 %v11366_v40 }
 0x297   :  { %1818 = vmatpush2.bf16.msra.mxu0 %v11285_v41  ;;  %v11371_v41 = vld [vmem:[#allocation11 + $0x1ac] ss:$16 sps:$4 sm:$0xff]  }
 0x298   :  { %1819 = vmatprep.subr.bf16.mxu0 %v11290_v42  ;;  %v11369_v42 = vld [vmem:[#allocation11 + $0x1a8] ss:$16 sps:$4 sm:$0xff]  }
 0x29b   :  { %1820 = vmatpush2.bf16.msra.mxu0 %v11288_v43  ;;  %v11374_v43 = vld [vmem:[#allocation11 + $0x1a4] ss:$16 sps:$4 sm:$0xff]  }
 0x29c   :  { %1821 = vmatprep.subr.bf16.mxu0 %v11293_v44  ;;  %v11372_v44 = vld [vmem:[#allocation11 + $0x1a0] ss:$16 sps:$4 sm:$0xff]   ;;  %2298 = vmatprep.subr.bf16.mxu1 %v11374_v43 }
 0x29d   :  { %2299 = vmatpush2.bf16.msra.mxu1 %v11372_v44  ;;  %v11405_v44 = vld [vmem:[#allocation8 + $0xe0] ss:$16 sps:$4 sm:$0xff]  }
 0x29f   :  { %1822 = vmatpush2.bf16.msra.mxu0 %v11291_v47  ;;  %v11377_v47 = vld [vmem:[#allocation11 + $0x18c] ss:$16 sps:$4 sm:$0xff]  }
 0x2a0   :  { %1823 = vmatprep.subr.bf16.mxu0 %v11296_v48  ;;  %v11375_v48 = vld [vmem:[#allocation11 + $0x188] ss:$16 sps:$4 sm:$0xff]  }
 0x2a3   :  { %1824 = vmatpush2.bf16.msra.mxu0 %v11294_v49  ;;  %v11380_v49 = vld [vmem:[#allocation11 + $0x184] ss:$16 sps:$4 sm:$0xff]  }
 0x2a4   :  { %1825 = vmatprep.subr.bf16.mxu0 %v11299_v50  ;;  %v11378_v50 = vld [vmem:[#allocation11 + $0x180] ss:$16 sps:$4 sm:$0xff]   ;;  %2300 = vmatprep.subr.bf16.mxu1 %v11380_v49 }
 0x2a5   :  { %2301 = vmatpush2.bf16.msra.mxu1 %v11378_v50  ;;  %v11413_v49 = vld [vmem:[#allocation8 + $0xa4] ss:$16 sps:$4 sm:$0xff]   ;;  %v11411_v50 = vld [vmem:[#allocation8 + $0xa0] ss:$16 sps:$4 sm:$0xff]  }
 0x2a7   :  { %1826 = vmatpush2.bf16.msra.mxu0 %v11297_v51  ;;  %v11383_v51 = vld [vmem:[#allocation11 + $0x16c] ss:$16 sps:$4 sm:$0xff]  }
 0x2a8   :  { %1827 = vmatprep.subr.bf16.mxu0 %v11302_v52  ;;  %v11381_v52 = vld [vmem:[#allocation11 + $0x168] ss:$16 sps:$4 sm:$0xff]  }
 0x2ab   :  { %1828 = vmatpush2.bf16.msra.mxu0 %v11300_v53  ;;  %v11384_v53 = vld [vmem:[#allocation11 + $0x160] ss:$16 sps:$4 sm:$0xff]  }
 0x2ac   :  { %1829 = vmatprep.subr.bf16.mxu0 %v11305_v54  ;;  %v11386_v54 = vld [vmem:[#allocation11 + $0x164] ss:$16 sps:$4 sm:$0xff]  }
 0x2ad   :  { %2302 = vmatprep.subr.bf16.mxu1 %v11386_v54  ;;  %v11417_v54 = vld [vmem:[#allocation8 + $0x60] ss:$16 sps:$4 sm:$0xff]  }
 0x2ae   :  { %2303 = vmatpush2.bf16.msra.mxu1 %v11384_v53  ;;  %v11419_v53 = vld [vmem:[#allocation8 + $0x64] ss:$16 sps:$4 sm:$0xff]  }
 0x2af   :  { %1830 = vmatpush2.bf16.msra.mxu0 %v11303_v56  ;;  %v11389_v56 = vld [vmem:[#allocation11 + $0x14c] ss:$16 sps:$4 sm:$0xff]  }
 0x2b0   :  { %1831 = vmatprep.subr.bf16.mxu0 %v11308_v57  ;;  %v11387_v57 = vld [vmem:[#allocation11 + $0x148] ss:$16 sps:$4 sm:$0xff]  }
 0x2b3   :  { %1832 = vmatpush2.bf16.msra.mxu0 %v11306_v0  ;;  %v11392_v0 = vld [vmem:[#allocation11 + $0x144] ss:$16 sps:$4 sm:$0xff]  }
 0x2b4   :  { %2319 = vmatprep.subr.bf16.mxu0 %v11311_v60  ;;  %v11395_v60 = vld [vmem:[#allocation11 + $0x12c] ss:$16 sps:$4 sm:$0xff]   ;;  %2304 = vmatprep.subr.bf16.mxu1 %v11392_v0  ;;  %v11425_v0 = vld [vmem:[#allocation8 + $0x24] ss:$16 sps:$4 sm:$0xff]  }
 0x2b6   :  { %1834 = vmatmul.mubr.bf16.vlgmr.msra.gmra.mxu0 %v13137_v30  ;;  %v11321_v30 = vld [vmem:[#allocation11 + $0xa8] ss:$16 sps:$4 sm:$0xff]  }
 0x2b7   :  { %2351 = vmatprep.mubr.bf16.mxu0 %v13160_v20  ;;  %2320 = vmatpush1.bf16.msra.mxu0 %v11309_v59  ;;  %v11339_v20 = vld [vmem:[#allocation11 + $0x48] ss:$16 sps:$4 sm:$0xff]   ;;  %v11390_v59 = vld [vmem:[#allocation11 + $0x140] ss:$16 sps:$4 sm:$0xff]  }
 0x2b8   :  { %2321 = vmatprep.subr.bf16.mxu0 %v11317_v63  ;;  %2305 = vmatpush2.bf16.msra.mxu1 %v11390_v59  ;;  %v11396_v63 = vld [vmem:[#allocation11 + $0x120] ss:$16 sps:$4 sm:$0xff]   ;;  %v11423_v59 = vld [vmem:[#allocation8 + $0x20] ss:$16 sps:$4 sm:$0xff]  }
 0x2b9   :  { %2306 = vmatprep.subr.bf16.mxu1 %v11398_v61  ;;  %v2496_v61 = vld [vmem:[#allocation5 + $0xa] sm:$0x1] }
 0x2bb   :  { %2322 = vmatpush1.bf16.msra.mxu0 %v11315_v2  ;;  %v11404_v2 = vld [vmem:[#allocation11 + $0x104] ss:$16 sps:$4 sm:$0xff]  }
 0x2bc   :  { %2323 = vmatprep.subr.bf16.mxu0 %v11323_v4  ;;  %2307 = vmatpush2.bf16.msra.mxu1 %v11396_v63  ;;  %v11402_v4 = vld [vmem:[#allocation11 + $0x100] ss:$16 sps:$4 sm:$0xff]  }
 0x2bd   :  { %2308 = vmatprep.subr.bf16.mxu1 %v11404_v2  ;;  %v11431_v63 = vld [vmem:[#allocation8 + $0x1e4] ss:$16 sps:$4 sm:$0xff]   ;;  %v2504_v2 = vpack.c.bf16 %v2496_v61, %v2496_v61 }
 0x2bf   :  { %2324 = vmatpush1.bf16.msra.mxu0 %v11321_v30 }
 0x2c0   :  { %2325 = vmatprep.subr.bf16.mxu0 %v11329_v7  ;;  %2309 = vmatpush2.bf16.msra.mxu1 %v11402_v4  ;;  %v11429_v4 = vld [vmem:[#allocation8 + $0x1e0] ss:$16 sps:$4 sm:$0xff]  }
 0x2c1   :  { %10906 = vmatprep.subr.bf16.mxu1 %v13041_v33 }
 0x2c3   :  { %2326 = vmatpush1.bf16.msra.mxu0 %v11327_v9  ;;  %v1418_v9 = vld [vmem:[#allocation10] sm:$0xf] }
 0x2c4   :  { %2327 = vmatprep.subr.bf16.mxu0 %v11335_v11  ;;  %v1423_v10 = vrot.slane %v1418_v9, %v13110_v45  ;;  %v1427_v11 = vrot.slane %v1418_v9, %v13112_v46  ;;  %v1435_v25 = vrot.slane %v1418_v9, %v13116_v55 }
 0x2c6   :  { %v1795_v12 = vadd.f32 %v13165_v24, %v1423_v10  ;;  %v11432_v10 = vld [vmem:[#allocation8 + $0x1c0] ss:$16 sps:$4 sm:$0xff]  }
 0x2c7   :  { %2328 = vmatpush1.bf16.msra.mxu0 %v11333_v14  ;;  %v1797_v14 = vadd.f32 %v13167_v27, %v1427_v11  ;;  %v2499_v11 = vld [vmem:[#allocation5 + $0x22] sm:$0x1] }
 0x2c8   :  { %2329 = vmatprep.subr.bf16.mxu0 %v11341_v17  ;;  %v9883_v16 = vmul.f32 -1.442695, %v1795_v12 }
 0x2c9   :  { %v9884_v17 = vmul.f32 -1.442695, %v1797_v14  ;;  %v11437_v14 = vld [vmem:[#allocation8 + $0x1a4] ss:$16 sps:$4 sm:$0xff]  }
 0x2ca   :  { %12645 = vpow2.f32 %v9883_v16 }
 0x2cb   :  { %2330 = vmatpush1.bf16.msra.mxu0 %v11339_v20  ;;  %12647 = vpow2.f32 %v9884_v17 }
 0x2cc   :  { %2331 = vmatprep.subr.bf16.mxu0 %v11347_v22 }
 0x2cf   :  { %2332 = vmatpush1.bf16.msra.mxu0 %v11345_v23  ;;  %v1431_v23 = vrot.slane %v1418_v9, %v13118_v58  ;;  %v2523_v9 = vunpack.c.l.b16 %v2504_v2  ;;  %v11456_v2 = vld [vmem:[#allocation13 + $0x60] sm:$0xff]  }
 0x2d0   :  { %2333 = vmatprep.subr.bf16.mxu0 %v11353_v28 }
 0x2d3   :  { %2334 = vmatpush1.bf16.msra.mxu0 %v11351_v29 }
 0x2d4   :  { %2335 = vmatprep.subr.bf16.mxu0 %v11359_v34 }
 0x2d7   :  { %2336 = vmatpush2.bf16.msra.mxu0 %v11357_v19  ;;  %v12646_v18 = vpop.eup %12645 }
 0x2d8   :  { %2337 = vmatprep.subr.bf16.mxu0 %v11365_v37  ;;  %v12648_v20 = vpop.eup %12647  ;;  %v1845_v21 = vadd.f32 1.0, %v12646_v18  ;;  %v2530_v18 = vrot.slane %v2523_v9, 7 }
 0x2d9   :  { %v1851_v22 = vadd.f32 1.0, %v12648_v20  ;;  %v2500_v20 = vld [vmem:[#allocation5 + $0x2a] sm:$0x1] }
 0x2da   :  { %12649 = vrcp.f32 %v1845_v21  ;;  %v2507_v21 = vpack.c.bf16 %v2499_v11, %v2499_v11 }
 0x2db   :  { %2338 = vmatpush2.bf16.msra.mxu0 %v11363_v38  ;;  %12651 = vrcp.f32 %v1851_v22  ;;  %v11435_v22 = vld [vmem:[#allocation8 + $0x1a0] ss:$16 sps:$4 sm:$0xff]  }
 0x2dc   :  { %2339 = vmatprep.subr.bf16.mxu0 %v11371_v41 }
 0x2df   :  { %2340 = vmatpush2.bf16.msra.mxu0 %v11369_v42 }
 0x2e0   :  { %2341 = vmatprep.subr.bf16.mxu0 %v11377_v47 }
 0x2e3   :  { %2342 = vmatpush2.bf16.msra.mxu0 %v11375_v48  ;;  %v11410_v48 = vld [vmem:[#allocation8 + $0xc4] ss:$16 sps:$4 sm:$0xff]  }
 0x2e4   :  { %2343 = vmatprep.subr.bf16.mxu0 %v11383_v51  ;;  %v11416_v51 = vld [vmem:[#allocation8 + $0x84] ss:$16 sps:$4 sm:$0xff]  }
 0x2e7   :  { %2344 = vmatpush2.bf16.msra.mxu0 %v11381_v52  ;;  %v12650_v34 = vpop.eup %12649  ;;  %v11414_v52 = vld [vmem:[#allocation8 + $0x80] ss:$16 sps:$4 sm:$0xff]  }
 0x2e8   :  { %2345 = vmatprep.subr.bf16.mxu0 %v11389_v56  ;;  %v12652_v19 = vpop.eup %12651  ;;  %v11422_v56 = vld [vmem:[#allocation8 + $0x44] ss:$16 sps:$4 sm:$0xff]  }
 0x2e9   :  { %v1861_v36 = vmul.f32 %v12652_v19, %v13122_v15  ;;  %v11408_v15 = vld [vmem:[#allocation8 + $0xc0] ss:$16 sps:$4 sm:$0xff]   ;;  %v2502_v19 = vld [vmem:[#allocation5 + $0x3a] sm:$0x1] }
 0x2eb   :  { %2346 = vmatpush2.bf16.msra.mxu0 %v11387_v57  ;;  %v11420_v57 = vld [vmem:[#allocation8 + $0x40] ss:$16 sps:$4 sm:$0xff]  }
 0x2ec   :  { %2347 = vmatprep.subr.bf16.mxu0 %v11395_v60  ;;  %v11428_v60 = vld [vmem:[#allocation8 + $0x4] ss:$16 sps:$4 sm:$0xff]  }
 0x2ef   :  { %2348 = vmatpush2.bf16.msra.mxu0 %v11393_v62  ;;  %v11426_v62 = vld [vmem:[#allocation8] ss:$16 sps:$4 sm:$0xff]  }
 0x2f0   :  { %2349 = vmatprep.subr.bf16.mxu0 %v11401_v1  ;;  %v2497_v1 = vld [vmem:[#allocation5 + $0x12] sm:$0x1] }
 0x2f3   :  { %2350 = vmatpush2.bf16.msra.mxu0 %v11399_v3  ;;  %v2495_v3 = vld [vmem:[#allocation5 + $0x2] sm:$0x1] }
 0x2f4   :  { %2952 = vmatprep.subr.bf16.mxu0 %v11407_v5  ;;  %v11434_v5 = vld [vmem:[#allocation8 + $0x1c4] ss:$16 sps:$4 sm:$0xff]  }
 0x336   :  { %v13172_v30 = vpop.f32.mrf.mxu0 }
 0x338   :  { %v10904_v6 = vpop.f32.mrf.mxu0 }
 0x339   :  { %v2498_v6 = vld [vmem:[#allocation5 + $0x1a] sm:$0x1] }
 0x33a   :  { %v1298_v7 = vpop.f32.mrf.mxu0  ;;  %v2506_v12 = vpack.c.bf16 %v2498_v6, %v2498_v6  ;;  %v11460_v6 = vld [vmem:[#allocation13 + $0x40] sm:$0xff]  }
 0x33b   :  { %v2505_v7 = vpack.c.bf16 %v2497_v1, %v2497_v1  ;;  %v11455_v1 = vld [vmem:[#allocation13 + $0x68] sm:$0xff]  }
 0x33c   :  { %v10905_v8 = vpop.f32.mrf.mxu0 }
 0x33d   :  { %v2503_v8 = vpack.c.bf16 %v2495_v3, %v2495_v3  ;;  %v2524_v16 = vunpack.c.l.b16 %v2505_v7  ;;  %v11457_v3 = vld [vmem:[#allocation13 + $0x58] sm:$0xff]  }
 0x33e   :  { %v11463_v7 = vld [vmem:[#allocation8 + $0xec] ss:$16 sps:$4 sm:$0xff]  }
 0x33f   :  { %v2522_v17 = vunpack.c.l.b16 %v2503_v8  ;;  %v1936_v8 = vld [vmem:[%s13569_s4] sm:$0xf] }
 0x340   :  { %v1941_v9 = vrot.slane %v1936_v8, %v13110_v45 }
 0x376   :  { %v1835_v26 = vpop.f32.mrf.mxu0 }
 0x377   :  { %v1836_v28 = vadd.f32 %v1835_v26, %v1431_v23  ;;  %v2525_v23 = vunpack.c.l.b16 %v2506_v12  ;;  %v2532_v26 = vrot.slane %v2524_v16, 6 }
 0x378   :  { %v1837_v29 = vpop.f32.mrf.mxu0 }
 0x379   :  { %12653 = vtanh.f32 %v1836_v28  ;;  %v1838_v24 = vadd.f32 %v1837_v29, %v1435_v25  ;;  %v11440_v25 = vld [vmem:[#allocation8 + $0x184] ss:$16 sps:$4 sm:$0xff]   ;;  %v2501_v28 = vld [vmem:[#allocation5 + $0x32] sm:$0x1]  ;;  %v2508_v29 = vpack.c.bf16 %v2500_v20, %v2500_v20 }
 0x37a   :  { %v1839_v27 = vpop.f32.mrf.mxu0 }
 0x37b   :  { %v9885_v31 = vmul.f32 -1.442695, %v1838_v24  ;;  %v2531_v24 = vsel %vm139_vm0, %v2530_v18, %v2522_v17  ;;  %v2526_v27 = vunpack.c.l.b16 %v2507_v21 }
 0x37c   :  { %v1840_v32 = vpop.f32.mrf.mxu0 }
 0x37d   :  { %12655 = vpow2.f32 %v9885_v31  ;;  %v11438_v31 = vld [vmem:[#allocation8 + $0x180] ss:$16 sps:$4 sm:$0xff]   ;;  %v2534_v32 = vrot.slane %v2525_v23, 5 }
 0x386   :  { %v12654_v35 = vpop.eup %12653 }
 0x387   :  { %v1862_v37 = vmul.f32 %v12654_v35, %v12650_v34  ;;  %v11443_v34 = vld [vmem:[#allocation8 + $0x164] ss:$16 sps:$4 sm:$0xff]   ;;  %v2509_v35 = vpack.c.bf16 %v2501_v28, %v2501_v28  ;;  %v1953_v28 = vrot.slane %v1936_v8, %v13116_v55 }
 0x389   :  { %v13181_v38 = vadd.f32 %v1862_v37, %v1861_v36  ;;  %v2533_v36 = vsel %vm142_vm1, %v2532_v26, %v2531_v24  ;;  %v2527_v37 = vunpack.c.l.b16 %v2508_v29  ;;  %v1949_v24 = vrot.slane %v1936_v8, %v13118_v58 }
 0x38a   :  { %v12656_v39 = vpop.eup %12655 }
 0x38b   :  { %v1858_v40 = vadd.f32 1.0, %v12656_v39  ;;  %12657 = vtanh.f32 %v13181_v38  ;;  %v2536_v39 = vrot.slane %v2526_v27, 4 }
 0x38d   :  { %12659 = vrcp.f32 %v1858_v40  ;;  %v11441_v40 = vld [vmem:[#allocation8 + $0x160] ss:$16 sps:$4 sm:$0xff]  }
 0x398   :  { %v12658_v41 = vpop.eup %12657 }
 0x39a   :  { %v12660_v42 = vpop.eup %12659 }
 0x39b   :  { %v1865_v43 = vmul.f32 %v12660_v42, %v12658_v41  ;;  %v2510_v41 = vpack.c.bf16 %v2502_v19, %v2502_v19  ;;  %v2535_v42 = vsel %vm145_vm2, %v2534_v32, %v2533_v36 }
 0x39d   :  { %v13184_v47 = vpack.c.bf16 %v1865_v43, %v1865_v43  ;;  %v11446_v43 = vld [vmem:[#allocation8 + $0x144] ss:$16 sps:$4 sm:$0xff]  }
 0x39f   :  { %2311 = vmatmul.mubr.bf16.vlgmr.msra.gmra.mxu1 %v13184_v47  ;;  %2352 = vmatmul.mubr.bf16.vlgmr.msra.gmra.mxu0 %v13184_v47 }
 0x3a0   :  { %2953 = vmatpush1.bf16.msra.mxu0 %v11405_v44  ;;  %2984 = vmatprep.mubr.bf16.mxu0 %v13184_v47  ;;  %v2528_v44 = vunpack.c.l.b16 %v2509_v35 }
 0x3a1   :  { %2954 = vmatprep.subr.bf16.mxu0 %v11410_v48  ;;  %10922 = vmatprep.mubr.msk.bf16.mxu1 %vm13042_vm7, %v13041_v33  ;;  %v2538_v48 = vrot.slane %v2527_v37, 3 }
 0x3a4   :  { %2955 = vmatpush1.bf16.msra.mxu0 %v11408_v15  ;;  %v2537_v15 = vsel %vm148_vm3, %v2536_v39, %v2535_v42 }
 0x3a5   :  { %2956 = vmatprep.subr.bf16.mxu0 %v11413_v49  ;;  %v11444_v49 = vld [vmem:[#allocation8 + $0x140] ss:$16 sps:$4 sm:$0xff]  }
 0x3a8   :  { %2957 = vmatpush1.bf16.msra.mxu0 %v11411_v50  ;;  %v2529_v50 = vunpack.c.l.b16 %v2510_v41 }
 0x3a9   :  { %2958 = vmatprep.subr.bf16.mxu0 %v11416_v51  ;;  %v11449_v51 = vld [vmem:[#allocation8 + $0x124] ss:$16 sps:$4 sm:$0xff]  }
 0x3ac   :  { %2959 = vmatpush1.bf16.msra.mxu0 %v11414_v52  ;;  %v2540_v52 = vrot.slane %v2528_v44, 2 }
 0x3ad   :  { %2960 = vmatprep.subr.bf16.mxu0 %v11419_v53  ;;  %v2539_v53 = vsel %vm151_vm4, %v2538_v48, %v2537_v15 }
 0x3b0   :  { %2961 = vmatpush1.bf16.msra.mxu0 %v11417_v54  ;;  %v11447_v54 = vld [vmem:[#allocation8 + $0x120] ss:$16 sps:$4 sm:$0xff]  }
 0x3b1   :  { %2962 = vmatprep.subr.bf16.mxu0 %v11422_v56  ;;  %v2542_v56 = vrot.slane %v2529_v50, 1  ;;  %v11461_v50 = vld [vmem:[#allocation8 + $0xe8] ss:$16 sps:$4 sm:$0xff]  }
 0x3b4   :  { %2963 = vmatpush1.bf16.msra.mxu0 %v11420_v57  ;;  %v11452_v57 = vld [vmem:[#allocation8 + $0x104] ss:$16 sps:$4 sm:$0xff]  }
 0x3b5   :  { %2964 = vmatprep.subr.bf16.mxu0 %v11425_v0  ;;  %v2541_v0 = vsel %vm154_vm5, %v2540_v52, %v2539_v53  ;;  %v11466_v52 = vld [vmem:[#allocation8 + $0xcc] ss:$16 sps:$4 sm:$0xff]  }
 0x3b6   :  { %v11469_v53 = vld [vmem:[#allocation8 + $0xac] ss:$16 sps:$4 sm:$0xff]  }
 0x3b8   :  { %2965 = vmatpush1.bf16.msra.mxu0 %v11423_v59  ;;  %v11450_v59 = vld [vmem:[#allocation8 + $0x100] ss:$16 sps:$4 sm:$0xff]  }
 0x3b9   :  { %2966 = vmatprep.subr.bf16.mxu0 %v11428_v60  ;;  %v2543_v60 = vsel %vm157_vm6, %v2542_v56, %v2541_v0  ;;  %v11467_v56 = vld [vmem:[#allocation8 + $0xa8] ss:$16 sps:$4 sm:$0xff]  }
 0x3ba   :  { %v13198_v61 = vpack.c.b16 %v2543_v60, %v2543_v60 }
 0x3bc   :  { %2967 = vmatpush1.bf16.msra.mxu0 %v11426_v62  ;;  %v11453_v62 = vld [vmem:[#allocation13 + $0x78] sm:$0xff]  }
 0x3bd   :  { %2968 = vmatprep.subr.bf16.mxu0 %v11431_v63  ;;  %10907 = vmatpush3.bf16.msra.mxu1 %v11453_v62  ;;  %v11454_v63 = vld [vmem:[#allocation13 + $0x70] sm:$0xff]   ;;  %v11475_v62 = vld [vmem:[#allocation8 + $0x6c] ss:$16 sps:$4 sm:$0xff]  }
 0x3be   :  { %10908 = vmatprep.subr.bf16.mxu1 %v13041_v33 }
 0x3c0   :  { %2969 = vmatpush2.bf16.msra.mxu0 %v11429_v4  ;;  %v11458_v4 = vld [vmem:[#allocation13 + $0x50] sm:$0xff]  }
 0x3c1   :  { %2970 = vmatprep.subr.bf16.mxu0 %v11434_v5  ;;  %10909 = vmatpush3.bf16.msra.mxu1 %v11454_v63  ;;  %v11459_v5 = vld [vmem:[#allocation13 + $0x48] sm:$0xff]  }
 0x3c2   :  { %10910 = vmatprep.subr.bf16.mxu1 %v13041_v33 }
 0x3c4   :  { %2971 = vmatpush2.bf16.msra.mxu0 %v11432_v10  ;;  %v1945_v10 = vrot.slane %v1936_v8, %v13112_v46  ;;  %v11485_v8 = vld [vmem:[#allocation8 + $0x1e8] ss:$16 sps:$4 sm:$0xff]  }
 0x3c5   :  { %2972 = vmatprep.subr.bf16.mxu0 %v11437_v14  ;;  %10911 = vmatpush3.bf16.msra.mxu1 %v11455_v1  ;;  %v11473_v1 = vld [vmem:[#allocation8 + $0x68] ss:$16 sps:$4 sm:$0xff]  }
 0x3c6   :  { %10912 = vmatprep.subr.bf16.mxu1 %v13041_v33 }
 0x3c8   :  { %2973 = vmatpush2.bf16.msra.mxu0 %v11435_v22 }
 0x3c9   :  { %2974 = vmatprep.subr.bf16.mxu0 %v11440_v25  ;;  %10913 = vmatpush3.bf16.msra.mxu1 %v11456_v2  ;;  %v11476_v2 = vld [vmem:[#allocation8 + $0x48] ss:$16 sps:$4 sm:$0xff]  }
 0x3ca   :  { %10914 = vmatprep.subr.bf16.mxu1 %v13041_v33 }
 0x3cc   :  { %2975 = vmatpush2.bf16.msra.mxu0 %v11438_v31 }
 0x3cd   :  { %2976 = vmatprep.subr.bf16.mxu0 %v11443_v34  ;;  %10915 = vmatpush3.bf16.msra.mxu1 %v11457_v3  ;;  %v11481_v3 = vld [vmem:[#allocation8 + $0x2c] ss:$16 sps:$4 sm:$0xff]  }
 0x3ce   :  { %10916 = vmatprep.subr.bf16.mxu1 %v13041_v33 }
 0x3d0   :  { %2977 = vmatpush2.bf16.msra.mxu0 %v11441_v40 }
 0x3d1   :  { %2978 = vmatprep.subr.bf16.mxu0 %v11446_v43  ;;  %10917 = vmatpush3.bf16.msra.mxu1 %v11458_v4  ;;  %v11479_v4 = vld [vmem:[#allocation8 + $0x28] ss:$16 sps:$4 sm:$0xff]  }
 0x3d2   :  { %10918 = vmatprep.subr.bf16.mxu1 %v13041_v33 }
 0x3d4   :  { %2979 = vmatpush2.bf16.msra.mxu0 %v11444_v49 }
 0x3d5   :  { %2980 = vmatprep.subr.bf16.mxu0 %v11449_v51  ;;  %10919 = vmatpush3.bf16.msra.mxu1 %v11459_v5  ;;  %v11484_v5 = vld [vmem:[#allocation8 + $0xc] ss:$16 sps:$4 sm:$0xff]  }
 0x3d6   :  { %10920 = vmatprep.subr.bf16.mxu1 %v13041_v33 }
 0x3d8   :  { %2981 = vmatpush2.bf16.msra.mxu0 %v11447_v54 }
 0x3d9   :  { %2982 = vmatprep.subr.bf16.mxu0 %v11452_v57  ;;  %10921 = vmatpush3.bf16.msra.mxu1 %v11460_v6  ;;  %v11472_v57 = vld [vmem:[#allocation8 + $0x8c] ss:$16 sps:$4 sm:$0xff]   ;;  %v11482_v6 = vld [vmem:[#allocation8 + $0x8] ss:$16 sps:$4 sm:$0xff]  }
 0x3da   :  { %2993 = vmatprep.subr.bf16.mxu1 %v11463_v7  ;;  %v11487_v7 = vld [vmem:[#allocation8 + $0x1ec] ss:$16 sps:$4 sm:$0xff]  }
 0x3dc   :  { %2983 = vmatpush2.bf16.msra.mxu0 %v11450_v59  ;;  %v11470_v59 = vld [vmem:[#allocation8 + $0x88] ss:$16 sps:$4 sm:$0xff]  }
 0x3df   :  { %2985 = vmatmul.mubr.bf16.vlgmr.msra.gmra.mxu0 %v13198_v61 }
 0x45f   :  { %v2312_v11 = vpop.f32.mrf.mxu1  ;;  %v2353_v12 = vpop.f32.mrf.mxu0 }
 0x460   :  { %v2313_v14 = vadd.f32 %v2312_v11, %v1941_v9  ;;  %v2354_v32 = vadd.f32 %v2353_v12, %v1949_v24  ;;  %v11490_v9 = vld [vmem:[#allocation8 + $0x1cc] ss:$16 sps:$4 sm:$0xff]   ;;  %v11491_v12 = vld [vmem:[#allocation8 + $0x1a8] ss:$16 sps:$4 sm:$0xff]   ;;  %v11512_v24 = vld [vmem:[#allocation11 + $0xe0] ss:$16 sps:$4 sm:$0xff]  }
 0x461   :  { %v2314_v16 = vpop.f32.mrf.mxu1  ;;  %v2355_v17 = vpop.f32.mrf.mxu0  ;;  %v11493_v11 = vld [vmem:[#allocation8 + $0x1ac] ss:$16 sps:$4 sm:$0xff]  }
 0x462   :  { %v9950_v18 = vmul.f32 -1.442695, %v2313_v14  ;;  %v2315_v20 = vadd.f32 %v2314_v16, %v1945_v10  ;;  %v2356_v29 = vadd.f32 %v2355_v17, %v1953_v28  ;;  %v11488_v10 = vld [vmem:[#allocation8 + $0x1c8] ss:$16 sps:$4 sm:$0xff]   ;;  %v11496_v14 = vld [vmem:[#allocation8 + $0x18c] ss:$16 sps:$4 sm:$0xff]  }
 0x463   :  { %v2316_v21 = vpop.f32.mrf.mxu1  ;;  %v2357_v22 = vpop.f32.mrf.mxu0  ;;  %v11494_v16 = vld [vmem:[#allocation8 + $0x188] ss:$16 sps:$4 sm:$0xff]   ;;  %v11499_v17 = vld [vmem:[#allocation8 + $0x16c] ss:$16 sps:$4 sm:$0xff]  }
 0x464   :  { %12661 = vpow2.f32 %v9950_v18  ;;  %v9951_v23 = vmul.f32 -1.442695, %v2315_v20  ;;  %v9952_v27 = vmul.f32 -1.442695, %v2356_v29  ;;  %v11497_v18 = vld [vmem:[#allocation8 + $0x168] ss:$16 sps:$4 sm:$0xff]  }
 0x465   :  { %v2317_v25 = vpop.f32.mrf.mxu1  ;;  %v2358_v26 = vpop.f32.mrf.mxu0  ;;  %v11502_v20 = vld [vmem:[#allocation8 + $0x14c] ss:$16 sps:$4 sm:$0xff]   ;;  %v11500_v21 = vld [vmem:[#allocation8 + $0x148] ss:$16 sps:$4 sm:$0xff]   ;;  %v11511_v29 = vld [vmem:[#allocation11 + $0xec] ss:$16 sps:$4 sm:$0xff]  }
 0x466   :  { %12663 = vpow2.f32 %v9951_v23  ;;  %v11505_v22 = vld [vmem:[#allocation8 + $0x12c] ss:$16 sps:$4 sm:$0xff]   ;;  %v11503_v23 = vld [vmem:[#allocation8 + $0x128] ss:$16 sps:$4 sm:$0xff]  }
 0x467   :  { %12665 = vpow2.f32 %v9952_v27  ;;  %v11508_v25 = vld [vmem:[#allocation8 + $0x10c] ss:$16 sps:$4 sm:$0xff]   ;;  %v11506_v26 = vld [vmem:[#allocation8 + $0x108] ss:$16 sps:$4 sm:$0xff]  }
 0x468   :  { %v11509_v28 = vld [vmem:[#allocation11 + $0xe8] ss:$16 sps:$4 sm:$0xff]   ;;  %v11514_v27 = vld [vmem:[#allocation11 + $0xe4] ss:$16 sps:$4 sm:$0xff]  }
 0x469   :  { %3470 = vmatprep.subr.bf16.mxu0 %v11514_v27  ;;  %v11598_v27 = vld [vmem:[#allocation11 + $0x124] ss:$16 sps:$4 sm:$0xff]  }
 0x46a   :  { %3471 = vmatpush1.bf16.msra.mxu0 %v11512_v24  ;;  %v11595_v24 = vld [vmem:[#allocation11 + $0x12c] ss:$16 sps:$4 sm:$0xff]  }
 0x471   :  { %v12662_v31 = vpop.eup %12661 }
 0x472   :  { %v2363_v34 = vadd.f32 1.0, %v12662_v31  ;;  %v11517_v31 = vld [vmem:[#allocation11 + $0xcc] ss:$16 sps:$4 sm:$0xff]  }
 0x473   :  { %v12664_v19 = vpop.eup %12663 }
 0x474   :  { %12667 = vrcp.f32 %v2363_v34  ;;  %v2369_v35 = vadd.f32 1.0, %v12664_v19  ;;  %v12666_v36 = vpop.eup %12665  ;;  %v11515_v34 = vld [vmem:[#allocation11 + $0xc8] ss:$16 sps:$4 sm:$0xff]   ;;  %v11518_v19 = vld [vmem:[#allocation11 + $0xc0] ss:$16 sps:$4 sm:$0xff]  }
 0x475   :  { %12669 = vtanh.f32 %v2354_v32  ;;  %v2376_v41 = vadd.f32 1.0, %v12666_v36  ;;  %v11520_v32 = vld [vmem:[#allocation11 + $0xc4] ss:$16 sps:$4 sm:$0xff]  }
 0x476   :  { %12671 = vrcp.f32 %v2369_v35  ;;  %v11523_v35 = vld [vmem:[#allocation11 + $0xac] ss:$16 sps:$4 sm:$0xff]   ;;  %3472 = vmatprep.subr.bf16.mxu0 %v11520_v32  ;;  %v11526_v36 = vld [vmem:[#allocation11 + $0xa4] ss:$16 sps:$4 sm:$0xff]   ;;  %v11596_v32 = vld [vmem:[#allocation11 + $0x120] ss:$16 sps:$4 sm:$0xff]  }
 0x477   :  { %12673 = vrcp.f32 %v2376_v41  ;;  %3473 = vmatpush1.bf16.msra.mxu0 %v11518_v19  ;;  %v11527_v41 = vld [vmem:[#allocation11 + $0x88] ss:$16 sps:$4 sm:$0xff]   ;;  %v11604_v19 = vld [vmem:[#allocation11 + $0x104] ss:$16 sps:$4 sm:$0xff]  }
 0x478   :  { %3474 = vmatprep.subr.bf16.mxu0 %v11526_v36  ;;  %v11602_v36 = vld [vmem:[#allocation11 + $0x100] ss:$16 sps:$4 sm:$0xff]  }
 0x481   :  { %v12668_v37 = vpop.eup %12667 }
 0x482   :  { %v12670_v39 = vpop.eup %12669 }
 0x483   :  { %v12672_v40 = vpop.eup %12671  ;;  %v2380_v42 = vmul.f32 %v12670_v39, %v12668_v37  ;;  %v11524_v37 = vld [vmem:[#allocation11 + $0xa0] ss:$16 sps:$4 sm:$0xff]   ;;  %v11529_v39 = vld [vmem:[#allocation11 + $0x8c] ss:$16 sps:$4 sm:$0xff]  }
 0x484   :  { %v2379_v43 = vmul.f32 %v12672_v40, %v13157_v13  ;;  %v12674_v48 = vpop.eup %12673  ;;  %v11464_v13 = vld [vmem:[#allocation8 + $0xc8] ss:$16 sps:$4 sm:$0xff]   ;;  %3475 = vmatpush1.bf16.msra.mxu0 %v11524_v37 }
 0x485   :  { %v11532_v40 = vld [vmem:[#allocation11 + $0x84] ss:$16 sps:$4 sm:$0xff]  }
 0x486   :  { %v13216_v44 = vadd.f32 %v2380_v42, %v2379_v43  ;;  %v11530_v42 = vld [vmem:[#allocation11 + $0x80] ss:$16 sps:$4 sm:$0xff]   ;;  %v11535_v43 = vld [vmem:[#allocation11 + $0x6c] ss:$16 sps:$4 sm:$0xff]   ;;  %3476 = vmatprep.subr.bf16.mxu0 %v11532_v40 }
 0x488   :  { %12675 = vtanh.f32 %v13216_v44  ;;  %3477 = vmatpush1.bf16.msra.mxu0 %v11530_v42  ;;  %v2610_v42 = vld [vmem:[#allocation10] sm:$0xf] }
 0x495   :  { %v12676_v15 = vpop.eup %12675 }
 0x496   :  { %v2383_v49 = vmul.f32 %v12676_v15, %v12674_v48  ;;  %v11538_v48 = vld [vmem:[#allocation11 + $0x64] ss:$16 sps:$4 sm:$0xff]   ;;  %v11533_v15 = vld [vmem:[#allocation11 + $0x68] ss:$16 sps:$4 sm:$0xff]  }
 0x497   :  { %3478 = vmatprep.subr.bf16.mxu0 %v11538_v48  ;;  %v2619_v48 = vrot.slane %v2610_v42, %v13112_v46 }
 0x498   :  { %v13219_v51 = vpack.c.bf16 %v2383_v49, %v2383_v49  ;;  %v11536_v49 = vld [vmem:[#allocation11 + $0x60] ss:$16 sps:$4 sm:$0xff]  }
 0x499   :  { %3479 = vmatpush1.bf16.msra.mxu0 %v11536_v49 }
 0x49a   :  { %10923 = vmatmul.mubr.bf16.vlgmr.msra.gmra.mxu1 %v13219_v51  ;;  %3502 = vmatprep.mubr.bf16.mxu0 %v13219_v51 }
 0x49b   :  { %2994 = vmatpush1.bf16.msra.mxu1 %v11461_v50  ;;  %3025 = vmatprep.mubr.bf16.mxu1 %v13184_v47  ;;  %v11478_v47 = vld [vmem:[#allocation8 + $0x4c] ss:$16 sps:$4 sm:$0xff]   ;;  %v11541_v50 = vld [vmem:[#allocation11 + $0x4c] ss:$16 sps:$4 sm:$0xff]  }
 0x49c   :  { %2995 = vmatprep.subr.bf16.mxu1 %v11466_v52  ;;  %v11539_v52 = vld [vmem:[#allocation11 + $0x48] ss:$16 sps:$4 sm:$0xff]  }
 0x49f   :  { %v13224_v54 = vpop.f32.mrf.mxu0  ;;  %2996 = vmatpush1.bf16.msra.mxu1 %v11464_v13  ;;  %v11542_v13 = vld [vmem:[#allocation11 + $0x40] ss:$16 sps:$4 sm:$0xff]  }
 0x4a0   :  { %2997 = vmatprep.subr.bf16.mxu1 %v11469_v53  ;;  %v11547_v53 = vld [vmem:[#allocation11 + $0x2c] ss:$16 sps:$4 sm:$0xff]  }
 0x4a1   :  { %v13226_v0 = vpop.f32.mrf.mxu0 }
 0x4a2   :  { %v2989_v49 = vadd.f32 %v13226_v0, %v2619_v48  ;;  %v11632_v48 = vld [vmem:[#allocation8 + $0x1c0] ss:$16 sps:$4 sm:$0xff]  }
 0x4a3   :  { %2998 = vmatpush1.bf16.msra.mxu1 %v11467_v56  ;;  %v2990_v60 = vpop.f32.mrf.mxu0  ;;  %v11545_v56 = vld [vmem:[#allocation11 + $0x28] ss:$16 sps:$4 sm:$0xff]  }
 0x4a4   :  { %2999 = vmatprep.subr.bf16.mxu1 %v11472_v57  ;;  %v11550_v57 = vld [vmem:[#allocation11 + $0x24] ss:$16 sps:$4 sm:$0xff]   ;;  %v11553_v60 = vld [vmem:[#allocation11 + $0xc] ss:$16 sps:$4 sm:$0xff]  }
 0x4a5   :  { %v2991_v63 = vpop.f32.mrf.mxu0 }
 0x4a6   :  { %v11556_v63 = vld [vmem:[#allocation11 + $0x4] ss:$16 sps:$4 sm:$0xff]  }
 0x4a7   :  { %3000 = vmatpush1.bf16.msra.mxu1 %v11470_v59  ;;  %v11548_v59 = vld [vmem:[#allocation11 + $0x20] ss:$16 sps:$4 sm:$0xff]  }
 0x4a8   :  { %3001 = vmatprep.subr.bf16.mxu1 %v11475_v62  ;;  %v11551_v62 = vld [vmem:[#allocation11 + $0x8] ss:$16 sps:$4 sm:$0xff]  }
 0x4ab   :  { %3002 = vmatpush1.bf16.msra.mxu1 %v11473_v1  ;;  %v11554_v1 = vld [vmem:[#allocation11] ss:$16 sps:$4 sm:$0xff]  }
 0x4ac   :  { %3003 = vmatprep.subr.bf16.mxu1 %v11478_v47  ;;  %v11559_v47 = vld [vmem:[#allocation11 + $0x1ec] ss:$16 sps:$4 sm:$0xff]  }
 0x4af   :  { %3004 = vmatpush1.bf16.msra.mxu1 %v11476_v2  ;;  %v11557_v2 = vld [vmem:[#allocation11 + $0x1e8] ss:$16 sps:$4 sm:$0xff]  }
 0x4b0   :  { %3005 = vmatprep.subr.bf16.mxu1 %v11481_v3  ;;  %v11562_v3 = vld [vmem:[#allocation11 + $0x1e4] ss:$16 sps:$4 sm:$0xff]  }
 0x4b3   :  { %3006 = vmatpush1.bf16.msra.mxu1 %v11479_v4  ;;  %v11560_v4 = vld [vmem:[#allocation11 + $0x1e0] ss:$16 sps:$4 sm:$0xff]  }
 0x4b4   :  { %3007 = vmatprep.subr.bf16.mxu1 %v11484_v5  ;;  %v11565_v5 = vld [vmem:[#allocation11 + $0x1cc] ss:$16 sps:$4 sm:$0xff]  }
 0x4b7   :  { %3008 = vmatpush1.bf16.msra.mxu1 %v11482_v6  ;;  %v11563_v6 = vld [vmem:[#allocation11 + $0x1c8] ss:$16 sps:$4 sm:$0xff]  }
 0x4b8   :  { %3009 = vmatprep.subr.bf16.mxu1 %v11487_v7  ;;  %v11568_v7 = vld [vmem:[#allocation11 + $0x1c4] ss:$16 sps:$4 sm:$0xff]  }
 0x4bb   :  { %3010 = vmatpush2.bf16.msra.mxu1 %v11485_v8  ;;  %v11566_v8 = vld [vmem:[#allocation11 + $0x1c0] ss:$16 sps:$4 sm:$0xff]  }
 0x4bc   :  { %3011 = vmatprep.subr.bf16.mxu1 %v11490_v9  ;;  %v11571_v9 = vld [vmem:[#allocation11 + $0x1ac] ss:$16 sps:$4 sm:$0xff]  }
 0x4bf   :  { %3012 = vmatpush2.bf16.msra.mxu1 %v11488_v10  ;;  %v11569_v10 = vld [vmem:[#allocation11 + $0x1a8] ss:$16 sps:$4 sm:$0xff]  }
 0x4c0   :  { %3013 = vmatprep.subr.bf16.mxu1 %v11493_v11  ;;  %v11574_v11 = vld [vmem:[#allocation11 + $0x1a4] ss:$16 sps:$4 sm:$0xff]  }
 0x4c3   :  { %3014 = vmatpush2.bf16.msra.mxu1 %v11491_v12  ;;  %v11572_v12 = vld [vmem:[#allocation11 + $0x1a0] ss:$16 sps:$4 sm:$0xff]  }
 0x4c4   :  { %3015 = vmatprep.subr.bf16.mxu1 %v11496_v14  ;;  %v11577_v14 = vld [vmem:[#allocation11 + $0x18c] ss:$16 sps:$4 sm:$0xff]  }
 0x4c7   :  { %3016 = vmatpush2.bf16.msra.mxu1 %v11494_v16  ;;  %v11575_v16 = vld [vmem:[#allocation11 + $0x188] ss:$16 sps:$4 sm:$0xff]  }
 0x4c8   :  { %3017 = vmatprep.subr.bf16.mxu1 %v11499_v17  ;;  %v11580_v17 = vld [vmem:[#allocation11 + $0x184] ss:$16 sps:$4 sm:$0xff]  }
 0x4cb   :  { %3018 = vmatpush2.bf16.msra.mxu1 %v11497_v18  ;;  %v11578_v18 = vld [vmem:[#allocation11 + $0x180] ss:$16 sps:$4 sm:$0xff]  }
 0x4cc   :  { %3019 = vmatprep.subr.bf16.mxu1 %v11502_v20  ;;  %v11583_v20 = vld [vmem:[#allocation11 + $0x16c] ss:$16 sps:$4 sm:$0xff]  }
 0x4cf   :  { %3020 = vmatpush2.bf16.msra.mxu1 %v11500_v21  ;;  %v11581_v21 = vld [vmem:[#allocation11 + $0x168] ss:$16 sps:$4 sm:$0xff]  }
 0x4d0   :  { %3021 = vmatprep.subr.bf16.mxu1 %v11505_v22  ;;  %v11584_v22 = vld [vmem:[#allocation11 + $0x160] ss:$16 sps:$4 sm:$0xff]  }
 0x4d3   :  { %3022 = vmatpush2.bf16.msra.mxu1 %v11503_v23  ;;  %v11586_v23 = vld [vmem:[#allocation11 + $0x164] ss:$16 sps:$4 sm:$0xff]  }
 0x4d4   :  { %3023 = vmatprep.subr.bf16.mxu1 %v11508_v25  ;;  %v11589_v25 = vld [vmem:[#allocation11 + $0x14c] ss:$16 sps:$4 sm:$0xff]  }
 0x4d7   :  { %3024 = vmatpush2.bf16.msra.mxu1 %v11506_v26  ;;  %v11587_v26 = vld [vmem:[#allocation11 + $0x148] ss:$16 sps:$4 sm:$0xff]  }
 0x4d8   :  { %3511 = vmatprep.subr.bf16.mxu1 %v11511_v29  ;;  %v11590_v29 = vld [vmem:[#allocation11 + $0x140] ss:$16 sps:$4 sm:$0xff]  }
 0x4da   :  { %3026 = vmatmul.mubr.bf16.vlgmr.msra.gmra.mxu1 %v13198_v61  ;;  %v11521_v61 = vld [vmem:[#allocation11 + $0xa8] ss:$16 sps:$4 sm:$0xff]  }
 0x4db   :  { %3543 = vmatprep.mubr.bf16.mxu1 %v13219_v51  ;;  %3512 = vmatpush1.bf16.msra.mxu1 %v11509_v28  ;;  %v11544_v51 = vld [vmem:[#allocation11 + $0x44] ss:$16 sps:$4 sm:$0xff]  }
 0x4dc   :  { %3513 = vmatprep.subr.bf16.mxu1 %v11517_v31  ;;  %3480 = vmatprep.subr.bf16.mxu0 %v11544_v51  ;;  %v11592_v28 = vld [vmem:[#allocation11 + $0x144] ss:$16 sps:$4 sm:$0xff]   ;;  %v11593_v31 = vld [vmem:[#allocation11 + $0x128] ss:$16 sps:$4 sm:$0xff]   ;;  %v10026_v51 = vmul.f32 -1.442695, %v2989_v49 }
 0x4dd   :  { %3481 = vmatpush1.bf16.msra.mxu0 %v11542_v13 }
 0x4de   :  { %3482 = vmatprep.subr.bf16.mxu0 %v11550_v57  ;;  %v2623_v57 = vrot.slane %v2610_v42, %v13118_v58 }
 0x4df   :  { %3514 = vmatpush1.bf16.msra.mxu1 %v11515_v34  ;;  %v11601_v34 = vld [vmem:[#allocation11 + $0x10c] ss:$16 sps:$4 sm:$0xff]  }
 0x4e0   :  { %3515 = vmatprep.subr.bf16.mxu1 %v11523_v35  ;;  %v11599_v35 = vld [vmem:[#allocation11 + $0x108] ss:$16 sps:$4 sm:$0xff]  }
 0x4e1   :  { %3483 = vmatpush1.bf16.msra.mxu0 %v11548_v59  ;;  %v2627_v59 = vrot.slane %v2610_v42, %v13116_v55 }
 0x4e2   :  { %3484 = vmatprep.subr.bf16.mxu0 %v11556_v63 }
 0x4e3   :  { %3516 = vmatpush1.bf16.msra.mxu1 %v11521_v61  ;;  %v11607_v61 = vld [vmem:[#allocation8 + $0xe4] ss:$16 sps:$4 sm:$0xff]  }
 0x4e4   :  { %3517 = vmatprep.subr.bf16.mxu1 %v11529_v39 }
 0x4e5   :  { %3485 = vmatpush1.bf16.msra.mxu0 %v11554_v1 }
 0x4e6   :  { %3486 = vmatprep.subr.bf16.mxu0 %v11562_v3 }
 0x4e7   :  { %3518 = vmatpush1.bf16.msra.mxu1 %v11527_v41 }
 0x4e8   :  { %3519 = vmatprep.subr.bf16.mxu1 %v11535_v43  ;;  %v2615_v43 = vrot.slane %v2610_v42, %v13110_v45 }
 0x4e9   :  { %3487 = vmatpush2.bf16.msra.mxu0 %v11560_v4 }
 0x4ea   :  { %3488 = vmatprep.subr.bf16.mxu0 %v11568_v7 }
 0x4eb   :  { %3520 = vmatpush1.bf16.msra.mxu1 %v11533_v15  ;;  %v2987_v15 = vadd.f32 %v13224_v54, %v2615_v43 }
 0x4ec   :  { %3521 = vmatprep.subr.bf16.mxu1 %v11541_v50 }
 0x4ed   :  { %3489 = vmatpush2.bf16.msra.mxu0 %v11566_v8  ;;  %v10025_v50 = vmul.f32 -1.442695, %v2987_v15  ;;  %v3691_v15 = vld [vmem:[#allocation5 + $0x23] sm:$0x1] }
 0x4ee   :  { %3490 = vmatprep.subr.bf16.mxu0 %v11574_v11 }
 0x4ef   :  { %3522 = vmatpush1.bf16.msra.mxu1 %v11539_v52  ;;  %12677 = vpow2.f32 %v10025_v50  ;;  %v11637_v50 = vld [vmem:[#allocation8 + $0x1a4] ss:$16 sps:$4 sm:$0xff]  }
 0x4f0   :  { %3523 = vmatprep.subr.bf16.mxu1 %v11547_v53  ;;  %12679 = vpow2.f32 %v10026_v51 }
 0x4f1   :  { %3491 = vmatpush2.bf16.msra.mxu0 %v11572_v12 }
 0x4f2   :  { %3492 = vmatprep.subr.bf16.mxu0 %v11580_v17  ;;  %v11610_v17 = vld [vmem:[#allocation8 + $0xc4] ss:$16 sps:$4 sm:$0xff]  }
 0x4f3   :  { %3524 = vmatpush1.bf16.msra.mxu1 %v11545_v56 }
 0x4f4   :  { %3525 = vmatprep.subr.bf16.mxu1 %v11553_v60 }
 0x4f5   :  { %3493 = vmatpush2.bf16.msra.mxu0 %v11578_v18  ;;  %v11613_v18 = vld [vmem:[#allocation8 + $0xa4] ss:$16 sps:$4 sm:$0xff]  }
 0x4f6   :  { %3494 = vmatprep.subr.bf16.mxu0 %v11586_v23  ;;  %v11619_v23 = vld [vmem:[#allocation8 + $0x64] ss:$16 sps:$4 sm:$0xff]  }
 0x4f7   :  { %3526 = vmatpush1.bf16.msra.mxu1 %v11551_v62 }
 0x4f8   :  { %3527 = vmatprep.subr.bf16.mxu1 %v11559_v47 }
 0x4f9   :  { %3495 = vmatpush2.bf16.msra.mxu0 %v11584_v22  ;;  %v11614_v22 = vld [vmem:[#allocation8 + $0x80] ss:$16 sps:$4 sm:$0xff]  }
 0x4fa   :  { %3496 = vmatprep.subr.bf16.mxu0 %v11592_v28  ;;  %v11620_v28 = vld [vmem:[#allocation8 + $0x40] ss:$16 sps:$4 sm:$0xff]  }
 0x4fb   :  { %3528 = vmatpush2.bf16.msra.mxu1 %v11557_v2 }
 0x4fc   :  { %3529 = vmatprep.subr.bf16.mxu1 %v11565_v5  ;;  %v12678_v52 = vpop.eup %12677 }
 0x4fd   :  { %3497 = vmatpush2.bf16.msra.mxu0 %v11590_v29  ;;  %v12680_v13 = vpop.eup %12679  ;;  %v3037_v53 = vadd.f32 1.0, %v12678_v52  ;;  %v11625_v29 = vld [vmem:[#allocation8 + $0x24] ss:$16 sps:$4 sm:$0xff]  }
 0x4fe   :  { %3498 = vmatprep.subr.bf16.mxu0 %v11598_v27  ;;  %v3043_v56 = vadd.f32 1.0, %v12680_v13  ;;  %v11628_v27 = vld [vmem:[#allocation8 + $0x4] ss:$16 sps:$4 sm:$0xff]  }
 0x4ff   :  { %3530 = vmatpush2.bf16.msra.mxu1 %v11563_v6  ;;  %12681 = vrcp.f32 %v3037_v53  ;;  %v3692_v53 = vld [vmem:[#allocation5 + $0x2b] sm:$0x1] }
 0x500   :  { %3531 = vmatprep.subr.bf16.mxu1 %v11571_v9  ;;  %12683 = vrcp.f32 %v3043_v56  ;;  %v3699_v56 = vpack.c.bf16 %v3691_v15, %v3691_v15 }
 0x501   :  { %3499 = vmatpush2.bf16.msra.mxu0 %v11596_v32  ;;  %v11626_v32 = vld [vmem:[#allocation8] ss:$16 sps:$4 sm:$0xff]  }
 0x502   :  { %3500 = vmatprep.subr.bf16.mxu0 %v11604_v19  ;;  %v3689_v19 = vld [vmem:[#allocation5 + $0x13] sm:$0x1] }
 0x503   :  { %3532 = vmatpush2.bf16.msra.mxu1 %v11569_v10 }
 0x504   :  { %3533 = vmatprep.subr.bf16.mxu1 %v11577_v14  ;;  %v11605_v14 = vld [vmem:[#allocation8 + $0xe0] ss:$16 sps:$4 sm:$0xff]  }
 0x505   :  { %3501 = vmatpush2.bf16.msra.mxu0 %v11602_v36  ;;  %v3687_v36 = vld [vmem:[#allocation5 + $0x3] sm:$0x1] }
 0x506   :  { %10926 = vmatprep.subr.bf16.mxu0 %v13041_v33  ;;  %v3695_v42 = vpack.c.bf16 %v3687_v36, %v3687_v36  ;;  %v11656_v36 = vld [vmem:[#allocation13 + $0xa0] sm:$0xff]  }
 0x507   :  { %3534 = vmatpush2.bf16.msra.mxu1 %v11575_v16 }
 0x508   :  { %3535 = vmatprep.subr.bf16.mxu1 %v11583_v20  ;;  %v11611_v20 = vld [vmem:[#allocation8 + $0xa0] ss:$16 sps:$4 sm:$0xff]   ;;  %v3714_v52 = vunpack.c.l.b16 %v3695_v42  ;;  %v11663_v42 = vld [vmem:[#allocation8 + $0xec] ss:$16 sps:$4 sm:$0xff]  }
 0x50b   :  { %3536 = vmatpush2.bf16.msra.mxu1 %v11581_v21  ;;  %v11616_v21 = vld [vmem:[#allocation8 + $0x84] ss:$16 sps:$4 sm:$0xff]  }
 0x50c   :  { %3537 = vmatprep.subr.bf16.mxu1 %v11589_v25  ;;  %v12682_v2 = vpop.eup %12681  ;;  %v11617_v25 = vld [vmem:[#allocation8 + $0x60] ss:$16 sps:$4 sm:$0xff]  }
 0x50d   :  { %v12684_v3 = vpop.eup %12683 }
 0x50e   :  { %v3053_v5 = vmul.f32 %v12684_v3, %v13181_v38  ;;  %v11608_v38 = vld [vmem:[#allocation8 + $0xc0] ss:$16 sps:$4 sm:$0xff]   ;;  %v11643_v3 = vld [vmem:[#allocation8 + $0x164] ss:$16 sps:$4 sm:$0xff]  }
 0x50f   :  { %3538 = vmatpush2.bf16.msra.mxu1 %v11587_v26  ;;  %v11622_v26 = vld [vmem:[#allocation8 + $0x44] ss:$16 sps:$4 sm:$0xff]  }
 0x510   :  { %3539 = vmatprep.subr.bf16.mxu1 %v11595_v24  ;;  %v11623_v24 = vld [vmem:[#allocation8 + $0x20] ss:$16 sps:$4 sm:$0xff]  }
 0x513   :  { %3540 = vmatpush2.bf16.msra.mxu1 %v11593_v31  ;;  %v3688_v31 = vld [vmem:[#allocation5 + $0xb] sm:$0x1] }
 0x514   :  { %3541 = vmatprep.subr.bf16.mxu1 %v11601_v34  ;;  %v11631_v34 = vld [vmem:[#allocation8 + $0x1e4] ss:$16 sps:$4 sm:$0xff]  }
 0x517   :  { %3542 = vmatpush2.bf16.msra.mxu1 %v11599_v35  ;;  %v3696_v35 = vpack.c.bf16 %v3688_v31, %v3688_v31 }
 0x518   :  { %4144 = vmatprep.subr.bf16.mxu1 %v11607_v61  ;;  %v11629_v61 = vld [vmem:[#allocation8 + $0x1e0] ss:$16 sps:$4 sm:$0xff]  }
 0x519   :  { %v3715_v43 = vunpack.c.l.b16 %v3696_v35  ;;  %v11655_v35 = vld [vmem:[#allocation13 + $0xa8] sm:$0xff]  }
 0x51b   :  { %v3722_v13 = vrot.slane %v3715_v43, 7  ;;  %v3128_v43 = vld [vmem:[%s13569_s4] sm:$0xf] }
 0x51c   :  { %v3137_v15 = vrot.slane %v3128_v43, %v13112_v46 }
 0x55a   :  { %v13231_v37 = vpop.f32.mrf.mxu1 }
 0x55c   :  { %v10924_v39 = vpop.f32.mrf.mxu1 }
 0x55d   :  { %v11634_v39 = vld [vmem:[#allocation8 + $0x1c4] ss:$16 sps:$4 sm:$0xff]  }
 0x55e   :  { %v2490_v40 = vpop.f32.mrf.mxu1 }
 0x55f   :  { %v3690_v40 = vld [vmem:[#allocation5 + $0x1b] sm:$0x1] }
 0x560   :  { %v10925_v41 = vpop.f32.mrf.mxu1  ;;  %v3698_v49 = vpack.c.bf16 %v3690_v40, %v3690_v40  ;;  %v11659_v40 = vld [vmem:[#allocation13 + $0x88] sm:$0xff]  }
 0x561   :  { %v3697_v41 = vpack.c.bf16 %v3689_v19, %v3689_v19  ;;  %v11654_v19 = vld [vmem:[#allocation13 + $0xb0] sm:$0xff]  }
 0x563   :  { %v3716_v51 = vunpack.c.l.b16 %v3697_v41  ;;  %v11660_v41 = vld [vmem:[#allocation13 + $0x80] sm:$0xff]  }
 0x59a   :  { %v3027_v60 = vpop.f32.mrf.mxu1 }
 0x59b   :  { %v3028_v62 = vadd.f32 %v3027_v60, %v2623_v57  ;;  %v11635_v57 = vld [vmem:[#allocation8 + $0x1a0] ss:$16 sps:$4 sm:$0xff]   ;;  %v11640_v60 = vld [vmem:[#allocation8 + $0x184] ss:$16 sps:$4 sm:$0xff]  }
 0x59c   :  { %v3029_v63 = vpop.f32.mrf.mxu1 }
 0x59d   :  { %12685 = vtanh.f32 %v3028_v62  ;;  %v3030_v54 = vadd.f32 %v3029_v63, %v2627_v59  ;;  %v3717_v59 = vunpack.c.l.b16 %v3698_v49  ;;  %v3724_v62 = vrot.slane %v3716_v51, 6  ;;  %v3693_v63 = vld [vmem:[#allocation5 + $0x33] sm:$0x1] }
 0x59e   :  { %v3031_v0 = vpop.f32.mrf.mxu1 }
 0x59f   :  { %v10027_v1 = vmul.f32 -1.442695, %v3030_v54  ;;  %v3700_v54 = vpack.c.bf16 %v3692_v53, %v3692_v53  ;;  %v3723_v0 = vsel %vm139_vm0, %v3722_v13, %v3714_v52 }
 0x5a0   :  { %v3032_v47 = vpop.f32.mrf.mxu1 }
 0x5a1   :  { %12687 = vpow2.f32 %v10027_v1  ;;  %v3718_v1 = vunpack.c.l.b16 %v3699_v56  ;;  %v11638_v47 = vld [vmem:[#allocation8 + $0x180] ss:$16 sps:$4 sm:$0xff]  }
 0x5aa   :  { %v12686_v4 = vpop.eup %12685 }
 0x5ab   :  { %v3054_v6 = vmul.f32 %v12686_v4, %v12682_v2  ;;  %v3726_v2 = vrot.slane %v3717_v59, 5  ;;  %v3694_v4 = vld [vmem:[#allocation5 + $0x3b] sm:$0x1] }
 0x5ad   :  { %v13240_v7 = vadd.f32 %v3054_v6, %v3053_v5  ;;  %v3701_v5 = vpack.c.bf16 %v3693_v63, %v3693_v63  ;;  %v3725_v6 = vsel %vm142_vm1, %v3724_v62, %v3723_v0 }
 0x5ae   :  { %v12688_v8 = vpop.eup %12687 }
 0x5af   :  { %v3050_v9 = vadd.f32 1.0, %v12688_v8  ;;  %12689 = vtanh.f32 %v13240_v7  ;;  %v3719_v8 = vunpack.c.l.b16 %v3700_v54  ;;  %v3145_v54 = vrot.slane %v3128_v43, %v13116_v55 }
 0x5b1   :  { %12691 = vrcp.f32 %v3050_v9  ;;  %v3728_v9 = vrot.slane %v3718_v1, 4  ;;  %v3141_v1 = vrot.slane %v3128_v43, %v13118_v58 }
 0x5bc   :  { %v12690_v10 = vpop.eup %12689 }
 0x5be   :  { %v12692_v11 = vpop.eup %12691 }
 0x5bf   :  { %v3057_v12 = vmul.f32 %v12692_v11, %v12690_v10  ;;  %v11641_v10 = vld [vmem:[#allocation8 + $0x160] ss:$16 sps:$4 sm:$0xff]   ;;  %v3702_v11 = vpack.c.bf16 %v3694_v4, %v3694_v4 }
 0x5c1   :  { %v13243_v16 = vpack.c.bf16 %v3057_v12, %v3057_v12  ;;  %v3727_v12 = vsel %vm145_vm2, %v3726_v2, %v3725_v6 }
 0x5c3   :  { %3503 = vmatmul.mubr.bf16.vlgmr.msra.gmra.mxu0 %v13243_v16  ;;  %3544 = vmatmul.mubr.bf16.vlgmr.msra.gmra.mxu1 %v13243_v16 }
 0x5c4   :  { %4145 = vmatpush1.bf16.msra.mxu1 %v11605_v14  ;;  %4176 = vmatprep.mubr.bf16.mxu1 %v13243_v16  ;;  %v11646_v14 = vld [vmem:[#allocation8 + $0x144] ss:$16 sps:$4 sm:$0xff]  }
 0x5c5   :  { %4146 = vmatprep.subr.bf16.mxu1 %v11610_v17  ;;  %10942 = vmatprep.mubr.msk.bf16.mxu0 %vm13042_vm7, %v13041_v33  ;;  %v3720_v17 = vunpack.c.l.b16 %v3701_v5 }
 0x5c8   :  { %4147 = vmatpush1.bf16.msra.mxu1 %v11608_v38  ;;  %v3730_v38 = vrot.slane %v3719_v8, 3 }
 0x5c9   :  { %4148 = vmatprep.subr.bf16.mxu1 %v11613_v18  ;;  %v3729_v18 = vsel %vm148_vm3, %v3728_v9, %v3727_v12 }
 0x5cc   :  { %4149 = vmatpush1.bf16.msra.mxu1 %v11611_v20  ;;  %v11644_v20 = vld [vmem:[#allocation8 + $0x140] ss:$16 sps:$4 sm:$0xff]  }
 0x5cd   :  { %4150 = vmatprep.subr.bf16.mxu1 %v11616_v21  ;;  %v3721_v21 = vunpack.c.l.b16 %v3702_v11 }
 0x5d0   :  { %4151 = vmatpush1.bf16.msra.mxu1 %v11614_v22  ;;  %v11649_v22 = vld [vmem:[#allocation8 + $0x124] ss:$16 sps:$4 sm:$0xff]  }
 0x5d1   :  { %4152 = vmatprep.subr.bf16.mxu1 %v11619_v23  ;;  %v3732_v23 = vrot.slane %v3720_v17, 2 }
 0x5d4   :  { %4153 = vmatpush1.bf16.msra.mxu1 %v11617_v25  ;;  %v3731_v25 = vsel %vm151_vm4, %v3730_v38, %v3729_v18 }
 0x5d5   :  { %4154 = vmatprep.subr.bf16.mxu1 %v11622_v26  ;;  %v11647_v26 = vld [vmem:[#allocation8 + $0x120] ss:$16 sps:$4 sm:$0xff]  }
 0x5d8   :  { %4155 = vmatpush1.bf16.msra.mxu1 %v11620_v28  ;;  %v3734_v28 = vrot.slane %v3721_v21, 1 }
 0x5d9   :  { %4156 = vmatprep.subr.bf16.mxu1 %v11625_v29  ;;  %v11652_v29 = vld [vmem:[#allocation8 + $0x104] ss:$16 sps:$4 sm:$0xff]  }
 0x5dc   :  { %4157 = vmatpush1.bf16.msra.mxu1 %v11623_v24  ;;  %v3733_v24 = vsel %vm154_vm5, %v3732_v23, %v3731_v25  ;;  %v11666_v25 = vld [vmem:[#allocation8 + $0xcc] ss:$16 sps:$4 sm:$0xff]  }
 0x5dd   :  { %4158 = vmatprep.subr.bf16.mxu1 %v11628_v27  ;;  %v11650_v27 = vld [vmem:[#allocation8 + $0x100] ss:$16 sps:$4 sm:$0xff]   ;;  %v3735_v31 = vsel %vm157_vm6, %v3734_v28, %v3733_v24  ;;  %v11672_v24 = vld [vmem:[#allocation8 + $0x8c] ss:$16 sps:$4 sm:$0xff]  }
 0x5e0   :  { %4159 = vmatpush1.bf16.msra.mxu1 %v11626_v32  ;;  %v13257_v32 = vpack.c.b16 %v3735_v31, %v3735_v31  ;;  %v11670_v31 = vld [vmem:[#allocation8 + $0x88] ss:$16 sps:$4 sm:$0xff]  }
 0x5e1   :  { %4160 = vmatprep.subr.bf16.mxu1 %v11631_v34  ;;  %v11653_v34 = vld [vmem:[#allocation13 + $0xb8] sm:$0xff]  }
 0x5e2   :  { %10927 = vmatpush3.bf16.msra.mxu0 %v11653_v34 }
 0x5e3   :  { %10928 = vmatprep.subr.bf16.mxu0 %v13041_v33 }
 0x5e4   :  { %4161 = vmatpush2.bf16.msra.mxu1 %v11629_v61  ;;  %v11657_v61 = vld [vmem:[#allocation13 + $0x98] sm:$0xff]  }
 0x5e5   :  { %4162 = vmatprep.subr.bf16.mxu1 %v11634_v39  ;;  %v11658_v39 = vld [vmem:[#allocation13 + $0x90] sm:$0xff]  }
 0x5e6   :  { %10929 = vmatpush3.bf16.msra.mxu0 %v11654_v19  ;;  %v11675_v19 = vld [vmem:[#allocation8 + $0x6c] ss:$16 sps:$4 sm:$0xff]  }
 0x5e7   :  { %10930 = vmatprep.subr.bf16.mxu0 %v13041_v33 }
 0x5e8   :  { %4163 = vmatpush2.bf16.msra.mxu1 %v11632_v48  ;;  %v3133_v48 = vrot.slane %v3128_v43, %v13110_v45  ;;  %v11687_v43 = vld [vmem:[#allocation8 + $0x1ec] ss:$16 sps:$4 sm:$0xff]  }
 0x5e9   :  { %4164 = vmatprep.subr.bf16.mxu1 %v11637_v50 }
 0x5ea   :  { %10931 = vmatpush3.bf16.msra.mxu0 %v11655_v35 }
 0x5eb   :  { %10932 = vmatprep.subr.bf16.mxu0 %v13041_v33 }
 0x5ec   :  { %4165 = vmatpush2.bf16.msra.mxu1 %v11635_v57 }
 0x5ed   :  { %4166 = vmatprep.subr.bf16.mxu1 %v11640_v60 }
 0x5ee   :  { %10933 = vmatpush3.bf16.msra.mxu0 %v11656_v36  ;;  %v11673_v36 = vld [vmem:[#allocation8 + $0x68] ss:$16 sps:$4 sm:$0xff]  }
 0x5ef   :  { %10934 = vmatprep.subr.bf16.mxu0 %v13041_v33 }
 0x5f0   :  { %4167 = vmatpush2.bf16.msra.mxu1 %v11638_v47 }
 0x5f1   :  { %4168 = vmatprep.subr.bf16.mxu1 %v11643_v3 }
 0x5f2   :  { %10935 = vmatpush3.bf16.msra.mxu0 %v11657_v61  ;;  %v11676_v61 = vld [vmem:[#allocation8 + $0x48] ss:$16 sps:$4 sm:$0xff]  }
 0x5f3   :  { %10936 = vmatprep.subr.bf16.mxu0 %v13041_v33 }
 0x5f4   :  { %4169 = vmatpush2.bf16.msra.mxu1 %v11641_v10 }
 0x5f5   :  { %4170 = vmatprep.subr.bf16.mxu1 %v11646_v14 }
 0x5f6   :  { %10937 = vmatpush3.bf16.msra.mxu0 %v11658_v39  ;;  %v11681_v39 = vld [vmem:[#allocation8 + $0x2c] ss:$16 sps:$4 sm:$0xff]  }
 0x5f7   :  { %10938 = vmatprep.subr.bf16.mxu0 %v13041_v33 }
 0x5f8   :  { %4171 = vmatpush2.bf16.msra.mxu1 %v11644_v20 }
 0x5f9   :  { %4172 = vmatprep.subr.bf16.mxu1 %v11649_v22  ;;  %v11661_v22 = vld [vmem:[#allocation8 + $0xe8] ss:$16 sps:$4 sm:$0xff]  }
 0x5fa   :  { %10939 = vmatpush3.bf16.msra.mxu0 %v11659_v40  ;;  %v11679_v40 = vld [vmem:[#allocation8 + $0x28] ss:$16 sps:$4 sm:$0xff]  }
 0x5fb   :  { %10940 = vmatprep.subr.bf16.mxu0 %v13041_v33 }
 0x5fc   :  { %4173 = vmatpush2.bf16.msra.mxu1 %v11647_v26  ;;  %v11669_v26 = vld [vmem:[#allocation8 + $0xac] ss:$16 sps:$4 sm:$0xff]  }
 0x5fd   :  { %4174 = vmatprep.subr.bf16.mxu1 %v11652_v29  ;;  %v11667_v29 = vld [vmem:[#allocation8 + $0xa8] ss:$16 sps:$4 sm:$0xff]  }
 0x5fe   :  { %10941 = vmatpush3.bf16.msra.mxu0 %v11660_v41  ;;  %v11684_v41 = vld [vmem:[#allocation8 + $0xc] ss:$16 sps:$4 sm:$0xff]  }
 0x5ff   :  { %4185 = vmatprep.subr.bf16.mxu0 %v11663_v42  ;;  %v11682_v42 = vld [vmem:[#allocation8 + $0x8] ss:$16 sps:$4 sm:$0xff]  }
 0x600   :  { %4175 = vmatpush2.bf16.msra.mxu1 %v11650_v27 }
 0x603   :  { %4177 = vmatmul.mubr.bf16.vlgmr.msra.gmra.mxu1 %v13257_v32 }
 0x683   :  { %v3504_v49 = vpop.f32.mrf.mxu0  ;;  %v3545_v50 = vpop.f32.mrf.mxu1 }
 0x684   :  { %v3505_v51 = vadd.f32 %v3504_v49, %v3133_v48  ;;  %v3546_v3 = vadd.f32 %v3545_v50, %v3141_v1  ;;  %v11685_v48 = vld [vmem:[#allocation8 + $0x1e8] ss:$16 sps:$4 sm:$0xff]   ;;  %v11693_v50 = vld [vmem:[#allocation8 + $0x1ac] ss:$16 sps:$4 sm:$0xff]   ;;  %v11711_v1 = vld [vmem:[#allocation11 + $0xec] ss:$16 sps:$4 sm:$0xff]  }
 0x685   :  { %v3506_v52 = vpop.f32.mrf.mxu0  ;;  %v3547_v13 = vpop.f32.mrf.mxu1  ;;  %v11688_v49 = vld [vmem:[#allocation8 + $0x1c8] ss:$16 sps:$4 sm:$0xff]  }
 0x686   :  { %v10092_v53 = vmul.f32 -1.442695, %v3505_v51  ;;  %v3507_v56 = vadd.f32 %v3506_v52, %v3137_v15  ;;  %v3548_v0 = vadd.f32 %v3547_v13, %v3145_v54  ;;  %v11690_v15 = vld [vmem:[#allocation8 + $0x1cc] ss:$16 sps:$4 sm:$0xff]   ;;  %v11691_v51 = vld [vmem:[#allocation8 + $0x1a8] ss:$16 sps:$4 sm:$0xff]  }
 0x687   :  { %v3508_v57 = vpop.f32.mrf.mxu0  ;;  %v3549_v59 = vpop.f32.mrf.mxu1  ;;  %v11696_v52 = vld [vmem:[#allocation8 + $0x18c] ss:$16 sps:$4 sm:$0xff]   ;;  %v11694_v13 = vld [vmem:[#allocation8 + $0x188] ss:$16 sps:$4 sm:$0xff]  }
 0x688   :  { %12693 = vpow2.f32 %v10092_v53  ;;  %v10093_v60 = vmul.f32 -1.442695, %v3507_v56  ;;  %v10094_v47 = vmul.f32 -1.442695, %v3548_v0  ;;  %v11699_v53 = vld [vmem:[#allocation8 + $0x16c] ss:$16 sps:$4 sm:$0xff]  }
 0x689   :  { %v3509_v62 = vpop.f32.mrf.mxu0  ;;  %v3550_v63 = vpop.f32.mrf.mxu1  ;;  %v11697_v56 = vld [vmem:[#allocation8 + $0x168] ss:$16 sps:$4 sm:$0xff]   ;;  %v11702_v57 = vld [vmem:[#allocation8 + $0x14c] ss:$16 sps:$4 sm:$0xff]  }
 0x68a   :  { %12695 = vpow2.f32 %v10093_v60  ;;  %v11700_v59 = vld [vmem:[#allocation8 + $0x148] ss:$16 sps:$4 sm:$0xff]   ;;  %v11705_v60 = vld [vmem:[#allocation8 + $0x12c] ss:$16 sps:$4 sm:$0xff]  }
 0x68b   :  { %12697 = vpow2.f32 %v10094_v47  ;;  %v11703_v62 = vld [vmem:[#allocation8 + $0x128] ss:$16 sps:$4 sm:$0xff]   ;;  %v11708_v63 = vld [vmem:[#allocation8 + $0x10c] ss:$16 sps:$4 sm:$0xff]   ;;  %v11712_v47 = vld [vmem:[#allocation11 + $0xe0] ss:$16 sps:$4 sm:$0xff]  }
 0x68c   :  { %v11706_v54 = vld [vmem:[#allocation8 + $0x108] ss:$16 sps:$4 sm:$0xff]   ;;  %v11709_v0 = vld [vmem:[#allocation11 + $0xe8] ss:$16 sps:$4 sm:$0xff]  }
 0x695   :  { %v12694_v2 = vpop.eup %12693 }
 0x696   :  { %v3555_v4 = vadd.f32 1.0, %v12694_v2  ;;  %v11714_v2 = vld [vmem:[#allocation11 + $0xe4] ss:$16 sps:$4 sm:$0xff]  }
 0x697   :  { %v12696_v5 = vpop.eup %12695  ;;  %4662 = vmatprep.subr.bf16.mxu1 %v11714_v2  ;;  %v11795_v2 = vld [vmem:[#allocation11 + $0x12c] ss:$16 sps:$4 sm:$0xff]  }
 0x698   :  { %12699 = vrcp.f32 %v3555_v4  ;;  %v3561_v6 = vadd.f32 1.0, %v12696_v5  ;;  %v12698_v8 = vpop.eup %12697  ;;  %v11720_v4 = vld [vmem:[#allocation11 + $0xc4] ss:$16 sps:$4 sm:$0xff]   ;;  %v11715_v5 = vld [vmem:[#allocation11 + $0xc8] ss:$16 sps:$4 sm:$0xff]   ;;  %4663 = vmatpush1.bf16.msra.mxu1 %v11712_v47 }
 0x699   :  { %12701 = vtanh.f32 %v3546_v3  ;;  %v3568_v12 = vadd.f32 1.0, %v12698_v8  ;;  %v11717_v3 = vld [vmem:[#allocation11 + $0xcc] ss:$16 sps:$4 sm:$0xff]   ;;  %4664 = vmatprep.subr.bf16.mxu1 %v11720_v4  ;;  %v11790_v47 = vld [vmem:[#allocation11 + $0x140] ss:$16 sps:$4 sm:$0xff]  }
 0x69a   :  { %12703 = vrcp.f32 %v3561_v6  ;;  %v11718_v6 = vld [vmem:[#allocation11 + $0xc0] ss:$16 sps:$4 sm:$0xff]   ;;  %v11723_v8 = vld [vmem:[#allocation11 + $0xac] ss:$16 sps:$4 sm:$0xff]   ;;  %v11793_v4 = vld [vmem:[#allocation11 + $0x128] ss:$16 sps:$4 sm:$0xff]  }
 0x69b   :  { %12705 = vrcp.f32 %v3568_v12  ;;  %v11732_v12 = vld [vmem:[#allocation11 + $0x84] ss:$16 sps:$4 sm:$0xff]  }
 0x69c   :  { %4665 = vmatpush1.bf16.msra.mxu1 %v11718_v6  ;;  %v11801_v6 = vld [vmem:[#allocation11 + $0x10c] ss:$16 sps:$4 sm:$0xff]  }
 0x6a5   :  { %v12700_v9 = vpop.eup %12699 }
 0x6a6   :  { %v12702_v10 = vpop.eup %12701 }
 0x6a7   :  { %v12704_v11 = vpop.eup %12703  ;;  %v3572_v14 = vmul.f32 %v12702_v10, %v12700_v9  ;;  %v11726_v9 = vld [vmem:[#allocation11 + $0xa4] ss:$16 sps:$4 sm:$0xff]   ;;  %v11724_v10 = vld [vmem:[#allocation11 + $0xa0] ss:$16 sps:$4 sm:$0xff]  }
 0x6a8   :  { %v3571_v17 = vmul.f32 %v12704_v11, %v13216_v44  ;;  %v12706_v18 = vpop.eup %12705  ;;  %v11664_v44 = vld [vmem:[#allocation8 + $0xc8] ss:$16 sps:$4 sm:$0xff]   ;;  %v11729_v11 = vld [vmem:[#allocation11 + $0x8c] ss:$16 sps:$4 sm:$0xff]   ;;  %4666 = vmatprep.subr.bf16.mxu1 %v11726_v9  ;;  %v11799_v9 = vld [vmem:[#allocation11 + $0x108] ss:$16 sps:$4 sm:$0xff]  }
 0x6a9   :  { %4667 = vmatpush1.bf16.msra.mxu1 %v11724_v10  ;;  %v11807_v10 = vld [vmem:[#allocation8 + $0xe4] ss:$16 sps:$4 sm:$0xff]  }
 0x6aa   :  { %v13275_v38 = vadd.f32 %v3572_v14, %v3571_v17  ;;  %v11727_v14 = vld [vmem:[#allocation11 + $0x88] ss:$16 sps:$4 sm:$0xff]   ;;  %v11730_v17 = vld [vmem:[#allocation11 + $0x80] ss:$16 sps:$4 sm:$0xff]   ;;  %4668 = vmatprep.subr.bf16.mxu1 %v11732_v12 }
 0x6ac   :  { %12707 = vtanh.f32 %v13275_v38 }
 0x6ad   :  { %4669 = vmatpush1.bf16.msra.mxu1 %v11730_v17 }
 0x6b9   :  { %v12708_v20 = vpop.eup %12707 }
 0x6ba   :  { %v3575_v21 = vmul.f32 %v12708_v20, %v12706_v18  ;;  %v11735_v18 = vld [vmem:[#allocation11 + $0x6c] ss:$16 sps:$4 sm:$0xff]   ;;  %v11738_v20 = vld [vmem:[#allocation11 + $0x64] ss:$16 sps:$4 sm:$0xff]  }
 0x6bb   :  { %4670 = vmatprep.subr.bf16.mxu1 %v11738_v20 }
 0x6bc   :  { %v13278_v23 = vpack.c.bf16 %v3575_v21, %v3575_v21  ;;  %v11733_v21 = vld [vmem:[#allocation11 + $0x68] ss:$16 sps:$4 sm:$0xff]  }
 0x6be   :  { %10943 = vmatmul.mubr.bf16.vlgmr.msra.gmra.mxu0 %v13278_v23  ;;  %4694 = vmatprep.mubr.bf16.mxu1 %v13278_v23 }
 0x6bf   :  { %4186 = vmatpush1.bf16.msra.mxu0 %v11661_v22  ;;  %4217 = vmatprep.mubr.bf16.mxu0 %v13243_v16  ;;  %v11678_v16 = vld [vmem:[#allocation8 + $0x4c] ss:$16 sps:$4 sm:$0xff]   ;;  %v11736_v22 = vld [vmem:[#allocation11 + $0x60] ss:$16 sps:$4 sm:$0xff]  }
 0x6c0   :  { %4187 = vmatprep.subr.bf16.mxu0 %v11666_v25  ;;  %v11744_v25 = vld [vmem:[#allocation11 + $0x44] ss:$16 sps:$4 sm:$0xff]   ;;  %4671 = vmatpush1.bf16.msra.mxu1 %v11736_v22 }
 0x6c1   :  { %4672 = vmatprep.subr.bf16.mxu1 %v11744_v25 }
 0x6c3   :  { %v13283_v28 = vpop.f32.mrf.mxu1  ;;  %4188 = vmatpush1.bf16.msra.mxu0 %v11664_v44  ;;  %v11739_v44 = vld [vmem:[#allocation11 + $0x48] ss:$16 sps:$4 sm:$0xff]  }
 0x6c4   :  { %4189 = vmatprep.subr.bf16.mxu0 %v11669_v26  ;;  %v11742_v26 = vld [vmem:[#allocation11 + $0x40] ss:$16 sps:$4 sm:$0xff]  }
 0x6c5   :  { %v13285_v27 = vpop.f32.mrf.mxu1  ;;  %4673 = vmatpush1.bf16.msra.mxu1 %v11742_v26 }
 0x6c7   :  { %4190 = vmatpush1.bf16.msra.mxu0 %v11667_v29  ;;  %v4182_v34 = vpop.f32.mrf.mxu1  ;;  %v11747_v29 = vld [vmem:[#allocation11 + $0x2c] ss:$16 sps:$4 sm:$0xff]  }
 0x6c8   :  { %4191 = vmatprep.subr.bf16.mxu0 %v11672_v24  ;;  %v11745_v24 = vld [vmem:[#allocation11 + $0x28] ss:$16 sps:$4 sm:$0xff]   ;;  %v11748_v34 = vld [vmem:[#allocation11 + $0x20] ss:$16 sps:$4 sm:$0xff]  }
 0x6c9   :  { %v4183_v35 = vpop.f32.mrf.mxu1 }
 0x6ca   :  { %v11751_v35 = vld [vmem:[#allocation11 + $0x8] ss:$16 sps:$4 sm:$0xff]  }
 0x6cb   :  { %4192 = vmatpush1.bf16.msra.mxu0 %v11670_v31  ;;  %v11750_v31 = vld [vmem:[#allocation11 + $0x24] ss:$16 sps:$4 sm:$0xff]  }
 0x6cc   :  { %4193 = vmatprep.subr.bf16.mxu0 %v11675_v19  ;;  %4674 = vmatprep.subr.bf16.mxu1 %v11750_v31  ;;  %v11753_v19 = vld [vmem:[#allocation11 + $0xc] ss:$16 sps:$4 sm:$0xff]  }
 0x6cd   :  { %4675 = vmatpush1.bf16.msra.mxu1 %v11748_v34 }
 0x6cf   :  { %4194 = vmatpush1.bf16.msra.mxu0 %v11673_v36  ;;  %v11756_v36 = vld [vmem:[#allocation11 + $0x4] ss:$16 sps:$4 sm:$0xff]  }
 0x6d0   :  { %4195 = vmatprep.subr.bf16.mxu0 %v11678_v16  ;;  %v11754_v16 = vld [vmem:[#allocation11] ss:$16 sps:$4 sm:$0xff]   ;;  %4676 = vmatprep.subr.bf16.mxu1 %v11756_v36 }
 0x6d1   :  { %4677 = vmatpush1.bf16.msra.mxu1 %v11754_v16 }
 0x6d3   :  { %4196 = vmatpush1.bf16.msra.mxu0 %v11676_v61  ;;  %v11759_v61 = vld [vmem:[#allocation11 + $0x1ec] ss:$16 sps:$4 sm:$0xff]  }
 0x6d4   :  { %4197 = vmatprep.subr.bf16.mxu0 %v11681_v39  ;;  %v11757_v39 = vld [vmem:[#allocation11 + $0x1e8] ss:$16 sps:$4 sm:$0xff]  }
 0x6d7   :  { %4198 = vmatpush1.bf16.msra.mxu0 %v11679_v40  ;;  %v11762_v40 = vld [vmem:[#allocation11 + $0x1e4] ss:$16 sps:$4 sm:$0xff]  }
 0x6d8   :  { %4199 = vmatprep.subr.bf16.mxu0 %v11684_v41  ;;  %v11760_v41 = vld [vmem:[#allocation11 + $0x1e0] ss:$16 sps:$4 sm:$0xff]   ;;  %4678 = vmatprep.subr.bf16.mxu1 %v11762_v40 }
 0x6d9   :  { %4679 = vmatpush2.bf16.msra.mxu1 %v11760_v41 }
 0x6db   :  { %4200 = vmatpush1.bf16.msra.mxu0 %v11682_v42  ;;  %v11765_v42 = vld [vmem:[#allocation11 + $0x1cc] ss:$16 sps:$4 sm:$0xff]  }
 0x6dc   :  { %4201 = vmatprep.subr.bf16.mxu0 %v11687_v43  ;;  %v11763_v43 = vld [vmem:[#allocation11 + $0x1c8] ss:$16 sps:$4 sm:$0xff]  }
 0x6df   :  { %4202 = vmatpush2.bf16.msra.mxu0 %v11685_v48  ;;  %v11768_v48 = vld [vmem:[#allocation11 + $0x1c4] ss:$16 sps:$4 sm:$0xff]  }
 0x6e0   :  { %4203 = vmatprep.subr.bf16.mxu0 %v11690_v15  ;;  %v11766_v15 = vld [vmem:[#allocation11 + $0x1c0] ss:$16 sps:$4 sm:$0xff]   ;;  %4680 = vmatprep.subr.bf16.mxu1 %v11768_v48 }
 0x6e1   :  { %4681 = vmatpush2.bf16.msra.mxu1 %v11766_v15 }
 0x6e3   :  { %4204 = vmatpush2.bf16.msra.mxu0 %v11688_v49  ;;  %v11771_v49 = vld [vmem:[#allocation11 + $0x1ac] ss:$16 sps:$4 sm:$0xff]  }
 0x6e4   :  { %4205 = vmatprep.subr.bf16.mxu0 %v11693_v50  ;;  %v11769_v50 = vld [vmem:[#allocation11 + $0x1a8] ss:$16 sps:$4 sm:$0xff]  }
 0x6e7   :  { %4206 = vmatpush2.bf16.msra.mxu0 %v11691_v51  ;;  %v11774_v51 = vld [vmem:[#allocation11 + $0x1a4] ss:$16 sps:$4 sm:$0xff]  }
 0x6e8   :  { %4207 = vmatprep.subr.bf16.mxu0 %v11696_v52  ;;  %v11772_v52 = vld [vmem:[#allocation11 + $0x1a0] ss:$16 sps:$4 sm:$0xff]   ;;  %4682 = vmatprep.subr.bf16.mxu1 %v11774_v51 }
 0x6e9   :  { %4683 = vmatpush2.bf16.msra.mxu1 %v11772_v52 }
 0x6eb   :  { %4208 = vmatpush2.bf16.msra.mxu0 %v11694_v13  ;;  %v11777_v13 = vld [vmem:[#allocation11 + $0x18c] ss:$16 sps:$4 sm:$0xff]  }
 0x6ec   :  { %4209 = vmatprep.subr.bf16.mxu0 %v11699_v53  ;;  %v11775_v53 = vld [vmem:[#allocation11 + $0x188] ss:$16 sps:$4 sm:$0xff]  }
 0x6ef   :  { %4210 = vmatpush2.bf16.msra.mxu0 %v11697_v56  ;;  %v11780_v56 = vld [vmem:[#allocation11 + $0x184] ss:$16 sps:$4 sm:$0xff]  }
 0x6f0   :  { %4211 = vmatprep.subr.bf16.mxu0 %v11702_v57  ;;  %v11778_v57 = vld [vmem:[#allocation11 + $0x180] ss:$16 sps:$4 sm:$0xff]   ;;  %4684 = vmatprep.subr.bf16.mxu1 %v11780_v56 }
 0x6f1   :  { %4685 = vmatpush2.bf16.msra.mxu1 %v11778_v57  ;;  %v11810_v57 = vld [vmem:[#allocation8 + $0xc4] ss:$16 sps:$4 sm:$0xff]  }
 0x6f3   :  { %4212 = vmatpush2.bf16.msra.mxu0 %v11700_v59  ;;  %v11783_v59 = vld [vmem:[#allocation11 + $0x16c] ss:$16 sps:$4 sm:$0xff]  }
 0x6f4   :  { %4213 = vmatprep.subr.bf16.mxu0 %v11705_v60  ;;  %v11781_v60 = vld [vmem:[#allocation11 + $0x168] ss:$16 sps:$4 sm:$0xff]  }
 0x6f7   :  { %4214 = vmatpush2.bf16.msra.mxu0 %v11703_v62  ;;  %v11784_v62 = vld [vmem:[#allocation11 + $0x160] ss:$16 sps:$4 sm:$0xff]  }
 0x6f8   :  { %4215 = vmatprep.subr.bf16.mxu0 %v11708_v63  ;;  %v11786_v63 = vld [vmem:[#allocation11 + $0x164] ss:$16 sps:$4 sm:$0xff]  }
 0x6f9   :  { %4686 = vmatprep.subr.bf16.mxu1 %v11786_v63  ;;  %v11814_v63 = vld [vmem:[#allocation8 + $0x80] ss:$16 sps:$4 sm:$0xff]  }
 0x6fa   :  { %4687 = vmatpush2.bf16.msra.mxu1 %v11784_v62  ;;  %v11816_v62 = vld [vmem:[#allocation8 + $0x84] ss:$16 sps:$4 sm:$0xff]  }
 0x6fb   :  { %4216 = vmatpush2.bf16.msra.mxu0 %v11706_v54  ;;  %v11789_v54 = vld [vmem:[#allocation11 + $0x14c] ss:$16 sps:$4 sm:$0xff]  }
 0x6fc   :  { %4703 = vmatprep.subr.bf16.mxu0 %v11711_v1  ;;  %v11792_v1 = vld [vmem:[#allocation11 + $0x144] ss:$16 sps:$4 sm:$0xff]  }
 0x6fd   :  { %4688 = vmatprep.subr.bf16.mxu1 %v11792_v1  ;;  %v11822_v1 = vld [vmem:[#allocation8 + $0x44] ss:$16 sps:$4 sm:$0xff]  }
 0x6fe   :  { %4218 = vmatmul.mubr.bf16.vlgmr.msra.gmra.mxu0 %v13257_v32  ;;  %v11721_v32 = vld [vmem:[#allocation11 + $0xa8] ss:$16 sps:$4 sm:$0xff]   ;;  %4689 = vmatpush2.bf16.msra.mxu1 %v11790_v47  ;;  %v11820_v47 = vld [vmem:[#allocation8 + $0x40] ss:$16 sps:$4 sm:$0xff]  }
 0x6ff   :  { %4735 = vmatprep.mubr.bf16.mxu0 %v13278_v23  ;;  %4704 = vmatpush1.bf16.msra.mxu0 %v11709_v0  ;;  %v11741_v23 = vld [vmem:[#allocation11 + $0x4c] ss:$16 sps:$4 sm:$0xff]   ;;  %v11787_v0 = vld [vmem:[#allocation11 + $0x148] ss:$16 sps:$4 sm:$0xff]  }
 0x700   :  { %4705 = vmatprep.subr.bf16.mxu0 %v11717_v3  ;;  %v11798_v3 = vld [vmem:[#allocation11 + $0x124] ss:$16 sps:$4 sm:$0xff]  }
 0x701   :  { %4690 = vmatprep.subr.bf16.mxu1 %v11798_v3  ;;  %v11823_v3 = vld [vmem:[#allocation8 + $0x20] ss:$16 sps:$4 sm:$0xff]  }
 0x703   :  { %4706 = vmatpush1.bf16.msra.mxu0 %v11715_v5  ;;  %v11796_v5 = vld [vmem:[#allocation11 + $0x120] ss:$16 sps:$4 sm:$0xff]  }
 0x704   :  { %4707 = vmatprep.subr.bf16.mxu0 %v11723_v8  ;;  %v11804_v8 = vld [vmem:[#allocation11 + $0x104] ss:$16 sps:$4 sm:$0xff]   ;;  %4691 = vmatpush2.bf16.msra.mxu1 %v11796_v5  ;;  %v4880_v5 = vld [vmem:[#allocation5 + $0xc] sm:$0x1] }
 0x705   :  { %4692 = vmatprep.subr.bf16.mxu1 %v11804_v8  ;;  %v11831_v8 = vld [vmem:[#allocation8 + $0x1e4] ss:$16 sps:$4 sm:$0xff]  }
 0x707   :  { %4708 = vmatpush1.bf16.msra.mxu0 %v11721_v32  ;;  %v11802_v32 = vld [vmem:[#allocation11 + $0x100] ss:$16 sps:$4 sm:$0xff]  }
 0x708   :  { %4709 = vmatprep.subr.bf16.mxu0 %v11729_v11  ;;  %4693 = vmatpush2.bf16.msra.mxu1 %v11802_v32  ;;  %v2493_v11 = vadd.f32 %v13231_v37, %v13172_v30  ;;  %v4888_v32 = vpack.c.bf16 %v4880_v5, %v4880_v5 }
 0x709   :  { %10946 = vmatprep.subr.bf16.mxu1 %v13041_v33 }
 0x70b   :  { %4710 = vmatpush1.bf16.msra.mxu0 %v11727_v14 }
 0x70c   :  { %4711 = vmatprep.subr.bf16.mxu0 %v11735_v18 }
 0x70f   :  { %4712 = vmatpush1.bf16.msra.mxu0 %v11733_v21  ;;  %v3802_v21 = vld [vmem:[#allocation10] sm:$0xf] }
 0x710   :  { %4713 = vmatprep.subr.bf16.mxu0 %v11741_v23  ;;  %v3807_v22 = vrot.slane %v3802_v21, %v13110_v45  ;;  %v3811_v23 = vrot.slane %v3802_v21, %v13112_v46  ;;  %v3815_v34 = vrot.slane %v3802_v21, %v13118_v58 }
 0x712   :  { %v4179_v25 = vadd.f32 %v13283_v28, %v3807_v22  ;;  %v11832_v22 = vld [vmem:[#allocation8 + $0x1c0] ss:$16 sps:$4 sm:$0xff]  }
 0x713   :  { %4714 = vmatpush1.bf16.msra.mxu0 %v11739_v44  ;;  %v4181_v44 = vadd.f32 %v13285_v27, %v3811_v23  ;;  %v4883_v23 = vld [vmem:[#allocation5 + $0x24] sm:$0x1] }
 0x714   :  { %4715 = vmatprep.subr.bf16.mxu0 %v11747_v29  ;;  %v10167_v26 = vmul.f32 -1.442695, %v4179_v25 }
 0x715   :  { %v10168_v29 = vmul.f32 -1.442695, %v4181_v44  ;;  %v11837_v44 = vld [vmem:[#allocation8 + $0x1a4] ss:$16 sps:$4 sm:$0xff]  }
 0x716   :  { %12709 = vpow2.f32 %v10167_v26 }
 0x717   :  { %4716 = vmatpush1.bf16.msra.mxu0 %v11745_v24  ;;  %12711 = vpow2.f32 %v10168_v29 }
 0x718   :  { %4717 = vmatprep.subr.bf16.mxu0 %v11753_v19  ;;  %v3819_v19 = vrot.slane %v3802_v21, %v13116_v55  ;;  %v4907_v21 = vunpack.c.l.b16 %v4888_v32  ;;  %v11856_v32 = vld [vmem:[#allocation13 + $0xe0] sm:$0xff]  }
 0x71b   :  { %4718 = vmatpush1.bf16.msra.mxu0 %v11751_v35 }
 0x71c   :  { %4719 = vmatprep.subr.bf16.mxu0 %v11759_v61 }
 0x71f   :  { %4720 = vmatpush2.bf16.msra.mxu0 %v11757_v39 }
 0x720   :  { %4721 = vmatprep.subr.bf16.mxu0 %v11765_v42 }
 0x723   :  { %4722 = vmatpush2.bf16.msra.mxu0 %v11763_v43  ;;  %v12710_v30 = vpop.eup %12709 }
 0x724   :  { %4723 = vmatprep.subr.bf16.mxu0 %v11771_v49  ;;  %v12712_v37 = vpop.eup %12711  ;;  %v4229_v24 = vadd.f32 1.0, %v12710_v30  ;;  %v4914_v30 = vrot.slane %v4907_v21, 7 }
 0x725   :  { %v4235_v31 = vadd.f32 1.0, %v12712_v37  ;;  %v4884_v37 = vld [vmem:[#allocation5 + $0x2c] sm:$0x1] }
 0x726   :  { %12713 = vrcp.f32 %v4229_v24  ;;  %v4891_v24 = vpack.c.bf16 %v4883_v23, %v4883_v23 }
 0x727   :  { %4724 = vmatpush2.bf16.msra.mxu0 %v11769_v50  ;;  %12715 = vrcp.f32 %v4235_v31  ;;  %v11835_v31 = vld [vmem:[#allocation8 + $0x1a0] ss:$16 sps:$4 sm:$0xff]  }
 0x728   :  { %4725 = vmatprep.subr.bf16.mxu0 %v11777_v13 }
 0x72b   :  { %4726 = vmatpush2.bf16.msra.mxu0 %v11775_v53  ;;  %v11805_v53 = vld [vmem:[#allocation8 + $0xe0] ss:$16 sps:$4 sm:$0xff]  }
 0x72c   :  { %4727 = vmatprep.subr.bf16.mxu0 %v11783_v59  ;;  %v11813_v59 = vld [vmem:[#allocation8 + $0xa4] ss:$16 sps:$4 sm:$0xff]  }
 0x72f   :  { %4728 = vmatpush2.bf16.msra.mxu0 %v11781_v60  ;;  %v11811_v60 = vld [vmem:[#allocation8 + $0xa0] ss:$16 sps:$4 sm:$0xff]  }
 0x730   :  { %4729 = vmatprep.subr.bf16.mxu0 %v11789_v54  ;;  %v11819_v54 = vld [vmem:[#allocation8 + $0x64] ss:$16 sps:$4 sm:$0xff]  }
 0x733   :  { %4730 = vmatpush2.bf16.msra.mxu0 %v11787_v0  ;;  %v12714_v40 = vpop.eup %12713  ;;  %v11817_v0 = vld [vmem:[#allocation8 + $0x60] ss:$16 sps:$4 sm:$0xff]  }
 0x734   :  { %4731 = vmatprep.subr.bf16.mxu0 %v11795_v2  ;;  %v12716_v41 = vpop.eup %12715  ;;  %v11825_v2 = vld [vmem:[#allocation8 + $0x24] ss:$16 sps:$4 sm:$0xff]  }
 0x735   :  { %v4245_v43 = vmul.f32 %v12716_v41, %v13240_v7  ;;  %v11808_v7 = vld [vmem:[#allocation8 + $0xc0] ss:$16 sps:$4 sm:$0xff]   ;;  %v4886_v41 = vld [vmem:[#allocation5 + $0x3c] sm:$0x1] }
 0x737   :  { %4732 = vmatpush2.bf16.msra.mxu0 %v11793_v4  ;;  %v11828_v4 = vld [vmem:[#allocation8 + $0x4] ss:$16 sps:$4 sm:$0xff]  }
 0x738   :  { %4733 = vmatprep.subr.bf16.mxu0 %v11801_v6  ;;  %v11826_v6 = vld [vmem:[#allocation8] ss:$16 sps:$4 sm:$0xff]  }
 0x73b   :  { %4734 = vmatpush2.bf16.msra.mxu0 %v11799_v9  ;;  %v4881_v9 = vld [vmem:[#allocation5 + $0x14] sm:$0x1] }
 0x73c   :  { %5336 = vmatprep.subr.bf16.mxu0 %v11807_v10  ;;  %v4879_v10 = vld [vmem:[#allocation5 + $0x4] sm:$0x1] }
 0x77e   :  { %v3679_v12 = vpop.f32.mrf.mxu0 }
 0x77f   :  { %v13292_v14 = vadd.f32 %v3679_v12, %v2493_v11  ;;  %v11829_v11 = vld [vmem:[#allocation8 + $0x1e0] ss:$16 sps:$4 sm:$0xff]   ;;  %v11834_v12 = vld [vmem:[#allocation8 + $0x1c4] ss:$16 sps:$4 sm:$0xff]  }
 0x780   :  { %v10944_v17 = vpop.f32.mrf.mxu0 }
 0x781   :  { %v4882_v17 = vld [vmem:[#allocation5 + $0x1c] sm:$0x1] }
 0x782   :  { %v3682_v18 = vpop.f32.mrf.mxu0  ;;  %v4890_v25 = vpack.c.bf16 %v4882_v17, %v4882_v17  ;;  %v11860_v17 = vld [vmem:[#allocation13 + $0xc0] sm:$0xff]  }
 0x783   :  { %v4889_v18 = vpack.c.bf16 %v4881_v9, %v4881_v9  ;;  %v11855_v9 = vld [vmem:[#allocation13 + $0xe8] sm:$0xff]  }
 0x784   :  { %v10945_v20 = vpop.f32.mrf.mxu0 }
 0x785   :  { %v4887_v20 = vpack.c.bf16 %v4879_v10, %v4879_v10  ;;  %v4908_v26 = vunpack.c.l.b16 %v4889_v18  ;;  %v11857_v10 = vld [vmem:[#allocation13 + $0xd8] sm:$0xff]  }
 0x786   :  { %v11863_v18 = vld [vmem:[#allocation8 + $0xec] ss:$16 sps:$4 sm:$0xff]  }
 0x787   :  { %v4906_v29 = vunpack.c.l.b16 %v4887_v20  ;;  %v4320_v20 = vld [vmem:[%s13569_s4] sm:$0xf] }
 0x788   :  { %v4325_v21 = vrot.slane %v4320_v20, %v13110_v45 }
 0x7be   :  { %v4219_v35 = vpop.f32.mrf.mxu0 }
 0x7bf   :  { %v4220_v36 = vadd.f32 %v4219_v35, %v3815_v34  ;;  %v4909_v34 = vunpack.c.l.b16 %v4890_v25  ;;  %v4916_v35 = vrot.slane %v4908_v26, 6 }
 0x7c0   :  { %v4221_v16 = vpop.f32.mrf.mxu0 }
 0x7c1   :  { %12717 = vtanh.f32 %v4220_v36  ;;  %v4222_v28 = vadd.f32 %v4221_v16, %v3819_v19  ;;  %v11840_v19 = vld [vmem:[#allocation8 + $0x184] ss:$16 sps:$4 sm:$0xff]   ;;  %v4892_v16 = vpack.c.bf16 %v4884_v37, %v4884_v37 }
 0x7c2   :  { %v4223_v27 = vpop.f32.mrf.mxu0  ;;  %v4885_v36 = vld [vmem:[#allocation5 + $0x34] sm:$0x1] }
 0x7c3   :  { %v10169_v61 = vmul.f32 -1.442695, %v4222_v28  ;;  %v4915_v28 = vsel %vm139_vm0, %v4914_v30, %v4906_v29  ;;  %v4910_v27 = vunpack.c.l.b16 %v4891_v24 }
 0x7c4   :  { %v4224_v39 = vpop.f32.mrf.mxu0 }
 0x7c5   :  { %12719 = vpow2.f32 %v10169_v61  ;;  %v11838_v61 = vld [vmem:[#allocation8 + $0x180] ss:$16 sps:$4 sm:$0xff]   ;;  %v4918_v39 = vrot.slane %v4909_v34, 5 }
 0x7ce   :  { %v12718_v42 = vpop.eup %12717 }
 0x7cf   :  { %v4246_v48 = vmul.f32 %v12718_v42, %v12714_v40  ;;  %v11843_v40 = vld [vmem:[#allocation8 + $0x164] ss:$16 sps:$4 sm:$0xff]   ;;  %v4893_v42 = vpack.c.bf16 %v4885_v36, %v4885_v36  ;;  %v4337_v36 = vrot.slane %v4320_v20, %v13116_v55 }
 0x7d1   :  { %v13301_v15 = vadd.f32 %v4246_v48, %v4245_v43  ;;  %v4917_v43 = vsel %vm142_vm1, %v4916_v35, %v4915_v28  ;;  %v4911_v48 = vunpack.c.l.b16 %v4892_v16  ;;  %v4333_v28 = vrot.slane %v4320_v20, %v13118_v58 }
 0x7d2   :  { %v12720_v49 = vpop.eup %12719 }
 0x7d3   :  { %v4242_v50 = vadd.f32 1.0, %v12720_v49  ;;  %12721 = vtanh.f32 %v13301_v15  ;;  %v4920_v49 = vrot.slane %v4910_v27, 4 }
 0x7d5   :  { %12723 = vrcp.f32 %v4242_v50  ;;  %v11841_v50 = vld [vmem:[#allocation8 + $0x160] ss:$16 sps:$4 sm:$0xff]  }
 0x7e0   :  { %v12722_v51 = vpop.eup %12721 }
 0x7e2   :  { %v12724_v52 = vpop.eup %12723 }
 0x7e3   :  { %v4249_v13 = vmul.f32 %v12724_v52, %v12722_v51  ;;  %v4894_v51 = vpack.c.bf16 %v4886_v41, %v4886_v41  ;;  %v4919_v52 = vsel %vm145_vm2, %v4918_v39, %v4917_v43 }
 0x7e5   :  { %v13304_v56 = vpack.c.bf16 %v4249_v13, %v4249_v13  ;;  %v11846_v13 = vld [vmem:[#allocation8 + $0x144] ss:$16 sps:$4 sm:$0xff]  }
 0x7e7   :  { %4695 = vmatmul.mubr.bf16.vlgmr.msra.gmra.mxu1 %v13304_v56  ;;  %4736 = vmatmul.mubr.bf16.vlgmr.msra.gmra.mxu0 %v13304_v56 }
 0x7e8   :  { %5337 = vmatpush1.bf16.msra.mxu0 %v11805_v53  ;;  %5368 = vmatprep.mubr.bf16.mxu0 %v13304_v56  ;;  %v4912_v53 = vunpack.c.l.b16 %v4893_v42 }
 0x7e9   :  { %5338 = vmatprep.subr.bf16.mxu0 %v11810_v57  ;;  %10962 = vmatprep.mubr.msk.bf16.mxu1 %vm13042_vm7, %v13041_v33  ;;  %v4922_v57 = vrot.slane %v4911_v48, 3 }
 0x7ec   :  { %5339 = vmatpush1.bf16.msra.mxu0 %v11808_v7  ;;  %v4921_v7 = vsel %vm148_vm3, %v4920_v49, %v4919_v52 }
 0x7ed   :  { %5340 = vmatprep.subr.bf16.mxu0 %v11813_v59  ;;  %v11844_v59 = vld [vmem:[#allocation8 + $0x140] ss:$16 sps:$4 sm:$0xff]  }
 0x7f0   :  { %5341 = vmatpush1.bf16.msra.mxu0 %v11811_v60  ;;  %v4913_v60 = vunpack.c.l.b16 %v4894_v51 }
 0x7f1   :  { %5342 = vmatprep.subr.bf16.mxu0 %v11816_v62  ;;  %v11849_v62 = vld [vmem:[#allocation8 + $0x124] ss:$16 sps:$4 sm:$0xff]  }
 0x7f4   :  { %5343 = vmatpush1.bf16.msra.mxu0 %v11814_v63  ;;  %v4924_v63 = vrot.slane %v4912_v53, 2 }
 0x7f5   :  { %5344 = vmatprep.subr.bf16.mxu0 %v11819_v54  ;;  %v4923_v54 = vsel %vm151_vm4, %v4922_v57, %v4921_v7 }
 0x7f8   :  { %5345 = vmatpush1.bf16.msra.mxu0 %v11817_v0  ;;  %v11847_v0 = vld [vmem:[#allocation8 + $0x120] ss:$16 sps:$4 sm:$0xff]  }
 0x7f9   :  { %5346 = vmatprep.subr.bf16.mxu0 %v11822_v1  ;;  %v4926_v1 = vrot.slane %v4913_v60, 1  ;;  %v11861_v60 = vld [vmem:[#allocation8 + $0xe8] ss:$16 sps:$4 sm:$0xff]  }
 0x7fc   :  { %5347 = vmatpush1.bf16.msra.mxu0 %v11820_v47  ;;  %v11852_v47 = vld [vmem:[#allocation8 + $0x104] ss:$16 sps:$4 sm:$0xff]  }
 0x7fd   :  { %5348 = vmatprep.subr.bf16.mxu0 %v11825_v2  ;;  %v4925_v2 = vsel %vm154_vm5, %v4924_v63, %v4923_v54  ;;  %v11866_v63 = vld [vmem:[#allocation8 + $0xcc] ss:$16 sps:$4 sm:$0xff]  }
 0x7fe   :  { %v11869_v54 = vld [vmem:[#allocation8 + $0xac] ss:$16 sps:$4 sm:$0xff]  }
 0x800   :  { %5349 = vmatpush1.bf16.msra.mxu0 %v11823_v3  ;;  %v11850_v3 = vld [vmem:[#allocation8 + $0x100] ss:$16 sps:$4 sm:$0xff]  }
 0x801   :  { %5350 = vmatprep.subr.bf16.mxu0 %v11828_v4  ;;  %v4927_v4 = vsel %vm157_vm6, %v4926_v1, %v4925_v2  ;;  %v11867_v1 = vld [vmem:[#allocation8 + $0xa8] ss:$16 sps:$4 sm:$0xff]  }
 0x802   :  { %v13318_v5 = vpack.c.b16 %v4927_v4, %v4927_v4 }
 0x804   :  { %5351 = vmatpush1.bf16.msra.mxu0 %v11826_v6  ;;  %v11853_v6 = vld [vmem:[#allocation13 + $0xf8] sm:$0xff]  }
 0x805   :  { %5352 = vmatprep.subr.bf16.mxu0 %v11831_v8  ;;  %10947 = vmatpush3.bf16.msra.mxu1 %v11853_v6  ;;  %v11854_v8 = vld [vmem:[#allocation13 + $0xf0] sm:$0xff]   ;;  %v11875_v6 = vld [vmem:[#allocation8 + $0x6c] ss:$16 sps:$4 sm:$0xff]  }
 0x806   :  { %10948 = vmatprep.subr.bf16.mxu1 %v13041_v33 }
 0x808   :  { %5353 = vmatpush2.bf16.msra.mxu0 %v11829_v11  ;;  %v11858_v11 = vld [vmem:[#allocation13 + $0xd0] sm:$0xff]  }
 0x809   :  { %5354 = vmatprep.subr.bf16.mxu0 %v11834_v12  ;;  %10949 = vmatpush3.bf16.msra.mxu1 %v11854_v8  ;;  %v11859_v12 = vld [vmem:[#allocation13 + $0xc8] sm:$0xff]  }
 0x80a   :  { %10950 = vmatprep.subr.bf16.mxu1 %v13041_v33 }
 0x80c   :  { %5355 = vmatpush2.bf16.msra.mxu0 %v11832_v22  ;;  %v4329_v22 = vrot.slane %v4320_v20, %v13112_v46  ;;  %v11885_v20 = vld [vmem:[#allocation8 + $0x1e8] ss:$16 sps:$4 sm:$0xff]  }
 0x80d   :  { %5356 = vmatprep.subr.bf16.mxu0 %v11837_v44  ;;  %10951 = vmatpush3.bf16.msra.mxu1 %v11855_v9  ;;  %v11873_v9 = vld [vmem:[#allocation8 + $0x68] ss:$16 sps:$4 sm:$0xff]  }
 0x80e   :  { %10952 = vmatprep.subr.bf16.mxu1 %v13041_v33 }
 0x810   :  { %5357 = vmatpush2.bf16.msra.mxu0 %v11835_v31 }
 0x811   :  { %5358 = vmatprep.subr.bf16.mxu0 %v11840_v19  ;;  %10953 = vmatpush3.bf16.msra.mxu1 %v11856_v32  ;;  %v11876_v32 = vld [vmem:[#allocation8 + $0x48] ss:$16 sps:$4 sm:$0xff]  }
 0x812   :  { %10954 = vmatprep.subr.bf16.mxu1 %v13041_v33 }
 0x814   :  { %5359 = vmatpush2.bf16.msra.mxu0 %v11838_v61 }
 0x815   :  { %5360 = vmatprep.subr.bf16.mxu0 %v11843_v40  ;;  %10955 = vmatpush3.bf16.msra.mxu1 %v11857_v10  ;;  %v11881_v10 = vld [vmem:[#allocation8 + $0x2c] ss:$16 sps:$4 sm:$0xff]  }
 0x816   :  { %10956 = vmatprep.subr.bf16.mxu1 %v13041_v33 }
 0x818   :  { %5361 = vmatpush2.bf16.msra.mxu0 %v11841_v50 }
 0x819   :  { %5362 = vmatprep.subr.bf16.mxu0 %v11846_v13  ;;  %10957 = vmatpush3.bf16.msra.mxu1 %v11858_v11  ;;  %v11879_v11 = vld [vmem:[#allocation8 + $0x28] ss:$16 sps:$4 sm:$0xff]  }
 0x81a   :  { %10958 = vmatprep.subr.bf16.mxu1 %v13041_v33 }
 0x81c   :  { %5363 = vmatpush2.bf16.msra.mxu0 %v11844_v59 }
 0x81d   :  { %5364 = vmatprep.subr.bf16.mxu0 %v11849_v62  ;;  %10959 = vmatpush3.bf16.msra.mxu1 %v11859_v12  ;;  %v11884_v12 = vld [vmem:[#allocation8 + $0xc] ss:$16 sps:$4 sm:$0xff]  }
 0x81e   :  { %10960 = vmatprep.subr.bf16.mxu1 %v13041_v33 }
 0x820   :  { %5365 = vmatpush2.bf16.msra.mxu0 %v11847_v0 }
 0x821   :  { %5366 = vmatprep.subr.bf16.mxu0 %v11852_v47  ;;  %10961 = vmatpush3.bf16.msra.mxu1 %v11860_v17  ;;  %v11872_v47 = vld [vmem:[#allocation8 + $0x8c] ss:$16 sps:$4 sm:$0xff]   ;;  %v11882_v17 = vld [vmem:[#allocation8 + $0x8] ss:$16 sps:$4 sm:$0xff]  }
 0x822   :  { %5377 = vmatprep.subr.bf16.mxu1 %v11863_v18  ;;  %v11887_v18 = vld [vmem:[#allocation8 + $0x1ec] ss:$16 sps:$4 sm:$0xff]  }
 0x824   :  { %5367 = vmatpush2.bf16.msra.mxu0 %v11850_v3  ;;  %v11870_v3 = vld [vmem:[#allocation8 + $0x88] ss:$16 sps:$4 sm:$0xff]  }
 0x827   :  { %5369 = vmatmul.mubr.bf16.vlgmr.msra.gmra.mxu0 %v13318_v5 }
 0x8a7   :  { %v4696_v23 = vpop.f32.mrf.mxu1  ;;  %v4737_v25 = vpop.f32.mrf.mxu0 }
 0x8a8   :  { %v4697_v44 = vadd.f32 %v4696_v23, %v4325_v21  ;;  %v4738_v39 = vadd.f32 %v4737_v25, %v4333_v28  ;;  %v11890_v21 = vld [vmem:[#allocation8 + $0x1cc] ss:$16 sps:$4 sm:$0xff]   ;;  %v11891_v25 = vld [vmem:[#allocation8 + $0x1a8] ss:$16 sps:$4 sm:$0xff]   ;;  %v11912_v28 = vld [vmem:[#allocation11 + $0xe0] ss:$16 sps:$4 sm:$0xff]  }
 0x8a9   :  { %v4698_v26 = vpop.f32.mrf.mxu1  ;;  %v4739_v29 = vpop.f32.mrf.mxu0  ;;  %v11893_v23 = vld [vmem:[#allocation8 + $0x1ac] ss:$16 sps:$4 sm:$0xff]  }
 0x8aa   :  { %v10234_v30 = vmul.f32 -1.442695, %v4697_v44  ;;  %v4699_v37 = vadd.f32 %v4698_v26, %v4329_v22  ;;  %v4740_v16 = vadd.f32 %v4739_v29, %v4337_v36  ;;  %v11888_v22 = vld [vmem:[#allocation8 + $0x1c8] ss:$16 sps:$4 sm:$0xff]   ;;  %v11896_v44 = vld [vmem:[#allocation8 + $0x18c] ss:$16 sps:$4 sm:$0xff]  }
 0x8ab   :  { %v4700_v24 = vpop.f32.mrf.mxu1  ;;  %v4741_v31 = vpop.f32.mrf.mxu0  ;;  %v11894_v26 = vld [vmem:[#allocation8 + $0x188] ss:$16 sps:$4 sm:$0xff]   ;;  %v11899_v29 = vld [vmem:[#allocation8 + $0x16c] ss:$16 sps:$4 sm:$0xff]  }
 0x8ac   :  { %12725 = vpow2.f32 %v10234_v30  ;;  %v10235_v34 = vmul.f32 -1.442695, %v4699_v37  ;;  %v10236_v27 = vmul.f32 -1.442695, %v4740_v16  ;;  %v11897_v30 = vld [vmem:[#allocation8 + $0x168] ss:$16 sps:$4 sm:$0xff]  }
 0x8ad   :  { %v4701_v19 = vpop.f32.mrf.mxu1  ;;  %v4742_v35 = vpop.f32.mrf.mxu0  ;;  %v11902_v37 = vld [vmem:[#allocation8 + $0x14c] ss:$16 sps:$4 sm:$0xff]   ;;  %v11900_v24 = vld [vmem:[#allocation8 + $0x148] ss:$16 sps:$4 sm:$0xff]   ;;  %v11911_v16 = vld [vmem:[#allocation11 + $0xec] ss:$16 sps:$4 sm:$0xff]  }
 0x8ae   :  { %12727 = vpow2.f32 %v10235_v34  ;;  %v11905_v31 = vld [vmem:[#allocation8 + $0x12c] ss:$16 sps:$4 sm:$0xff]   ;;  %v11903_v34 = vld [vmem:[#allocation8 + $0x128] ss:$16 sps:$4 sm:$0xff]  }
 0x8af   :  { %12729 = vpow2.f32 %v10236_v27  ;;  %v11908_v19 = vld [vmem:[#allocation8 + $0x10c] ss:$16 sps:$4 sm:$0xff]   ;;  %v11906_v35 = vld [vmem:[#allocation8 + $0x108] ss:$16 sps:$4 sm:$0xff]  }
 0x8b0   :  { %v11909_v36 = vld [vmem:[#allocation11 + $0xe8] ss:$16 sps:$4 sm:$0xff]   ;;  %v11914_v27 = vld [vmem:[#allocation11 + $0xe4] ss:$16 sps:$4 sm:$0xff]  }
 0x8b1   :  { %5854 = vmatprep.subr.bf16.mxu0 %v11914_v27  ;;  %v11998_v27 = vld [vmem:[#allocation11 + $0x124] ss:$16 sps:$4 sm:$0xff]  }
 0x8b2   :  { %5855 = vmatpush1.bf16.msra.mxu0 %v11912_v28  ;;  %v11995_v28 = vld [vmem:[#allocation11 + $0x12c] ss:$16 sps:$4 sm:$0xff]  }
 0x8b9   :  { %v12726_v61 = vpop.eup %12725 }
 0x8ba   :  { %v4747_v40 = vadd.f32 1.0, %v12726_v61  ;;  %v11917_v61 = vld [vmem:[#allocation11 + $0xcc] ss:$16 sps:$4 sm:$0xff]  }
 0x8bb   :  { %v12728_v41 = vpop.eup %12727 }
 0x8bc   :  { %12731 = vrcp.f32 %v4747_v40  ;;  %v4753_v42 = vadd.f32 1.0, %v12728_v41  ;;  %v12730_v43 = vpop.eup %12729  ;;  %v11915_v40 = vld [vmem:[#allocation11 + $0xc8] ss:$16 sps:$4 sm:$0xff]   ;;  %v11918_v41 = vld [vmem:[#allocation11 + $0xc0] ss:$16 sps:$4 sm:$0xff]  }
 0x8bd   :  { %12733 = vtanh.f32 %v4738_v39  ;;  %v4760_v51 = vadd.f32 1.0, %v12730_v43  ;;  %v11920_v39 = vld [vmem:[#allocation11 + $0xc4] ss:$16 sps:$4 sm:$0xff]  }
 0x8be   :  { %12735 = vrcp.f32 %v4753_v42  ;;  %v11923_v42 = vld [vmem:[#allocation11 + $0xac] ss:$16 sps:$4 sm:$0xff]   ;;  %5856 = vmatprep.subr.bf16.mxu0 %v11920_v39  ;;  %v11926_v43 = vld [vmem:[#allocation11 + $0xa4] ss:$16 sps:$4 sm:$0xff]   ;;  %v11996_v39 = vld [vmem:[#allocation11 + $0x120] ss:$16 sps:$4 sm:$0xff]  }
 0x8bf   :  { %12737 = vrcp.f32 %v4760_v51  ;;  %5857 = vmatpush1.bf16.msra.mxu0 %v11918_v41  ;;  %v11927_v51 = vld [vmem:[#allocation11 + $0x88] ss:$16 sps:$4 sm:$0xff]   ;;  %v12004_v41 = vld [vmem:[#allocation11 + $0x104] ss:$16 sps:$4 sm:$0xff]  }
 0x8c0   :  { %5858 = vmatprep.subr.bf16.mxu0 %v11926_v43  ;;  %v12002_v43 = vld [vmem:[#allocation11 + $0x100] ss:$16 sps:$4 sm:$0xff]  }
 0x8c9   :  { %v12732_v48 = vpop.eup %12731 }
 0x8ca   :  { %v12734_v49 = vpop.eup %12733 }
 0x8cb   :  { %v12736_v50 = vpop.eup %12735  ;;  %v4764_v52 = vmul.f32 %v12734_v49, %v12732_v48  ;;  %v11924_v48 = vld [vmem:[#allocation11 + $0xa0] ss:$16 sps:$4 sm:$0xff]   ;;  %v11929_v49 = vld [vmem:[#allocation11 + $0x8c] ss:$16 sps:$4 sm:$0xff]  }
 0x8cc   :  { %v4763_v13 = vmul.f32 %v12736_v50, %v13275_v38  ;;  %v12738_v57 = vpop.eup %12737  ;;  %v11864_v38 = vld [vmem:[#allocation8 + $0xc8] ss:$16 sps:$4 sm:$0xff]   ;;  %5859 = vmatpush1.bf16.msra.mxu0 %v11924_v48 }
 0x8cd   :  { %v11932_v50 = vld [vmem:[#allocation11 + $0x84] ss:$16 sps:$4 sm:$0xff]  }
 0x8ce   :  { %v13336_v53 = vadd.f32 %v4764_v52, %v4763_v13  ;;  %v11930_v52 = vld [vmem:[#allocation11 + $0x80] ss:$16 sps:$4 sm:$0xff]   ;;  %v11935_v13 = vld [vmem:[#allocation11 + $0x6c] ss:$16 sps:$4 sm:$0xff]   ;;  %5860 = vmatprep.subr.bf16.mxu0 %v11932_v50 }
 0x8d0   :  { %12739 = vtanh.f32 %v13336_v53  ;;  %5861 = vmatpush1.bf16.msra.mxu0 %v11930_v52 }
 0x8dd   :  { %v12740_v7 = vpop.eup %12739 }
 0x8de   :  { %v4767_v59 = vmul.f32 %v12740_v7, %v12738_v57  ;;  %v11938_v57 = vld [vmem:[#allocation11 + $0x64] ss:$16 sps:$4 sm:$0xff]   ;;  %v11933_v7 = vld [vmem:[#allocation11 + $0x68] ss:$16 sps:$4 sm:$0xff]  }
 0x8df   :  { %5862 = vmatprep.subr.bf16.mxu0 %v11938_v57 }
 0x8e0   :  { %v13339_v62 = vpack.c.bf16 %v4767_v59, %v4767_v59  ;;  %v11936_v59 = vld [vmem:[#allocation11 + $0x60] ss:$16 sps:$4 sm:$0xff]  }
 0x8e1   :  { %5863 = vmatpush1.bf16.msra.mxu0 %v11936_v59 }
 0x8e2   :  { %10963 = vmatmul.mubr.bf16.vlgmr.msra.gmra.mxu1 %v13339_v62  ;;  %5886 = vmatprep.mubr.bf16.mxu0 %v13339_v62 }
 0x8e3   :  { %5378 = vmatpush1.bf16.msra.mxu1 %v11861_v60  ;;  %5409 = vmatprep.mubr.bf16.mxu1 %v13304_v56  ;;  %v11878_v56 = vld [vmem:[#allocation8 + $0x4c] ss:$16 sps:$4 sm:$0xff]   ;;  %v11941_v60 = vld [vmem:[#allocation11 + $0x4c] ss:$16 sps:$4 sm:$0xff]  }
 0x8e4   :  { %5379 = vmatprep.subr.bf16.mxu1 %v11866_v63  ;;  %v11939_v63 = vld [vmem:[#allocation11 + $0x48] ss:$16 sps:$4 sm:$0xff]  }
 0x8e7   :  { %v13344_v0 = vpop.f32.mrf.mxu0  ;;  %5380 = vmatpush1.bf16.msra.mxu1 %v11864_v38  ;;  %v11942_v38 = vld [vmem:[#allocation11 + $0x40] ss:$16 sps:$4 sm:$0xff]  }
 0x8e8   :  { %5381 = vmatprep.subr.bf16.mxu1 %v11869_v54  ;;  %v11947_v54 = vld [vmem:[#allocation11 + $0x2c] ss:$16 sps:$4 sm:$0xff]  }
 0x8e9   :  { %v13346_v2 = vpop.f32.mrf.mxu0 }
 0x8eb   :  { %5382 = vmatpush1.bf16.msra.mxu1 %v11867_v1  ;;  %v5374_v4 = vpop.f32.mrf.mxu0  ;;  %v11945_v1 = vld [vmem:[#allocation11 + $0x28] ss:$16 sps:$4 sm:$0xff]  }
 0x8ec   :  { %5383 = vmatprep.subr.bf16.mxu1 %v11872_v47  ;;  %v11950_v47 = vld [vmem:[#allocation11 + $0x24] ss:$16 sps:$4 sm:$0xff]   ;;  %v11953_v4 = vld [vmem:[#allocation11 + $0xc] ss:$16 sps:$4 sm:$0xff]  }
 0x8ed   :  { %v5375_v8 = vpop.f32.mrf.mxu0 }
 0x8ee   :  { %v11956_v8 = vld [vmem:[#allocation11 + $0x4] ss:$16 sps:$4 sm:$0xff]  }
 0x8ef   :  { %5384 = vmatpush1.bf16.msra.mxu1 %v11870_v3  ;;  %v11948_v3 = vld [vmem:[#allocation11 + $0x20] ss:$16 sps:$4 sm:$0xff]  }
 0x8f0   :  { %5385 = vmatprep.subr.bf16.mxu1 %v11875_v6  ;;  %v11951_v6 = vld [vmem:[#allocation11 + $0x8] ss:$16 sps:$4 sm:$0xff]  }
 0x8f3   :  { %5386 = vmatpush1.bf16.msra.mxu1 %v11873_v9  ;;  %v11954_v9 = vld [vmem:[#allocation11] ss:$16 sps:$4 sm:$0xff]  }
 0x8f4   :  { %5387 = vmatprep.subr.bf16.mxu1 %v11878_v56  ;;  %v11959_v56 = vld [vmem:[#allocation11 + $0x1ec] ss:$16 sps:$4 sm:$0xff]  }
 0x8f7   :  { %5388 = vmatpush1.bf16.msra.mxu1 %v11876_v32  ;;  %v11957_v32 = vld [vmem:[#allocation11 + $0x1e8] ss:$16 sps:$4 sm:$0xff]  }
 0x8f8   :  { %5389 = vmatprep.subr.bf16.mxu1 %v11881_v10  ;;  %v11962_v10 = vld [vmem:[#allocation11 + $0x1e4] ss:$16 sps:$4 sm:$0xff]  }
 0x8fb   :  { %5390 = vmatpush1.bf16.msra.mxu1 %v11879_v11  ;;  %v11960_v11 = vld [vmem:[#allocation11 + $0x1e0] ss:$16 sps:$4 sm:$0xff]  }
 0x8fc   :  { %5391 = vmatprep.subr.bf16.mxu1 %v11884_v12  ;;  %v11965_v12 = vld [vmem:[#allocation11 + $0x1cc] ss:$16 sps:$4 sm:$0xff]  }
 0x8ff   :  { %5392 = vmatpush1.bf16.msra.mxu1 %v11882_v17  ;;  %v11963_v17 = vld [vmem:[#allocation11 + $0x1c8] ss:$16 sps:$4 sm:$0xff]  }
 0x900   :  { %5393 = vmatprep.subr.bf16.mxu1 %v11887_v18  ;;  %v11968_v18 = vld [vmem:[#allocation11 + $0x1c4] ss:$16 sps:$4 sm:$0xff]  }
 0x903   :  { %5394 = vmatpush2.bf16.msra.mxu1 %v11885_v20  ;;  %v11966_v20 = vld [vmem:[#allocation11 + $0x1c0] ss:$16 sps:$4 sm:$0xff]  }
 0x904   :  { %5395 = vmatprep.subr.bf16.mxu1 %v11890_v21  ;;  %v11971_v21 = vld [vmem:[#allocation11 + $0x1ac] ss:$16 sps:$4 sm:$0xff]  }
 0x907   :  { %5396 = vmatpush2.bf16.msra.mxu1 %v11888_v22  ;;  %v11969_v22 = vld [vmem:[#allocation11 + $0x1a8] ss:$16 sps:$4 sm:$0xff]  }
 0x908   :  { %5397 = vmatprep.subr.bf16.mxu1 %v11893_v23  ;;  %v11974_v23 = vld [vmem:[#allocation11 + $0x1a4] ss:$16 sps:$4 sm:$0xff]  }
 0x90b   :  { %5398 = vmatpush2.bf16.msra.mxu1 %v11891_v25  ;;  %v11972_v25 = vld [vmem:[#allocation11 + $0x1a0] ss:$16 sps:$4 sm:$0xff]  }
 0x90c   :  { %5399 = vmatprep.subr.bf16.mxu1 %v11896_v44  ;;  %v11977_v44 = vld [vmem:[#allocation11 + $0x18c] ss:$16 sps:$4 sm:$0xff]  }
 0x90f   :  { %5400 = vmatpush2.bf16.msra.mxu1 %v11894_v26  ;;  %v11975_v26 = vld [vmem:[#allocation11 + $0x188] ss:$16 sps:$4 sm:$0xff]  }
 0x910   :  { %5401 = vmatprep.subr.bf16.mxu1 %v11899_v29  ;;  %v11980_v29 = vld [vmem:[#allocation11 + $0x184] ss:$16 sps:$4 sm:$0xff]  }
 0x913   :  { %5402 = vmatpush2.bf16.msra.mxu1 %v11897_v30  ;;  %v11978_v30 = vld [vmem:[#allocation11 + $0x180] ss:$16 sps:$4 sm:$0xff]  }
 0x914   :  { %5403 = vmatprep.subr.bf16.mxu1 %v11902_v37  ;;  %v11983_v37 = vld [vmem:[#allocation11 + $0x16c] ss:$16 sps:$4 sm:$0xff]  }
 0x917   :  { %5404 = vmatpush2.bf16.msra.mxu1 %v11900_v24  ;;  %v11981_v24 = vld [vmem:[#allocation11 + $0x168] ss:$16 sps:$4 sm:$0xff]  }
 0x918   :  { %5405 = vmatprep.subr.bf16.mxu1 %v11905_v31  ;;  %v11984_v31 = vld [vmem:[#allocation11 + $0x160] ss:$16 sps:$4 sm:$0xff]  }
 0x91b   :  { %5406 = vmatpush2.bf16.msra.mxu1 %v11903_v34  ;;  %v11986_v34 = vld [vmem:[#allocation11 + $0x164] ss:$16 sps:$4 sm:$0xff]  }
 0x91c   :  { %5407 = vmatprep.subr.bf16.mxu1 %v11908_v19  ;;  %v11989_v19 = vld [vmem:[#allocation11 + $0x14c] ss:$16 sps:$4 sm:$0xff]  }
 0x91f   :  { %5408 = vmatpush2.bf16.msra.mxu1 %v11906_v35  ;;  %v11987_v35 = vld [vmem:[#allocation11 + $0x148] ss:$16 sps:$4 sm:$0xff]  }
 0x920   :  { %5895 = vmatprep.subr.bf16.mxu1 %v11911_v16  ;;  %v11990_v16 = vld [vmem:[#allocation11 + $0x140] ss:$16 sps:$4 sm:$0xff]  }
 0x922   :  { %5410 = vmatmul.mubr.bf16.vlgmr.msra.gmra.mxu1 %v13318_v5  ;;  %v11921_v5 = vld [vmem:[#allocation11 + $0xa8] ss:$16 sps:$4 sm:$0xff]  }
 0x923   :  { %5927 = vmatprep.mubr.bf16.mxu1 %v13339_v62  ;;  %5896 = vmatpush1.bf16.msra.mxu1 %v11909_v36  ;;  %v11944_v62 = vld [vmem:[#allocation11 + $0x44] ss:$16 sps:$4 sm:$0xff]  }
 0x924   :  { %5897 = vmatprep.subr.bf16.mxu1 %v11917_v61  ;;  %5864 = vmatprep.subr.bf16.mxu0 %v11944_v62  ;;  %v11992_v36 = vld [vmem:[#allocation11 + $0x144] ss:$16 sps:$4 sm:$0xff]   ;;  %v11993_v61 = vld [vmem:[#allocation11 + $0x128] ss:$16 sps:$4 sm:$0xff]  }
 0x925   :  { %5865 = vmatpush1.bf16.msra.mxu0 %v11942_v38 }
 0x926   :  { %5866 = vmatprep.subr.bf16.mxu0 %v11950_v47 }
 0x927   :  { %5898 = vmatpush1.bf16.msra.mxu1 %v11915_v40  ;;  %v12001_v40 = vld [vmem:[#allocation11 + $0x10c] ss:$16 sps:$4 sm:$0xff]  }
 0x928   :  { %5899 = vmatprep.subr.bf16.mxu1 %v11923_v42  ;;  %v11999_v42 = vld [vmem:[#allocation11 + $0x108] ss:$16 sps:$4 sm:$0xff]  }
 0x929   :  { %5867 = vmatpush1.bf16.msra.mxu0 %v11948_v3 }
 0x92a   :  { %5868 = vmatprep.subr.bf16.mxu0 %v11956_v8 }
 0x92b   :  { %5900 = vmatpush1.bf16.msra.mxu1 %v11921_v5  ;;  %v12007_v5 = vld [vmem:[#allocation8 + $0xe4] ss:$16 sps:$4 sm:$0xff]  }
 0x92c   :  { %5901 = vmatprep.subr.bf16.mxu1 %v11929_v49 }
 0x92d   :  { %5869 = vmatpush1.bf16.msra.mxu0 %v11954_v9 }
 0x92e   :  { %5870 = vmatprep.subr.bf16.mxu0 %v11962_v10 }
 0x92f   :  { %5902 = vmatpush1.bf16.msra.mxu1 %v11927_v51 }
 0x930   :  { %5903 = vmatprep.subr.bf16.mxu1 %v11935_v13  ;;  %v4994_v13 = vld [vmem:[#allocation10] sm:$0xf] }
 0x931   :  { %5871 = vmatpush2.bf16.msra.mxu0 %v11960_v11  ;;  %v4999_v57 = vrot.slane %v4994_v13, %v13110_v45  ;;  %v5007_v47 = vrot.slane %v4994_v13, %v13118_v58  ;;  %v5011_v3 = vrot.slane %v4994_v13, %v13116_v55 }
 0x932   :  { %5872 = vmatprep.subr.bf16.mxu0 %v11968_v18 }
 0x933   :  { %5904 = vmatpush1.bf16.msra.mxu1 %v11933_v7  ;;  %v5003_v7 = vrot.slane %v4994_v13, %v13112_v46  ;;  %v5371_v59 = vadd.f32 %v13344_v0, %v4999_v57  ;;  %v12032_v57 = vld [vmem:[#allocation8 + $0x1c0] ss:$16 sps:$4 sm:$0xff]  }
 0x934   :  { %5905 = vmatprep.subr.bf16.mxu1 %v11941_v60 }
 0x935   :  { %5873 = vmatpush2.bf16.msra.mxu0 %v11966_v20  ;;  %v5373_v60 = vadd.f32 %v13346_v2, %v5003_v7  ;;  %v10309_v62 = vmul.f32 -1.442695, %v5371_v59  ;;  %v6075_v7 = vld [vmem:[#allocation5 + $0x25] sm:$0x1] }
 0x936   :  { %5874 = vmatprep.subr.bf16.mxu0 %v11974_v23 }
 0x937   :  { %5906 = vmatpush1.bf16.msra.mxu1 %v11939_v63  ;;  %v10310_v63 = vmul.f32 -1.442695, %v5373_v60  ;;  %12741 = vpow2.f32 %v10309_v62  ;;  %v12037_v60 = vld [vmem:[#allocation8 + $0x1a4] ss:$16 sps:$4 sm:$0xff]  }
 0x938   :  { %5907 = vmatprep.subr.bf16.mxu1 %v11947_v54 }
 0x939   :  { %5875 = vmatpush2.bf16.msra.mxu0 %v11972_v25  ;;  %12743 = vpow2.f32 %v10310_v63 }
 0x93a   :  { %5876 = vmatprep.subr.bf16.mxu0 %v11980_v29  ;;  %v12010_v29 = vld [vmem:[#allocation8 + $0xc4] ss:$16 sps:$4 sm:$0xff]  }
 0x93b   :  { %5908 = vmatpush1.bf16.msra.mxu1 %v11945_v1 }
 0x93c   :  { %5909 = vmatprep.subr.bf16.mxu1 %v11953_v4 }
 0x93d   :  { %5877 = vmatpush2.bf16.msra.mxu0 %v11978_v30  ;;  %v12013_v30 = vld [vmem:[#allocation8 + $0xa4] ss:$16 sps:$4 sm:$0xff]  }
 0x93e   :  { %5878 = vmatprep.subr.bf16.mxu0 %v11986_v34  ;;  %v12019_v34 = vld [vmem:[#allocation8 + $0x64] ss:$16 sps:$4 sm:$0xff]  }
 0x93f   :  { %5910 = vmatpush1.bf16.msra.mxu1 %v11951_v6 }
 0x940   :  { %5911 = vmatprep.subr.bf16.mxu1 %v11959_v56 }
 0x941   :  { %5879 = vmatpush2.bf16.msra.mxu0 %v11984_v31  ;;  %v12014_v31 = vld [vmem:[#allocation8 + $0x80] ss:$16 sps:$4 sm:$0xff]  }
 0x942   :  { %5880 = vmatprep.subr.bf16.mxu0 %v11992_v36  ;;  %v12020_v36 = vld [vmem:[#allocation8 + $0x40] ss:$16 sps:$4 sm:$0xff]  }
 0x943   :  { %5912 = vmatpush2.bf16.msra.mxu1 %v11957_v32 }
 0x944   :  { %5913 = vmatprep.subr.bf16.mxu1 %v11965_v12  ;;  %v12742_v38 = vpop.eup %12741 }
 0x945   :  { %5881 = vmatpush2.bf16.msra.mxu0 %v11990_v16  ;;  %v12025_v16 = vld [vmem:[#allocation8 + $0x24] ss:$16 sps:$4 sm:$0xff]  }
 0x946   :  { %5882 = vmatprep.subr.bf16.mxu0 %v11998_v27  ;;  %v12744_v54 = vpop.eup %12743  ;;  %v12028_v27 = vld [vmem:[#allocation8 + $0x4] ss:$16 sps:$4 sm:$0xff]  }
 0x947   :  { %5914 = vmatpush2.bf16.msra.mxu1 %v11963_v17  ;;  %v5427_v1 = vadd.f32 1.0, %v12744_v54  ;;  %v6076_v54 = vld [vmem:[#allocation5 + $0x2d] sm:$0x1] }
 0x948   :  { %5915 = vmatprep.subr.bf16.mxu1 %v11971_v21 }
 0x949   :  { %5883 = vmatpush2.bf16.msra.mxu0 %v11996_v39  ;;  %v12026_v39 = vld [vmem:[#allocation8] ss:$16 sps:$4 sm:$0xff]  }
 0x94a   :  { %5884 = vmatprep.subr.bf16.mxu0 %v12004_v41  ;;  %v6073_v41 = vld [vmem:[#allocation5 + $0x15] sm:$0x1] }
 0x94b   :  { %5916 = vmatpush2.bf16.msra.mxu1 %v11969_v22 }
 0x94c   :  { %5917 = vmatprep.subr.bf16.mxu1 %v11977_v44  ;;  %v12005_v44 = vld [vmem:[#allocation8 + $0xe0] ss:$16 sps:$4 sm:$0xff]  }
 0x94d   :  { %5885 = vmatpush2.bf16.msra.mxu0 %v12002_v43  ;;  %v6071_v43 = vld [vmem:[#allocation5 + $0x5] sm:$0x1] }
 0x94e   :  { %10966 = vmatprep.subr.bf16.mxu0 %v13041_v33 }
 0x94f   :  { %5918 = vmatpush2.bf16.msra.mxu1 %v11975_v26 }
 0x950   :  { %5919 = vmatprep.subr.bf16.mxu1 %v11983_v37  ;;  %v12011_v37 = vld [vmem:[#allocation8 + $0xa0] ss:$16 sps:$4 sm:$0xff]  }
 0x953   :  { %5920 = vmatpush2.bf16.msra.mxu1 %v11981_v24  ;;  %v12016_v24 = vld [vmem:[#allocation8 + $0x84] ss:$16 sps:$4 sm:$0xff]  }
 0x954   :  { %5921 = vmatprep.subr.bf16.mxu1 %v11989_v19  ;;  %v12017_v19 = vld [vmem:[#allocation8 + $0x60] ss:$16 sps:$4 sm:$0xff]  }
 0x957   :  { %5922 = vmatpush2.bf16.msra.mxu1 %v11987_v35  ;;  %v12022_v35 = vld [vmem:[#allocation8 + $0x44] ss:$16 sps:$4 sm:$0xff]  }
 0x958   :  { %5923 = vmatprep.subr.bf16.mxu1 %v11995_v28  ;;  %v12023_v28 = vld [vmem:[#allocation8 + $0x20] ss:$16 sps:$4 sm:$0xff]  }
 0x95b   :  { %5924 = vmatpush2.bf16.msra.mxu1 %v11993_v61  ;;  %v6072_v61 = vld [vmem:[#allocation5 + $0xd] sm:$0x1] }
 0x95c   :  { %5925 = vmatprep.subr.bf16.mxu1 %v12001_v40  ;;  %v12031_v40 = vld [vmem:[#allocation8 + $0x1e4] ss:$16 sps:$4 sm:$0xff]  }
 0x95f   :  { %5926 = vmatpush2.bf16.msra.mxu1 %v11999_v42  ;;  %v6080_v42 = vpack.c.bf16 %v6072_v61, %v6072_v61 }
 0x960   :  { %6528 = vmatprep.subr.bf16.mxu1 %v12007_v5  ;;  %v12029_v5 = vld [vmem:[#allocation8 + $0x1e0] ss:$16 sps:$4 sm:$0xff]  }
 0x961   :  { %v6099_v13 = vunpack.c.l.b16 %v6080_v42  ;;  %v12056_v42 = vld [vmem:[#allocation13 + $0x120] sm:$0xff]  }
 0x9a2   :  { %v4871_v48 = vpop.f32.mrf.mxu1 }
 0x9a3   :  { %v13352_v49 = vadd.f32 %v4871_v48, %v13292_v14  ;;  %v5421_v14 = vadd.f32 1.0, %v12742_v38  ;;  %v12034_v48 = vld [vmem:[#allocation8 + $0x1c4] ss:$16 sps:$4 sm:$0xff]   ;;  %v6106_v38 = vrot.slane %v6099_v13, 7 }
 0x9a4   :  { %v10964_v50 = vpop.f32.mrf.mxu1 }
 0x9a5   :  { %12745 = vrcp.f32 %v5421_v14  ;;  %v6074_v50 = vld [vmem:[#allocation5 + $0x1d] sm:$0x1]  ;;  %v6083_v14 = vpack.c.bf16 %v6075_v7, %v6075_v7 }
 0x9a6   :  { %v4874_v51 = vpop.f32.mrf.mxu1  ;;  %12747 = vrcp.f32 %v5427_v1  ;;  %v6082_v59 = vpack.c.bf16 %v6074_v50, %v6074_v50  ;;  %v12035_v1 = vld [vmem:[#allocation8 + $0x1a0] ss:$16 sps:$4 sm:$0xff]   ;;  %v12060_v50 = vld [vmem:[#allocation13 + $0x100] sm:$0xff]  }
 0x9a7   :  { %v6081_v51 = vpack.c.bf16 %v6073_v41, %v6073_v41  ;;  %v12055_v41 = vld [vmem:[#allocation13 + $0x128] sm:$0xff]  }
 0x9a8   :  { %v10965_v52 = vpop.f32.mrf.mxu1 }
 0x9a9   :  { %v6079_v52 = vpack.c.bf16 %v6071_v43, %v6071_v43  ;;  %v6100_v62 = vunpack.c.l.b16 %v6081_v51  ;;  %v12057_v43 = vld [vmem:[#allocation13 + $0x118] sm:$0xff]  }
 0x9aa   :  { %v12063_v51 = vld [vmem:[#allocation8 + $0xec] ss:$16 sps:$4 sm:$0xff]  }
 0x9ab   :  { %v6098_v63 = vunpack.c.l.b16 %v6079_v52  ;;  %v5512_v52 = vld [vmem:[%s13569_s4] sm:$0xf] }
 0x9ac   :  { %v5517_v13 = vrot.slane %v5512_v52, %v13110_v45 }
 0x9b2   :  { %v12746_v32 = vpop.eup %12745 }
 0x9b3   :  { %v12748_v10 = vpop.eup %12747 }
 0x9b4   :  { %v5437_v12 = vmul.f32 %v12748_v10, %v13301_v15  ;;  %v12008_v15 = vld [vmem:[#allocation8 + $0xc0] ss:$16 sps:$4 sm:$0xff]   ;;  %v6078_v10 = vld [vmem:[#allocation5 + $0x3d] sm:$0x1] }
 0x9e2   :  { %v5411_v4 = vpop.f32.mrf.mxu1 }
 0x9e3   :  { %v5412_v6 = vadd.f32 %v5411_v4, %v5007_v47  ;;  %v6101_v47 = vunpack.c.l.b16 %v6082_v59  ;;  %v6108_v4 = vrot.slane %v6100_v62, 6 }
 0x9e4   :  { %v5413_v8 = vpop.f32.mrf.mxu1 }
 0x9e5   :  { %12749 = vtanh.f32 %v5412_v6  ;;  %v5414_v0 = vadd.f32 %v5413_v8, %v5011_v3  ;;  %v12040_v3 = vld [vmem:[#allocation8 + $0x184] ss:$16 sps:$4 sm:$0xff]   ;;  %v6084_v8 = vpack.c.bf16 %v6076_v54, %v6076_v54 }
 0x9e6   :  { %v5415_v2 = vpop.f32.mrf.mxu1  ;;  %v6077_v6 = vld [vmem:[#allocation5 + $0x35] sm:$0x1] }
 0x9e7   :  { %v10311_v9 = vmul.f32 -1.442695, %v5414_v0  ;;  %v6107_v0 = vsel %vm139_vm0, %v6106_v38, %v6098_v63  ;;  %v6102_v2 = vunpack.c.l.b16 %v6083_v14 }
 0x9e8   :  { %v5416_v56 = vpop.f32.mrf.mxu1 }
 0x9e9   :  { %12751 = vpow2.f32 %v10311_v9  ;;  %v12038_v9 = vld [vmem:[#allocation8 + $0x180] ss:$16 sps:$4 sm:$0xff]   ;;  %v6110_v56 = vrot.slane %v6101_v47, 5 }
 0x9f2   :  { %v12750_v11 = vpop.eup %12749 }
 0x9f3   :  { %v5438_v17 = vmul.f32 %v12750_v11, %v12746_v32  ;;  %v12043_v32 = vld [vmem:[#allocation8 + $0x164] ss:$16 sps:$4 sm:$0xff]   ;;  %v6085_v11 = vpack.c.bf16 %v6077_v6, %v6077_v6  ;;  %v5529_v6 = vrot.slane %v5512_v52, %v13116_v55 }
 0x9f5   :  { %v13361_v18 = vadd.f32 %v5438_v17, %v5437_v12  ;;  %v6109_v12 = vsel %vm142_vm1, %v6108_v4, %v6107_v0  ;;  %v6103_v17 = vunpack.c.l.b16 %v6084_v8  ;;  %v5525_v0 = vrot.slane %v5512_v52, %v13118_v58 }
 0x9f6   :  { %v12752_v20 = vpop.eup %12751 }
 0x9f7   :  { %v5434_v21 = vadd.f32 1.0, %v12752_v20  ;;  %12753 = vtanh.f32 %v13361_v18  ;;  %v6112_v20 = vrot.slane %v6102_v2, 4 }
 0x9f9   :  { %12755 = vrcp.f32 %v5434_v21  ;;  %v12041_v21 = vld [vmem:[#allocation8 + $0x160] ss:$16 sps:$4 sm:$0xff]  }
 0xa04   :  { %v12754_v22 = vpop.eup %12753 }
 0xa06   :  { %v12756_v23 = vpop.eup %12755 }
 0xa07   :  { %v5441_v25 = vmul.f32 %v12756_v23, %v12754_v22  ;;  %v6086_v22 = vpack.c.bf16 %v6078_v10, %v6078_v10  ;;  %v6111_v23 = vsel %vm145_vm2, %v6110_v56, %v6109_v12 }
 0xa09   :  { %v13364_v26 = vpack.c.bf16 %v5441_v25, %v5441_v25  ;;  %v12046_v25 = vld [vmem:[#allocation8 + $0x144] ss:$16 sps:$4 sm:$0xff]  }
 0xa0b   :  { %5887 = vmatmul.mubr.bf16.vlgmr.msra.gmra.mxu0 %v13364_v26  ;;  %5928 = vmatmul.mubr.bf16.vlgmr.msra.gmra.mxu1 %v13364_v26 }
 0xa0c   :  { %6529 = vmatpush1.bf16.msra.mxu1 %v12005_v44  ;;  %6560 = vmatprep.mubr.bf16.mxu1 %v13364_v26  ;;  %v6104_v44 = vunpack.c.l.b16 %v6085_v11 }
 0xa0d   :  { %6530 = vmatprep.subr.bf16.mxu1 %v12010_v29  ;;  %10982 = vmatprep.mubr.msk.bf16.mxu0 %vm13042_vm7, %v13041_v33  ;;  %v6114_v29 = vrot.slane %v6103_v17, 3 }
 0xa10   :  { %6531 = vmatpush1.bf16.msra.mxu1 %v12008_v15  ;;  %v6113_v15 = vsel %vm148_vm3, %v6112_v20, %v6111_v23 }
 0xa11   :  { %6532 = vmatprep.subr.bf16.mxu1 %v12013_v30  ;;  %v12044_v30 = vld [vmem:[#allocation8 + $0x140] ss:$16 sps:$4 sm:$0xff]  }
 0xa14   :  { %6533 = vmatpush1.bf16.msra.mxu1 %v12011_v37  ;;  %v6105_v37 = vunpack.c.l.b16 %v6086_v22 }
 0xa15   :  { %6534 = vmatprep.subr.bf16.mxu1 %v12016_v24  ;;  %v12049_v24 = vld [vmem:[#allocation8 + $0x124] ss:$16 sps:$4 sm:$0xff]  }
 0xa18   :  { %6535 = vmatpush1.bf16.msra.mxu1 %v12014_v31  ;;  %v6116_v31 = vrot.slane %v6104_v44, 2 }
 0xa19   :  { %6536 = vmatprep.subr.bf16.mxu1 %v12019_v34  ;;  %v6115_v34 = vsel %vm151_vm4, %v6114_v29, %v6113_v15 }
 0xa1c   :  { %6537 = vmatpush1.bf16.msra.mxu1 %v12017_v19  ;;  %v12047_v19 = vld [vmem:[#allocation8 + $0x120] ss:$16 sps:$4 sm:$0xff]  }
 0xa1d   :  { %6538 = vmatprep.subr.bf16.mxu1 %v12022_v35  ;;  %v6118_v35 = vrot.slane %v6105_v37, 1  ;;  %v12061_v37 = vld [vmem:[#allocation8 + $0xe8] ss:$16 sps:$4 sm:$0xff]  }
 0xa20   :  { %6539 = vmatpush1.bf16.msra.mxu1 %v12020_v36  ;;  %v12052_v36 = vld [vmem:[#allocation8 + $0x104] ss:$16 sps:$4 sm:$0xff]  }
 0xa21   :  { %6540 = vmatprep.subr.bf16.mxu1 %v12025_v16  ;;  %v6117_v16 = vsel %vm154_vm5, %v6116_v31, %v6115_v34  ;;  %v12066_v31 = vld [vmem:[#allocation8 + $0xcc] ss:$16 sps:$4 sm:$0xff]  }
 0xa22   :  { %v12069_v34 = vld [vmem:[#allocation8 + $0xac] ss:$16 sps:$4 sm:$0xff]  }
 0xa24   :  { %6541 = vmatpush1.bf16.msra.mxu1 %v12023_v28  ;;  %v12050_v28 = vld [vmem:[#allocation8 + $0x100] ss:$16 sps:$4 sm:$0xff]  }
 0xa25   :  { %6542 = vmatprep.subr.bf16.mxu1 %v12028_v27  ;;  %v6119_v27 = vsel %vm157_vm6, %v6118_v35, %v6117_v16  ;;  %v12067_v35 = vld [vmem:[#allocation8 + $0xa8] ss:$16 sps:$4 sm:$0xff]  }
 0xa26   :  { %v13378_v61 = vpack.c.b16 %v6119_v27, %v6119_v27 }
 0xa28   :  { %6543 = vmatpush1.bf16.msra.mxu1 %v12026_v39  ;;  %v12053_v39 = vld [vmem:[#allocation13 + $0x138] sm:$0xff]  }
 0xa29   :  { %6544 = vmatprep.subr.bf16.mxu1 %v12031_v40  ;;  %10967 = vmatpush3.bf16.msra.mxu0 %v12053_v39  ;;  %v12054_v40 = vld [vmem:[#allocation13 + $0x130] sm:$0xff]   ;;  %v12075_v39 = vld [vmem:[#allocation8 + $0x6c] ss:$16 sps:$4 sm:$0xff]  }
 0xa2a   :  { %10968 = vmatprep.subr.bf16.mxu0 %v13041_v33 }
 0xa2c   :  { %6545 = vmatpush2.bf16.msra.mxu1 %v12029_v5  ;;  %v12058_v5 = vld [vmem:[#allocation13 + $0x110] sm:$0xff]  }
 0xa2d   :  { %6546 = vmatprep.subr.bf16.mxu1 %v12034_v48  ;;  %10969 = vmatpush3.bf16.msra.mxu0 %v12054_v40  ;;  %v12059_v48 = vld [vmem:[#allocation13 + $0x108] sm:$0xff]  }
 0xa2e   :  { %10970 = vmatprep.subr.bf16.mxu0 %v13041_v33 }
 0xa30   :  { %6547 = vmatpush2.bf16.msra.mxu1 %v12032_v57  ;;  %v5521_v57 = vrot.slane %v5512_v52, %v13112_v46  ;;  %v12085_v52 = vld [vmem:[#allocation8 + $0x1e8] ss:$16 sps:$4 sm:$0xff]  }
 0xa31   :  { %6548 = vmatprep.subr.bf16.mxu1 %v12037_v60  ;;  %10971 = vmatpush3.bf16.msra.mxu0 %v12055_v41  ;;  %v12073_v41 = vld [vmem:[#allocation8 + $0x68] ss:$16 sps:$4 sm:$0xff]  }
 0xa32   :  { %10972 = vmatprep.subr.bf16.mxu0 %v13041_v33 }
 0xa34   :  { %6549 = vmatpush2.bf16.msra.mxu1 %v12035_v1 }
 0xa35   :  { %6550 = vmatprep.subr.bf16.mxu1 %v12040_v3  ;;  %10973 = vmatpush3.bf16.msra.mxu0 %v12056_v42  ;;  %v12076_v42 = vld [vmem:[#allocation8 + $0x48] ss:$16 sps:$4 sm:$0xff]  }
 0xa36   :  { %10974 = vmatprep.subr.bf16.mxu0 %v13041_v33 }
 0xa38   :  { %6551 = vmatpush2.bf16.msra.mxu1 %v12038_v9 }
 0xa39   :  { %6552 = vmatprep.subr.bf16.mxu1 %v12043_v32  ;;  %10975 = vmatpush3.bf16.msra.mxu0 %v12057_v43  ;;  %v12081_v43 = vld [vmem:[#allocation8 + $0x2c] ss:$16 sps:$4 sm:$0xff]  }
 0xa3a   :  { %10976 = vmatprep.subr.bf16.mxu0 %v13041_v33 }
 0xa3c   :  { %6553 = vmatpush2.bf16.msra.mxu1 %v12041_v21 }
 0xa3d   :  { %6554 = vmatprep.subr.bf16.mxu1 %v12046_v25  ;;  %10977 = vmatpush3.bf16.msra.mxu0 %v12058_v5  ;;  %v12079_v5 = vld [vmem:[#allocation8 + $0x28] ss:$16 sps:$4 sm:$0xff]  }
 0xa3e   :  { %10978 = vmatprep.subr.bf16.mxu0 %v13041_v33 }
 0xa40   :  { %6555 = vmatpush2.bf16.msra.mxu1 %v12044_v30 }
 0xa41   :  { %6556 = vmatprep.subr.bf16.mxu1 %v12049_v24  ;;  %10979 = vmatpush3.bf16.msra.mxu0 %v12059_v48  ;;  %v12084_v48 = vld [vmem:[#allocation8 + $0xc] ss:$16 sps:$4 sm:$0xff]  }
 0xa42   :  { %10980 = vmatprep.subr.bf16.mxu0 %v13041_v33 }
 0xa44   :  { %6557 = vmatpush2.bf16.msra.mxu1 %v12047_v19 }
 0xa45   :  { %6558 = vmatprep.subr.bf16.mxu1 %v12052_v36  ;;  %10981 = vmatpush3.bf16.msra.mxu0 %v12060_v50  ;;  %v12072_v36 = vld [vmem:[#allocation8 + $0x8c] ss:$16 sps:$4 sm:$0xff]   ;;  %v12082_v50 = vld [vmem:[#allocation8 + $0x8] ss:$16 sps:$4 sm:$0xff]  }
 0xa46   :  { %6569 = vmatprep.subr.bf16.mxu0 %v12063_v51  ;;  %v12087_v51 = vld [vmem:[#allocation8 + $0x1ec] ss:$16 sps:$4 sm:$0xff]  }
 0xa48   :  { %6559 = vmatpush2.bf16.msra.mxu1 %v12050_v28  ;;  %v12070_v28 = vld [vmem:[#allocation8 + $0x88] ss:$16 sps:$4 sm:$0xff]  }
 0xa4b   :  { %6561 = vmatmul.mubr.bf16.vlgmr.msra.gmra.mxu1 %v13378_v61 }
 0xacb   :  { %v5888_v7 = vpop.f32.mrf.mxu0  ;;  %v5929_v59 = vpop.f32.mrf.mxu1 }
 0xacc   :  { %v5889_v60 = vadd.f32 %v5888_v7, %v5517_v13  ;;  %v5930_v56 = vadd.f32 %v5929_v59, %v5525_v0  ;;  %v12090_v13 = vld [vmem:[#allocation8 + $0x1cc] ss:$16 sps:$4 sm:$0xff]   ;;  %v12091_v59 = vld [vmem:[#allocation8 + $0x1a8] ss:$16 sps:$4 sm:$0xff]   ;;  %v12112_v0 = vld [vmem:[#allocation11 + $0xe0] ss:$16 sps:$4 sm:$0xff]  }
 0xacd   :  { %v5890_v62 = vpop.f32.mrf.mxu0  ;;  %v5931_v63 = vpop.f32.mrf.mxu1  ;;  %v12093_v7 = vld [vmem:[#allocation8 + $0x1ac] ss:$16 sps:$4 sm:$0xff]  }
 0xace   :  { %v10376_v38 = vmul.f32 -1.442695, %v5889_v60  ;;  %v5891_v54 = vadd.f32 %v5890_v62, %v5521_v57  ;;  %v5932_v8 = vadd.f32 %v5931_v63, %v5529_v6  ;;  %v12088_v57 = vld [vmem:[#allocation8 + $0x1c8] ss:$16 sps:$4 sm:$0xff]   ;;  %v12096_v60 = vld [vmem:[#allocation8 + $0x18c] ss:$16 sps:$4 sm:$0xff]  }
 0xacf   :  { %v5892_v14 = vpop.f32.mrf.mxu0  ;;  %v5933_v1 = vpop.f32.mrf.mxu1  ;;  %v12094_v62 = vld [vmem:[#allocation8 + $0x188] ss:$16 sps:$4 sm:$0xff]   ;;  %v12099_v63 = vld [vmem:[#allocation8 + $0x16c] ss:$16 sps:$4 sm:$0xff]  }
 0xad0   :  { %12757 = vpow2.f32 %v10376_v38  ;;  %v10377_v47 = vmul.f32 -1.442695, %v5891_v54  ;;  %v10378_v2 = vmul.f32 -1.442695, %v5932_v8  ;;  %v12097_v38 = vld [vmem:[#allocation8 + $0x168] ss:$16 sps:$4 sm:$0xff]  }
 0xad1   :  { %v5893_v3 = vpop.f32.mrf.mxu0  ;;  %v5934_v4 = vpop.f32.mrf.mxu1  ;;  %v12102_v54 = vld [vmem:[#allocation8 + $0x14c] ss:$16 sps:$4 sm:$0xff]   ;;  %v12100_v14 = vld [vmem:[#allocation8 + $0x148] ss:$16 sps:$4 sm:$0xff]   ;;  %v12111_v8 = vld [vmem:[#allocation11 + $0xec] ss:$16 sps:$4 sm:$0xff]  }
 0xad2   :  { %12759 = vpow2.f32 %v10377_v47  ;;  %v12105_v1 = vld [vmem:[#allocation8 + $0x12c] ss:$16 sps:$4 sm:$0xff]   ;;  %v12103_v47 = vld [vmem:[#allocation8 + $0x128] ss:$16 sps:$4 sm:$0xff]  }
 0xad3   :  { %12761 = vpow2.f32 %v10378_v2  ;;  %v12108_v3 = vld [vmem:[#allocation8 + $0x10c] ss:$16 sps:$4 sm:$0xff]   ;;  %v12106_v4 = vld [vmem:[#allocation8 + $0x108] ss:$16 sps:$4 sm:$0xff]  }
 0xad4   :  { %v12109_v6 = vld [vmem:[#allocation11 + $0xe8] ss:$16 sps:$4 sm:$0xff]   ;;  %v12114_v2 = vld [vmem:[#allocation11 + $0xe4] ss:$16 sps:$4 sm:$0xff]  }
 0xad5   :  { %7046 = vmatprep.subr.bf16.mxu1 %v12114_v2  ;;  %v12198_v2 = vld [vmem:[#allocation11 + $0x124] ss:$16 sps:$4 sm:$0xff]  }
 0xad6   :  { %7047 = vmatpush1.bf16.msra.mxu1 %v12112_v0  ;;  %v12195_v0 = vld [vmem:[#allocation11 + $0x12c] ss:$16 sps:$4 sm:$0xff]  }
 0xadd   :  { %v12758_v9 = vpop.eup %12757 }
 0xade   :  { %v5939_v32 = vadd.f32 1.0, %v12758_v9  ;;  %v12117_v9 = vld [vmem:[#allocation11 + $0xcc] ss:$16 sps:$4 sm:$0xff]  }
 0xadf   :  { %v12760_v10 = vpop.eup %12759 }
 0xae0   :  { %12763 = vrcp.f32 %v5939_v32  ;;  %v5945_v11 = vadd.f32 1.0, %v12760_v10  ;;  %v12762_v12 = vpop.eup %12761  ;;  %v12115_v32 = vld [vmem:[#allocation11 + $0xc8] ss:$16 sps:$4 sm:$0xff]   ;;  %v12118_v10 = vld [vmem:[#allocation11 + $0xc0] ss:$16 sps:$4 sm:$0xff]  }
 0xae1   :  { %12765 = vtanh.f32 %v5930_v56  ;;  %v5952_v22 = vadd.f32 1.0, %v12762_v12  ;;  %v12120_v56 = vld [vmem:[#allocation11 + $0xc4] ss:$16 sps:$4 sm:$0xff]  }
 0xae2   :  { %12767 = vrcp.f32 %v5945_v11  ;;  %v12123_v11 = vld [vmem:[#allocation11 + $0xac] ss:$16 sps:$4 sm:$0xff]   ;;  %7048 = vmatprep.subr.bf16.mxu1 %v12120_v56  ;;  %v12126_v12 = vld [vmem:[#allocation11 + $0xa4] ss:$16 sps:$4 sm:$0xff]   ;;  %v12196_v56 = vld [vmem:[#allocation11 + $0x120] ss:$16 sps:$4 sm:$0xff]  }
 0xae3   :  { %12769 = vrcp.f32 %v5952_v22  ;;  %7049 = vmatpush1.bf16.msra.mxu1 %v12118_v10  ;;  %v12127_v22 = vld [vmem:[#allocation11 + $0x88] ss:$16 sps:$4 sm:$0xff]   ;;  %v12204_v10 = vld [vmem:[#allocation11 + $0x104] ss:$16 sps:$4 sm:$0xff]  }
 0xae4   :  { %7050 = vmatprep.subr.bf16.mxu1 %v12126_v12  ;;  %v12202_v12 = vld [vmem:[#allocation11 + $0x100] ss:$16 sps:$4 sm:$0xff]  }
 0xaed   :  { %v12764_v17 = vpop.eup %12763 }
 0xaee   :  { %v12766_v20 = vpop.eup %12765 }
 0xaef   :  { %v12768_v21 = vpop.eup %12767  ;;  %v5956_v23 = vmul.f32 %v12766_v20, %v12764_v17  ;;  %v12124_v17 = vld [vmem:[#allocation11 + $0xa0] ss:$16 sps:$4 sm:$0xff]   ;;  %v12129_v20 = vld [vmem:[#allocation11 + $0x8c] ss:$16 sps:$4 sm:$0xff]  }
 0xaf0   :  { %v5955_v25 = vmul.f32 %v12768_v21, %v13336_v53  ;;  %v12770_v29 = vpop.eup %12769  ;;  %v12064_v53 = vld [vmem:[#allocation8 + $0xc8] ss:$16 sps:$4 sm:$0xff]   ;;  %7051 = vmatpush1.bf16.msra.mxu1 %v12124_v17 }
 0xaf1   :  { %v12132_v21 = vld [vmem:[#allocation11 + $0x84] ss:$16 sps:$4 sm:$0xff]  }
 0xaf2   :  { %v13396_v44 = vadd.f32 %v5956_v23, %v5955_v25  ;;  %v12130_v23 = vld [vmem:[#allocation11 + $0x80] ss:$16 sps:$4 sm:$0xff]   ;;  %v12135_v25 = vld [vmem:[#allocation11 + $0x6c] ss:$16 sps:$4 sm:$0xff]   ;;  %7052 = vmatprep.subr.bf16.mxu1 %v12132_v21 }
 0xaf4   :  { %12771 = vtanh.f32 %v13396_v44  ;;  %7053 = vmatpush1.bf16.msra.mxu1 %v12130_v23 }
 0xb01   :  { %v12772_v15 = vpop.eup %12771 }
 0xb02   :  { %v5959_v30 = vmul.f32 %v12772_v15, %v12770_v29  ;;  %v12138_v29 = vld [vmem:[#allocation11 + $0x64] ss:$16 sps:$4 sm:$0xff]   ;;  %v12133_v15 = vld [vmem:[#allocation11 + $0x68] ss:$16 sps:$4 sm:$0xff]  }
 0xb03   :  { %7054 = vmatprep.subr.bf16.mxu1 %v12138_v29 }
 0xb04   :  { %v13399_v24 = vpack.c.bf16 %v5959_v30, %v5959_v30  ;;  %v12136_v30 = vld [vmem:[#allocation11 + $0x60] ss:$16 sps:$4 sm:$0xff]  }
 0xb05   :  { %7055 = vmatpush1.bf16.msra.mxu1 %v12136_v30 }
 0xb06   :  { %10983 = vmatmul.mubr.bf16.vlgmr.msra.gmra.mxu0 %v13399_v24  ;;  %7078 = vmatprep.mubr.bf16.mxu1 %v13399_v24 }
 0xb07   :  { %6570 = vmatpush1.bf16.msra.mxu0 %v12061_v37  ;;  %6601 = vmatprep.mubr.bf16.mxu0 %v13364_v26  ;;  %v12078_v26 = vld [vmem:[#allocation8 + $0x4c] ss:$16 sps:$4 sm:$0xff]   ;;  %v12141_v37 = vld [vmem:[#allocation11 + $0x4c] ss:$16 sps:$4 sm:$0xff]  }
 0xb08   :  { %6571 = vmatprep.subr.bf16.mxu0 %v12066_v31  ;;  %v12139_v31 = vld [vmem:[#allocation11 + $0x48] ss:$16 sps:$4 sm:$0xff]  }
 0xb0b   :  { %v13404_v19 = vpop.f32.mrf.mxu1  ;;  %6572 = vmatpush1.bf16.msra.mxu0 %v12064_v53  ;;  %v12142_v53 = vld [vmem:[#allocation11 + $0x40] ss:$16 sps:$4 sm:$0xff]  }
 0xb0c   :  { %6573 = vmatprep.subr.bf16.mxu0 %v12069_v34  ;;  %v12147_v34 = vld [vmem:[#allocation11 + $0x2c] ss:$16 sps:$4 sm:$0xff]  }
 0xb0d   :  { %v13406_v16 = vpop.f32.mrf.mxu1 }
 0xb0f   :  { %6574 = vmatpush1.bf16.msra.mxu0 %v12067_v35  ;;  %v6566_v27 = vpop.f32.mrf.mxu1  ;;  %v12145_v35 = vld [vmem:[#allocation11 + $0x28] ss:$16 sps:$4 sm:$0xff]  }
 0xb10   :  { %6575 = vmatprep.subr.bf16.mxu0 %v12072_v36  ;;  %v12150_v36 = vld [vmem:[#allocation11 + $0x24] ss:$16 sps:$4 sm:$0xff]   ;;  %v12153_v27 = vld [vmem:[#allocation11 + $0xc] ss:$16 sps:$4 sm:$0xff]  }
 0xb11   :  { %v6567_v40 = vpop.f32.mrf.mxu1 }
 0xb12   :  { %v12156_v40 = vld [vmem:[#allocation11 + $0x4] ss:$16 sps:$4 sm:$0xff]  }
 0xb13   :  { %6576 = vmatpush1.bf16.msra.mxu0 %v12070_v28  ;;  %v12148_v28 = vld [vmem:[#allocation11 + $0x20] ss:$16 sps:$4 sm:$0xff]  }
 0xb14   :  { %6577 = vmatprep.subr.bf16.mxu0 %v12075_v39  ;;  %v12151_v39 = vld [vmem:[#allocation11 + $0x8] ss:$16 sps:$4 sm:$0xff]  }
 0xb17   :  { %6578 = vmatpush1.bf16.msra.mxu0 %v12073_v41  ;;  %v12154_v41 = vld [vmem:[#allocation11] ss:$16 sps:$4 sm:$0xff]  }
 0xb18   :  { %6579 = vmatprep.subr.bf16.mxu0 %v12078_v26  ;;  %v12159_v26 = vld [vmem:[#allocation11 + $0x1ec] ss:$16 sps:$4 sm:$0xff]  }
 0xb1b   :  { %6580 = vmatpush1.bf16.msra.mxu0 %v12076_v42  ;;  %v12157_v42 = vld [vmem:[#allocation11 + $0x1e8] ss:$16 sps:$4 sm:$0xff]  }
 0xb1c   :  { %6581 = vmatprep.subr.bf16.mxu0 %v12081_v43  ;;  %v12162_v43 = vld [vmem:[#allocation11 + $0x1e4] ss:$16 sps:$4 sm:$0xff]  }
 0xb1f   :  { %6582 = vmatpush1.bf16.msra.mxu0 %v12079_v5  ;;  %v12160_v5 = vld [vmem:[#allocation11 + $0x1e0] ss:$16 sps:$4 sm:$0xff]  }
 0xb20   :  { %6583 = vmatprep.subr.bf16.mxu0 %v12084_v48  ;;  %v12165_v48 = vld [vmem:[#allocation11 + $0x1cc] ss:$16 sps:$4 sm:$0xff]  }
 0xb23   :  { %6584 = vmatpush1.bf16.msra.mxu0 %v12082_v50  ;;  %v12163_v50 = vld [vmem:[#allocation11 + $0x1c8] ss:$16 sps:$4 sm:$0xff]  }
 0xb24   :  { %6585 = vmatprep.subr.bf16.mxu0 %v12087_v51  ;;  %v12168_v51 = vld [vmem:[#allocation11 + $0x1c4] ss:$16 sps:$4 sm:$0xff]  }
 0xb27   :  { %6586 = vmatpush2.bf16.msra.mxu0 %v12085_v52  ;;  %v12166_v52 = vld [vmem:[#allocation11 + $0x1c0] ss:$16 sps:$4 sm:$0xff]  }
 0xb28   :  { %6587 = vmatprep.subr.bf16.mxu0 %v12090_v13  ;;  %v12171_v13 = vld [vmem:[#allocation11 + $0x1ac] ss:$16 sps:$4 sm:$0xff]  }
 0xb2b   :  { %6588 = vmatpush2.bf16.msra.mxu0 %v12088_v57  ;;  %v12169_v57 = vld [vmem:[#allocation11 + $0x1a8] ss:$16 sps:$4 sm:$0xff]  }
 0xb2c   :  { %6589 = vmatprep.subr.bf16.mxu0 %v12093_v7  ;;  %v12174_v7 = vld [vmem:[#allocation11 + $0x1a4] ss:$16 sps:$4 sm:$0xff]  }
 0xb2f   :  { %6590 = vmatpush2.bf16.msra.mxu0 %v12091_v59  ;;  %v12172_v59 = vld [vmem:[#allocation11 + $0x1a0] ss:$16 sps:$4 sm:$0xff]  }
 0xb30   :  { %6591 = vmatprep.subr.bf16.mxu0 %v12096_v60  ;;  %v12177_v60 = vld [vmem:[#allocation11 + $0x18c] ss:$16 sps:$4 sm:$0xff]  }
 0xb33   :  { %6592 = vmatpush2.bf16.msra.mxu0 %v12094_v62  ;;  %v12175_v62 = vld [vmem:[#allocation11 + $0x188] ss:$16 sps:$4 sm:$0xff]  }
 0xb34   :  { %6593 = vmatprep.subr.bf16.mxu0 %v12099_v63  ;;  %v12180_v63 = vld [vmem:[#allocation11 + $0x184] ss:$16 sps:$4 sm:$0xff]  }
 0xb37   :  { %6594 = vmatpush2.bf16.msra.mxu0 %v12097_v38  ;;  %v12178_v38 = vld [vmem:[#allocation11 + $0x180] ss:$16 sps:$4 sm:$0xff]  }
 0xb38   :  { %6595 = vmatprep.subr.bf16.mxu0 %v12102_v54  ;;  %v12183_v54 = vld [vmem:[#allocation11 + $0x16c] ss:$16 sps:$4 sm:$0xff]  }
 0xb3b   :  { %6596 = vmatpush2.bf16.msra.mxu0 %v12100_v14  ;;  %v12181_v14 = vld [vmem:[#allocation11 + $0x168] ss:$16 sps:$4 sm:$0xff]  }
 0xb3c   :  { %6597 = vmatprep.subr.bf16.mxu0 %v12105_v1  ;;  %v12184_v1 = vld [vmem:[#allocation11 + $0x160] ss:$16 sps:$4 sm:$0xff]  }
 0xb3f   :  { %6598 = vmatpush2.bf16.msra.mxu0 %v12103_v47  ;;  %v12186_v47 = vld [vmem:[#allocation11 + $0x164] ss:$16 sps:$4 sm:$0xff]  }
 0xb40   :  { %6599 = vmatprep.subr.bf16.mxu0 %v12108_v3  ;;  %v12189_v3 = vld [vmem:[#allocation11 + $0x14c] ss:$16 sps:$4 sm:$0xff]  }
 0xb43   :  { %6600 = vmatpush2.bf16.msra.mxu0 %v12106_v4  ;;  %v12187_v4 = vld [vmem:[#allocation11 + $0x148] ss:$16 sps:$4 sm:$0xff]  }
 0xb44   :  { %7087 = vmatprep.subr.bf16.mxu0 %v12111_v8  ;;  %v12190_v8 = vld [vmem:[#allocation11 + $0x140] ss:$16 sps:$4 sm:$0xff]  }
 0xb46   :  { %6602 = vmatmul.mubr.bf16.vlgmr.msra.gmra.mxu0 %v13378_v61  ;;  %v12121_v61 = vld [vmem:[#allocation11 + $0xa8] ss:$16 sps:$4 sm:$0xff]  }
 0xb47   :  { %7119 = vmatprep.mubr.bf16.mxu0 %v13399_v24  ;;  %7088 = vmatpush1.bf16.msra.mxu0 %v12109_v6  ;;  %v12144_v24 = vld [vmem:[#allocation11 + $0x44] ss:$16 sps:$4 sm:$0xff]  }
 0xb48   :  { %7089 = vmatprep.subr.bf16.mxu0 %v12117_v9  ;;  %7056 = vmatprep.subr.bf16.mxu1 %v12144_v24  ;;  %v12192_v6 = vld [vmem:[#allocation11 + $0x144] ss:$16 sps:$4 sm:$0xff]   ;;  %v12193_v9 = vld [vmem:[#allocation11 + $0x128] ss:$16 sps:$4 sm:$0xff]  }
 0xb49   :  { %7057 = vmatpush1.bf16.msra.mxu1 %v12142_v53 }
 0xb4a   :  { %7058 = vmatprep.subr.bf16.mxu1 %v12150_v36 }
 0xb4b   :  { %7090 = vmatpush1.bf16.msra.mxu0 %v12115_v32  ;;  %v12201_v32 = vld [vmem:[#allocation11 + $0x10c] ss:$16 sps:$4 sm:$0xff]  }
 0xb4c   :  { %7091 = vmatprep.subr.bf16.mxu0 %v12123_v11  ;;  %v12199_v11 = vld [vmem:[#allocation11 + $0x108] ss:$16 sps:$4 sm:$0xff]  }
 0xb4d   :  { %7059 = vmatpush1.bf16.msra.mxu1 %v12148_v28 }
 0xb4e   :  { %7060 = vmatprep.subr.bf16.mxu1 %v12156_v40 }
 0xb4f   :  { %7092 = vmatpush1.bf16.msra.mxu0 %v12121_v61  ;;  %v12207_v61 = vld [vmem:[#allocation8 + $0xe4] ss:$16 sps:$4 sm:$0xff]  }
 0xb50   :  { %7093 = vmatprep.subr.bf16.mxu0 %v12129_v20 }
 0xb51   :  { %7061 = vmatpush1.bf16.msra.mxu1 %v12154_v41 }
 0xb52   :  { %7062 = vmatprep.subr.bf16.mxu1 %v12162_v43 }
 0xb53   :  { %7094 = vmatpush1.bf16.msra.mxu0 %v12127_v22 }
 0xb54   :  { %7095 = vmatprep.subr.bf16.mxu0 %v12135_v25  ;;  %v6186_v25 = vld [vmem:[#allocation10] sm:$0xf] }
 0xb55   :  { %7063 = vmatpush2.bf16.msra.mxu1 %v12160_v5  ;;  %v6191_v29 = vrot.slane %v6186_v25, %v13110_v45  ;;  %v6199_v36 = vrot.slane %v6186_v25, %v13118_v58  ;;  %v6203_v28 = vrot.slane %v6186_v25, %v13116_v55 }
 0xb56   :  { %7064 = vmatprep.subr.bf16.mxu1 %v12168_v51 }
 0xb57   :  { %7096 = vmatpush1.bf16.msra.mxu0 %v12133_v15  ;;  %v6195_v15 = vrot.slane %v6186_v25, %v13112_v46  ;;  %v6563_v30 = vadd.f32 %v13404_v19, %v6191_v29  ;;  %v12232_v29 = vld [vmem:[#allocation8 + $0x1c0] ss:$16 sps:$4 sm:$0xff]  }
 0xb58   :  { %7097 = vmatprep.subr.bf16.mxu0 %v12141_v37 }
 0xb59   :  { %7065 = vmatpush2.bf16.msra.mxu1 %v12166_v52  ;;  %v6565_v37 = vadd.f32 %v13406_v16, %v6195_v15  ;;  %v10451_v24 = vmul.f32 -1.442695, %v6563_v30  ;;  %v7267_v15 = vld [vmem:[#allocation5 + $0x26] sm:$0x1] }
 0xb5a   :  { %7066 = vmatprep.subr.bf16.mxu1 %v12174_v7 }
 0xb5b   :  { %7098 = vmatpush1.bf16.msra.mxu0 %v12139_v31  ;;  %v10452_v31 = vmul.f32 -1.442695, %v6565_v37  ;;  %12773 = vpow2.f32 %v10451_v24  ;;  %v12237_v37 = vld [vmem:[#allocation8 + $0x1a4] ss:$16 sps:$4 sm:$0xff]  }
 0xb5c   :  { %7099 = vmatprep.subr.bf16.mxu0 %v12147_v34 }
 0xb5d   :  { %7067 = vmatpush2.bf16.msra.mxu1 %v12172_v59  ;;  %12775 = vpow2.f32 %v10452_v31 }
 0xb5e   :  { %7068 = vmatprep.subr.bf16.mxu1 %v12180_v63  ;;  %v12210_v63 = vld [vmem:[#allocation8 + $0xc4] ss:$16 sps:$4 sm:$0xff]  }
 0xb5f   :  { %7100 = vmatpush1.bf16.msra.mxu0 %v12145_v35 }
 0xb60   :  { %7101 = vmatprep.subr.bf16.mxu0 %v12153_v27 }
 0xb61   :  { %7069 = vmatpush2.bf16.msra.mxu1 %v12178_v38  ;;  %v12213_v38 = vld [vmem:[#allocation8 + $0xa4] ss:$16 sps:$4 sm:$0xff]  }
 0xb62   :  { %7070 = vmatprep.subr.bf16.mxu1 %v12186_v47  ;;  %v12219_v47 = vld [vmem:[#allocation8 + $0x64] ss:$16 sps:$4 sm:$0xff]  }
 0xb63   :  { %7102 = vmatpush1.bf16.msra.mxu0 %v12151_v39 }
 0xb64   :  { %7103 = vmatprep.subr.bf16.mxu0 %v12159_v26 }
 0xb65   :  { %7071 = vmatpush2.bf16.msra.mxu1 %v12184_v1  ;;  %v12214_v1 = vld [vmem:[#allocation8 + $0x80] ss:$16 sps:$4 sm:$0xff]  }
 0xb66   :  { %7072 = vmatprep.subr.bf16.mxu1 %v12192_v6  ;;  %v12220_v6 = vld [vmem:[#allocation8 + $0x40] ss:$16 sps:$4 sm:$0xff]  }
 0xb67   :  { %7104 = vmatpush2.bf16.msra.mxu0 %v12157_v42 }
 0xb68   :  { %7105 = vmatprep.subr.bf16.mxu0 %v12165_v48  ;;  %v12774_v53 = vpop.eup %12773 }
 0xb69   :  { %7073 = vmatpush2.bf16.msra.mxu1 %v12190_v8  ;;  %v12225_v8 = vld [vmem:[#allocation8 + $0x24] ss:$16 sps:$4 sm:$0xff]  }
 0xb6a   :  { %7074 = vmatprep.subr.bf16.mxu1 %v12198_v2  ;;  %v12776_v34 = vpop.eup %12775  ;;  %v12228_v2 = vld [vmem:[#allocation8 + $0x4] ss:$16 sps:$4 sm:$0xff]  }
 0xb6b   :  { %7106 = vmatpush2.bf16.msra.mxu0 %v12163_v50  ;;  %v6619_v35 = vadd.f32 1.0, %v12776_v34  ;;  %v7268_v34 = vld [vmem:[#allocation5 + $0x2e] sm:$0x1] }
 0xb6c   :  { %7107 = vmatprep.subr.bf16.mxu0 %v12171_v13 }
 0xb6d   :  { %7075 = vmatpush2.bf16.msra.mxu1 %v12196_v56  ;;  %v12226_v56 = vld [vmem:[#allocation8] ss:$16 sps:$4 sm:$0xff]  }
 0xb6e   :  { %7076 = vmatprep.subr.bf16.mxu1 %v12204_v10  ;;  %v7265_v10 = vld [vmem:[#allocation5 + $0x16] sm:$0x1] }
 0xb6f   :  { %7108 = vmatpush2.bf16.msra.mxu0 %v12169_v57 }
 0xb70   :  { %7109 = vmatprep.subr.bf16.mxu0 %v12177_v60  ;;  %v12205_v60 = vld [vmem:[#allocation8 + $0xe0] ss:$16 sps:$4 sm:$0xff]  }
 0xb71   :  { %7077 = vmatpush2.bf16.msra.mxu1 %v12202_v12  ;;  %v7263_v12 = vld [vmem:[#allocation5 + $0x6] sm:$0x1] }
 0xb72   :  { %10986 = vmatprep.subr.bf16.mxu1 %v13041_v33 }
 0xb73   :  { %7110 = vmatpush2.bf16.msra.mxu0 %v12175_v62 }
 0xb74   :  { %7111 = vmatprep.subr.bf16.mxu0 %v12183_v54  ;;  %v12211_v54 = vld [vmem:[#allocation8 + $0xa0] ss:$16 sps:$4 sm:$0xff]  }
 0xb77   :  { %7112 = vmatpush2.bf16.msra.mxu0 %v12181_v14  ;;  %v12216_v14 = vld [vmem:[#allocation8 + $0x84] ss:$16 sps:$4 sm:$0xff]  }
 0xb78   :  { %7113 = vmatprep.subr.bf16.mxu0 %v12189_v3  ;;  %v12217_v3 = vld [vmem:[#allocation8 + $0x60] ss:$16 sps:$4 sm:$0xff]  }
 0xb7b   :  { %7114 = vmatpush2.bf16.msra.mxu0 %v12187_v4  ;;  %v12222_v4 = vld [vmem:[#allocation8 + $0x44] ss:$16 sps:$4 sm:$0xff]  }
 0xb7c   :  { %7115 = vmatprep.subr.bf16.mxu0 %v12195_v0  ;;  %v12223_v0 = vld [vmem:[#allocation8 + $0x20] ss:$16 sps:$4 sm:$0xff]  }
 0xb7f   :  { %7116 = vmatpush2.bf16.msra.mxu0 %v12193_v9  ;;  %v7264_v9 = vld [vmem:[#allocation5 + $0xe] sm:$0x1] }
 0xb80   :  { %7117 = vmatprep.subr.bf16.mxu0 %v12201_v32  ;;  %v12231_v32 = vld [vmem:[#allocation8 + $0x1e4] ss:$16 sps:$4 sm:$0xff]  }
 0xb83   :  { %7118 = vmatpush2.bf16.msra.mxu0 %v12199_v11  ;;  %v7272_v11 = vpack.c.bf16 %v7264_v9, %v7264_v9 }
 0xb84   :  { %7720 = vmatprep.subr.bf16.mxu0 %v12207_v61  ;;  %v12229_v61 = vld [vmem:[#allocation8 + $0x1e0] ss:$16 sps:$4 sm:$0xff]  }
 0xb85   :  { %v7291_v25 = vunpack.c.l.b16 %v7272_v11  ;;  %v12256_v11 = vld [vmem:[#allocation13 + $0x160] sm:$0xff]  }
 0xbc6   :  { %v6063_v17 = vpop.f32.mrf.mxu0 }
 0xbc7   :  { %v13412_v20 = vadd.f32 %v6063_v17, %v13352_v49  ;;  %v6613_v49 = vadd.f32 1.0, %v12774_v53  ;;  %v12234_v17 = vld [vmem:[#allocation8 + $0x1c4] ss:$16 sps:$4 sm:$0xff]   ;;  %v7298_v53 = vrot.slane %v7291_v25, 7 }
 0xbc8   :  { %v10984_v21 = vpop.f32.mrf.mxu0 }
 0xbc9   :  { %12777 = vrcp.f32 %v6613_v49  ;;  %v7266_v21 = vld [vmem:[#allocation5 + $0x1e] sm:$0x1]  ;;  %v7275_v49 = vpack.c.bf16 %v7267_v15, %v7267_v15 }
 0xbca   :  { %v6066_v22 = vpop.f32.mrf.mxu0  ;;  %12779 = vrcp.f32 %v6619_v35  ;;  %v7274_v30 = vpack.c.bf16 %v7266_v21, %v7266_v21  ;;  %v12235_v35 = vld [vmem:[#allocation8 + $0x1a0] ss:$16 sps:$4 sm:$0xff]   ;;  %v12260_v21 = vld [vmem:[#allocation13 + $0x140] sm:$0xff]  }
 0xbcb   :  { %v7273_v22 = vpack.c.bf16 %v7265_v10, %v7265_v10  ;;  %v12255_v10 = vld [vmem:[#allocation13 + $0x168] sm:$0xff]  }
 0xbcc   :  { %v10985_v23 = vpop.f32.mrf.mxu0 }
 0xbcd   :  { %v7271_v23 = vpack.c.bf16 %v7263_v12, %v7263_v12  ;;  %v7292_v24 = vunpack.c.l.b16 %v7273_v22  ;;  %v12257_v12 = vld [vmem:[#allocation13 + $0x158] sm:$0xff]  }
 0xbce   :  { %v12263_v22 = vld [vmem:[#allocation8 + $0xec] ss:$16 sps:$4 sm:$0xff]  }
 0xbcf   :  { %v7290_v31 = vunpack.c.l.b16 %v7271_v23  ;;  %v6704_v23 = vld [vmem:[%s13569_s4] sm:$0xf] }
 0xbd0   :  { %v6709_v25 = vrot.slane %v6704_v23, %v13110_v45 }
 0xbd6   :  { %v12778_v42 = vpop.eup %12777 }
 0xbd7   :  { %v12780_v43 = vpop.eup %12779 }
 0xbd8   :  { %v6629_v48 = vmul.f32 %v12780_v43, %v13361_v18  ;;  %v12208_v18 = vld [vmem:[#allocation8 + $0xc0] ss:$16 sps:$4 sm:$0xff]   ;;  %v7270_v43 = vld [vmem:[#allocation5 + $0x3e] sm:$0x1] }
 0xc06   :  { %v6603_v27 = vpop.f32.mrf.mxu0 }
 0xc07   :  { %v6604_v39 = vadd.f32 %v6603_v27, %v6199_v36  ;;  %v7293_v36 = vunpack.c.l.b16 %v7274_v30  ;;  %v7300_v27 = vrot.slane %v7292_v24, 6 }
 0xc08   :  { %v6605_v40 = vpop.f32.mrf.mxu0 }
 0xc09   :  { %12781 = vtanh.f32 %v6604_v39  ;;  %v6606_v19 = vadd.f32 %v6605_v40, %v6203_v28  ;;  %v12240_v28 = vld [vmem:[#allocation8 + $0x184] ss:$16 sps:$4 sm:$0xff]   ;;  %v7276_v40 = vpack.c.bf16 %v7268_v34, %v7268_v34 }
 0xc0a   :  { %v6607_v16 = vpop.f32.mrf.mxu0  ;;  %v7269_v39 = vld [vmem:[#allocation5 + $0x36] sm:$0x1] }
 0xc0b   :  { %v10453_v41 = vmul.f32 -1.442695, %v6606_v19  ;;  %v7299_v19 = vsel %vm139_vm0, %v7298_v53, %v7290_v31  ;;  %v7294_v16 = vunpack.c.l.b16 %v7275_v49 }
 0xc0c   :  { %v6608_v26 = vpop.f32.mrf.mxu0 }
 0xc0d   :  { %12783 = vpow2.f32 %v10453_v41  ;;  %v12238_v41 = vld [vmem:[#allocation8 + $0x180] ss:$16 sps:$4 sm:$0xff]   ;;  %v7302_v26 = vrot.slane %v7293_v36, 5 }
 0xc16   :  { %v12782_v5 = vpop.eup %12781 }
 0xc17   :  { %v6630_v50 = vmul.f32 %v12782_v5, %v12778_v42  ;;  %v12243_v42 = vld [vmem:[#allocation8 + $0x164] ss:$16 sps:$4 sm:$0xff]   ;;  %v7277_v5 = vpack.c.bf16 %v7269_v39, %v7269_v39  ;;  %v6721_v39 = vrot.slane %v6704_v23, %v13116_v55 }
 0xc19   :  { %v13421_v51 = vadd.f32 %v6630_v50, %v6629_v48  ;;  %v7301_v48 = vsel %vm142_vm1, %v7300_v27, %v7299_v19  ;;  %v7295_v50 = vunpack.c.l.b16 %v7276_v40  ;;  %v6717_v19 = vrot.slane %v6704_v23, %v13118_v58 }
 0xc1a   :  { %v12784_v52 = vpop.eup %12783 }
 0xc1b   :  { %v6626_v13 = vadd.f32 1.0, %v12784_v52  ;;  %12785 = vtanh.f32 %v13421_v51  ;;  %v7304_v52 = vrot.slane %v7294_v16, 4 }
 0xc1d   :  { %12787 = vrcp.f32 %v6626_v13  ;;  %v12241_v13 = vld [vmem:[#allocation8 + $0x160] ss:$16 sps:$4 sm:$0xff]  }
 0xc28   :  { %v12786_v57 = vpop.eup %12785 }
 0xc2a   :  { %v12788_v7 = vpop.eup %12787 }
 0xc2b   :  { %v6633_v59 = vmul.f32 %v12788_v7, %v12786_v57  ;;  %v7278_v57 = vpack.c.bf16 %v7270_v43, %v7270_v43  ;;  %v7303_v7 = vsel %vm145_vm2, %v7302_v26, %v7301_v48 }
 0xc2d   :  { %v13424_v62 = vpack.c.bf16 %v6633_v59, %v6633_v59  ;;  %v12246_v59 = vld [vmem:[#allocation8 + $0x144] ss:$16 sps:$4 sm:$0xff]  }
 0xc2f   :  { %7079 = vmatmul.mubr.bf16.vlgmr.msra.gmra.mxu1 %v13424_v62  ;;  %7120 = vmatmul.mubr.bf16.vlgmr.msra.gmra.mxu0 %v13424_v62 }
 0xc30   :  { %7721 = vmatpush1.bf16.msra.mxu0 %v12205_v60  ;;  %7752 = vmatprep.mubr.bf16.mxu0 %v13424_v62  ;;  %v7296_v60 = vunpack.c.l.b16 %v7277_v5 }
 0xc31   :  { %7722 = vmatprep.subr.bf16.mxu0 %v12210_v63  ;;  %11002 = vmatprep.mubr.msk.bf16.mxu1 %vm13042_vm7, %v13041_v33  ;;  %v7306_v63 = vrot.slane %v7295_v50, 3 }
 0xc34   :  { %7723 = vmatpush1.bf16.msra.mxu0 %v12208_v18  ;;  %v7305_v18 = vsel %vm148_vm3, %v7304_v52, %v7303_v7 }
 0xc35   :  { %7724 = vmatprep.subr.bf16.mxu0 %v12213_v38  ;;  %v12244_v38 = vld [vmem:[#allocation8 + $0x140] ss:$16 sps:$4 sm:$0xff]  }
 0xc38   :  { %7725 = vmatpush1.bf16.msra.mxu0 %v12211_v54  ;;  %v7297_v54 = vunpack.c.l.b16 %v7278_v57 }
 0xc39   :  { %7726 = vmatprep.subr.bf16.mxu0 %v12216_v14  ;;  %v12249_v14 = vld [vmem:[#allocation8 + $0x124] ss:$16 sps:$4 sm:$0xff]  }
 0xc3c   :  { %7727 = vmatpush1.bf16.msra.mxu0 %v12214_v1  ;;  %v7308_v1 = vrot.slane %v7296_v60, 2 }
 0xc3d   :  { %7728 = vmatprep.subr.bf16.mxu0 %v12219_v47  ;;  %v7307_v47 = vsel %vm151_vm4, %v7306_v63, %v7305_v18 }
 0xc40   :  { %7729 = vmatpush1.bf16.msra.mxu0 %v12217_v3  ;;  %v12247_v3 = vld [vmem:[#allocation8 + $0x120] ss:$16 sps:$4 sm:$0xff]  }
 0xc41   :  { %7730 = vmatprep.subr.bf16.mxu0 %v12222_v4  ;;  %v7310_v4 = vrot.slane %v7297_v54, 1  ;;  %v12261_v54 = vld [vmem:[#allocation8 + $0xe8] ss:$16 sps:$4 sm:$0xff]  }
 0xc44   :  { %7731 = vmatpush1.bf16.msra.mxu0 %v12220_v6  ;;  %v12252_v6 = vld [vmem:[#allocation8 + $0x104] ss:$16 sps:$4 sm:$0xff]  }
 0xc45   :  { %7732 = vmatprep.subr.bf16.mxu0 %v12225_v8  ;;  %v7309_v8 = vsel %vm154_vm5, %v7308_v1, %v7307_v47  ;;  %v12266_v1 = vld [vmem:[#allocation8 + $0xcc] ss:$16 sps:$4 sm:$0xff]  }
 0xc46   :  { %v12269_v47 = vld [vmem:[#allocation8 + $0xac] ss:$16 sps:$4 sm:$0xff]  }
 0xc48   :  { %7733 = vmatpush1.bf16.msra.mxu0 %v12223_v0  ;;  %v12250_v0 = vld [vmem:[#allocation8 + $0x100] ss:$16 sps:$4 sm:$0xff]  }
 0xc49   :  { %7734 = vmatprep.subr.bf16.mxu0 %v12228_v2  ;;  %v7311_v2 = vsel %vm157_vm6, %v7310_v4, %v7309_v8  ;;  %v12267_v4 = vld [vmem:[#allocation8 + $0xa8] ss:$16 sps:$4 sm:$0xff]  }
 0xc4a   :  { %v13438_v9 = vpack.c.b16 %v7311_v2, %v7311_v2 }
 0xc4c   :  { %7735 = vmatpush1.bf16.msra.mxu0 %v12226_v56  ;;  %v12253_v56 = vld [vmem:[#allocation13 + $0x178] sm:$0xff]  }
 0xc4d   :  { %7736 = vmatprep.subr.bf16.mxu0 %v12231_v32  ;;  %10987 = vmatpush3.bf16.msra.mxu1 %v12253_v56  ;;  %v12254_v32 = vld [vmem:[#allocation13 + $0x170] sm:$0xff]   ;;  %v12275_v56 = vld [vmem:[#allocation8 + $0x6c] ss:$16 sps:$4 sm:$0xff]  }
 0xc4e   :  { %10988 = vmatprep.subr.bf16.mxu1 %v13041_v33 }
 0xc50   :  { %7737 = vmatpush2.bf16.msra.mxu0 %v12229_v61  ;;  %v12258_v61 = vld [vmem:[#allocation13 + $0x150] sm:$0xff]  }
 0xc51   :  { %7738 = vmatprep.subr.bf16.mxu0 %v12234_v17  ;;  %10989 = vmatpush3.bf16.msra.mxu1 %v12254_v32  ;;  %v12259_v17 = vld [vmem:[#allocation13 + $0x148] sm:$0xff]  }
 0xc52   :  { %10990 = vmatprep.subr.bf16.mxu1 %v13041_v33 }
 0xc54   :  { %7739 = vmatpush2.bf16.msra.mxu0 %v12232_v29  ;;  %v6713_v29 = vrot.slane %v6704_v23, %v13112_v46  ;;  %v12285_v23 = vld [vmem:[#allocation8 + $0x1e8] ss:$16 sps:$4 sm:$0xff]  }
 0xc55   :  { %7740 = vmatprep.subr.bf16.mxu0 %v12237_v37  ;;  %10991 = vmatpush3.bf16.msra.mxu1 %v12255_v10  ;;  %v12273_v10 = vld [vmem:[#allocation8 + $0x68] ss:$16 sps:$4 sm:$0xff]  }
 0xc56   :  { %10992 = vmatprep.subr.bf16.mxu1 %v13041_v33 }
 0xc58   :  { %7741 = vmatpush2.bf16.msra.mxu0 %v12235_v35 }
 0xc59   :  { %7742 = vmatprep.subr.bf16.mxu0 %v12240_v28  ;;  %10993 = vmatpush3.bf16.msra.mxu1 %v12256_v11  ;;  %v12276_v11 = vld [vmem:[#allocation8 + $0x48] ss:$16 sps:$4 sm:$0xff]  }
 0xc5a   :  { %10994 = vmatprep.subr.bf16.mxu1 %v13041_v33 }
 0xc5c   :  { %7743 = vmatpush2.bf16.msra.mxu0 %v12238_v41 }
 0xc5d   :  { %7744 = vmatprep.subr.bf16.mxu0 %v12243_v42  ;;  %10995 = vmatpush3.bf16.msra.mxu1 %v12257_v12  ;;  %v12281_v12 = vld [vmem:[#allocation8 + $0x2c] ss:$16 sps:$4 sm:$0xff]  }
 0xc5e   :  { %10996 = vmatprep.subr.bf16.mxu1 %v13041_v33 }
 0xc60   :  { %7745 = vmatpush2.bf16.msra.mxu0 %v12241_v13 }
 0xc61   :  { %7746 = vmatprep.subr.bf16.mxu0 %v12246_v59  ;;  %10997 = vmatpush3.bf16.msra.mxu1 %v12258_v61  ;;  %v12279_v61 = vld [vmem:[#allocation8 + $0x28] ss:$16 sps:$4 sm:$0xff]  }
 0xc62   :  { %10998 = vmatprep.subr.bf16.mxu1 %v13041_v33 }
 0xc64   :  { %7747 = vmatpush2.bf16.msra.mxu0 %v12244_v38 }
 0xc65   :  { %7748 = vmatprep.subr.bf16.mxu0 %v12249_v14  ;;  %10999 = vmatpush3.bf16.msra.mxu1 %v12259_v17  ;;  %v12284_v17 = vld [vmem:[#allocation8 + $0xc] ss:$16 sps:$4 sm:$0xff]  }
 0xc66   :  { %11000 = vmatprep.subr.bf16.mxu1 %v13041_v33 }
 0xc68   :  { %7749 = vmatpush2.bf16.msra.mxu0 %v12247_v3 }
 0xc69   :  { %7750 = vmatprep.subr.bf16.mxu0 %v12252_v6  ;;  %11001 = vmatpush3.bf16.msra.mxu1 %v12260_v21  ;;  %v12272_v6 = vld [vmem:[#allocation8 + $0x8c] ss:$16 sps:$4 sm:$0xff]   ;;  %v12282_v21 = vld [vmem:[#allocation8 + $0x8] ss:$16 sps:$4 sm:$0xff]  }
 0xc6a   :  { %7761 = vmatprep.subr.bf16.mxu1 %v12263_v22  ;;  %v12287_v22 = vld [vmem:[#allocation8 + $0x1ec] ss:$16 sps:$4 sm:$0xff]  }
 0xc6c   :  { %7751 = vmatpush2.bf16.msra.mxu0 %v12250_v0  ;;  %v12270_v0 = vld [vmem:[#allocation8 + $0x88] ss:$16 sps:$4 sm:$0xff]  }
 0xc6f   :  { %7753 = vmatmul.mubr.bf16.vlgmr.msra.gmra.mxu0 %v13438_v9 }
 0xcef   :  { %v7080_v15 = vpop.f32.mrf.mxu1  ;;  %v7121_v30 = vpop.f32.mrf.mxu0 }
 0xcf0   :  { %v7081_v37 = vadd.f32 %v7080_v15, %v6709_v25  ;;  %v7122_v26 = vadd.f32 %v7121_v30, %v6717_v19  ;;  %v12290_v25 = vld [vmem:[#allocation8 + $0x1cc] ss:$16 sps:$4 sm:$0xff]   ;;  %v12291_v30 = vld [vmem:[#allocation8 + $0x1a8] ss:$16 sps:$4 sm:$0xff]   ;;  %v12312_v19 = vld [vmem:[#allocation11 + $0xe0] ss:$16 sps:$4 sm:$0xff]  }
 0xcf1   :  { %v7082_v24 = vpop.f32.mrf.mxu1  ;;  %v7123_v31 = vpop.f32.mrf.mxu0  ;;  %v12293_v15 = vld [vmem:[#allocation8 + $0x1ac] ss:$16 sps:$4 sm:$0xff]  }
 0xcf2   :  { %v10518_v53 = vmul.f32 -1.442695, %v7081_v37  ;;  %v7083_v34 = vadd.f32 %v7082_v24, %v6713_v29  ;;  %v7124_v40 = vadd.f32 %v7123_v31, %v6721_v39  ;;  %v12288_v29 = vld [vmem:[#allocation8 + $0x1c8] ss:$16 sps:$4 sm:$0xff]   ;;  %v12296_v37 = vld [vmem:[#allocation8 + $0x18c] ss:$16 sps:$4 sm:$0xff]  }
 0xcf3   :  { %v7084_v49 = vpop.f32.mrf.mxu1  ;;  %v7125_v35 = vpop.f32.mrf.mxu0  ;;  %v12294_v24 = vld [vmem:[#allocation8 + $0x188] ss:$16 sps:$4 sm:$0xff]   ;;  %v12299_v31 = vld [vmem:[#allocation8 + $0x16c] ss:$16 sps:$4 sm:$0xff]  }
 0xcf4   :  { %12789 = vpow2.f32 %v10518_v53  ;;  %v10519_v36 = vmul.f32 -1.442695, %v7083_v34  ;;  %v10520_v16 = vmul.f32 -1.442695, %v7124_v40  ;;  %v12297_v53 = vld [vmem:[#allocation8 + $0x168] ss:$16 sps:$4 sm:$0xff]  }
 0xcf5   :  { %v7085_v28 = vpop.f32.mrf.mxu1  ;;  %v7126_v27 = vpop.f32.mrf.mxu0  ;;  %v12302_v34 = vld [vmem:[#allocation8 + $0x14c] ss:$16 sps:$4 sm:$0xff]   ;;  %v12300_v49 = vld [vmem:[#allocation8 + $0x148] ss:$16 sps:$4 sm:$0xff]   ;;  %v12311_v40 = vld [vmem:[#allocation11 + $0xec] ss:$16 sps:$4 sm:$0xff]  }
 0xcf6   :  { %12791 = vpow2.f32 %v10519_v36  ;;  %v12305_v35 = vld [vmem:[#allocation8 + $0x12c] ss:$16 sps:$4 sm:$0xff]   ;;  %v12303_v36 = vld [vmem:[#allocation8 + $0x128] ss:$16 sps:$4 sm:$0xff]  }
 0xcf7   :  { %12793 = vpow2.f32 %v10520_v16  ;;  %v12308_v28 = vld [vmem:[#allocation8 + $0x10c] ss:$16 sps:$4 sm:$0xff]   ;;  %v12306_v27 = vld [vmem:[#allocation8 + $0x108] ss:$16 sps:$4 sm:$0xff]  }
 0xcf8   :  { %v12309_v39 = vld [vmem:[#allocation11 + $0xe8] ss:$16 sps:$4 sm:$0xff]   ;;  %v12314_v16 = vld [vmem:[#allocation11 + $0xe4] ss:$16 sps:$4 sm:$0xff]  }
 0xcf9   :  { %8238 = vmatprep.subr.bf16.mxu0 %v12314_v16  ;;  %v12398_v16 = vld [vmem:[#allocation11 + $0x124] ss:$16 sps:$4 sm:$0xff]  }
 0xcfa   :  { %8239 = vmatpush1.bf16.msra.mxu0 %v12312_v19  ;;  %v12395_v19 = vld [vmem:[#allocation11 + $0x12c] ss:$16 sps:$4 sm:$0xff]  }
 0xd01   :  { %v12790_v41 = vpop.eup %12789 }
 0xd02   :  { %v7131_v42 = vadd.f32 1.0, %v12790_v41  ;;  %v12317_v41 = vld [vmem:[#allocation11 + $0xcc] ss:$16 sps:$4 sm:$0xff]  }
 0xd03   :  { %v12792_v43 = vpop.eup %12791 }
 0xd04   :  { %12795 = vrcp.f32 %v7131_v42  ;;  %v7137_v5 = vadd.f32 1.0, %v12792_v43  ;;  %v12794_v48 = vpop.eup %12793  ;;  %v12315_v42 = vld [vmem:[#allocation11 + $0xc8] ss:$16 sps:$4 sm:$0xff]   ;;  %v12318_v43 = vld [vmem:[#allocation11 + $0xc0] ss:$16 sps:$4 sm:$0xff]  }
 0xd05   :  { %12797 = vtanh.f32 %v7122_v26  ;;  %v7144_v57 = vadd.f32 1.0, %v12794_v48  ;;  %v12320_v26 = vld [vmem:[#allocation11 + $0xc4] ss:$16 sps:$4 sm:$0xff]  }
 0xd06   :  { %12799 = vrcp.f32 %v7137_v5  ;;  %v12323_v5 = vld [vmem:[#allocation11 + $0xac] ss:$16 sps:$4 sm:$0xff]   ;;  %8240 = vmatprep.subr.bf16.mxu0 %v12320_v26  ;;  %v12326_v48 = vld [vmem:[#allocation11 + $0xa4] ss:$16 sps:$4 sm:$0xff]   ;;  %v12396_v26 = vld [vmem:[#allocation11 + $0x120] ss:$16 sps:$4 sm:$0xff]  }
 0xd07   :  { %12801 = vrcp.f32 %v7144_v57  ;;  %8241 = vmatpush1.bf16.msra.mxu0 %v12318_v43  ;;  %v12327_v57 = vld [vmem:[#allocation11 + $0x88] ss:$16 sps:$4 sm:$0xff]   ;;  %v12404_v43 = vld [vmem:[#allocation11 + $0x104] ss:$16 sps:$4 sm:$0xff]  }
 0xd08   :  { %8242 = vmatprep.subr.bf16.mxu0 %v12326_v48  ;;  %v12402_v48 = vld [vmem:[#allocation11 + $0x100] ss:$16 sps:$4 sm:$0xff]  }
 0xd11   :  { %v12796_v50 = vpop.eup %12795 }
 0xd12   :  { %v12798_v52 = vpop.eup %12797 }
 0xd13   :  { %v12800_v13 = vpop.eup %12799  ;;  %v7148_v7 = vmul.f32 %v12798_v52, %v12796_v50  ;;  %v12324_v50 = vld [vmem:[#allocation11 + $0xa0] ss:$16 sps:$4 sm:$0xff]   ;;  %v12329_v52 = vld [vmem:[#allocation11 + $0x8c] ss:$16 sps:$4 sm:$0xff]  }
 0xd14   :  { %v7147_v59 = vmul.f32 %v12800_v13, %v13396_v44  ;;  %v12802_v63 = vpop.eup %12801  ;;  %v12264_v44 = vld [vmem:[#allocation8 + $0xc8] ss:$16 sps:$4 sm:$0xff]   ;;  %8243 = vmatpush1.bf16.msra.mxu0 %v12324_v50 }
 0xd15   :  { %v12332_v13 = vld [vmem:[#allocation11 + $0x84] ss:$16 sps:$4 sm:$0xff]  }
 0xd16   :  { %v13456_v60 = vadd.f32 %v7148_v7, %v7147_v59  ;;  %v12330_v7 = vld [vmem:[#allocation11 + $0x80] ss:$16 sps:$4 sm:$0xff]   ;;  %v12335_v59 = vld [vmem:[#allocation11 + $0x6c] ss:$16 sps:$4 sm:$0xff]   ;;  %8244 = vmatprep.subr.bf16.mxu0 %v12332_v13 }
 0xd18   :  { %12803 = vtanh.f32 %v13456_v60  ;;  %8245 = vmatpush1.bf16.msra.mxu0 %v12330_v7 }
 0xd25   :  { %v12804_v18 = vpop.eup %12803 }
 0xd26   :  { %v7151_v38 = vmul.f32 %v12804_v18, %v12802_v63  ;;  %v12338_v63 = vld [vmem:[#allocation11 + $0x64] ss:$16 sps:$4 sm:$0xff]   ;;  %v12333_v18 = vld [vmem:[#allocation11 + $0x68] ss:$16 sps:$4 sm:$0xff]  }
 0xd27   :  { %8246 = vmatprep.subr.bf16.mxu0 %v12338_v63 }
 0xd28   :  { %v13459_v14 = vpack.c.bf16 %v7151_v38, %v7151_v38  ;;  %v12336_v38 = vld [vmem:[#allocation11 + $0x60] ss:$16 sps:$4 sm:$0xff]  }
 0xd29   :  { %8247 = vmatpush1.bf16.msra.mxu0 %v12336_v38 }
 0xd2a   :  { %11003 = vmatmul.mubr.bf16.vlgmr.msra.gmra.mxu1 %v13459_v14  ;;  %8270 = vmatprep.mubr.bf16.mxu0 %v13459_v14 }
 0xd2b   :  { %7762 = vmatpush1.bf16.msra.mxu1 %v12261_v54  ;;  %7793 = vmatprep.mubr.bf16.mxu1 %v13424_v62  ;;  %v12278_v62 = vld [vmem:[#allocation8 + $0x4c] ss:$16 sps:$4 sm:$0xff]   ;;  %v12341_v54 = vld [vmem:[#allocation11 + $0x4c] ss:$16 sps:$4 sm:$0xff]  }
 0xd2c   :  { %7763 = vmatprep.subr.bf16.mxu1 %v12266_v1  ;;  %v12339_v1 = vld [vmem:[#allocation11 + $0x48] ss:$16 sps:$4 sm:$0xff]  }
 0xd2f   :  { %v13464_v3 = vpop.f32.mrf.mxu0  ;;  %7764 = vmatpush1.bf16.msra.mxu1 %v12264_v44  ;;  %v12342_v44 = vld [vmem:[#allocation11 + $0x40] ss:$16 sps:$4 sm:$0xff]  }
 0xd30   :  { %7765 = vmatprep.subr.bf16.mxu1 %v12269_v47  ;;  %v12347_v47 = vld [vmem:[#allocation11 + $0x2c] ss:$16 sps:$4 sm:$0xff]  }
 0xd31   :  { %v13466_v8 = vpop.f32.mrf.mxu0 }
 0xd33   :  { %7766 = vmatpush1.bf16.msra.mxu1 %v12267_v4  ;;  %v7758_v2 = vpop.f32.mrf.mxu0  ;;  %v12345_v4 = vld [vmem:[#allocation11 + $0x28] ss:$16 sps:$4 sm:$0xff]  }
 0xd34   :  { %7767 = vmatprep.subr.bf16.mxu1 %v12272_v6  ;;  %v12350_v6 = vld [vmem:[#allocation11 + $0x24] ss:$16 sps:$4 sm:$0xff]   ;;  %v12353_v2 = vld [vmem:[#allocation11 + $0xc] ss:$16 sps:$4 sm:$0xff]  }
 0xd35   :  { %v7759_v32 = vpop.f32.mrf.mxu0 }
 0xd36   :  { %v12356_v32 = vld [vmem:[#allocation11 + $0x4] ss:$16 sps:$4 sm:$0xff]  }
 0xd37   :  { %7768 = vmatpush1.bf16.msra.mxu1 %v12270_v0  ;;  %v12348_v0 = vld [vmem:[#allocation11 + $0x20] ss:$16 sps:$4 sm:$0xff]  }
 0xd38   :  { %7769 = vmatprep.subr.bf16.mxu1 %v12275_v56  ;;  %v12351_v56 = vld [vmem:[#allocation11 + $0x8] ss:$16 sps:$4 sm:$0xff]  }
 0xd3b   :  { %7770 = vmatpush1.bf16.msra.mxu1 %v12273_v10  ;;  %v12354_v10 = vld [vmem:[#allocation11] ss:$16 sps:$4 sm:$0xff]  }
 0xd3c   :  { %7771 = vmatprep.subr.bf16.mxu1 %v12278_v62  ;;  %v12359_v62 = vld [vmem:[#allocation11 + $0x1ec] ss:$16 sps:$4 sm:$0xff]  }
 0xd3f   :  { %7772 = vmatpush1.bf16.msra.mxu1 %v12276_v11  ;;  %v12357_v11 = vld [vmem:[#allocation11 + $0x1e8] ss:$16 sps:$4 sm:$0xff]  }
 0xd40   :  { %7773 = vmatprep.subr.bf16.mxu1 %v12281_v12  ;;  %v12362_v12 = vld [vmem:[#allocation11 + $0x1e4] ss:$16 sps:$4 sm:$0xff]  }
 0xd43   :  { %7774 = vmatpush1.bf16.msra.mxu1 %v12279_v61  ;;  %v12360_v61 = vld [vmem:[#allocation11 + $0x1e0] ss:$16 sps:$4 sm:$0xff]  }
 0xd44   :  { %7775 = vmatprep.subr.bf16.mxu1 %v12284_v17  ;;  %v12365_v17 = vld [vmem:[#allocation11 + $0x1cc] ss:$16 sps:$4 sm:$0xff]  }
 0xd47   :  { %7776 = vmatpush1.bf16.msra.mxu1 %v12282_v21  ;;  %v12363_v21 = vld [vmem:[#allocation11 + $0x1c8] ss:$16 sps:$4 sm:$0xff]  }
 0xd48   :  { %7777 = vmatprep.subr.bf16.mxu1 %v12287_v22  ;;  %v12368_v22 = vld [vmem:[#allocation11 + $0x1c4] ss:$16 sps:$4 sm:$0xff]  }
 0xd4b   :  { %7778 = vmatpush2.bf16.msra.mxu1 %v12285_v23  ;;  %v12366_v23 = vld [vmem:[#allocation11 + $0x1c0] ss:$16 sps:$4 sm:$0xff]  }
 0xd4c   :  { %7779 = vmatprep.subr.bf16.mxu1 %v12290_v25  ;;  %v12371_v25 = vld [vmem:[#allocation11 + $0x1ac] ss:$16 sps:$4 sm:$0xff]  }
 0xd4f   :  { %7780 = vmatpush2.bf16.msra.mxu1 %v12288_v29  ;;  %v12369_v29 = vld [vmem:[#allocation11 + $0x1a8] ss:$16 sps:$4 sm:$0xff]  }
 0xd50   :  { %7781 = vmatprep.subr.bf16.mxu1 %v12293_v15  ;;  %v12374_v15 = vld [vmem:[#allocation11 + $0x1a4] ss:$16 sps:$4 sm:$0xff]  }
 0xd53   :  { %7782 = vmatpush2.bf16.msra.mxu1 %v12291_v30  ;;  %v12372_v30 = vld [vmem:[#allocation11 + $0x1a0] ss:$16 sps:$4 sm:$0xff]  }
 0xd54   :  { %7783 = vmatprep.subr.bf16.mxu1 %v12296_v37  ;;  %v12377_v37 = vld [vmem:[#allocation11 + $0x18c] ss:$16 sps:$4 sm:$0xff]  }
 0xd57   :  { %7784 = vmatpush2.bf16.msra.mxu1 %v12294_v24  ;;  %v12375_v24 = vld [vmem:[#allocation11 + $0x188] ss:$16 sps:$4 sm:$0xff]  }
 0xd58   :  { %7785 = vmatprep.subr.bf16.mxu1 %v12299_v31  ;;  %v12380_v31 = vld [vmem:[#allocation11 + $0x184] ss:$16 sps:$4 sm:$0xff]  }
 0xd5b   :  { %7786 = vmatpush2.bf16.msra.mxu1 %v12297_v53  ;;  %v12378_v53 = vld [vmem:[#allocation11 + $0x180] ss:$16 sps:$4 sm:$0xff]  }
 0xd5c   :  { %7787 = vmatprep.subr.bf16.mxu1 %v12302_v34  ;;  %v12383_v34 = vld [vmem:[#allocation11 + $0x16c] ss:$16 sps:$4 sm:$0xff]  }
 0xd5f   :  { %7788 = vmatpush2.bf16.msra.mxu1 %v12300_v49  ;;  %v12381_v49 = vld [vmem:[#allocation11 + $0x168] ss:$16 sps:$4 sm:$0xff]  }
 0xd60   :  { %7789 = vmatprep.subr.bf16.mxu1 %v12305_v35  ;;  %v12384_v35 = vld [vmem:[#allocation11 + $0x160] ss:$16 sps:$4 sm:$0xff]  }
 0xd63   :  { %7790 = vmatpush2.bf16.msra.mxu1 %v12303_v36  ;;  %v12386_v36 = vld [vmem:[#allocation11 + $0x164] ss:$16 sps:$4 sm:$0xff]  }
 0xd64   :  { %7791 = vmatprep.subr.bf16.mxu1 %v12308_v28  ;;  %v12389_v28 = vld [vmem:[#allocation11 + $0x14c] ss:$16 sps:$4 sm:$0xff]  }
 0xd67   :  { %7792 = vmatpush2.bf16.msra.mxu1 %v12306_v27  ;;  %v12387_v27 = vld [vmem:[#allocation11 + $0x148] ss:$16 sps:$4 sm:$0xff]  }
 0xd68   :  { %8279 = vmatprep.subr.bf16.mxu1 %v12311_v40  ;;  %v12390_v40 = vld [vmem:[#allocation11 + $0x140] ss:$16 sps:$4 sm:$0xff]  }
 0xd6a   :  { %7794 = vmatmul.mubr.bf16.vlgmr.msra.gmra.mxu1 %v13438_v9  ;;  %v12321_v9 = vld [vmem:[#allocation11 + $0xa8] ss:$16 sps:$4 sm:$0xff]  }
 0xd6b   :  { %8311 = vmatprep.mubr.bf16.mxu1 %v13459_v14  ;;  %8280 = vmatpush1.bf16.msra.mxu1 %v12309_v39  ;;  %v12344_v14 = vld [vmem:[#allocation11 + $0x44] ss:$16 sps:$4 sm:$0xff]  }
 0xd6c   :  { %8281 = vmatprep.subr.bf16.mxu1 %v12317_v41  ;;  %8248 = vmatprep.subr.bf16.mxu0 %v12344_v14  ;;  %v12392_v39 = vld [vmem:[#allocation11 + $0x144] ss:$16 sps:$4 sm:$0xff]   ;;  %v12393_v41 = vld [vmem:[#allocation11 + $0x128] ss:$16 sps:$4 sm:$0xff]  }
 0xd6d   :  { %8249 = vmatpush1.bf16.msra.mxu0 %v12342_v44 }
 0xd6e   :  { %8250 = vmatprep.subr.bf16.mxu0 %v12350_v6 }
 0xd6f   :  { %8282 = vmatpush1.bf16.msra.mxu1 %v12315_v42  ;;  %v12401_v42 = vld [vmem:[#allocation11 + $0x10c] ss:$16 sps:$4 sm:$0xff]  }
 0xd70   :  { %8283 = vmatprep.subr.bf16.mxu1 %v12323_v5  ;;  %v12399_v5 = vld [vmem:[#allocation11 + $0x108] ss:$16 sps:$4 sm:$0xff]  }
 0xd71   :  { %8251 = vmatpush1.bf16.msra.mxu0 %v12348_v0 }
 0xd72   :  { %8252 = vmatprep.subr.bf16.mxu0 %v12356_v32 }
 0xd73   :  { %8284 = vmatpush1.bf16.msra.mxu1 %v12321_v9  ;;  %v12407_v9 = vld [vmem:[#allocation8 + $0xe4] ss:$16 sps:$4 sm:$0xff]  }
 0xd74   :  { %8285 = vmatprep.subr.bf16.mxu1 %v12329_v52 }
 0xd75   :  { %8253 = vmatpush1.bf16.msra.mxu0 %v12354_v10 }
 0xd76   :  { %8254 = vmatprep.subr.bf16.mxu0 %v12362_v12 }
 0xd77   :  { %8286 = vmatpush1.bf16.msra.mxu1 %v12327_v57 }
 0xd78   :  { %8287 = vmatprep.subr.bf16.mxu1 %v12335_v59  ;;  %v7378_v59 = vld [vmem:[#allocation10] sm:$0xf] }
 0xd79   :  { %8255 = vmatpush2.bf16.msra.mxu0 %v12360_v61  ;;  %v7383_v63 = vrot.slane %v7378_v59, %v13110_v45  ;;  %v7391_v6 = vrot.slane %v7378_v59, %v13118_v58  ;;  %v7395_v0 = vrot.slane %v7378_v59, %v13116_v55 }
 0xd7a   :  { %8256 = vmatprep.subr.bf16.mxu0 %v12368_v22 }
 0xd7b   :  { %8288 = vmatpush1.bf16.msra.mxu1 %v12333_v18  ;;  %v7387_v18 = vrot.slane %v7378_v59, %v13112_v46  ;;  %v7755_v38 = vadd.f32 %v13464_v3, %v7383_v63  ;;  %v12432_v63 = vld [vmem:[#allocation8 + $0x1c0] ss:$16 sps:$4 sm:$0xff]  }
 0xd7c   :  { %8289 = vmatprep.subr.bf16.mxu1 %v12341_v54 }
 0xd7d   :  { %8257 = vmatpush2.bf16.msra.mxu0 %v12366_v23  ;;  %v7757_v54 = vadd.f32 %v13466_v8, %v7387_v18  ;;  %v10593_v14 = vmul.f32 -1.442695, %v7755_v38  ;;  %v8459_v18 = vld [vmem:[#allocation5 + $0x27] sm:$0x1] }
 0xd7e   :  { %8258 = vmatprep.subr.bf16.mxu0 %v12374_v15 }
 0xd7f   :  { %8290 = vmatpush1.bf16.msra.mxu1 %v12339_v1  ;;  %v10594_v1 = vmul.f32 -1.442695, %v7757_v54  ;;  %12805 = vpow2.f32 %v10593_v14  ;;  %v12437_v54 = vld [vmem:[#allocation8 + $0x1a4] ss:$16 sps:$4 sm:$0xff]  }
 0xd80   :  { %8291 = vmatprep.subr.bf16.mxu1 %v12347_v47 }
 0xd81   :  { %8259 = vmatpush2.bf16.msra.mxu0 %v12372_v30  ;;  %12807 = vpow2.f32 %v10594_v1 }
 0xd82   :  { %8260 = vmatprep.subr.bf16.mxu0 %v12380_v31  ;;  %v12410_v31 = vld [vmem:[#allocation8 + $0xc4] ss:$16 sps:$4 sm:$0xff]  }
 0xd83   :  { %8292 = vmatpush1.bf16.msra.mxu1 %v12345_v4 }
 0xd84   :  { %8293 = vmatprep.subr.bf16.mxu1 %v12353_v2 }
 0xd85   :  { %8261 = vmatpush2.bf16.msra.mxu0 %v12378_v53  ;;  %v12413_v53 = vld [vmem:[#allocation8 + $0xa4] ss:$16 sps:$4 sm:$0xff]  }
 0xd86   :  { %8262 = vmatprep.subr.bf16.mxu0 %v12386_v36  ;;  %v12419_v36 = vld [vmem:[#allocation8 + $0x64] ss:$16 sps:$4 sm:$0xff]  }
 0xd87   :  { %8294 = vmatpush1.bf16.msra.mxu1 %v12351_v56 }
 0xd88   :  { %8295 = vmatprep.subr.bf16.mxu1 %v12359_v62 }
 0xd89   :  { %8263 = vmatpush2.bf16.msra.mxu0 %v12384_v35  ;;  %v12414_v35 = vld [vmem:[#allocation8 + $0x80] ss:$16 sps:$4 sm:$0xff]  }
 0xd8a   :  { %8264 = vmatprep.subr.bf16.mxu0 %v12392_v39  ;;  %v12420_v39 = vld [vmem:[#allocation8 + $0x40] ss:$16 sps:$4 sm:$0xff]  }
 0xd8b   :  { %8296 = vmatpush2.bf16.msra.mxu1 %v12357_v11 }
 0xd8c   :  { %8297 = vmatprep.subr.bf16.mxu1 %v12365_v17  ;;  %v12806_v44 = vpop.eup %12805 }
 0xd8d   :  { %8265 = vmatpush2.bf16.msra.mxu0 %v12390_v40  ;;  %v12425_v40 = vld [vmem:[#allocation8 + $0x24] ss:$16 sps:$4 sm:$0xff]  }
 0xd8e   :  { %8266 = vmatprep.subr.bf16.mxu0 %v12398_v16  ;;  %v12808_v47 = vpop.eup %12807  ;;  %v12428_v16 = vld [vmem:[#allocation8 + $0x4] ss:$16 sps:$4 sm:$0xff]  }
 0xd8f   :  { %8298 = vmatpush2.bf16.msra.mxu1 %v12363_v21  ;;  %v7811_v4 = vadd.f32 1.0, %v12808_v47  ;;  %v8460_v47 = vld [vmem:[#allocation5 + $0x2f] sm:$0x1] }
 0xd90   :  { %8299 = vmatprep.subr.bf16.mxu1 %v12371_v25 }
 0xd91   :  { %8267 = vmatpush2.bf16.msra.mxu0 %v12396_v26  ;;  %v12426_v26 = vld [vmem:[#allocation8] ss:$16 sps:$4 sm:$0xff]  }
 0xd92   :  { %8268 = vmatprep.subr.bf16.mxu0 %v12404_v43  ;;  %v8457_v43 = vld [vmem:[#allocation5 + $0x17] sm:$0x1] }
 0xd93   :  { %8300 = vmatpush2.bf16.msra.mxu1 %v12369_v29 }
 0xd94   :  { %8301 = vmatprep.subr.bf16.mxu1 %v12377_v37  ;;  %v12405_v37 = vld [vmem:[#allocation8 + $0xe0] ss:$16 sps:$4 sm:$0xff]  }
 0xd95   :  { %8269 = vmatpush2.bf16.msra.mxu0 %v12402_v48  ;;  %v8455_v48 = vld [vmem:[#allocation5 + $0x7] sm:$0x1] }
 0xd96   :  { %11006 = vmatprep.subr.bf16.mxu0 %v13041_v33 }
 0xd97   :  { %8302 = vmatpush2.bf16.msra.mxu1 %v12375_v24 }
 0xd98   :  { %8303 = vmatprep.subr.bf16.mxu1 %v12383_v34  ;;  %v12411_v34 = vld [vmem:[#allocation8 + $0xa0] ss:$16 sps:$4 sm:$0xff]  }
 0xd9b   :  { %8304 = vmatpush2.bf16.msra.mxu1 %v12381_v49  ;;  %v12416_v49 = vld [vmem:[#allocation8 + $0x84] ss:$16 sps:$4 sm:$0xff]  }
 0xd9c   :  { %8305 = vmatprep.subr.bf16.mxu1 %v12389_v28  ;;  %v12417_v28 = vld [vmem:[#allocation8 + $0x60] ss:$16 sps:$4 sm:$0xff]  }
 0xd9f   :  { %8306 = vmatpush2.bf16.msra.mxu1 %v12387_v27  ;;  %v12422_v27 = vld [vmem:[#allocation8 + $0x44] ss:$16 sps:$4 sm:$0xff]  }
 0xda0   :  { %8307 = vmatprep.subr.bf16.mxu1 %v12395_v19  ;;  %v12423_v19 = vld [vmem:[#allocation8 + $0x20] ss:$16 sps:$4 sm:$0xff]  }
 0xda3   :  { %8308 = vmatpush2.bf16.msra.mxu1 %v12393_v41  ;;  %v8456_v41 = vld [vmem:[#allocation5 + $0xf] sm:$0x1] }
 0xda4   :  { %8309 = vmatprep.subr.bf16.mxu1 %v12401_v42  ;;  %v12431_v42 = vld [vmem:[#allocation8 + $0x1e4] ss:$16 sps:$4 sm:$0xff]  }
 0xda7   :  { %8310 = vmatpush2.bf16.msra.mxu1 %v12399_v5  ;;  %v8464_v5 = vpack.c.bf16 %v8456_v41, %v8456_v41 }
 0xda8   :  { %8912 = vmatprep.subr.bf16.mxu1 %v12407_v9  ;;  %v12429_v9 = vld [vmem:[#allocation8 + $0x1e0] ss:$16 sps:$4 sm:$0xff]  }
 0xda9   :  { %v8483_v59 = vunpack.c.l.b16 %v8464_v5  ;;  %v12456_v5 = vld [vmem:[#allocation13 + $0x1a0] sm:$0xff]  }
 0xdea   :  { %v7255_v50 = vpop.f32.mrf.mxu1 }
 0xdeb   :  { %v13472_v52 = vadd.f32 %v7255_v50, %v13412_v20  ;;  %v7805_v20 = vadd.f32 1.0, %v12806_v44  ;;  %v12434_v50 = vld [vmem:[#allocation8 + $0x1c4] ss:$16 sps:$4 sm:$0xff]   ;;  %v8490_v44 = vrot.slane %v8483_v59, 7 }
 0xdec   :  { %v11004_v13 = vpop.f32.mrf.mxu1 }
 0xded   :  { %12809 = vrcp.f32 %v7805_v20  ;;  %v8458_v13 = vld [vmem:[#allocation5 + $0x1f] sm:$0x1]  ;;  %v8467_v20 = vpack.c.bf16 %v8459_v18, %v8459_v18 }
 0xdee   :  { %v7258_v57 = vpop.f32.mrf.mxu1  ;;  %12811 = vrcp.f32 %v7811_v4  ;;  %v8466_v38 = vpack.c.bf16 %v8458_v13, %v8458_v13  ;;  %v12435_v4 = vld [vmem:[#allocation8 + $0x1a0] ss:$16 sps:$4 sm:$0xff]   ;;  %v12460_v13 = vld [vmem:[#allocation13 + $0x180] sm:$0xff]  }
 0xdef   :  { %v8465_v57 = vpack.c.bf16 %v8457_v43, %v8457_v43  ;;  %v12455_v43 = vld [vmem:[#allocation13 + $0x1a8] sm:$0xff]  }
 0xdf0   :  { %v11005_v7 = vpop.f32.mrf.mxu1 }
 0xdf1   :  { %v8463_v7 = vpack.c.bf16 %v8455_v48, %v8455_v48  ;;  %v8484_v14 = vunpack.c.l.b16 %v8465_v57  ;;  %v12457_v48 = vld [vmem:[#allocation13 + $0x198] sm:$0xff]  }
 0xdf2   :  { %v12463_v57 = vld [vmem:[#allocation8 + $0xec] ss:$16 sps:$4 sm:$0xff]  }
 0xdf3   :  { %v8482_v1 = vunpack.c.l.b16 %v8463_v7  ;;  %v7896_v7 = vld [vmem:[%s13569_s4] sm:$0xf] }
 0xdf4   :  { %v7901_v59 = vrot.slane %v7896_v7, %v13110_v45 }
 0xdfa   :  { %v12810_v11 = vpop.eup %12809 }
 0xdfb   :  { %v12812_v12 = vpop.eup %12811 }
 0xdfc   :  { %v7821_v17 = vmul.f32 %v12812_v12, %v13421_v51  ;;  %v12408_v51 = vld [vmem:[#allocation8 + $0xc0] ss:$16 sps:$4 sm:$0xff]   ;;  %v8462_v12 = vld [vmem:[#allocation5 + $0x3f] sm:$0x1] }
 0xe2a   :  { %v7795_v2 = vpop.f32.mrf.mxu1 }
 0xe2b   :  { %v7796_v56 = vadd.f32 %v7795_v2, %v7391_v6  ;;  %v8485_v6 = vunpack.c.l.b16 %v8466_v38  ;;  %v8492_v2 = vrot.slane %v8484_v14, 6 }
 0xe2c   :  { %v7797_v32 = vpop.f32.mrf.mxu1 }
 0xe2d   :  { %12813 = vtanh.f32 %v7796_v56  ;;  %v7798_v3 = vadd.f32 %v7797_v32, %v7395_v0  ;;  %v12440_v0 = vld [vmem:[#allocation8 + $0x184] ss:$16 sps:$4 sm:$0xff]   ;;  %v8468_v32 = vpack.c.bf16 %v8460_v47, %v8460_v47 }
 0xe2e   :  { %v7799_v8 = vpop.f32.mrf.mxu1  ;;  %v8461_v56 = vld [vmem:[#allocation5 + $0x37] sm:$0x1] }
 0xe2f   :  { %v10595_v10 = vmul.f32 -1.442695, %v7798_v3  ;;  %v8491_v3 = vsel %vm139_vm0, %v8490_v44, %v8482_v1  ;;  %v8486_v8 = vunpack.c.l.b16 %v8467_v20 }
 0xe30   :  { %v7800_v62 = vpop.f32.mrf.mxu1 }
 0xe31   :  { %12815 = vpow2.f32 %v10595_v10  ;;  %v12438_v10 = vld [vmem:[#allocation8 + $0x180] ss:$16 sps:$4 sm:$0xff]   ;;  %v8494_v62 = vrot.slane %v8485_v6, 5 }
 0xe3a   :  { %v12814_v61 = vpop.eup %12813 }
 0xe3b   :  { %v7822_v21 = vmul.f32 %v12814_v61, %v12810_v11  ;;  %v12443_v11 = vld [vmem:[#allocation8 + $0x164] ss:$16 sps:$4 sm:$0xff]   ;;  %v8469_v61 = vpack.c.bf16 %v8461_v56, %v8461_v56  ;;  %v7913_v56 = vrot.slane %v7896_v7, %v13116_v55 }
 0xe3d   :  { %v13481_v22 = vadd.f32 %v7822_v21, %v7821_v17  ;;  %v8493_v17 = vsel %vm142_vm1, %v8492_v2, %v8491_v3  ;;  %v8487_v21 = vunpack.c.l.b16 %v8468_v32  ;;  %v7909_v3 = vrot.slane %v7896_v7, %v13118_v58 }
 0xe3e   :  { %v12816_v23 = vpop.eup %12815 }
 0xe3f   :  { %v7818_v25 = vadd.f32 1.0, %v12816_v23  ;;  %12817 = vtanh.f32 %v13481_v22  ;;  %v8496_v23 = vrot.slane %v8486_v8, 4 }
 0xe41   :  { %12819 = vrcp.f32 %v7818_v25  ;;  %v12441_v25 = vld [vmem:[#allocation8 + $0x160] ss:$16 sps:$4 sm:$0xff]  }
 0xe4c   :  { %v12818_v29 = vpop.eup %12817 }
 0xe4e   :  { %v12820_v15 = vpop.eup %12819 }
 0xe4f   :  { %v7825_v30 = vmul.f32 %v12820_v15, %v12818_v29  ;;  %v8470_v29 = vpack.c.bf16 %v8462_v12, %v8462_v12  ;;  %v8495_v15 = vsel %vm145_vm2, %v8494_v62, %v8493_v17 }
 0xe51   :  { %v13484_v24 = vpack.c.bf16 %v7825_v30, %v7825_v30  ;;  %v12446_v30 = vld [vmem:[#allocation8 + $0x144] ss:$16 sps:$4 sm:$0xff]  }
 0xe53   :  { %8271 = vmatmul.mubr.bf16.vlgmr.msra.gmra.mxu0 %v13484_v24  ;;  %8312 = vmatmul.mubr.bf16.vlgmr.msra.gmra.mxu1 %v13484_v24 }
 0xe54   :  { %8913 = vmatpush1.bf16.msra.mxu1 %v12405_v37  ;;  %8944 = vmatprep.mubr.bf16.mxu1 %v13484_v24  ;;  %v8488_v37 = vunpack.c.l.b16 %v8469_v61 }
 0xe55   :  { %8914 = vmatprep.subr.bf16.mxu1 %v12410_v31  ;;  %11022 = vmatprep.mubr.msk.bf16.mxu0 %vm13042_vm7, %v13041_v33  ;;  %v8498_v31 = vrot.slane %v8487_v21, 3 }
 0xe58   :  { %8915 = vmatpush1.bf16.msra.mxu1 %v12408_v51  ;;  %v8497_v51 = vsel %vm148_vm3, %v8496_v23, %v8495_v15 }
 0xe59   :  { %8916 = vmatprep.subr.bf16.mxu1 %v12413_v53  ;;  %v12444_v53 = vld [vmem:[#allocation8 + $0x140] ss:$16 sps:$4 sm:$0xff]  }
 0xe5c   :  { %8917 = vmatpush1.bf16.msra.mxu1 %v12411_v34  ;;  %v8489_v34 = vunpack.c.l.b16 %v8470_v29 }
 0xe5d   :  { %8918 = vmatprep.subr.bf16.mxu1 %v12416_v49  ;;  %v12449_v49 = vld [vmem:[#allocation8 + $0x124] ss:$16 sps:$4 sm:$0xff]  }
 0xe60   :  { %8919 = vmatpush1.bf16.msra.mxu1 %v12414_v35  ;;  %v8500_v35 = vrot.slane %v8488_v37, 2 }
 0xe61   :  { %8920 = vmatprep.subr.bf16.mxu1 %v12419_v36  ;;  %v8499_v36 = vsel %vm151_vm4, %v8498_v31, %v8497_v51 }
 0xe64   :  { %8921 = vmatpush1.bf16.msra.mxu1 %v12417_v28  ;;  %v12447_v28 = vld [vmem:[#allocation8 + $0x120] ss:$16 sps:$4 sm:$0xff]  }
 0xe65   :  { %8922 = vmatprep.subr.bf16.mxu1 %v12422_v27  ;;  %v8502_v27 = vrot.slane %v8489_v34, 1  ;;  %v12461_v34 = vld [vmem:[#allocation8 + $0xe8] ss:$16 sps:$4 sm:$0xff]  }
 0xe68   :  { %8923 = vmatpush1.bf16.msra.mxu1 %v12420_v39  ;;  %v12452_v39 = vld [vmem:[#allocation8 + $0x104] ss:$16 sps:$4 sm:$0xff]  }
 0xe69   :  { %8924 = vmatprep.subr.bf16.mxu1 %v12425_v40  ;;  %v8501_v40 = vsel %vm154_vm5, %v8500_v35, %v8499_v36  ;;  %v12466_v35 = vld [vmem:[#allocation8 + $0xcc] ss:$16 sps:$4 sm:$0xff]  }
 0xe6a   :  { %v12469_v36 = vld [vmem:[#allocation8 + $0xac] ss:$16 sps:$4 sm:$0xff]  }
 0xe6c   :  { %8925 = vmatpush1.bf16.msra.mxu1 %v12423_v19  ;;  %v12450_v19 = vld [vmem:[#allocation8 + $0x100] ss:$16 sps:$4 sm:$0xff]  }
 0xe6d   :  { %8926 = vmatprep.subr.bf16.mxu1 %v12428_v16  ;;  %v8503_v16 = vsel %vm157_vm6, %v8502_v27, %v8501_v40  ;;  %v12467_v27 = vld [vmem:[#allocation8 + $0xa8] ss:$16 sps:$4 sm:$0xff]  }
 0xe6e   :  { %v13498_v41 = vpack.c.b16 %v8503_v16, %v8503_v16 }
 0xe70   :  { %8927 = vmatpush1.bf16.msra.mxu1 %v12426_v26  ;;  %v12453_v26 = vld [vmem:[#allocation13 + $0x1b8] sm:$0xff]  }
 0xe71   :  { %8928 = vmatprep.subr.bf16.mxu1 %v12431_v42  ;;  %11007 = vmatpush3.bf16.msra.mxu0 %v12453_v26  ;;  %v12454_v42 = vld [vmem:[#allocation13 + $0x1b0] sm:$0xff]   ;;  %v12475_v26 = vld [vmem:[#allocation8 + $0x6c] ss:$16 sps:$4 sm:$0xff]  }
 0xe72   :  { %11008 = vmatprep.subr.bf16.mxu0 %v13041_v33 }
 0xe74   :  { %8929 = vmatpush2.bf16.msra.mxu1 %v12429_v9  ;;  %v12458_v9 = vld [vmem:[#allocation13 + $0x190] sm:$0xff]  }
 0xe75   :  { %8930 = vmatprep.subr.bf16.mxu1 %v12434_v50  ;;  %11009 = vmatpush3.bf16.msra.mxu0 %v12454_v42  ;;  %v12459_v50 = vld [vmem:[#allocation13 + $0x188] sm:$0xff]  }
 0xe76   :  { %11010 = vmatprep.subr.bf16.mxu0 %v13041_v33 }
 0xe78   :  { %8931 = vmatpush2.bf16.msra.mxu1 %v12432_v63  ;;  %v7905_v63 = vrot.slane %v7896_v7, %v13112_v46  ;;  %v12485_v7 = vld [vmem:[#allocation8 + $0x1e8] ss:$16 sps:$4 sm:$0xff]  }
 0xe79   :  { %8932 = vmatprep.subr.bf16.mxu1 %v12437_v54  ;;  %11011 = vmatpush3.bf16.msra.mxu0 %v12455_v43  ;;  %v12473_v43 = vld [vmem:[#allocation8 + $0x68] ss:$16 sps:$4 sm:$0xff]  }
 0xe7a   :  { %11012 = vmatprep.subr.bf16.mxu0 %v13041_v33 }
 0xe7c   :  { %8933 = vmatpush2.bf16.msra.mxu1 %v12435_v4 }
 0xe7d   :  { %8934 = vmatprep.subr.bf16.mxu1 %v12440_v0  ;;  %11013 = vmatpush3.bf16.msra.mxu0 %v12456_v5  ;;  %v12476_v5 = vld [vmem:[#allocation8 + $0x48] ss:$16 sps:$4 sm:$0xff]  }
 0xe7e   :  { %11014 = vmatprep.subr.bf16.mxu0 %v13041_v33 }
 0xe80   :  { %8935 = vmatpush2.bf16.msra.mxu1 %v12438_v10 }
 0xe81   :  { %8936 = vmatprep.subr.bf16.mxu1 %v12443_v11  ;;  %11015 = vmatpush3.bf16.msra.mxu0 %v12457_v48  ;;  %v12481_v48 = vld [vmem:[#allocation8 + $0x2c] ss:$16 sps:$4 sm:$0xff]  }
 0xe82   :  { %11016 = vmatprep.subr.bf16.mxu0 %v13041_v33 }
 0xe84   :  { %8937 = vmatpush2.bf16.msra.mxu1 %v12441_v25 }
 0xe85   :  { %8938 = vmatprep.subr.bf16.mxu1 %v12446_v30  ;;  %11017 = vmatpush3.bf16.msra.mxu0 %v12458_v9  ;;  %v12479_v9 = vld [vmem:[#allocation8 + $0x28] ss:$16 sps:$4 sm:$0xff]  }
 0xe86   :  { %11018 = vmatprep.subr.bf16.mxu0 %v13041_v33 }
 0xe88   :  { %8939 = vmatpush2.bf16.msra.mxu1 %v12444_v53 }
 0xe89   :  { %8940 = vmatprep.subr.bf16.mxu1 %v12449_v49  ;;  %11019 = vmatpush3.bf16.msra.mxu0 %v12459_v50  ;;  %v12484_v50 = vld [vmem:[#allocation8 + $0xc] ss:$16 sps:$4 sm:$0xff]  }
 0xe8a   :  { %11020 = vmatprep.subr.bf16.mxu0 %v13041_v33 }
 0xe8c   :  { %8941 = vmatpush2.bf16.msra.mxu1 %v12447_v28 }
 0xe8d   :  { %8942 = vmatprep.subr.bf16.mxu1 %v12452_v39  ;;  %11021 = vmatpush3.bf16.msra.mxu0 %v12460_v13  ;;  %v12472_v39 = vld [vmem:[#allocation8 + $0x8c] ss:$16 sps:$4 sm:$0xff]   ;;  %v12482_v13 = vld [vmem:[#allocation8 + $0x8] ss:$16 sps:$4 sm:$0xff]  }
 0xe8e   :  { %8953 = vmatprep.subr.bf16.mxu0 %v12463_v57  ;;  %v12487_v57 = vld [vmem:[#allocation8 + $0x1ec] ss:$16 sps:$4 sm:$0xff]  }
 0xe90   :  { %8943 = vmatpush2.bf16.msra.mxu1 %v12450_v19  ;;  %v12470_v19 = vld [vmem:[#allocation8 + $0x88] ss:$16 sps:$4 sm:$0xff]  }
 0xe93   :  { %8945 = vmatmul.mubr.bf16.vlgmr.msra.gmra.mxu1 %v13498_v41 }
 0xf13   :  { %v8272_v18 = vpop.f32.mrf.mxu0  ;;  %v8313_v38 = vpop.f32.mrf.mxu1 }
 0xf14   :  { %v8273_v54 = vadd.f32 %v8272_v18, %v7901_v59  ;;  %v8314_v62 = vadd.f32 %v8313_v38, %v7909_v3  ;;  %v12490_v59 = vld [vmem:[#allocation8 + $0x1cc] ss:$16 sps:$4 sm:$0xff]   ;;  %v12491_v38 = vld [vmem:[#allocation8 + $0x1a8] ss:$16 sps:$4 sm:$0xff]  }
 0xf15   :  { %v8274_v14 = vpop.f32.mrf.mxu0  ;;  %v8315_v1 = vpop.f32.mrf.mxu1  ;;  %v12493_v18 = vld [vmem:[#allocation8 + $0x1ac] ss:$16 sps:$4 sm:$0xff]  }
 0xf16   :  { %v10660_v44 = vmul.f32 -1.442695, %v8273_v54  ;;  %v8275_v47 = vadd.f32 %v8274_v14, %v7905_v63  ;;  %v8316_v32 = vadd.f32 %v8315_v1, %v7913_v56  ;;  %v12488_v63 = vld [vmem:[#allocation8 + $0x1c8] ss:$16 sps:$4 sm:$0xff]   ;;  %v12496_v54 = vld [vmem:[#allocation8 + $0x18c] ss:$16 sps:$4 sm:$0xff]  }
 0xf17   :  { %v8276_v20 = vpop.f32.mrf.mxu0  ;;  %v8317_v4 = vpop.f32.mrf.mxu1  ;;  %v12494_v14 = vld [vmem:[#allocation8 + $0x188] ss:$16 sps:$4 sm:$0xff]   ;;  %v12499_v1 = vld [vmem:[#allocation8 + $0x16c] ss:$16 sps:$4 sm:$0xff]   ;;  %v12509_v56 = vld [vmem:[#allocation11 + $0xe0] ss:$16 sps:$4 sm:$0xff]  }
 0xf18   :  { %12821 = vpow2.f32 %v10660_v44  ;;  %v10661_v6 = vmul.f32 -1.442695, %v8275_v47  ;;  %v10662_v8 = vmul.f32 -1.442695, %v8316_v32  ;;  %v12497_v44 = vld [vmem:[#allocation8 + $0x168] ss:$16 sps:$4 sm:$0xff]  }
 0xf19   :  { %v8277_v0 = vpop.f32.mrf.mxu0  ;;  %v8318_v2 = vpop.f32.mrf.mxu1  ;;  %v12502_v47 = vld [vmem:[#allocation8 + $0x14c] ss:$16 sps:$4 sm:$0xff]   ;;  %v12500_v20 = vld [vmem:[#allocation8 + $0x148] ss:$16 sps:$4 sm:$0xff]  }
 0xf1a   :  { %12823 = vpow2.f32 %v10661_v6  ;;  %v12505_v4 = vld [vmem:[#allocation8 + $0x12c] ss:$16 sps:$4 sm:$0xff]   ;;  %v12503_v6 = vld [vmem:[#allocation8 + $0x128] ss:$16 sps:$4 sm:$0xff]  }
 0xf1b   :  { %12825 = vpow2.f32 %v10662_v8  ;;  %v12508_v0 = vld [vmem:[#allocation8 + $0x10c] ss:$16 sps:$4 sm:$0xff]   ;;  %v12506_v2 = vld [vmem:[#allocation8 + $0x108] ss:$16 sps:$4 sm:$0xff]   ;;  %v12514_v8 = vld [vmem:[#allocation11 + $0xec] ss:$16 sps:$4 sm:$0xff]  }
 0xf1c   :  { %v12511_v32 = vld [vmem:[#allocation11 + $0xe4] ss:$16 sps:$4 sm:$0xff]   ;;  %v12512_v3 = vld [vmem:[#allocation11 + $0xe8] ss:$16 sps:$4 sm:$0xff]  }
 0xf1d   :  { %9430 = vmatprep.subr.bf16.mxu1 %v12511_v32  ;;  %v12590_v32 = vld [vmem:[#allocation11 + $0x148] ss:$16 sps:$4 sm:$0xff]  }
 0xf1e   :  { %9431 = vmatpush1.bf16.msra.mxu1 %v12509_v56  ;;  %v12587_v56 = vld [vmem:[#allocation11 + $0x140] ss:$16 sps:$4 sm:$0xff]  }
 0xf25   :  { %v12822_v10 = vpop.eup %12821 }
 0xf26   :  { %v8323_v11 = vadd.f32 1.0, %v12822_v10  ;;  %v12517_v10 = vld [vmem:[#allocation11 + $0xc4] ss:$16 sps:$4 sm:$0xff]  }
 0xf27   :  { %v12824_v12 = vpop.eup %12823  ;;  %9432 = vmatprep.subr.bf16.mxu1 %v12517_v10  ;;  %v12593_v10 = vld [vmem:[#allocation11 + $0x120] ss:$16 sps:$4 sm:$0xff]  }
 0xf28   :  { %12827 = vrcp.f32 %v8323_v11  ;;  %v8329_v61 = vadd.f32 1.0, %v12824_v12  ;;  %v12826_v17 = vpop.eup %12825  ;;  %v12515_v11 = vld [vmem:[#allocation11 + $0xc0] ss:$16 sps:$4 sm:$0xff]   ;;  %v12518_v12 = vld [vmem:[#allocation11 + $0xc8] ss:$16 sps:$4 sm:$0xff]  }
 0xf29   :  { %12829 = vtanh.f32 %v8314_v62  ;;  %v8336_v29 = vadd.f32 1.0, %v12826_v17  ;;  %v12520_v62 = vld [vmem:[#allocation11 + $0xcc] ss:$16 sps:$4 sm:$0xff]   ;;  %9433 = vmatpush1.bf16.msra.mxu1 %v12515_v11  ;;  %v12601_v11 = vld [vmem:[#allocation11 + $0x104] ss:$16 sps:$4 sm:$0xff]  }
 0xf2a   :  { %12831 = vrcp.f32 %v8329_v61  ;;  %v12523_v61 = vld [vmem:[#allocation11 + $0xa4] ss:$16 sps:$4 sm:$0xff]   ;;  %v12526_v17 = vld [vmem:[#allocation11 + $0xac] ss:$16 sps:$4 sm:$0xff]  }
 0xf2b   :  { %12833 = vrcp.f32 %v8336_v29  ;;  %9434 = vmatprep.subr.bf16.mxu1 %v12523_v61  ;;  %v12527_v29 = vld [vmem:[#allocation11 + $0x80] ss:$16 sps:$4 sm:$0xff]  }
 0xf2c   :  { %v12599_v61 = vld [vmem:[#allocation11 + $0x100] ss:$16 sps:$4 sm:$0xff]  }
 0xf35   :  { %v12828_v21 = vpop.eup %12827 }
 0xf36   :  { %v12830_v23 = vpop.eup %12829 }
 0xf37   :  { %v12832_v25 = vpop.eup %12831  ;;  %v8340_v15 = vmul.f32 %v12830_v23, %v12828_v21  ;;  %v12524_v21 = vld [vmem:[#allocation11 + $0xa8] ss:$16 sps:$4 sm:$0xff]   ;;  %v12529_v23 = vld [vmem:[#allocation11 + $0x84] ss:$16 sps:$4 sm:$0xff]  }
 0xf38   :  { %v8339_v30 = vmul.f32 %v12832_v25, %v13456_v60  ;;  %v12834_v31 = vpop.eup %12833  ;;  %v12464_v60 = vld [vmem:[#allocation8 + $0xc8] ss:$16 sps:$4 sm:$0xff]   ;;  %v12532_v25 = vld [vmem:[#allocation11 + $0x8c] ss:$16 sps:$4 sm:$0xff]  }
 0xf3a   :  { %v13516_v37 = vadd.f32 %v8340_v15, %v8339_v30  ;;  %v12530_v15 = vld [vmem:[#allocation11 + $0x88] ss:$16 sps:$4 sm:$0xff]   ;;  %v12535_v30 = vld [vmem:[#allocation11 + $0x64] ss:$16 sps:$4 sm:$0xff]  }
 0xf3c   :  { %12835 = vtanh.f32 %v13516_v37 }
 0xf49   :  { %v12836_v51 = vpop.eup %12835 }
 0xf4a   :  { %v8343_v53 = vmul.f32 %v12836_v51, %v12834_v31  ;;  %v12538_v31 = vld [vmem:[#allocation11 + $0x6c] ss:$16 sps:$4 sm:$0xff]   ;;  %v12533_v51 = vld [vmem:[#allocation11 + $0x60] ss:$16 sps:$4 sm:$0xff]  }
 0xf4c   :  { %v13519_v49 = vpack.c.bf16 %v8343_v53, %v8343_v53  ;;  %v12536_v53 = vld [vmem:[#allocation11 + $0x68] ss:$16 sps:$4 sm:$0xff]  }
 0xf4e   :  { %11023 = vmatmul.mubr.bf16.vlgmr.msra.gmra.mxu0 %v13519_v49  ;;  %9462 = vmatprep.mubr.bf16.mxu1 %v13519_v49 }
 0xf4f   :  { %8954 = vmatpush1.bf16.msra.mxu0 %v12461_v34  ;;  %8985 = vmatprep.mubr.bf16.mxu0 %v13484_v24  ;;  %v12478_v24 = vld [vmem:[#allocation8 + $0x4c] ss:$16 sps:$4 sm:$0xff]   ;;  %v12541_v34 = vld [vmem:[#allocation11 + $0x44] ss:$16 sps:$4 sm:$0xff]  }
 0xf50   :  { %8955 = vmatprep.subr.bf16.mxu0 %v12466_v35  ;;  %v12539_v35 = vld [vmem:[#allocation11 + $0x40] ss:$16 sps:$4 sm:$0xff]  }
 0xf53   :  { %v13524_v28 = vpop.f32.mrf.mxu1  ;;  %8956 = vmatpush1.bf16.msra.mxu0 %v12464_v60  ;;  %v12542_v60 = vld [vmem:[#allocation11 + $0x48] ss:$16 sps:$4 sm:$0xff]  }
 0xf54   :  { %8957 = vmatprep.subr.bf16.mxu0 %v12469_v36  ;;  %v12547_v36 = vld [vmem:[#allocation11 + $0x24] ss:$16 sps:$4 sm:$0xff]  }
 0xf55   :  { %v13526_v40 = vpop.f32.mrf.mxu1 }
 0xf57   :  { %8958 = vmatpush1.bf16.msra.mxu0 %v12467_v27  ;;  %v8950_v16 = vpop.f32.mrf.mxu1  ;;  %v12550_v27 = vld [vmem:[#allocation11 + $0x2c] ss:$16 sps:$4 sm:$0xff]  }
 0xf58   :  { %8959 = vmatprep.subr.bf16.mxu0 %v12472_v39  ;;  %v12545_v39 = vld [vmem:[#allocation11 + $0x20] ss:$16 sps:$4 sm:$0xff]   ;;  %v12553_v16 = vld [vmem:[#allocation11 + $0x4] ss:$16 sps:$4 sm:$0xff]  }
 0xf59   :  { %v8951_v42 = vpop.f32.mrf.mxu1 }
 0xf5a   :  { %v12551_v42 = vld [vmem:[#allocation11] ss:$16 sps:$4 sm:$0xff]  }
 0xf5b   :  { %8960 = vmatpush1.bf16.msra.mxu0 %v12470_v19  ;;  %v12548_v19 = vld [vmem:[#allocation11 + $0x28] ss:$16 sps:$4 sm:$0xff]  }
 0xf5c   :  { %8961 = vmatprep.subr.bf16.mxu0 %v12475_v26  ;;  %v12556_v26 = vld [vmem:[#allocation11 + $0xc] ss:$16 sps:$4 sm:$0xff]  }
 0xf5f   :  { %8962 = vmatpush1.bf16.msra.mxu0 %v12473_v43  ;;  %v12554_v43 = vld [vmem:[#allocation11 + $0x8] ss:$16 sps:$4 sm:$0xff]  }
 0xf60   :  { %8963 = vmatprep.subr.bf16.mxu0 %v12478_v24  ;;  %v12559_v24 = vld [vmem:[#allocation11 + $0x1e4] ss:$16 sps:$4 sm:$0xff]  }
 0xf63   :  { %8964 = vmatpush1.bf16.msra.mxu0 %v12476_v5  ;;  %v12562_v5 = vld [vmem:[#allocation11 + $0x1ec] ss:$16 sps:$4 sm:$0xff]  }
 0xf64   :  { %8965 = vmatprep.subr.bf16.mxu0 %v12481_v48  ;;  %v12557_v48 = vld [vmem:[#allocation11 + $0x1e0] ss:$16 sps:$4 sm:$0xff]  }
 0xf67   :  { %8966 = vmatpush1.bf16.msra.mxu0 %v12479_v9  ;;  %v12560_v9 = vld [vmem:[#allocation11 + $0x1e8] ss:$16 sps:$4 sm:$0xff]  }
 0xf68   :  { %8967 = vmatprep.subr.bf16.mxu0 %v12484_v50  ;;  %v12565_v50 = vld [vmem:[#allocation11 + $0x1c4] ss:$16 sps:$4 sm:$0xff]  }
 0xf6b   :  { %8968 = vmatpush1.bf16.msra.mxu0 %v12482_v13  ;;  %v12568_v13 = vld [vmem:[#allocation11 + $0x1cc] ss:$16 sps:$4 sm:$0xff]  }
 0xf6c   :  { %8969 = vmatprep.subr.bf16.mxu0 %v12487_v57  ;;  %v12563_v57 = vld [vmem:[#allocation11 + $0x1c0] ss:$16 sps:$4 sm:$0xff]  }
 0xf6f   :  { %8970 = vmatpush2.bf16.msra.mxu0 %v12485_v7  ;;  %v12566_v7 = vld [vmem:[#allocation11 + $0x1c8] ss:$16 sps:$4 sm:$0xff]  }
 0xf70   :  { %8971 = vmatprep.subr.bf16.mxu0 %v12490_v59  ;;  %v12571_v59 = vld [vmem:[#allocation11 + $0x1a4] ss:$16 sps:$4 sm:$0xff]  }
 0xf73   :  { %8972 = vmatpush2.bf16.msra.mxu0 %v12488_v63  ;;  %v12574_v63 = vld [vmem:[#allocation11 + $0x1ac] ss:$16 sps:$4 sm:$0xff]  }
 0xf74   :  { %8973 = vmatprep.subr.bf16.mxu0 %v12493_v18  ;;  %v12569_v18 = vld [vmem:[#allocation11 + $0x1a0] ss:$16 sps:$4 sm:$0xff]  }
 0xf77   :  { %8974 = vmatpush2.bf16.msra.mxu0 %v12491_v38  ;;  %v12572_v38 = vld [vmem:[#allocation11 + $0x1a8] ss:$16 sps:$4 sm:$0xff]  }
 0xf78   :  { %8975 = vmatprep.subr.bf16.mxu0 %v12496_v54  ;;  %v12577_v54 = vld [vmem:[#allocation11 + $0x184] ss:$16 sps:$4 sm:$0xff]  }
 0xf7b   :  { %8976 = vmatpush2.bf16.msra.mxu0 %v12494_v14  ;;  %v12580_v14 = vld [vmem:[#allocation11 + $0x18c] ss:$16 sps:$4 sm:$0xff]  }
 0xf7c   :  { %8977 = vmatprep.subr.bf16.mxu0 %v12499_v1  ;;  %v12575_v1 = vld [vmem:[#allocation11 + $0x180] ss:$16 sps:$4 sm:$0xff]  }
 0xf7f   :  { %8978 = vmatpush2.bf16.msra.mxu0 %v12497_v44  ;;  %v12578_v44 = vld [vmem:[#allocation11 + $0x188] ss:$16 sps:$4 sm:$0xff]  }
 0xf80   :  { %8979 = vmatprep.subr.bf16.mxu0 %v12502_v47  ;;  %v12581_v47 = vld [vmem:[#allocation11 + $0x160] ss:$16 sps:$4 sm:$0xff]  }
 0xf83   :  { %8980 = vmatpush2.bf16.msra.mxu0 %v12500_v20  ;;  %v12583_v20 = vld [vmem:[#allocation11 + $0x164] ss:$16 sps:$4 sm:$0xff]  }
 0xf84   :  { %8981 = vmatprep.subr.bf16.mxu0 %v12505_v4  ;;  %v12584_v4 = vld [vmem:[#allocation11 + $0x168] ss:$16 sps:$4 sm:$0xff]  }
 0xf87   :  { %8982 = vmatpush2.bf16.msra.mxu0 %v12503_v6  ;;  %v12586_v6 = vld [vmem:[#allocation11 + $0x16c] ss:$16 sps:$4 sm:$0xff]  }
 0xf88   :  { %8983 = vmatprep.subr.bf16.mxu0 %v12508_v0  ;;  %v12589_v0 = vld [vmem:[#allocation11 + $0x144] ss:$16 sps:$4 sm:$0xff]  }
 0xf8b   :  { %8984 = vmatpush2.bf16.msra.mxu0 %v12506_v2  ;;  %v12592_v2 = vld [vmem:[#allocation11 + $0x14c] ss:$16 sps:$4 sm:$0xff]  }
 0xf8c   :  { %9471 = vmatprep.subr.bf16.mxu0 %v12514_v8  ;;  %v12598_v8 = vld [vmem:[#allocation11 + $0x12c] ss:$16 sps:$4 sm:$0xff]  }
 0xf8e   :  { %8986 = vmatmul.mubr.bf16.vlgmr.msra.gmra.mxu0 %v13498_v41  ;;  %v12521_v41 = vld [vmem:[#allocation11 + $0xa0] ss:$16 sps:$4 sm:$0xff]  }
 0xf8f   :  { %9503 = vmatprep.mubr.bf16.mxu0 %v13519_v49  ;;  %9472 = vmatpush1.bf16.msra.mxu0 %v12512_v3  ;;  %v12544_v49 = vld [vmem:[#allocation11 + $0x4c] ss:$16 sps:$4 sm:$0xff]   ;;  %v12595_v3 = vld [vmem:[#allocation11 + $0x124] ss:$16 sps:$4 sm:$0xff]  }
 0xf90   :  { %9473 = vmatprep.subr.bf16.mxu0 %v12520_v62  ;;  %9435 = vmatpush1.bf16.msra.mxu1 %v12521_v41  ;;  %v12596_v62 = vld [vmem:[#allocation11 + $0x128] ss:$16 sps:$4 sm:$0xff]  }
 0xf91   :  { %9436 = vmatprep.subr.bf16.mxu1 %v12529_v23 }
 0xf93   :  { %9474 = vmatpush1.bf16.msra.mxu0 %v12518_v12  ;;  %v12604_v12 = vld [vmem:[#allocation11 + $0x10c] ss:$16 sps:$4 sm:$0xff]  }
 0xf94   :  { %9475 = vmatprep.subr.bf16.mxu0 %v12526_v17  ;;  %9437 = vmatpush1.bf16.msra.mxu1 %v12527_v29  ;;  %v12602_v17 = vld [vmem:[#allocation11 + $0x108] ss:$16 sps:$4 sm:$0xff]  }
 0xf95   :  { %9438 = vmatprep.subr.bf16.mxu1 %v12535_v30 }
 0xf97   :  { %9476 = vmatpush1.bf16.msra.mxu0 %v12524_v21 }
 0xf98   :  { %9477 = vmatprep.subr.bf16.mxu0 %v12532_v25  ;;  %9439 = vmatpush1.bf16.msra.mxu1 %v12533_v51 }
 0xf99   :  { %9440 = vmatprep.subr.bf16.mxu1 %v12541_v34 }
 0xf9b   :  { %9478 = vmatpush1.bf16.msra.mxu0 %v12530_v15  ;;  %v8570_v15 = vld [vmem:[#allocation10] sm:$0xf] }
 0xf9c   :  { %9479 = vmatprep.subr.bf16.mxu0 %v12538_v31  ;;  %9441 = vmatpush1.bf16.msra.mxu1 %v12539_v35  ;;  %v8575_v30 = vrot.slane %v8570_v15, %v13110_v45  ;;  %v8579_v31 = vrot.slane %v8570_v15, %v13112_v46 }
 0xf9d   :  { %9442 = vmatprep.subr.bf16.mxu1 %v12547_v36 }
 0xf9e   :  { %v8947_v51 = vadd.f32 %v13524_v28, %v8575_v30 }
 0xf9f   :  { %9480 = vmatpush1.bf16.msra.mxu0 %v12536_v53  ;;  %v8949_v53 = vadd.f32 %v13526_v40, %v8579_v31 }
 0xfa0   :  { %9481 = vmatprep.subr.bf16.mxu0 %v12544_v49  ;;  %9443 = vmatpush1.bf16.msra.mxu1 %v12545_v39  ;;  %v10735_v34 = vmul.f32 -1.442695, %v8947_v51  ;;  %v8587_v39 = vrot.slane %v8570_v15, %v13116_v55 }
 0xfa1   :  { %9444 = vmatprep.subr.bf16.mxu1 %v12553_v16  ;;  %v10736_v49 = vmul.f32 -1.442695, %v8949_v53 }
 0xfa2   :  { %12837 = vpow2.f32 %v10735_v34 }
 0xfa3   :  { %9482 = vmatpush1.bf16.msra.mxu0 %v12542_v60  ;;  %12839 = vpow2.f32 %v10736_v49 }
 0xfa4   :  { %9483 = vmatprep.subr.bf16.mxu0 %v12550_v27  ;;  %9445 = vmatpush1.bf16.msra.mxu1 %v12551_v42  ;;  %v8583_v27 = vrot.slane %v8570_v15, %v13118_v58 }
 0xfa5   :  { %9446 = vmatprep.subr.bf16.mxu1 %v12559_v24 }
 0xfa7   :  { %9484 = vmatpush1.bf16.msra.mxu0 %v12548_v19 }
 0xfa8   :  { %9485 = vmatprep.subr.bf16.mxu0 %v12556_v26  ;;  %9447 = vmatpush2.bf16.msra.mxu1 %v12557_v48 }
 0xfa9   :  { %9448 = vmatprep.subr.bf16.mxu1 %v12565_v50 }
 0xfab   :  { %9486 = vmatpush1.bf16.msra.mxu0 %v12554_v43 }
 0xfac   :  { %9487 = vmatprep.subr.bf16.mxu0 %v12562_v5  ;;  %9449 = vmatpush2.bf16.msra.mxu1 %v12563_v57 }
 0xfad   :  { %9450 = vmatprep.subr.bf16.mxu1 %v12571_v59 }
 0xfaf   :  { %9488 = vmatpush2.bf16.msra.mxu0 %v12560_v9  ;;  %v12838_v35 = vpop.eup %12837 }
 0xfb0   :  { %9489 = vmatprep.subr.bf16.mxu0 %v12568_v13  ;;  %9451 = vmatpush2.bf16.msra.mxu1 %v12569_v18  ;;  %v12840_v60 = vpop.eup %12839 }
 0xfb1   :  { %9452 = vmatprep.subr.bf16.mxu1 %v12577_v54  ;;  %v9003_v36 = vadd.f32 1.0, %v12840_v60  ;;  %v12605_v54 = vld [vmem:[#allocation13 + $0x1f8] sm:$0xff]  }
 0xfb3   :  { %9490 = vmatpush2.bf16.msra.mxu0 %v12566_v7 }
 0xfb4   :  { %9491 = vmatprep.subr.bf16.mxu0 %v12574_v63  ;;  %9453 = vmatpush2.bf16.msra.mxu1 %v12575_v1  ;;  %v12608_v1 = vld [vmem:[#allocation13 + $0x1e0] sm:$0xff]  }
 0xfb5   :  { %9454 = vmatprep.subr.bf16.mxu1 %v12583_v20  ;;  %v12611_v20 = vld [vmem:[#allocation13 + $0x1c8] sm:$0xff]  }
 0xfb7   :  { %9492 = vmatpush2.bf16.msra.mxu0 %v12572_v38 }
 0xfb8   :  { %9493 = vmatprep.subr.bf16.mxu0 %v12580_v14  ;;  %9455 = vmatpush2.bf16.msra.mxu1 %v12581_v47  ;;  %v12607_v14 = vld [vmem:[#allocation13 + $0x1e8] sm:$0xff]   ;;  %v12610_v47 = vld [vmem:[#allocation13 + $0x1d0] sm:$0xff]  }
 0xfb9   :  { %9456 = vmatprep.subr.bf16.mxu1 %v12589_v0 }
 0xfbb   :  { %9494 = vmatpush2.bf16.msra.mxu0 %v12578_v44  ;;  %v12609_v44 = vld [vmem:[#allocation13 + $0x1d8] sm:$0xff]  }
 0xfbc   :  { %9495 = vmatprep.subr.bf16.mxu0 %v12586_v6  ;;  %9457 = vmatpush2.bf16.msra.mxu1 %v12587_v56  ;;  %v9088_v6 = vld [vmem:[%s13569_s4] sm:$0xf] }
 0xfbd   :  { %9458 = vmatprep.subr.bf16.mxu1 %v12595_v3  ;;  %v9093_v0 = vrot.slane %v9088_v6, %v13110_v45  ;;  %v9101_v45 = vrot.slane %v9088_v6, %v13118_v58 }
 0xfbf   :  { %9496 = vmatpush2.bf16.msra.mxu0 %v12584_v4  ;;  %v12612_v4 = vld [vmem:[#allocation13 + $0x1c0] sm:$0xff]  }
 0xfc0   :  { %9497 = vmatprep.subr.bf16.mxu0 %v12592_v2  ;;  %9459 = vmatpush2.bf16.msra.mxu1 %v12593_v10  ;;  %v9097_v2 = vrot.slane %v9088_v6, %v13112_v46 }
 0xfc1   :  { %9460 = vmatprep.subr.bf16.mxu1 %v12601_v11 }
 0xfc3   :  { %9498 = vmatpush2.bf16.msra.mxu0 %v12590_v32 }
 0xfc4   :  { %9499 = vmatprep.subr.bf16.mxu0 %v12598_v8  ;;  %9461 = vmatpush2.bf16.msra.mxu1 %v12599_v61 }
 0xfc5   :  { %11026 = vmatprep.subr.bf16.mxu1 %v13041_v33 }
 0xfc7   :  { %9500 = vmatpush2.bf16.msra.mxu0 %v12596_v62 }
 0xfc8   :  { %9501 = vmatprep.subr.bf16.mxu0 %v12604_v12 }
 0xfcb   :  { %9502 = vmatpush2.bf16.msra.mxu0 %v12602_v17 }
0x100e   :  { %v8447_v41 = vpop.f32.mrf.mxu0 }
0x100f   :  { %v13532_v21 = vadd.f32 %v8447_v41, %v13472_v52  ;;  %v8997_v52 = vadd.f32 1.0, %v12838_v35 }
0x1010   :  { %v11024_v23 = vpop.f32.mrf.mxu0 }
0x1011   :  { %12841 = vrcp.f32 %v8997_v52  ;;  %v9105_v23 = vrot.slane %v9088_v6, %v13116_v55 }
0x1012   :  { %v8450_v25 = vpop.f32.mrf.mxu0  ;;  %12843 = vrcp.f32 %v9003_v36 }
0x1014   :  { %v11025_v29 = vpop.f32.mrf.mxu0 }
0x101e   :  { %v12842_v24 = vpop.eup %12841 }
0x101f   :  { %v12844_v5 = vpop.eup %12843 }
0x1020   :  { %v9013_v9 = vmul.f32 %v12844_v5, %v13481_v22  ;;  %v12606_v22 = vld [vmem:[#allocation13 + $0x1f0] sm:$0xff]  }
0x104e   :  { %v8987_v19 = vpop.f32.mrf.mxu0 }
0x104f   :  { %v8988_v16 = vadd.f32 %v8987_v19, %v8583_v27 }
0x1050   :  { %v8989_v26 = vpop.f32.mrf.mxu0 }
0x1051   :  { %12845 = vtanh.f32 %v8988_v16  ;;  %v8990_v28 = vadd.f32 %v8989_v26, %v8587_v39  ;;  %v10813_v26 = vld [vmem:[%s13571_s6] ss:$0 sm:$0xff] }
0x1052   :  { %v8991_v40 = vpop.f32.mrf.mxu0 }
0x1053   :  { %v10737_v42 = vmul.f32 -1.442695, %v8990_v28 }
0x1054   :  { %v8992_v43 = vpop.f32.mrf.mxu0 }
0x1055   :  { %12847 = vpow2.f32 %v10737_v42 }
0x105e   :  { %v12846_v48 = vpop.eup %12845 }
0x105f   :  { %v9014_v50 = vmul.f32 %v12846_v48, %v12842_v24 }
0x1061   :  { %v9015_v13 = vadd.f32 %v9014_v50, %v9013_v9 }
0x1062   :  { %v12848_v57 = vpop.eup %12847 }
0x1063   :  { %v9010_v7 = vadd.f32 1.0, %v12848_v57  ;;  %12849 = vtanh.f32 %v9015_v13 }
0x1065   :  { %12851 = vrcp.f32 %v9010_v7 }
0x1070   :  { %v12850_v59 = vpop.eup %12849 }
0x1072   :  { %v12852_v63 = vpop.eup %12851 }
0x1073   :  { %v9017_v18 = vmul.f32 %v12852_v63, %v12850_v59 }
0x1075   :  { %v9020_v38 = vpack.c.bf16 %v9017_v18, %v9017_v18 }
0x1077   :  { %9463 = vmatmul.mubr.bf16.vlgmr.msra.gmra.mxu1 %v9020_v38  ;;  %9504 = vmatmul.mubr.bf16.vlgmr.msra.gmra.mxu0 %v9020_v38 }
0x1078   :  { %11042 = vmatprep.mubr.msk.bf16.mxu1 %vm13042_vm7, %v13041_v33  ;;  %11027 = vmatpush3.bf16.msra.mxu1 %v12605_v54 }
0x1079   :  { %11028 = vmatprep.subr.bf16.mxu1 %v13041_v33 }
0x107c   :  { %11029 = vmatpush3.bf16.msra.mxu1 %v12606_v22 }
0x107d   :  { %11030 = vmatprep.subr.bf16.mxu1 %v13041_v33 }
0x1080   :  { %11031 = vmatpush3.bf16.msra.mxu1 %v12607_v14 }
0x1081   :  { %11032 = vmatprep.subr.bf16.mxu1 %v13041_v33 }
0x1084   :  { %11033 = vmatpush3.bf16.msra.mxu1 %v12608_v1 }
0x1085   :  { %11034 = vmatprep.subr.bf16.mxu1 %v13041_v33 }
0x1088   :  { %11035 = vmatpush3.bf16.msra.mxu1 %v12609_v44 }
0x1089   :  { %11036 = vmatprep.subr.bf16.mxu1 %v13041_v33 }
0x108c   :  { %11037 = vmatpush3.bf16.msra.mxu1 %v12610_v47 }
0x108d   :  { %11038 = vmatprep.subr.bf16.mxu1 %v13041_v33 }
0x1090   :  { %11039 = vmatpush3.bf16.msra.mxu1 %v12611_v20 }
0x1091   :  { %11040 = vmatprep.subr.bf16.mxu1 %v13041_v33 }
0x1094   :  { %11041 = vmatpush3.bf16.msra.mxu1 %v12612_v4 }
0x1137   :  { %v9464_v56 = vpop.f32.mrf.mxu1  ;;  %v9505_v32 = vpop.f32.mrf.mxu0 }
0x1138   :  { %v9465_v3 = vadd.f32 %v9464_v56, %v9093_v0  ;;  %v9506_v15 = vadd.f32 %v9505_v32, %v9101_v45 }
0x1139   :  { %v9466_v8 = vpop.f32.mrf.mxu1  ;;  %v9507_v10 = vpop.f32.mrf.mxu0 }
0x113a   :  { %v10802_v62 = vmul.f32 -1.442695, %v9465_v3  ;;  %v9467_v11 = vadd.f32 %v9466_v8, %v9097_v2  ;;  %v9508_v25 = vadd.f32 %v9507_v10, %v9105_v23 }
0x113b   :  { %v9468_v12 = vpop.f32.mrf.mxu1  ;;  %v9509_v61 = vpop.f32.mrf.mxu0 }
0x113c   :  { %12853 = vpow2.f32 %v10802_v62  ;;  %v10803_v33 = vmul.f32 -1.442695, %v9467_v11  ;;  %v10804_v46 = vmul.f32 -1.442695, %v9508_v25 }
0x113d   :  { %v9469_v17 = vpop.f32.mrf.mxu1  ;;  %v9510_v41 = vpop.f32.mrf.mxu0 }
0x113e   :  { %12855 = vpow2.f32 %v10803_v33 }
0x113f   :  { %12857 = vpow2.f32 %v10804_v46 }
0x1149   :  { %v12854_v29 = vpop.eup %12853 }
0x114a   :  { %v9515_v30 = vadd.f32 1.0, %v12854_v29 }
0x114b   :  { %v12856_v31 = vpop.eup %12855 }
0x114c   :  { %12859 = vrcp.f32 %v9515_v30  ;;  %v9521_v51 = vadd.f32 1.0, %v12856_v31  ;;  %v12858_v53 = vpop.eup %12857 }
0x114d   :  { %12861 = vtanh.f32 %v9506_v15  ;;  %v9528_v60 = vadd.f32 1.0, %v12858_v53 }
0x114e   :  { %12863 = vrcp.f32 %v9521_v51 }
0x114f   :  { %12865 = vrcp.f32 %v9528_v60 }
0x1159   :  { %v12860_v34 = vpop.eup %12859 }
0x115a   :  { %v12862_v49 = vpop.eup %12861 }
0x115b   :  { %v12864_v35 = vpop.eup %12863  ;;  %v9532_v52 = vmul.f32 %v12862_v49, %v12860_v34 }
0x115c   :  { %v9531_v55 = vmul.f32 %v12864_v35, %v13516_v37  ;;  %v12866_v58 = vpop.eup %12865 }
0x115e   :  { %v9533_v36 = vadd.f32 %v9532_v52, %v9531_v55 }
0x1160   :  { %12867 = vtanh.f32 %v9533_v36 }
0x116d   :  { %v12868_v27 = vpop.eup %12867 }
0x116e   :  { %v9535_v39 = vmul.f32 %v12868_v27, %v12866_v58 }
0x1170   :  { %v9538_v19 = vpack.c.bf16 %v9535_v39, %v9535_v39 }
0x1172   :  { %11043 = vmatmul.mubr.bf16.vlgmr.msra.gmra.mxu1 %v9538_v19 }
0x1232   :  { %v9639_v16 = vpop.f32.mrf.mxu1 }
0x1233   :  { %v9645_v28 = vadd.f32 %v9639_v16, %v13532_v21 }
0x1234   :  { %v11044_v40 = vpop.f32.mrf.mxu1 }
0x1235   :  { %v9658_v42 = vadd.f32 %v10813_v26, %v9645_v28 }
0x1236   :  { %v9642_v37 = vpop.f32.mrf.mxu1 }
0x1237   :  { %9659 = vst [vmem:[#allocation14] sm:$0xff] %v9658_v42 }
0x1238   :  { %v11045_v43 = vpop.f32.mrf.mxu1 }
0x1239   :  { %13012 = shalt.err (!%p13009_p1)
}
0x123a   :  { %9669 = dma.vmem_to_hbm [thread:$0]  %s9667_s21, 128, %s13572_s7, [#allocation7]  }
0x123b   :  { %13027 = dma.done.wait [#allocation7], 128  }
0x123c   :  { %13028 = vsyncadd [#allocation7], 4294967168 }
0x123d   :  { %9673 = vsyncpa [#allocation6], 1 }
0x123e   :  { %9674 = vsyncpa [#allocation9], 1 }
0x123f   :  { %9675 = vsyncpa [#allocation12], 1 }
0x1240   :  { %9676 = vsyncpa [#allocation7], 1 }

</bundles_post_ra>
